<compile_context>
chip_gen: v7x
topology: tpu7x:2x2x1
jax: 0.10.0
libtpu: 0.0.40
codegen_flags: <defaults>
</compile_context>

<pallas_src>
import functools

import jax
import jax.numpy as jnp
import numpy as np
from jax import lax
from jax.experimental import pallas as pl
from jax.experimental.pallas import tpu as pltpu

C1_OUT = 64           # conv1 output channels
C2_OUT = 128          # conv2 output channels
NTAP = 9              # 3x3 taps
K1 = NTAP * NTAP      # 81  : composite conv1-patch length per conv2 position
K2 = NTAP * C1_OUT    # 576 : conv2 contraction depth (tap-major, channel-minor)
SLOPE = 0.2           # LeakyReLU negative slope
PAD = 2               # raw-image zero padding (covers the composite 5x5 window)


# ---------------------------------------------------------------------------
# Static geometry (pure numpy, built once per spatial size at trace time).
# ---------------------------------------------------------------------------
@functools.lru_cache(maxsize=None)
def _geometry(H, W):
    H2 = (H + 2 - 3) // 2 + 1        # conv2: k=3, stride=2, pad=1 (conv1 'same')
    W2 = (W + 2 - 3) // 2 + 1
    H3 = (H2 - 3) // 2 + 1           # conv3: k=3, stride=2, pad=0
    W3 = (W2 - 3) // 2 + 1
    P2, P3 = H2 * W2, H3 * W3
    Wp = W + 2 * PAD

    # idx[p2, t2*9+t1] = flat index into the zero-padded (H+4, W+4) image of
    # the raw pixel feeding conv1-tap t1 of the conv1 patch that conv2-tap t2
    # reads at conv2 output position p2.  conv1's zero padding is handled by
    # the padded image; conv2's zero padding is handled by redirecting the
    # whole 9-pixel patch to padded pixel (0,0) (always zero), so conv1 -> 0
    # -> lrelu -> 0, exactly like conv2 reading a padded zero.  No mask array.
    idx = np.zeros((P2, K1), np.int32)
    for y2 in range(H2):
        for x2 in range(W2):
            p = y2 * W2 + x2
            for i2 in range(3):
                for j2 in range(3):
                    t2 = i2 * 3 + j2
                    y1 = 2 * y2 + i2 - 1
                    x1 = 2 * x2 + j2 - 1
                    inside = (0 <= y1 < H) and (0 <= x1 < W)
                    for i1 in range(3):
                        for j1 in range(3):
                            c = t2 * NTAP + i1 * 3 + j1
                            if inside:
                                yi = y1 + i1 - 1 + PAD
                                xi = x1 + j1 - 1 + PAD
                                idx[p, c] = yi * Wp + xi
                            else:
                                idx[p, c] = 0    # guaranteed-zero padded pixel

    # sel_rows[p3][t3] = h2 row feeding conv3-tap t3 of conv3 output p3
    # (compile-time constants: conv3 has stride 2, no padding).
    sel_rows = []
    for y3 in range(H3):
        for x3 in range(W3):
            rows = []
            for i3 in range(3):
                for j3 in range(3):
                    rows.append((2 * y3 + i3) * W2 + (2 * x3 + j3))
            sel_rows.append(tuple(rows))
    return H2, W2, H3, W3, idx, tuple(sel_rows)


def _pick_b_tile(n, p2):
    """Largest divisor of n with b_tile*p2 ~<= 256 rows, keeping >=2 grid steps
    when the batch allows it (so both v7x TensorCores get work)."""
    cap = max(1, 256 // p2)
    if n >= 2:
        cap = min(cap, n // 2)
    cap = max(1, min(cap, n))
    for b in range(cap, 0, -1):
        if n % b == 0:
            return b
    return 1


# ---------------------------------------------------------------------------
# Fused Pallas kernel: conv1 -> lrelu -> conv2 -> lrelu -> conv3 for one
# batch tile (B_TILE images stacked along the matmul M dimension).
# ---------------------------------------------------------------------------
def _critic_kernel(p_ref, w1_ref, w2_ref, w3_ref, o_ref, *,
                   b_tile, p2, p3, sel_rows):
    m = b_tile * p2
    hp = lax.Precision.HIGHEST

    # conv1 (block-diagonal weights) and conv2: two big MXU matmuls.
    patches = p_ref[...].reshape(m, K1)                                   # (M, 81)
    h1 = jnp.dot(patches, w1_ref[...],
                 preferred_element_type=jnp.float32, precision=hp)        # (M, 576)
    h1 = jnp.where(h1 >= 0.0, h1, SLOPE * h1)                             # LeakyReLU
    h2 = jnp.dot(h1, w2_ref[...],
                 preferred_element_type=jnp.float32, precision=hp)        # (M, 128)
    h2 = jnp.where(h2 >= 0.0, h2, SLOPE * h2)

    # conv3 (Cout=1): one K=128 matmul, then static-index selection sums.
    g = jnp.dot(h2, w3_ref[...],
                preferred_element_type=jnp.float32, precision=hp)         # (M, 9)
    g = g.reshape(b_tile, p2, NTAP)

    # TODO(synk): for large images, tile P2 (VMEM scratch accumulator with
    # pl.when init/finalize) and tile this selection loop instead of a full
    # static unroll over P3.
    col = lax.broadcasted_iota(jnp.int32, (b_tile, p3), 1)
    out_row = jnp.zeros((b_tile, p3), jnp.float32)
    for q in range(p3):                              # static unroll (9 at 16x16)
        rows = sel_rows[q]
        val = g[:, rows[0], 0:1]                     # (b_tile, 1)
        for t in range(1, NTAP):
            val = val + g[:, rows[t], t:t + 1]
        out_row = out_row + jnp.where(col == q, val, 0.0)
    o_ref[...] = out_row.reshape(b_tile, 1, p3)


# ---------------------------------------------------------------------------
# One-time weight preparation (outside the per-forward path).
# ---------------------------------------------------------------------------
def prepare_params(params):
    # conv1: (64,1,3,3) -> W1[t1, c]
    w1m = jnp.transpose(params["w1"], (2, 3, 1, 0)).reshape(NTAP, C1_OUT)
    eye9 = jnp.eye(NTAP, dtype=jnp.float32)
    # Block-diagonal conv1 weight (81, 576): row t2*9+t1, col t2*64+c.
    w1bd = (eye9[:, None, :, None] * w1m[None, :, None, :]).reshape(K1, K2)
    # conv2: (128,64,3,3) -> (576,128), rows tap-major / channel-minor.
    w2m = jnp.transpose(params["w2"], (2, 3, 1, 0)).reshape(K2, C2_OUT)
    # conv3: (1,128,3,3) -> (128, 9).
    w3m = params["w3"].reshape(C2_OUT, NTAP)
    return {"w1bd": w1bd.astype(jnp.float32),
            "w2m": w2m.astype(jnp.float32),
            "w3m": w3m.astype(jnp.float32)}


# ---------------------------------------------------------------------------
# Forward: NCHW input -> flattened 1-D output (torch.flatten semantics).
# ---------------------------------------------------------------------------
def discriminator_forward(x_nchw, prep):
    N, C, H, W = x_nchw.shape
    assert C == 1, "Discriminator expects a single input channel"
    H2, W2, H3, W3, idx_np, sel_rows = _geometry(H, W)
    P2, P3 = H2 * W2, H3 * W3

    # Thin XLA glue: zero-pad once and gather the composite 5x5 patches in the
    # (P2, 81) lane-friendly layout (no mask array, no multiply, no bf16 copy).
    # TODO(synk): build these patches in-kernel from 4 stride-2 parity planes
    # of the padded image to remove the remaining ~20x HBM duplication of the
    # gather output for large images.
    xpad = jnp.pad(x_nchw[:, 0].astype(jnp.float32),
                   ((0, 0), (PAD, PAD), (PAD, PAD)))
    xflat = xpad.reshape(N, (H + 2 * PAD) * (W + 2 * PAD))
    patches = jnp.take(xflat, jnp.asarray(idx_np), axis=1)        # (N, P2, 81)

    b_tile = _pick_b_tile(N, P2)
    assert N % b_tile == 0
    grid = (N // b_tile,)
    kernel = functools.partial(_critic_kernel, b_tile=b_tile, p2=P2, p3=P3,
                               sel_rows=sel_rows)
    out = pl.pallas_call(
        kernel,
        out_shape=jax.ShapeDtypeStruct((N, 1, P3), jnp.float32),
        grid=grid,
        in_specs=[
            pl.BlockSpec((b_tile, P2, K1), lambda b: (b, 0, 0)),   # patches
            pl.BlockSpec((K1, K2), lambda b: (0, 0)),              # w1 (blockdiag)
            pl.BlockSpec((K2, C2_OUT), lambda b: (0, 0)),          # w2
            pl.BlockSpec((C2_OUT, NTAP), lambda b: (0, 0)),        # w3
        ],
        out_specs=pl.BlockSpec((b_tile, 1, P3), lambda b: (b, 0, 0)),
        compiler_params=pltpu.CompilerParams(
            dimension_semantics=("parallel",),
            vmem_limit_bytes=32 * 1024 * 1024),
    )(patches, prep["w1bd"], prep["w2m"], prep["w3m"])

    # torch.flatten of the NCHW result (Cout=1): n-major, then (y3,x3) row-major.
    return out.reshape(-1)


# ---------------------------------------------------------------------------
# Parameter init (PyTorch Conv2d-style U(+/-1/sqrt(fan_in)), OIHW, bias=False
# exactly as in the original module).
# ---------------------------------------------------------------------------
def init_params(key):
    def conv_w(k, cout, cin, ksz):
        fan_in = cin * ksz * ksz
        bound = 1.0 / np.sqrt(fan_in)
        return jax.random.uniform(k, (cout, cin, ksz, ksz), jnp.float32,
                                  -bound, bound)

    k1, k2, k3 = jax.random.split(key, 3)
    return {
        "w1": conv_w(k1, 64, 1, 3),
        "w2": conv_w(k2, 128, 64, 3),
        "w3": conv_w(k3, 1, 128, 3),
    }


# Pure-JAX reference (lax.conv) for the correctness cross-check.
def reference_forward(x_nchw, params):
    def conv(x, w, stride, pad):
        return lax.conv_general_dilated(
            x, w, (stride, stride), ((pad, pad), (pad, pad)),
            dimension_numbers=("NCHW", "OIHW", "NCHW"),
            precision=lax.Precision.HIGHEST,
        )

    def lrelu(x):
        return jnp.where(x >= 0, x, SLOPE * x)

    x = lrelu(conv(x_nchw, params["w1"], 1, 1))
    x = lrelu(conv(x, params["w2"], 2, 1))
    x = conv(x, params["w3"], 2, 0)
    return x.reshape(-1)


if __name__ == "__main__":
    key = jax.random.PRNGKey(0)
    pkey, xkey = jax.random.split(key)
    params = init_params(pkey)

    # Small deterministic input: N=2, C=1 (module requires 1 channel), 16x16.
    x = jax.random.normal(xkey, (2, 1, 16, 16), dtype=jnp.float32)

    prep = prepare_params(params)               # one-time weight prep
    fwd = jax.jit(discriminator_forward)

    out = jax.block_until_ready(fwd(x, prep))

    # 16x16 -> 16x16 -> 8x8 -> 3x3, Cout=1  =>  flat length 2*1*3*3
    assert out.shape == (2 * 1 * 3 * 3,), out.shape

    ref = jax.block_until_ready(reference_forward(x, params))
    # f32 matmuls at HIGHEST precision: observed error ~1e-6; tolerance kept
    # generous purely as a sanity-check margin.
    np.testing.assert_allclose(np.asarray(out), np.asarray(ref),
                               rtol=2e-2, atol=2e-2)
    print("KERNEL_OK")
</pallas_src>

<mosaic_0001>
module attributes {stable_mosaic.version = 11 : i64} {
  func.func @_critic_kernel(%arg0: i32, %arg1: memref<1x64x81xf32, #tpu.memory_space<vmem>>, %arg2: memref<81x576xf32, #tpu.memory_space<vmem>>, %arg3: memref<576x128xf32, #tpu.memory_space<vmem>>, %arg4: memref<128x9xf32, #tpu.memory_space<vmem>>, %arg5: memref<1x1x9xf32, #tpu.memory_space<vmem>>) attributes {dimension_semantics = [#tpu.dimension_semantics<parallel>], iteration_bounds = array<i64: 2>, scalar_prefetch = 0 : i64, scratch_operands = 0 : i64, tpu.core_type = #tpu.core_type<tc>, window_params = [{transform_indices = @transform_0, window_bounds = array<i64: 1, 64, 81>}, {pipeline_mode = #tpu.pipeline_mode<synchronous>, transform_indices = @transform_1, window_bounds = array<i64: 81, 576>}, {pipeline_mode = #tpu.pipeline_mode<synchronous>, transform_indices = @transform_2, window_bounds = array<i64: 576, 128>}, {pipeline_mode = #tpu.pipeline_mode<synchronous>, transform_indices = @transform_3, window_bounds = array<i64: 128, 9>}, {transform_indices = @transform_4, window_bounds = array<i64: 1, 1, 9>}]} {
    %c0 = arith.constant 0 : index
    %c0_0 = arith.constant 0 : index
    %c0_1 = arith.constant 0 : index
    %0 = vector.load %arg1[%c0, %c0_0, %c0_1] : memref<1x64x81xf32, #tpu.memory_space<vmem>>, vector<1x64x81xf32>
    %1 = vector.shape_cast %0 : vector<1x64x81xf32> to vector<64x81xf32>
    %c0_2 = arith.constant 0 : index
    %c0_3 = arith.constant 0 : index
    %2 = vector.load %arg2[%c0_2, %c0_3] : memref<81x576xf32, #tpu.memory_space<vmem>>, vector<81x576xf32>
    %cst = arith.constant dense<0.000000e+00> : vector<64x576xf32>
    %3 = tpu.matmul %1, %2, %cst {dimension_numbers = #tpu.dot_dimension_numbers<[1], [0], [0], [1], [0, 0, 1, 1], [], []>, precision = #tpu.contract_precision<fp32>} : vector<64x81xf32>, vector<81x576xf32>, vector<64x576xf32> -> vector<64x576xf32>
    %cst_4 = arith.constant 0.000000e+00 : f32
    %4 = vector.broadcast %cst_4 : f32 to vector<64x576xf32>
    %5 = arith.cmpf oge, %3, %4 : vector<64x576xf32>
    %cst_5 = arith.constant 2.000000e-01 : f32
    %6 = vector.broadcast %cst_5 : f32 to vector<64x576xf32>
    %7 = arith.mulf %6, %3 : vector<64x576xf32>
    %8 = arith.select %5, %3, %7 : vector<64x576xi1>, vector<64x576xf32>
    %c0_6 = arith.constant 0 : index
    %c0_7 = arith.constant 0 : index
    %9 = vector.load %arg3[%c0_6, %c0_7] : memref<576x128xf32, #tpu.memory_space<vmem>>, vector<576x128xf32>
    %cst_8 = arith.constant dense<0.000000e+00> : vector<64x128xf32>
    %10 = tpu.matmul %8, %9, %cst_8 {dimension_numbers = #tpu.dot_dimension_numbers<[1], [0], [0], [1], [0, 0, 1, 1], [], []>, precision = #tpu.contract_precision<fp32>} : vector<64x576xf32>, vector<576x128xf32>, vector<64x128xf32> -> vector<64x128xf32>
    %cst_9 = arith.constant 0.000000e+00 : f32
    %11 = vector.broadcast %cst_9 : f32 to vector<64x128xf32>
    %12 = arith.cmpf oge, %10, %11 : vector<64x128xf32>
    %cst_10 = arith.constant 2.000000e-01 : f32
    %13 = vector.broadcast %cst_10 : f32 to vector<64x128xf32>
    %14 = arith.mulf %13, %10 : vector<64x128xf32>
    %15 = arith.select %12, %10, %14 : vector<64x128xi1>, vector<64x128xf32>
    %c0_11 = arith.constant 0 : index
    %c0_12 = arith.constant 0 : index
    %16 = vector.load %arg4[%c0_11, %c0_12] : memref<128x9xf32, #tpu.memory_space<vmem>>, vector<128x9xf32>
    %cst_13 = arith.constant dense<0.000000e+00> : vector<64x9xf32>
    %17 = tpu.matmul %15, %16, %cst_13 {dimension_numbers = #tpu.dot_dimension_numbers<[1], [0], [0], [1], [0, 0, 1, 1], [], []>, precision = #tpu.contract_precision<fp32>} : vector<64x128xf32>, vector<128x9xf32>, vector<64x9xf32> -> vector<64x9xf32>
    %18 = vector.shape_cast %17 : vector<64x9xf32> to vector<1x64x9xf32>
    %19 = tpu.iota {dimensions = array<i32: 1>} : vector<1x9xi32>
    %cst_14 = arith.constant 0.000000e+00 : f32
    %20 = vector.broadcast %cst_14 : f32 to vector<1x9xf32>
    %21 = vector.extract_strided_slice %18 {offsets = [0, 0, 0], sizes = [1, 1, 1], strides = [1, 1, 1]} : vector<1x64x9xf32> to vector<1x1x1xf32>
    %22 = vector.shape_cast %21 : vector<1x1x1xf32> to vector<1x1xf32>
    %23 = vector.extract_strided_slice %18 {offsets = [0, 1, 1], sizes = [1, 1, 1], strides = [1, 1, 1]} : vector<1x64x9xf32> to vector<1x1x1xf32>
    %24 = vector.shape_cast %23 : vector<1x1x1xf32> to vector<1x1xf32>
    %25 = arith.addf %22, %24 : vector<1x1xf32>
    %26 = vector.extract_strided_slice %18 {offsets = [0, 2, 2], sizes = [1, 1, 1], strides = [1, 1, 1]} : vector<1x64x9xf32> to vector<1x1x1xf32>
    %27 = vector.shape_cast %26 : vector<1x1x1xf32> to vector<1x1xf32>
    %28 = arith.addf %25, %27 : vector<1x1xf32>
    %29 = vector.extract_strided_slice %18 {offsets = [0, 8, 3], sizes = [1, 1, 1], strides = [1, 1, 1]} : vector<1x64x9xf32> to vector<1x1x1xf32>
    %30 = vector.shape_cast %29 : vector<1x1x1xf32> to vector<1x1xf32>
    %31 = arith.addf %28, %30 : vector<1x1xf32>
    %32 = vector.extract_strided_slice %18 {offsets = [0, 9, 4], sizes = [1, 1, 1], strides = [1, 1, 1]} : vector<1x64x9xf32> to vector<1x1x1xf32>
    %33 = vector.shape_cast %32 : vector<1x1x1xf32> to vector<1x1xf32>
    %34 = arith.addf %31, %33 : vector<1x1xf32>
    %35 = vector.extract_strided_slice %18 {offsets = [0, 10, 5], sizes = [1, 1, 1], strides = [1, 1, 1]} : vector<1x64x9xf32> to vector<1x1x1xf32>
    %36 = vector.shape_cast %35 : vector<1x1x1xf32> to vector<1x1xf32>
    %37 = arith.addf %34, %36 : vector<1x1xf32>
    %38 = vector.extract_strided_slice %18 {offsets = [0, 16, 6], sizes = [1, 1, 1], strides = [1, 1, 1]} : vector<1x64x9xf32> to vector<1x1x1xf32>
    %39 = vector.shape_cast %38 : vector<1x1x1xf32> to vector<1x1xf32>
    %40 = arith.addf %37, %39 : vector<1x1xf32>
    %41 = vector.extract_strided_slice %18 {offsets = [0, 17, 7], sizes = [1, 1, 1], strides = [1, 1, 1]} : vector<1x64x9xf32> to vector<1x1x1xf32>
    %42 = vector.shape_cast %41 : vector<1x1x1xf32> to vector<1x1xf32>
    %43 = arith.addf %40, %42 : vector<1x1xf32>
    %44 = vector.extract_strided_slice %18 {offsets = [0, 18, 8], sizes = [1, 1, 1], strides = [1, 1, 1]} : vector<1x64x9xf32> to vector<1x1x1xf32>
    %45 = vector.shape_cast %44 : vector<1x1x1xf32> to vector<1x1xf32>
    %46 = arith.addf %43, %45 : vector<1x1xf32>
    %c0_i32 = arith.constant 0 : i32
    %47 = vector.broadcast %c0_i32 : i32 to vector<1x9xi32>
    %48 = arith.cmpi eq, %19, %47 : vector<1x9xi32>
    %cst_15 = arith.constant 0.000000e+00 : f32
    %49 = vector.shape_cast %46 : vector<1x1xf32> to vector<1x1xf32>
    %50 = vector.broadcast %49 : vector<1x1xf32> to vector<1x9xf32>
    %51 = vector.broadcast %cst_15 : f32 to vector<1x9xf32>
    %52 = arith.select %48, %50, %51 : vector<1x9xi1>, vector<1x9xf32>
    %53 = arith.addf %20, %52 : vector<1x9xf32>
    %54 = vector.extract_strided_slice %18 {offsets = [0, 2, 0], sizes = [1, 1, 1], strides = [1, 1, 1]} : vector<1x64x9xf32> to vector<1x1x1xf32>
    %55 = vector.shape_cast %54 : vector<1x1x1xf32> to vector<1x1xf32>
    %56 = vector.extract_strided_slice %18 {offsets = [0, 3, 1], sizes = [1, 1, 1], strides = [1, 1, 1]} : vector<1x64x9xf32> to vector<1x1x1xf32>
    %57 = vector.shape_cast %56 : vector<1x1x1xf32> to vector<1x1xf32>
    %58 = arith.addf %55, %57 : vector<1x1xf32>
    %59 = vector.extract_strided_slice %18 {offsets = [0, 4, 2], sizes = [1, 1, 1], strides = [1, 1, 1]} : vector<1x64x9xf32> to vector<1x1x1xf32>
    %60 = vector.shape_cast %59 : vector<1x1x1xf32> to vector<1x1xf32>
    %61 = arith.addf %58, %60 : vector<1x1xf32>
    %62 = vector.extract_strided_slice %18 {offsets = [0, 10, 3], sizes = [1, 1, 1], strides = [1, 1, 1]} : vector<1x64x9xf32> to vector<1x1x1xf32>
    %63 = vector.shape_cast %62 : vector<1x1x1xf32> to vector<1x1xf32>
    %64 = arith.addf %61, %63 : vector<1x1xf32>
    %65 = vector.extract_strided_slice %18 {offsets = [0, 11, 4], sizes = [1, 1, 1], strides = [1, 1, 1]} : vector<1x64x9xf32> to vector<1x1x1xf32>
    %66 = vector.shape_cast %65 : vector<1x1x1xf32> to vector<1x1xf32>
    %67 = arith.addf %64, %66 : vector<1x1xf32>
    %68 = vector.extract_strided_slice %18 {offsets = [0, 12, 5], sizes = [1, 1, 1], strides = [1, 1, 1]} : vector<1x64x9xf32> to vector<1x1x1xf32>
    %69 = vector.shape_cast %68 : vector<1x1x1xf32> to vector<1x1xf32>
    %70 = arith.addf %67, %69 : vector<1x1xf32>
    %71 = vector.extract_strided_slice %18 {offsets = [0, 18, 6], sizes = [1, 1, 1], strides = [1, 1, 1]} : vector<1x64x9xf32> to vector<1x1x1xf32>
    %72 = vector.shape_cast %71 : vector<1x1x1xf32> to vector<1x1xf32>
    %73 = arith.addf %70, %72 : vector<1x1xf32>
    %74 = vector.extract_strided_slice %18 {offsets = [0, 19, 7], sizes = [1, 1, 1], strides = [1, 1, 1]} : vector<1x64x9xf32> to vector<1x1x1xf32>
    %75 = vector.shape_cast %74 : vector<1x1x1xf32> to vector<1x1xf32>
    %76 = arith.addf %73, %75 : vector<1x1xf32>
    %77 = vector.extract_strided_slice %18 {offsets = [0, 20, 8], sizes = [1, 1, 1], strides = [1, 1, 1]} : vector<1x64x9xf32> to vector<1x1x1xf32>
    %78 = vector.shape_cast %77 : vector<1x1x1xf32> to vector<1x1xf32>
    %79 = arith.addf %76, %78 : vector<1x1xf32>
    %c1_i32 = arith.constant 1 : i32
    %80 = vector.broadcast %c1_i32 : i32 to vector<1x9xi32>
    %81 = arith.cmpi eq, %19, %80 : vector<1x9xi32>
    %cst_16 = arith.constant 0.000000e+00 : f32
    %82 = vector.shape_cast %79 : vector<1x1xf32> to vector<1x1xf32>
    %83 = vector.broadcast %82 : vector<1x1xf32> to vector<1x9xf32>
    %84 = vector.broadcast %cst_16 : f32 to vector<1x9xf32>
    %85 = arith.select %81, %83, %84 : vector<1x9xi1>, vector<1x9xf32>
    %86 = arith.addf %53, %85 : vector<1x9xf32>
    %87 = vector.extract_strided_slice %18 {offsets = [0, 4, 0], sizes = [1, 1, 1], strides = [1, 1, 1]} : vector<1x64x9xf32> to vector<1x1x1xf32>
    %88 = vector.shape_cast %87 : vector<1x1x1xf32> to vector<1x1xf32>
    %89 = vector.extract_strided_slice %18 {offsets = [0, 5, 1], sizes = [1, 1, 1], strides = [1, 1, 1]} : vector<1x64x9xf32> to vector<1x1x1xf32>
    %90 = vector.shape_cast %89 : vector<1x1x1xf32> to vector<1x1xf32>
    %91 = arith.addf %88, %90 : vector<1x1xf32>
    %92 = vector.extract_strided_slice %18 {offsets = [0, 6, 2], sizes = [1, 1, 1], strides = [1, 1, 1]} : vector<1x64x9xf32> to vector<1x1x1xf32>
    %93 = vector.shape_cast %92 : vector<1x1x1xf32> to vector<1x1xf32>
    %94 = arith.addf %91, %93 : vector<1x1xf32>
    %95 = vector.extract_strided_slice %18 {offsets = [0, 12, 3], sizes = [1, 1, 1], strides = [1, 1, 1]} : vector<1x64x9xf32> to vector<1x1x1xf32>
    %96 = vector.shape_cast %95 : vector<1x1x1xf32> to vector<1x1xf32>
    %97 = arith.addf %94, %96 : vector<1x1xf32>
    %98 = vector.extract_strided_slice %18 {offsets = [0, 13, 4], sizes = [1, 1, 1], strides = [1, 1, 1]} : vector<1x64x9xf32> to vector<1x1x1xf32>
    %99 = vector.shape_cast %98 : vector<1x1x1xf32> to vector<1x1xf32>
    %100 = arith.addf %97, %99 : vector<1x1xf32>
    %101 = vector.extract_strided_slice %18 {offsets = [0, 14, 5], sizes = [1, 1, 1], strides = [1, 1, 1]} : vector<1x64x9xf32> to vector<1x1x1xf32>
    %102 = vector.shape_cast %101 : vector<1x1x1xf32> to vector<1x1xf32>
    %103 = arith.addf %100, %102 : vector<1x1xf32>
    %104 = vector.extract_strided_slice %18 {offsets = [0, 20, 6], sizes = [1, 1, 1], strides = [1, 1, 1]} : vector<1x64x9xf32> to vector<1x1x1xf32>
    %105 = vector.shape_cast %104 : vector<1x1x1xf32> to vector<1x1xf32>
    %106 = arith.addf %103, %105 : vector<1x1xf32>
    %107 = vector.extract_strided_slice %18 {offsets = [0, 21, 7], sizes = [1, 1, 1], strides = [1, 1, 1]} : vector<1x64x9xf32> to vector<1x1x1xf32>
    %108 = vector.shape_cast %107 : vector<1x1x1xf32> to vector<1x1xf32>
    %109 = arith.addf %106, %108 : vector<1x1xf32>
    %110 = vector.extract_strided_slice %18 {offsets = [0, 22, 8], sizes = [1, 1, 1], strides = [1, 1, 1]} : vector<1x64x9xf32> to vector<1x1x1xf32>
    %111 = vector.shape_cast %110 : vector<1x1x1xf32> to vector<1x1xf32>
    %112 = arith.addf %109, %111 : vector<1x1xf32>
    %c2_i32 = arith.constant 2 : i32
    %113 = vector.broadcast %c2_i32 : i32 to vector<1x9xi32>
    %114 = arith.cmpi eq, %19, %113 : vector<1x9xi32>
    %cst_17 = arith.constant 0.000000e+00 : f32
    %115 = vector.shape_cast %112 : vector<1x1xf32> to vector<1x1xf32>
    %116 = vector.broadcast %115 : vector<1x1xf32> to vector<1x9xf32>
    %117 = vector.broadcast %cst_17 : f32 to vector<1x9xf32>
    %118 = arith.select %114, %116, %117 : vector<1x9xi1>, vector<1x9xf32>
    %119 = arith.addf %86, %118 : vector<1x9xf32>
    %120 = vector.extract_strided_slice %18 {offsets = [0, 16, 0], sizes = [1, 1, 1], strides = [1, 1, 1]} : vector<1x64x9xf32> to vector<1x1x1xf32>
    %121 = vector.shape_cast %120 : vector<1x1x1xf32> to vector<1x1xf32>
    %122 = vector.extract_strided_slice %18 {offsets = [0, 17, 1], sizes = [1, 1, 1], strides = [1, 1, 1]} : vector<1x64x9xf32> to vector<1x1x1xf32>
    %123 = vector.shape_cast %122 : vector<1x1x1xf32> to vector<1x1xf32>
    %124 = arith.addf %121, %123 : vector<1x1xf32>
    %125 = vector.extract_strided_slice %18 {offsets = [0, 18, 2], sizes = [1, 1, 1], strides = [1, 1, 1]} : vector<1x64x9xf32> to vector<1x1x1xf32>
    %126 = vector.shape_cast %125 : vector<1x1x1xf32> to vector<1x1xf32>
    %127 = arith.addf %124, %126 : vector<1x1xf32>
    %128 = vector.extract_strided_slice %18 {offsets = [0, 24, 3], sizes = [1, 1, 1], strides = [1, 1, 1]} : vector<1x64x9xf32> to vector<1x1x1xf32>
    %129 = vector.shape_cast %128 : vector<1x1x1xf32> to vector<1x1xf32>
    %130 = arith.addf %127, %129 : vector<1x1xf32>
    %131 = vector.extract_strided_slice %18 {offsets = [0, 25, 4], sizes = [1, 1, 1], strides = [1, 1, 1]} : vector<1x64x9xf32> to vector<1x1x1xf32>
    %132 = vector.shape_cast %131 : vector<1x1x1xf32> to vector<1x1xf32>
    %133 = arith.addf %130, %132 : vector<1x1xf32>
    %134 = vector.extract_strided_slice %18 {offsets = [0, 26, 5], sizes = [1, 1, 1], strides = [1, 1, 1]} : vector<1x64x9xf32> to vector<1x1x1xf32>
    %135 = vector.shape_cast %134 : vector<1x1x1xf32> to vector<1x1xf32>
    %136 = arith.addf %133, %135 : vector<1x1xf32>
    %137 = vector.extract_strided_slice %18 {offsets = [0, 32, 6], sizes = [1, 1, 1], strides = [1, 1, 1]} : vector<1x64x9xf32> to vector<1x1x1xf32>
    %138 = vector.shape_cast %137 : vector<1x1x1xf32> to vector<1x1xf32>
    %139 = arith.addf %136, %138 : vector<1x1xf32>
    %140 = vector.extract_strided_slice %18 {offsets = [0, 33, 7], sizes = [1, 1, 1], strides = [1, 1, 1]} : vector<1x64x9xf32> to vector<1x1x1xf32>
    %141 = vector.shape_cast %140 : vector<1x1x1xf32> to vector<1x1xf32>
    %142 = arith.addf %139, %141 : vector<1x1xf32>
    %143 = vector.extract_strided_slice %18 {offsets = [0, 34, 8], sizes = [1, 1, 1], strides = [1, 1, 1]} : vector<1x64x9xf32> to vector<1x1x1xf32>
    %144 = vector.shape_cast %143 : vector<1x1x1xf32> to vector<1x1xf32>
    %145 = arith.addf %142, %144 : vector<1x1xf32>
    %c3_i32 = arith.constant 3 : i32
    %146 = vector.broadcast %c3_i32 : i32 to vector<1x9xi32>
    %147 = arith.cmpi eq, %19, %146 : vector<1x9xi32>
    %cst_18 = arith.constant 0.000000e+00 : f32
    %148 = vector.shape_cast %145 : vector<1x1xf32> to vector<1x1xf32>
    %149 = vector.broadcast %148 : vector<1x1xf32> to vector<1x9xf32>
    %150 = vector.broadcast %cst_18 : f32 to vector<1x9xf32>
    %151 = arith.select %147, %149, %150 : vector<1x9xi1>, vector<1x9xf32>
    %152 = arith.addf %119, %151 : vector<1x9xf32>
    %153 = vector.extract_strided_slice %18 {offsets = [0, 18, 0], sizes = [1, 1, 1], strides = [1, 1, 1]} : vector<1x64x9xf32> to vector<1x1x1xf32>
    %154 = vector.shape_cast %153 : vector<1x1x1xf32> to vector<1x1xf32>
    %155 = vector.extract_strided_slice %18 {offsets = [0, 19, 1], sizes = [1, 1, 1], strides = [1, 1, 1]} : vector<1x64x9xf32> to vector<1x1x1xf32>
    %156 = vector.shape_cast %155 : vector<1x1x1xf32> to vector<1x1xf32>
    %157 = arith.addf %154, %156 : vector<1x1xf32>
    %158 = vector.extract_strided_slice %18 {offsets = [0, 20, 2], sizes = [1, 1, 1], strides = [1, 1, 1]} : vector<1x64x9xf32> to vector<1x1x1xf32>
    %159 = vector.shape_cast %158 : vector<1x1x1xf32> to vector<1x1xf32>
    %160 = arith.addf %157, %159 : vector<1x1xf32>
    %161 = vector.extract_strided_slice %18 {offsets = [0, 26, 3], sizes = [1, 1, 1], strides = [1, 1, 1]} : vector<1x64x9xf32> to vector<1x1x1xf32>
    %162 = vector.shape_cast %161 : vector<1x1x1xf32> to vector<1x1xf32>
    %163 = arith.addf %160, %162 : vector<1x1xf32>
    %164 = vector.extract_strided_slice %18 {offsets = [0, 27, 4], sizes = [1, 1, 1], strides = [1, 1, 1]} : vector<1x64x9xf32> to vector<1x1x1xf32>
    %165 = vector.shape_cast %164 : vector<1x1x1xf32> to vector<1x1xf32>
    %166 = arith.addf %163, %165 : vector<1x1xf32>
    %167 = vector.extract_strided_slice %18 {offsets = [0, 28, 5], sizes = [1, 1, 1], strides = [1, 1, 1]} : vector<1x64x9xf32> to vector<1x1x1xf32>
    %168 = vector.shape_cast %167 : vector<1x1x1xf32> to vector<1x1xf32>
    %169 = arith.addf %166, %168 : vector<1x1xf32>
    %170 = vector.extract_strided_slice %18 {offsets = [0, 34, 6], sizes = [1, 1, 1], strides = [1, 1, 1]} : vector<1x64x9xf32> to vector<1x1x1xf32>
    %171 = vector.shape_cast %170 : vector<1x1x1xf32> to vector<1x1xf32>
    %172 = arith.addf %169, %171 : vector<1x1xf32>
    %173 = vector.extract_strided_slice %18 {offsets = [0, 35, 7], sizes = [1, 1, 1], strides = [1, 1, 1]} : vector<1x64x9xf32> to vector<1x1x1xf32>
    %174 = vector.shape_cast %173 : vector<1x1x1xf32> to vector<1x1xf32>
    %175 = arith.addf %172, %174 : vector<1x1xf32>
    %176 = vector.extract_strided_slice %18 {offsets = [0, 36, 8], sizes = [1, 1, 1], strides = [1, 1, 1]} : vector<1x64x9xf32> to vector<1x1x1xf32>
    %177 = vector.shape_cast %176 : vector<1x1x1xf32> to vector<1x1xf32>
    %178 = arith.addf %175, %177 : vector<1x1xf32>
    %c4_i32 = arith.constant 4 : i32
    %179 = vector.broadcast %c4_i32 : i32 to vector<1x9xi32>
    %180 = arith.cmpi eq, %19, %179 : vector<1x9xi32>
    %cst_19 = arith.constant 0.000000e+00 : f32
    %181 = vector.shape_cast %178 : vector<1x1xf32> to vector<1x1xf32>
    %182 = vector.broadcast %181 : vector<1x1xf32> to vector<1x9xf32>
    %183 = vector.broadcast %cst_19 : f32 to vector<1x9xf32>
    %184 = arith.select %180, %182, %183 : vector<1x9xi1>, vector<1x9xf32>
    %185 = arith.addf %152, %184 : vector<1x9xf32>
    %186 = vector.extract_strided_slice %18 {offsets = [0, 20, 0], sizes = [1, 1, 1], strides = [1, 1, 1]} : vector<1x64x9xf32> to vector<1x1x1xf32>
    %187 = vector.shape_cast %186 : vector<1x1x1xf32> to vector<1x1xf32>
    %188 = vector.extract_strided_slice %18 {offsets = [0, 21, 1], sizes = [1, 1, 1], strides = [1, 1, 1]} : vector<1x64x9xf32> to vector<1x1x1xf32>
    %189 = vector.shape_cast %188 : vector<1x1x1xf32> to vector<1x1xf32>
    %190 = arith.addf %187, %189 : vector<1x1xf32>
    %191 = vector.extract_strided_slice %18 {offsets = [0, 22, 2], sizes = [1, 1, 1], strides = [1, 1, 1]} : vector<1x64x9xf32> to vector<1x1x1xf32>
    %192 = vector.shape_cast %191 : vector<1x1x1xf32> to vector<1x1xf32>
    %193 = arith.addf %190, %192 : vector<1x1xf32>
    %194 = vector.extract_strided_slice %18 {offsets = [0, 28, 3], sizes = [1, 1, 1], strides = [1, 1, 1]} : vector<1x64x9xf32> to vector<1x1x1xf32>
    %195 = vector.shape_cast %194 : vector<1x1x1xf32> to vector<1x1xf32>
    %196 = arith.addf %193, %195 : vector<1x1xf32>
    %197 = vector.extract_strided_slice %18 {offsets = [0, 29, 4], sizes = [1, 1, 1], strides = [1, 1, 1]} : vector<1x64x9xf32> to vector<1x1x1xf32>
    %198 = vector.shape_cast %197 : vector<1x1x1xf32> to vector<1x1xf32>
    %199 = arith.addf %196, %198 : vector<1x1xf32>
    %200 = vector.extract_strided_slice %18 {offsets = [0, 30, 5], sizes = [1, 1, 1], strides = [1, 1, 1]} : vector<1x64x9xf32> to vector<1x1x1xf32>
    %201 = vector.shape_cast %200 : vector<1x1x1xf32> to vector<1x1xf32>
    %202 = arith.addf %199, %201 : vector<1x1xf32>
    %203 = vector.extract_strided_slice %18 {offsets = [0, 36, 6], sizes = [1, 1, 1], strides = [1, 1, 1]} : vector<1x64x9xf32> to vector<1x1x1xf32>
    %204 = vector.shape_cast %203 : vector<1x1x1xf32> to vector<1x1xf32>
    %205 = arith.addf %202, %204 : vector<1x1xf32>
    %206 = vector.extract_strided_slice %18 {offsets = [0, 37, 7], sizes = [1, 1, 1], strides = [1, 1, 1]} : vector<1x64x9xf32> to vector<1x1x1xf32>
    %207 = vector.shape_cast %206 : vector<1x1x1xf32> to vector<1x1xf32>
    %208 = arith.addf %205, %207 : vector<1x1xf32>
    %209 = vector.extract_strided_slice %18 {offsets = [0, 38, 8], sizes = [1, 1, 1], strides = [1, 1, 1]} : vector<1x64x9xf32> to vector<1x1x1xf32>
    %210 = vector.shape_cast %209 : vector<1x1x1xf32> to vector<1x1xf32>
    %211 = arith.addf %208, %210 : vector<1x1xf32>
    %c5_i32 = arith.constant 5 : i32
    %212 = vector.broadcast %c5_i32 : i32 to vector<1x9xi32>
    %213 = arith.cmpi eq, %19, %212 : vector<1x9xi32>
    %cst_20 = arith.constant 0.000000e+00 : f32
    %214 = vector.shape_cast %211 : vector<1x1xf32> to vector<1x1xf32>
    %215 = vector.broadcast %214 : vector<1x1xf32> to vector<1x9xf32>
    %216 = vector.broadcast %cst_20 : f32 to vector<1x9xf32>
    %217 = arith.select %213, %215, %216 : vector<1x9xi1>, vector<1x9xf32>
    %218 = arith.addf %185, %217 : vector<1x9xf32>
    %219 = vector.extract_strided_slice %18 {offsets = [0, 32, 0], sizes = [1, 1, 1], strides = [1, 1, 1]} : vector<1x64x9xf32> to vector<1x1x1xf32>
    %220 = vector.shape_cast %219 : vector<1x1x1xf32> to vector<1x1xf32>
    %221 = vector.extract_strided_slice %18 {offsets = [0, 33, 1], sizes = [1, 1, 1], strides = [1, 1, 1]} : vector<1x64x9xf32> to vector<1x1x1xf32>
    %222 = vector.shape_cast %221 : vector<1x1x1xf32> to vector<1x1xf32>
    %223 = arith.addf %220, %222 : vector<1x1xf32>
    %224 = vector.extract_strided_slice %18 {offsets = [0, 34, 2], sizes = [1, 1, 1], strides = [1, 1, 1]} : vector<1x64x9xf32> to vector<1x1x1xf32>
    %225 = vector.shape_cast %224 : vector<1x1x1xf32> to vector<1x1xf32>
    %226 = arith.addf %223, %225 : vector<1x1xf32>
    %227 = vector.extract_strided_slice %18 {offsets = [0, 40, 3], sizes = [1, 1, 1], strides = [1, 1, 1]} : vector<1x64x9xf32> to vector<1x1x1xf32>
    %228 = vector.shape_cast %227 : vector<1x1x1xf32> to vector<1x1xf32>
    %229 = arith.addf %226, %228 : vector<1x1xf32>
    %230 = vector.extract_strided_slice %18 {offsets = [0, 41, 4], sizes = [1, 1, 1], strides = [1, 1, 1]} : vector<1x64x9xf32> to vector<1x1x1xf32>
    %231 = vector.shape_cast %230 : vector<1x1x1xf32> to vector<1x1xf32>
    %232 = arith.addf %229, %231 : vector<1x1xf32>
    %233 = vector.extract_strided_slice %18 {offsets = [0, 42, 5], sizes = [1, 1, 1], strides = [1, 1, 1]} : vector<1x64x9xf32> to vector<1x1x1xf32>
    %234 = vector.shape_cast %233 : vector<1x1x1xf32> to vector<1x1xf32>
    %235 = arith.addf %232, %234 : vector<1x1xf32>
    %236 = vector.extract_strided_slice %18 {offsets = [0, 48, 6], sizes = [1, 1, 1], strides = [1, 1, 1]} : vector<1x64x9xf32> to vector<1x1x1xf32>
    %237 = vector.shape_cast %236 : vector<1x1x1xf32> to vector<1x1xf32>
    %238 = arith.addf %235, %237 : vector<1x1xf32>
    %239 = vector.extract_strided_slice %18 {offsets = [0, 49, 7], sizes = [1, 1, 1], strides = [1, 1, 1]} : vector<1x64x9xf32> to vector<1x1x1xf32>
    %240 = vector.shape_cast %239 : vector<1x1x1xf32> to vector<1x1xf32>
    %241 = arith.addf %238, %240 : vector<1x1xf32>
    %242 = vector.extract_strided_slice %18 {offsets = [0, 50, 8], sizes = [1, 1, 1], strides = [1, 1, 1]} : vector<1x64x9xf32> to vector<1x1x1xf32>
    %243 = vector.shape_cast %242 : vector<1x1x1xf32> to vector<1x1xf32>
    %244 = arith.addf %241, %243 : vector<1x1xf32>
    %c6_i32 = arith.constant 6 : i32
    %245 = vector.broadcast %c6_i32 : i32 to vector<1x9xi32>
    %246 = arith.cmpi eq, %19, %245 : vector<1x9xi32>
    %cst_21 = arith.constant 0.000000e+00 : f32
    %247 = vector.shape_cast %244 : vector<1x1xf32> to vector<1x1xf32>
    %248 = vector.broadcast %247 : vector<1x1xf32> to vector<1x9xf32>
    %249 = vector.broadcast %cst_21 : f32 to vector<1x9xf32>
    %250 = arith.select %246, %248, %249 : vector<1x9xi1>, vector<1x9xf32>
    %251 = arith.addf %218, %250 : vector<1x9xf32>
    %252 = vector.extract_strided_slice %18 {offsets = [0, 34, 0], sizes = [1, 1, 1], strides = [1, 1, 1]} : vector<1x64x9xf32> to vector<1x1x1xf32>
    %253 = vector.shape_cast %252 : vector<1x1x1xf32> to vector<1x1xf32>
    %254 = vector.extract_strided_slice %18 {offsets = [0, 35, 1], sizes = [1, 1, 1], strides = [1, 1, 1]} : vector<1x64x9xf32> to vector<1x1x1xf32>
    %255 = vector.shape_cast %254 : vector<1x1x1xf32> to vector<1x1xf32>
    %256 = arith.addf %253, %255 : vector<1x1xf32>
    %257 = vector.extract_strided_slice %18 {offsets = [0, 36, 2], sizes = [1, 1, 1], strides = [1, 1, 1]} : vector<1x64x9xf32> to vector<1x1x1xf32>
    %258 = vector.shape_cast %257 : vector<1x1x1xf32> to vector<1x1xf32>
    %259 = arith.addf %256, %258 : vector<1x1xf32>
    %260 = vector.extract_strided_slice %18 {offsets = [0, 42, 3], sizes = [1, 1, 1], strides = [1, 1, 1]} : vector<1x64x9xf32> to vector<1x1x1xf32>
    %261 = vector.shape_cast %260 : vector<1x1x1xf32> to vector<1x1xf32>
    %262 = arith.addf %259, %261 : vector<1x1xf32>
    %263 = vector.extract_strided_slice %18 {offsets = [0, 43, 4], sizes = [1, 1, 1], strides = [1, 1, 1]} : vector<1x64x9xf32> to vector<1x1x1xf32>
    %264 = vector.shape_cast %263 : vector<1x1x1xf32> to vector<1x1xf32>
    %265 = arith.addf %262, %264 : vector<1x1xf32>
    %266 = vector.extract_strided_slice %18 {offsets = [0, 44, 5], sizes = [1, 1, 1], strides = [1, 1, 1]} : vector<1x64x9xf32> to vector<1x1x1xf32>
    %267 = vector.shape_cast %266 : vector<1x1x1xf32> to vector<1x1xf32>
    %268 = arith.addf %265, %267 : vector<1x1xf32>
    %269 = vector.extract_strided_slice %18 {offsets = [0, 50, 6], sizes = [1, 1, 1], strides = [1, 1, 1]} : vector<1x64x9xf32> to vector<1x1x1xf32>
    %270 = vector.shape_cast %269 : vector<1x1x1xf32> to vector<1x1xf32>
    %271 = arith.addf %268, %270 : vector<1x1xf32>
    %272 = vector.extract_strided_slice %18 {offsets = [0, 51, 7], sizes = [1, 1, 1], strides = [1, 1, 1]} : vector<1x64x9xf32> to vector<1x1x1xf32>
    %273 = vector.shape_cast %272 : vector<1x1x1xf32> to vector<1x1xf32>
    %274 = arith.addf %271, %273 : vector<1x1xf32>
    %275 = vector.extract_strided_slice %18 {offsets = [0, 52, 8], sizes = [1, 1, 1], strides = [1, 1, 1]} : vector<1x64x9xf32> to vector<1x1x1xf32>
    %276 = vector.shape_cast %275 : vector<1x1x1xf32> to vector<1x1xf32>
    %277 = arith.addf %274, %276 : vector<1x1xf32>
    %c7_i32 = arith.constant 7 : i32
    %278 = vector.broadcast %c7_i32 : i32 to vector<1x9xi32>
    %279 = arith.cmpi eq, %19, %278 : vector<1x9xi32>
    %cst_22 = arith.constant 0.000000e+00 : f32
    %280 = vector.shape_cast %277 : vector<1x1xf32> to vector<1x1xf32>
    %281 = vector.broadcast %280 : vector<1x1xf32> to vector<1x9xf32>
    %282 = vector.broadcast %cst_22 : f32 to vector<1x9xf32>
    %283 = arith.select %279, %281, %282 : vector<1x9xi1>, vector<1x9xf32>
    %284 = arith.addf %251, %283 : vector<1x9xf32>
    %285 = vector.extract_strided_slice %18 {offsets = [0, 36, 0], sizes = [1, 1, 1], strides = [1, 1, 1]} : vector<1x64x9xf32> to vector<1x1x1xf32>
    %286 = vector.shape_cast %285 : vector<1x1x1xf32> to vector<1x1xf32>
    %287 = vector.extract_strided_slice %18 {offsets = [0, 37, 1], sizes = [1, 1, 1], strides = [1, 1, 1]} : vector<1x64x9xf32> to vector<1x1x1xf32>
    %288 = vector.shape_cast %287 : vector<1x1x1xf32> to vector<1x1xf32>
    %289 = arith.addf %286, %288 : vector<1x1xf32>
    %290 = vector.extract_strided_slice %18 {offsets = [0, 38, 2], sizes = [1, 1, 1], strides = [1, 1, 1]} : vector<1x64x9xf32> to vector<1x1x1xf32>
    %291 = vector.shape_cast %290 : vector<1x1x1xf32> to vector<1x1xf32>
    %292 = arith.addf %289, %291 : vector<1x1xf32>
    %293 = vector.extract_strided_slice %18 {offsets = [0, 44, 3], sizes = [1, 1, 1], strides = [1, 1, 1]} : vector<1x64x9xf32> to vector<1x1x1xf32>
    %294 = vector.shape_cast %293 : vector<1x1x1xf32> to vector<1x1xf32>
    %295 = arith.addf %292, %294 : vector<1x1xf32>
    %296 = vector.extract_strided_slice %18 {offsets = [0, 45, 4], sizes = [1, 1, 1], strides = [1, 1, 1]} : vector<1x64x9xf32> to vector<1x1x1xf32>
    %297 = vector.shape_cast %296 : vector<1x1x1xf32> to vector<1x1xf32>
    %298 = arith.addf %295, %297 : vector<1x1xf32>
    %299 = vector.extract_strided_slice %18 {offsets = [0, 46, 5], sizes = [1, 1, 1], strides = [1, 1, 1]} : vector<1x64x9xf32> to vector<1x1x1xf32>
    %300 = vector.shape_cast %299 : vector<1x1x1xf32> to vector<1x1xf32>
    %301 = arith.addf %298, %300 : vector<1x1xf32>
    %302 = vector.extract_strided_slice %18 {offsets = [0, 52, 6], sizes = [1, 1, 1], strides = [1, 1, 1]} : vector<1x64x9xf32> to vector<1x1x1xf32>
    %303 = vector.shape_cast %302 : vector<1x1x1xf32> to vector<1x1xf32>
    %304 = arith.addf %301, %303 : vector<1x1xf32>
    %305 = vector.extract_strided_slice %18 {offsets = [0, 53, 7], sizes = [1, 1, 1], strides = [1, 1, 1]} : vector<1x64x9xf32> to vector<1x1x1xf32>
    %306 = vector.shape_cast %305 : vector<1x1x1xf32> to vector<1x1xf32>
    %307 = arith.addf %304, %306 : vector<1x1xf32>
    %308 = vector.extract_strided_slice %18 {offsets = [0, 54, 8], sizes = [1, 1, 1], strides = [1, 1, 1]} : vector<1x64x9xf32> to vector<1x1x1xf32>
    %309 = vector.shape_cast %308 : vector<1x1x1xf32> to vector<1x1xf32>
    %310 = arith.addf %307, %309 : vector<1x1xf32>
    %c8_i32 = arith.constant 8 : i32
    %311 = vector.broadcast %c8_i32 : i32 to vector<1x9xi32>
    %312 = arith.cmpi eq, %19, %311 : vector<1x9xi32>
    %cst_23 = arith.constant 0.000000e+00 : f32
    %313 = vector.shape_cast %310 : vector<1x1xf32> to vector<1x1xf32>
    %314 = vector.broadcast %313 : vector<1x1xf32> to vector<1x9xf32>
    %315 = vector.broadcast %cst_23 : f32 to vector<1x9xf32>
    %316 = arith.select %312, %314, %315 : vector<1x9xi1>, vector<1x9xf32>
    %317 = arith.addf %284, %316 : vector<1x9xf32>
    %318 = vector.shape_cast %317 : vector<1x9xf32> to vector<1x1x9xf32>
    %c0_24 = arith.constant 0 : index
    %c0_25 = arith.constant 0 : index
    %c0_26 = arith.constant 0 : index
    %319 = vector.load %arg5[%c0_24, %c0_25, %c0_26] : memref<1x1x9xf32, #tpu.memory_space<vmem>>, vector<1x1x9xf32>
    tpu.vector_store %arg5[%c0_24, %c0_25, %c0_26], %318 {strides = array<i32>} : memref<1x1x9xf32, #tpu.memory_space<vmem>>, vector<1x1x9xf32>,
    return
  }
  func.func @transform_0(%arg0: i32) -> (i32, i32, i32) {
    %c0_i32 = arith.constant 0 : i32
    %c0_i32_0 = arith.constant 0 : i32
    %c0_i32_1 = arith.constant 0 : i32
    return %arg0, %c0_i32, %c0_i32_0 : i32, i32, i32
  }
  func.func @transform_1(%arg0: i32) -> (i32, i32) {
    %c0_i32 = arith.constant 0 : i32
    %c0_i32_0 = arith.constant 0 : i32
    %c0_i32_1 = arith.constant 0 : i32
    return %c0_i32, %c0_i32_0 : i32, i32
  }
  func.func @transform_2(%arg0: i32) -> (i32, i32) {
    %c0_i32 = arith.constant 0 : i32
    %c0_i32_0 = arith.constant 0 : i32
    %c0_i32_1 = arith.constant 0 : i32
    return %c0_i32, %c0_i32_0 : i32, i32
  }
  func.func @transform_3(%arg0: i32) -> (i32, i32) {
    %c0_i32 = arith.constant 0 : i32
    %c0_i32_0 = arith.constant 0 : i32
    %c0_i32_1 = arith.constant 0 : i32
    return %c0_i32, %c0_i32_0 : i32, i32
  }
  func.func @transform_4(%arg0: i32) -> (i32, i32, i32) {
    %c0_i32 = arith.constant 0 : i32
    %c0_i32_0 = arith.constant 0 : i32
    %c0_i32_1 = arith.constant 0 : i32
    return %arg0, %c0_i32, %c0_i32_0 : i32, i32, i32
  }
}

</mosaic_0001>

<bundles_post_ra>
// kernel: discriminator_forward.1
= control target key start
LH: loop header
LB: loop body
LE: loop exit
PB: predicated region body
PF: predicated region fallthrough
CT: control target
= control target key end

     0   :  { %s11145_s15 = smov 0   ;;  %s15866_s0 = inlined_call_operand.vmem [shape: f32[2,64,81], index: 0, kind: input, shape index: {}]   ;;  %s15867_s1 = inlined_call_operand.vmem [shape: f32[81,576], index: 1, kind: input, shape index: {}]   ;;  %s15868_s2 = inlined_call_operand.vmem [shape: f32[576,128], index: 2, kind: input, shape index: {}]   ;;  %s15869_s3 = inlined_call_operand.vmem [shape: f32[128,9], index: 3, kind: input, shape index: {}]   ;;  %s15870_s4 = inlined_call_operand.vmem [shape: f32[2,1,9], index: 4, kind: output, shape index: {}]  }
   0x1 LB: > { %s8078_s16 = sadd.s32 4294967295, %s11108_s15   ;;  %p8082_p0 = scmp.ge.s32.totalorder %s11108_s15, 1  ;;  %s11108_s15 = sphi %s11145_s15, %s14_s15  }
   0x2   : > { %p162_p1 = scmp.lt.s32.totalorder %s11108_s15, 3 }
   0x4   : > { %p163_p2 = pnand %p8082_p0, %p162_p1 }
   0x6   : > { %166 = sbr.rel (%p163_p2) target bundleno = 1662 (0x67e), region = 36 }
   0xd   : > { %v203_v0 = vld [vmem:[%s15867_s1 + $0x8] sm:$0xff]  ;;  %v208_v1 = vld [vmem:[%s15867_s1 + $0x30] sm:$0xff]  ;;  %v202_v2 = vld [vmem:[%s15867_s1] sm:$0xff]  ;;  %v15899_v9 = vmov 0.0   ;;  %vm282_vm0 = vcmask 1040384   ;;  %p11258_p3 = scmp.lt.s32.totalorder %s8078_s16, 1 }
   0xe   : > { %v298_v3 = vand.u32 4294901760, %v203_v0  ;;  %v302_v4 = vand.u32 4294901760, %v208_v1  ;;  %v207_v5 = vld [vmem:[%s15867_s1 + $0x28] sm:$0xff]  ;;  %v300_v6 = vand.u32 4294901760, %v202_v2  ;;  %v213_v7 = vld [vmem:[%s15867_s1 + $0x58] sm:$0xff]  ;;  %v218_v8 = vld [vmem:[%s15867_s1 + $0x80] sm:$0xff]  ;;  %384 = vmatprep.mubr.f32.mxu1 %v15899_v9  ;;  %647 = vmatprep.mubr.f32.mxu0 %v15899_v9 }
   0xf   : > { %v304_v10 = vand.u32 4294901760, %v207_v5  ;;  %v306_v11 = vand.u32 4294901760, %v213_v7  ;;  %v310_v12 = vand.u32 4294901760, %v218_v8  ;;  %v212_v13 = vld [vmem:[%s15867_s1 + $0x50] sm:$0xff]  ;;  %v217_v14 = vld [vmem:[%s15867_s1 + $0x78] sm:$0xff]  ;;  %v223_v15 = vld [vmem:[%s15867_s1 + $0xa8] sm:$0xff] }
  0x10   : > { %v11182_v16 = vpack.c.bf16 %v302_v4, %v298_v3  ;;  %v11184_v17 = vsub.f32 %v203_v0, %v298_v3  ;;  %v11186_v18 = vsub.f32 %v208_v1, %v302_v4  ;;  %v228_v19 = vld [vmem:[%s15867_s1 + $0xd0] sm:$0xff]  ;;  %v11193_v21 = vsub.f32 %v202_v2, %v300_v6  ;;  %v222_v23 = vld [vmem:[%s15867_s1 + $0xa0] sm:$0xff]  ;;  %v227_v32 = vld [vmem:[%s15867_s1 + $0xc8] sm:$0xff]  ;;  %s17315_s16 = smov (!%p11258_p3, %s8078_s16), 1  ;;  %s11111_s20 = smov 125  }
  0x11   : > { %v11191_v20 = vpack.c.bf16 %v304_v10, %v300_v6  ;;  %v11195_v22 = vpack.c.bf16 %v310_v12, %v306_v11  ;;  %v11201_v24 = vsub.f32 %v207_v5, %v304_v10  ;;  %v308_v25 = vand.u32 4294901760, %v212_v13  ;;  %v233_v37 = vld [vmem:[%s15867_s1 + $0xf8] sm:$0xff]  ;;  %v238_v38 = vld [vmem:[%s15867_s1 + $0x120] sm:$0xff]  ;;  %v232_v55 = vld [vmem:[%s15867_s1 + $0xf0] sm:$0xff]  ;;  %s8087_s10 = sshll.u32 %s17315_s16, 6  ;;  %s11112_s21 = smov 127  }
  0x12   : > { %16381 = vst [vmem:[#allocation2_spill] sm:$0xff] %v11182_v16  ;;  %9751 = vmatprep.subr.bf16.mxu1 %v11182_v16  ;;  %v312_v26 = vand.u32 4294901760, %v217_v14  ;;  %v314_v27 = vand.u32 4294901760, %v223_v15  ;;  %v11204_v28 = vsub.f32 %v213_v7, %v306_v11  ;;  %v318_v29 = vand.u32 4294901760, %v228_v19  ;;  %v237_v56 = vld [vmem:[%s15867_s1 + $0x118] sm:$0xff]  ;;  %v243_v61 = vld [vmem:[%s15867_s1 + $0x148] sm:$0xff]  ;;  %s11354_s17 = scalar_lea.vmem %s15866_s0, %s8087_s10  ;;  %s193_s30 = scalar_lea.vmem %s15870_s4, %s17315_s16 }
  0x13   : > { %16382 = vst [vmem:[#allocation3_spill] sm:$0xff] %v11191_v20  ;;  %16383 = vst [vmem:[#allocation4_spill] sm:$0xff] %v11195_v22  ;;  %9753 = vmatpush1.bf16.msra.mxu1 %v11191_v20  ;;  %v15891_v30 = vand.u32 4294901760, %v11184_v17  ;;  %v15890_v31 = vand.u32 4294901760, %v11186_v18  ;;  %v11212_v33 = vsub.f32 %v218_v8, %v310_v12  ;;  %v11216_v35 = vsub.f32 %v212_v13, %v308_v25  ;;  %v248_v6 = vld [vmem:[%s15867_s1 + $0x170] sm:$0xff]  ;;  %s11113_s22 = smov 124  }
  0x14   : > { %9755 = vmatprep.subr.bf16.mxu1 %v11195_v22  ;;  %v11214_v34 = vpack.c.bf16 %v312_v26, %v308_v25  ;;  %v316_v36 = vand.u32 4294901760, %v222_v23  ;;  %v11224_v39 = vsub.f32 %v217_v14, %v312_v26  ;;  %v11226_v40 = vpack.c.bf16 %v318_v29, %v314_v27  ;;  %s11114_s23 = smov 126   ;;  %s11115_s24 = smov 123  }
  0x15   : > { %v476_v41 = vsub.f32 %v11184_v17, %v15891_v30  ;;  %v488_v42 = vsub.f32 %v11186_v18, %v15890_v31  ;;  %v11234_v43 = vsub.f32 %v223_v15, %v314_v27  ;;  %v320_v44 = vand.u32 4294901760, %v227_v32  ;;  %v242_v27 = vld [vmem:[%s15867_s1 + $0x140] sm:$0xff]  ;;  %v199_v30 = vld [vmem:[%s11354_s17 + $0x28] sm:$0xff]  ;;  %s11116_s25 = smov 122   ;;  %s11118_s26 = smov 121  }
  0x16   : > { %16384 = vst [vmem:[#allocation5_spill] sm:$0xff] %v11226_v40  ;;  %v15888_v45 = vand.u32 4294901760, %v11193_v21  ;;  %v15887_v46 = vand.u32 4294901760, %v11201_v24  ;;  %v322_v49 = vand.u32 4294901760, %v233_v37  ;;  %v326_v50 = vand.u32 4294901760, %v238_v38  ;;  %s11119_s27 = smov 120  }
  0x17   : > { %9757 = vmatpush1.bf16.msra.mxu1 %v11214_v34  ;;  %v477_v47 = vand.u32 4294901760, %v476_v41  ;;  %v489_v48 = vand.u32 4294901760, %v488_v42  ;;  %v11240_v51 = vsub.f32 %v228_v19, %v318_v29  ;;  %v11242_v52 = vpack.c.bf16 %v320_v44, %v316_v36  ;;  %v247_v29 = vld [vmem:[%s15867_s1 + $0x168] sm:$0xff]  ;;  %v253_v41 = vld [vmem:[%s15867_s1 + $0x198] sm:$0x1] }
  0x18   : > { %9759 = vmatprep.subr.bf16.mxu1 %v11226_v40  ;;  %v482_v53 = vsub.f32 %v11193_v21, %v15888_v45  ;;  %v494_v54 = vsub.f32 %v11201_v24, %v15887_v46  ;;  %v11264_v58 = vsub.f32 %v222_v23, %v316_v36  ;;  %v11266_v59 = vsub.f32 %v227_v32, %v320_v44  ;;  %v197_v46 = vld [vmem:[%s11354_s17 + $0x18] sm:$0xff] }
  0x19   : > { %16385 = vst [vmem:[#allocation6_spill] sm:$0xff] %v11242_v52  ;;  %v11262_v57 = vpack.c.bf16 %v489_v48, %v477_v47  ;;  %v11268_v60 = vpack.c.bf16 %v326_v50, %v322_v49  ;;  %v15883_v0 = vand.u32 4294901760, %v11204_v28  ;;  %v15882_v1 = vand.u32 4294901760, %v11212_v33 }
  0x1a   : > { %v483_v62 = vand.u32 4294901760, %v482_v53  ;;  %v495_v63 = vand.u32 4294901760, %v494_v54  ;;  %v324_v2 = vand.u32 4294901760, %v232_v55  ;;  %v328_v3 = vand.u32 4294901760, %v237_v56 }
  0x1b   : > { %16387 = vst [vmem:[#allocation7_spill] sm:$0xff] %v11268_v60  ;;  %9771 = vmatprep.subr.bf16.mxu0 %v11262_v57  ;;  %9761 = vmatpush1.bf16.msra.mxu1 %v11242_v52  ;;  %v15880_v4 = vand.u32 4294901760, %v11216_v35  ;;  %v15879_v5 = vand.u32 4294901760, %v11224_v39  ;;  %v500_v8 = vsub.f32 %v11204_v28, %v15883_v0  ;;  %v512_v10 = vsub.f32 %v11212_v33, %v15882_v1  ;;  %v196_v1 = vld [vmem:[%s11354_s17 + $0x10] sm:$0xff] }
  0x1c   : > { %v11282_v7 = vpack.c.bf16 %v495_v63, %v483_v62  ;;  %9763 = vmatprep.subr.bf16.mxu1 %v11268_v60  ;;  %v330_v11 = vand.u32 4294901760, %v243_v61  ;;  %v11297_v12 = vsub.f32 %v233_v37, %v322_v49  ;;  %v11299_v13 = vsub.f32 %v238_v38, %v326_v50 }
  0x1d   : > { %v11301_v14 = vpack.c.bf16 %v328_v3, %v324_v2  ;;  %v506_v15 = vsub.f32 %v11216_v35, %v15880_v4  ;;  %v501_v19 = vand.u32 4294901760, %v500_v8  ;;  %v513_v23 = vand.u32 4294901760, %v512_v10 }
  0x1e   : > { %9773 = vmatpush1.bf16.msra.mxu0 %v11282_v7  ;;  %v518_v25 = vsub.f32 %v11224_v39, %v15879_v5  ;;  %v334_v26 = vand.u32 4294901760, %v248_v6  ;;  %v11317_v32 = vsub.f32 %v232_v55, %v324_v2  ;;  %v15877_v37 = vand.u32 4294901760, %v11234_v43 }
  0x1f   : > { %16388 = vst [vmem:[#allocation8_spill] sm:$0xff] %v11301_v14  ;;  %9765 = vmatpush1.bf16.msra.mxu1 %v11301_v14  ;;  %v507_v36 = vand.u32 4294901760, %v506_v15  ;;  %v15875_v38 = vand.u32 4294901760, %v11240_v51  ;;  %v11324_v42 = vpack.c.bf16 %v513_v23, %v501_v19  ;;  %v11326_v44 = vsub.f32 %v237_v56, %v328_v3  ;;  %v252_v15 = vld [vmem:[%s15867_s1 + $0x190] sm:$0x1] }
  0x20   : > { %v519_v47 = vand.u32 4294901760, %v518_v25  ;;  %v11328_v48 = vpack.c.bf16 %v334_v26, %v330_v11  ;;  %v524_v49 = vsub.f32 %v11234_v43, %v15877_v37  ;;  %v332_v53 = vand.u32 4294901760, %v242_v27 }
  0x21   : > { %v536_v50 = vsub.f32 %v11240_v51, %v15875_v38  ;;  %v336_v54 = vand.u32 4294901760, %v247_v29  ;;  %9775 = vmatprep.subr.bf16.mxu0 %v11324_v42  ;;  %v15874_v56 = vand.u32 4294901760, %v11264_v58  ;;  %v15872_v62 = vand.u32 4294901760, %v11266_v59  ;;  %v195_v38 = vld [vmem:[%s11354_s17 + $0x8] sm:$0xff] }
  0x22   : > { %16389 = vst [vmem:[#allocation9_spill] sm:$0xff] %v11328_v48  ;;  %v11338_v55 = vpack.c.bf16 %v519_v47, %v507_v36  ;;  %9767 = vmatprep.subr.bf16.mxu1 %v11328_v48  ;;  %v287_v63 = vsel %vm282_vm0, %v253_v41, 0  ;;  %v11344_v2 = vsub.f32 %v243_v61, %v330_v11  ;;  %v525_v3 = vand.u32 4294901760, %v524_v49 }
  0x23   : > { %v537_v8 = vand.u32 4294901760, %v536_v50  ;;  %v11346_v10 = vpack.c.bf16 %v336_v54, %v332_v53  ;;  %v11357_v19 = vsub.f32 %v248_v6, %v334_v26  ;;  %v11359_v61 = vsub.f32 %v242_v27, %v332_v53  ;;  %v194_v50 = vld [vmem:[%s11354_s17] sm:$0xff] }
  0x24   : > { %9777 = vmatpush1.bf16.msra.mxu0 %v11338_v55  ;;  %v530_v11 = vsub.f32 %v11264_v58, %v15874_v56  ;;  %v542_v23 = vsub.f32 %v11266_v59, %v15872_v62  ;;  %v11370_v36 = vsub.f32 %v247_v29, %v336_v54  ;;  %v11372_v41 = vand.u32 4294901760, %v287_v63 }
  0x25   : > { %16390 = vst [vmem:[#allocation10_spill] sm:$0xff] %v11346_v10  ;;  %v11367_v25 = vpack.c.bf16 %v537_v8, %v525_v3  ;;  %9769 = vmatpush1.bf16.msra.mxu1 %v11346_v10  ;;  %v15871_v6 = vand.u32 4294901760, %v11297_v12  ;;  %v15873_v47 = vand.u32 4294901760, %v11299_v13  ;;  %v284_v49 = vsel %vm282_vm0, %v252_v15, 0 }
  0x26   : > { %16391 = vst [vmem:[#allocation11_spill] sm:$0xff] %v11372_v41  ;;  %v531_v26 = vand.u32 4294901760, %v530_v11  ;;  %v543_v27 = vand.u32 4294901760, %v542_v23  ;;  %339 = vmatprep.subr.mxu1 %v11372_v41  ;;  %v11383_v53 = vand.u32 4294901760, %v284_v49  ;;  %v15876_v54 = vand.u32 4294901760, %v11317_v32 }
  0x27   : > { %9779 = vmatprep.subr.bf16.mxu0 %v11367_v25  ;;  %v548_v29 = vsub.f32 %v11297_v12, %v15871_v6  ;;  %v15878_v3 = vand.u32 4294901760, %v11326_v44  ;;  %v560_v15 = vsub.f32 %v11299_v13, %v15873_v47  ;;  %vm257_vm1 = vcmask 662528  }
  0x28   : > { %16392 = vst [vmem:[#allocation12_spill] sm:$0xff] %v11383_v53  ;;  %v11387_v8 = vpack.c.bf16 %v543_v27, %v531_v26  ;;  %v15881_v11 = vand.u32 4294901760, %v11344_v2  ;;  %v554_v6 = vsub.f32 %v11317_v32, %v15876_v54  ;;  %v259_v26 = vsel %vm257_vm1, %v194_v50, 0 }
  0x29   : > { %v549_v23 = vand.u32 4294901760, %v548_v29  ;;  %341 = vmatpush1.msra.mxu1 %v11383_v53  ;;  %v566_v62 = vsub.f32 %v11326_v44, %v15878_v3  ;;  %v561_v27 = vand.u32 4294901760, %v560_v15  ;;  %v11402_v47 = vand.u32 4294901760, %v259_v26 }
  0x2a   : > { %9781 = vmatpush1.bf16.msra.mxu0 %v11387_v8  ;;  %v572_v29 = vsub.f32 %v11344_v2, %v15881_v11  ;;  %v15886_v56 = vand.u32 4294901760, %v11357_v19  ;;  %10782 = vmatprep.subr.bf16.mxu1 %v11262_v57  ;;  %v555_v54 = vand.u32 4294901760, %v554_v6  ;;  %v15885_v3 = vand.u32 4294901760, %v11359_v61 }
  0x2b   : > { %16393 = vst [vmem:[#allocation13_spill] sm:$0xff] %v11402_v47  ;;  %v567_v37 = vand.u32 4294901760, %v566_v62  ;;  %v15884_v50 = vand.u32 4294901760, %v11370_v36  ;;  %v11412_v5 = vpack.c.bf16 %v561_v27, %v549_v23  ;;  %v11415_v15 = vsub.f32 %v259_v26, %v11402_v47 }
  0x2c   : > { %v573_v4 = vand.u32 4294901760, %v572_v29  ;;  %v584_v11 = vsub.f32 %v11357_v19, %v15886_v56  ;;  %v578_v57 = vsub.f32 %v11359_v61, %v15885_v3  ;;  %v262_v6 = vsel %vm257_vm1, %v195_v38, 0 }
  0x2d   : > { %16394 = vst [vmem:[#allocation14_spill] sm:$0xff] %v11415_v15  ;;  %v11421_v0 = vpack.c.bf16 %v567_v37, %v555_v54  ;;  %v590_v62 = vsub.f32 %v11370_v36, %v15884_v50  ;;  %9783 = vmatprep.subr.bf16.mxu0 %v11412_v5  ;;  %v11432_v23 = vand.u32 4294901760, %v11415_v15  ;;  %v11434_v27 = vand.u32 4294901760, %v262_v6 }
  0x2e   : > { %v585_v26 = vand.u32 4294901760, %v584_v11  ;;  %v11437_v37 = vsub.f32 %v287_v63, %v11372_v41  ;;  %v579_v54 = vand.u32 4294901760, %v578_v57  ;;  %v11441_v50 = vsub.f32 %v284_v49, %v11383_v53  ;;  %v201_v41 = vld [vmem:[%s11354_s17 + $0x38] sm:$0xff] }
  0x2f   : > { %16395 = vst [vmem:[#allocation15_spill] sm:$0xff] %v11432_v23  ;;  %16396 = vst [vmem:[#allocation16_spill] sm:$0xff] %v11434_v27  ;;  %9785 = vmatpush1.bf16.msra.mxu0 %v11421_v0  ;;  %v591_v29 = vand.u32 4294901760, %v590_v62  ;;  %v265_v38 = vsel %vm257_vm1, %v196_v1, 0  ;;  %v388_v3 = vsub.f32 %v11415_v15, %v11432_v23  ;;  %v11449_v11 = vsub.f32 %v262_v6, %v11434_v27  ;;  %v198_v6 = vld [vmem:[%s11354_s17 + $0x20] sm:$0xff]  ;;  %v200_v23 = vld [vmem:[%s11354_s17 + $0x30] sm:$0xff] }
  0x30   : > { %16397 = vst [vmem:[#allocation17_spill] sm:$0xff] %v11437_v37  ;;  %16398 = vst [vmem:[#allocation18_spill] sm:$0xff] %v11441_v50  ;;  %v11446_v56 = vpack.c.bf16 %v585_v26, %v573_v4  ;;  %v15889_v63 = vand.u32 4294901760, %v11437_v37  ;;  %v15892_v57 = vand.u32 4294901760, %v11441_v50  ;;  %v11456_v49 = vand.u32 4294901760, %v265_v38 }
  0x31   : > { %16399 = vst [vmem:[#allocation19_spill] sm:$0xff] %v11449_v11  ;;  %v11453_v45 = vpack.c.bf16 %v591_v29, %v579_v54  ;;  %v11458_v62 = vand.u32 4294901760, %v388_v3  ;;  %v11462_v1 = vand.u32 4294901760, %v11449_v11  ;;  %v268_v54 = vsel %vm257_vm1, %v197_v46, 0 }
  0x32   : > { %16400 = vst [vmem:[#allocation20_spill] sm:$0xff] %v11456_v49  ;;  %9787 = vmatprep.subr.bf16.mxu0 %v11446_v56  ;;  %v11467_v4 = vsub.f32 %v11437_v37, %v15889_v63  ;;  %v11474_v26 = vsub.f32 %v11441_v50, %v15892_v57  ;;  %v11477_v3 = vsub.f32 %v265_v38, %v11456_v49  ;;  %v11484_v31 = vand.u32 4294901760, %v268_v54 }
  0x33   : > { %16401 = vst [vmem:[#allocation21_spill] sm:$0xff] %v11458_v62  ;;  %16402 = vst [vmem:[#allocation22_spill] sm:$0xff] %v11462_v1  ;;  %9789 = vmatpush1.bf16.msra.mxu0 %v11453_v45  ;;  %390 = vmatmul.mubr.f32.vlgmr.msra.gmra.mrb[0].mxu1 %v11458_v62  ;;  %v399_v29 = vsub.f32 %v11449_v11, %v11462_v1  ;;  %v9790_v46 = vpack.c.bf16 %v11186_v18, %v11184_v17  ;;  %v271_v1 = vsel %vm257_vm1, %v198_v6, 0  ;;  %v16414_v10 = vmov 0.0  }
  0x34   : > { %16403 = vst [vmem:[#allocation23_spill] sm:$0xff] %v11477_v3  ;;  %16404 = vst [vmem:[#allocation24_spill] sm:$0xff] %v11484_v31  ;;  %395 = vmatprep.mubr.f32.mxu1 %v15899_v9  ;;  %v11490_v38 = vand.u32 4294901760, %v11477_v3  ;;  %10788 = vmatpush1.bf16.msra.mxu1 %v11282_v7  ;;  %v16407_v62 = vand.u32 4294901760, %v11467_v4  ;;  %v9792_v9 = vpack.c.bf16 %v11201_v24, %v11193_v21  ;;  %v11507_v53 = vand.u32 4294901760, %v271_v1 }
  0x35   : > { %v11497_v63 = vand.u32 4294901760, %v399_v29  ;;  %v11504_v57 = vsub.f32 %v268_v54, %v11484_v31  ;;  %10783 = vmatprep.subr.bf16.mxu1 %v11324_v42  ;;  %v16410_v7 = vand.u32 4294901760, %v11474_v26  ;;  %v9794_v29 = vpack.c.bf16 %v11212_v33, %v11204_v28 }
  0x36   : > { %16405 = vst [vmem:[#allocation25_spill] sm:$0xff] %v11490_v38  ;;  %598 = vmatprep.subr.mxu0 %v16407_v62  ;;  %16409 = vst [vmem:[#allocation28_spill] sm:$0xff] %v11507_v53  ;;  %v410_v6 = vsub.f32 %v11477_v3, %v11490_v38  ;;  %v274_v62 = vsel %vm257_vm1, %v199_v30, 0  ;;  %v11523_v54 = vsub.f32 %v271_v1, %v11507_v53  ;;  %v277_v38 = vsel %vm257_vm1, %v200_v23, 0 }
  0x37   : > { %16406 = vst [vmem:[#allocation26_spill] sm:$0xff] %v11497_v63  ;;  %16408 = vst [vmem:[#allocation27_spill] sm:$0xff] %v11504_v57  ;;  %604 = vmatpush1.msra.mxu0 %v16410_v7  ;;  %401 = vmatmul.mubr.f32.gmra.mrb[2].mxu1 %v11497_v63  ;;  %v11520_v42 = vand.u32 4294901760, %v11504_v57  ;;  %v11525_v7 = vand.u32 4294901760, %v274_v62  ;;  %v9796_v30 = vpack.c.bf16 %v11224_v39, %v11216_v35  ;;  %v11533_v63 = vand.u32 4294901760, %v277_v38 }
  0x38   : > { %649 = vmatmul.mubr.f32.vlgmr.msra.gmra.mrb[0].mxu0 %v11402_v47  ;;  %16412 = vst [vmem:[#allocation30_spill] sm:$0xff] %v11523_v54  ;;  %406 = vmatprep.mubr.f32.mxu1 %v16414_v10  ;;  %v11529_v48 = vand.u32 4294901760, %v410_v6  ;;  %v11539_v47 = vand.u32 4294901760, %v11523_v54  ;;  %v280_v6 = vsel %vm257_vm1, %v201_v41, 0 }
  0x39   : > { %16411 = vst [vmem:[#allocation29_spill] sm:$0xff] %v11520_v42  ;;  %16413 = vst [vmem:[#allocation31_spill] sm:$0xff] %v11525_v7  ;;  %9791 = vmatprep.subr.bf16.mxu0 %v9790_v46  ;;  %654 = vmatprep.mubr.f32.mxu0 %v16414_v10  ;;  %v421_v1 = vsub.f32 %v11504_v57, %v11520_v42  ;;  %v11542_v23 = vsub.f32 %v274_v62, %v11525_v7 }
  0x3a   : > { %16415 = vst [vmem:[#allocation32_spill] sm:$0xff] %v11529_v48  ;;  %16416 = vst [vmem:[#allocation33_spill] sm:$0xff] %v11533_v63  ;;  %9793 = vmatpush1.bf16.msra.mxu0 %v9792_v9  ;;  %10789 = vmatpush1.bf16.msra.mxu1 %v11338_v55  ;;  %v9798_v46 = vpack.c.bf16 %v11240_v51, %v11234_v43  ;;  %v11549_v9 = vsub.f32 %v277_v38, %v11533_v63 }
  0x3b   : > { %16417 = vst [vmem:[#allocation34_spill] sm:$0xff] %v11539_v47  ;;  %16418 = vst [vmem:[#allocation35_spill] sm:$0xff] %v11542_v23  ;;  %9795 = vmatprep.subr.bf16.mxu0 %v9794_v29  ;;  %412 = vmatmul.mubr.f32.gmra.mrb[4].mxu1 %v11529_v48  ;;  %v11552_v42 = vand.u32 4294901760, %v421_v1  ;;  %v432_v62 = vsub.f32 %v11523_v54, %v11539_v47  ;;  %v11558_v41 = vand.u32 4294901760, %v11542_v23  ;;  %v11560_v29 = vand.u32 4294901760, %v280_v6  ;;  %v219_v47 = vld [vmem:[%s15867_s1 + $0x88] sm:$0xff] }
  0x3c   : > { %16419 = vst [vmem:[#allocation36_spill] sm:$0xff] %v11549_v9  ;;  %656 = vmatmul.mubr.f32.gmra.mrb[2].mxu0 %v11434_v27  ;;  %417 = vmatprep.mubr.f32.mxu1 %v16414_v10  ;;  %v9800_v55 = vpack.c.bf16 %v11266_v59, %v11264_v58  ;;  %v9802_v38 = vpack.c.bf16 %v11299_v13, %v11297_v12  ;;  %v1380_v48 = vand.u32 4294901760, %v219_v47 }
  0x3d   : > { %16420 = vst [vmem:[#allocation37_spill] sm:$0xff] %v11552_v42  ;;  %16421 = vst [vmem:[#allocation38_spill] sm:$0xff] %v11558_v41  ;;  %661 = vmatprep.mubr.f32.mxu0 %v16414_v10  ;;  %10784 = vmatprep.subr.bf16.mxu1 %v11367_v25  ;;  %v11571_v1 = vand.u32 4294901760, %v432_v62  ;;  %v11577_v25 = vand.u32 4294901760, %v11549_v9  ;;  %v11580_v27 = vsub.f32 %v280_v6, %v11560_v29  ;;  %v205_v6 = vld [vmem:[%s15867_s1 + $0x18] sm:$0xff]  ;;  %v210_v62 = vld [vmem:[%s15867_s1 + $0x40] sm:$0xff] }
  0x3e   : > { %16422 = vst [vmem:[#allocation39_spill] sm:$0xff] %v11560_v29  ;;  %9797 = vmatpush1.bf16.msra.mxu0 %v9796_v30  ;;  %10790 = vmatpush1.bf16.msra.mxu1 %v11387_v8  ;;  %v443_v30 = vsub.f32 %v11542_v23, %v11558_v41  ;;  %v9804_v8 = vpack.c.bf16 %v11326_v44, %v11317_v32  ;;  %v214_v41 = vld [vmem:[%s15867_s1 + $0x60] sm:$0xff] }
  0x3f   : > { %9799 = vmatprep.subr.bf16.mxu0 %v9798_v46  ;;  %423 = vmatmul.mubr.f32.gmra.mrb[6].mxu1 %v11552_v42  ;;  %16423 = vst [vmem:[#allocation40_spill] sm:$0xff] %v11571_v1  ;;  %16424 = vst [vmem:[#allocation41_spill] sm:$0xff] %v11577_v25  ;;  %v9806_v46 = vpack.c.bf16 %v11357_v19, %v11344_v2  ;;  %v1376_v42 = vand.u32 4294901760, %v214_v41 }
  0x40   : > { %663 = vmatmul.mubr.f32.gmra.mrb[4].mxu0 %v11456_v49  ;;  %16425 = vst [vmem:[#allocation42_spill] sm:$0xff] %v11580_v27  ;;  %428 = vmatprep.mubr.f32.mxu1 %v16414_v10  ;;  %v1370_v49 = vand.u32 4294901760, %v210_v62 }
  0x41   : > { %668 = vmatprep.mubr.f32.mxu0 %v16414_v10  ;;  %10785 = vmatprep.subr.bf16.mxu1 %v11412_v5  ;;  %v11597_v5 = vand.u32 4294901760, %v443_v30  ;;  %v1366_v30 = vand.u32 4294901760, %v205_v6 }
  0x42   : > { %9801 = vmatpush1.bf16.msra.mxu0 %v9800_v55  ;;  %10791 = vmatpush1.bf16.msra.mxu1 %v11421_v0  ;;  %v454_v0 = vsub.f32 %v11549_v9, %v11577_v25  ;;  %v11603_v55 = vand.u32 4294901760, %v11580_v27 }
  0x43   : > { %9803 = vmatprep.subr.bf16.mxu0 %v9802_v38  ;;  %434 = vmatmul.mubr.f32.gmra.mrb[8].mxu1 %v11571_v1  ;;  %16426 = vst [vmem:[#allocation43_spill] sm:$0xff] %v11597_v5  ;;  %v9808_v38 = vpack.c.bf16 %v11370_v36, %v11359_v61  ;;  %v11672_v1 = vsub.f32 %v210_v62, %v1370_v49 }
  0x44   : > { %670 = vmatmul.mubr.f32.gmra.mrb[6].mxu0 %v11484_v31  ;;  %16427 = vst [vmem:[#allocation44_spill] sm:$0xff] %v11603_v55  ;;  %439 = vmatprep.mubr.f32.mxu1 %v16414_v10  ;;  %v11612_v31 = vand.u32 4294901760, %v454_v0  ;;  %v465_v25 = vsub.f32 %v11580_v27, %v11603_v55  ;;  %v215_v0 = vld [vmem:[%s15867_s1 + $0x68] sm:$0xff]  ;;  %v16431_v55 = vand.u32 4294901760, %v11474_v26  ;;  %v16434_v26 = vand.u32 4294901760, %v11186_v18 }
  0x45   : > { %675 = vmatprep.mubr.f32.mxu0 %v16414_v10  ;;  %10786 = vmatprep.subr.bf16.mxu1 %v11446_v56  ;;  %v204_v56 = vld [vmem:[%s15867_s1 + $0x10] sm:$0xff]  ;;  %v16436_v18 = vand.u32 4294901760, %v11201_v24  ;;  %v229_v24 = vld [vmem:[%s15867_s1 + $0xd8] sm:$0xff] }
  0x46   : > { %9805 = vmatpush1.bf16.msra.mxu0 %v9804_v8  ;;  %10792 = vmatpush1.bf16.msra.mxu1 %v11453_v45  ;;  %16428 = vst [vmem:[#allocation45_spill] sm:$0xff] %v11612_v31  ;;  %v209_v45 = vld [vmem:[%s15867_s1 + $0x38] sm:$0xff]  ;;  %v16429_v8 = vand.u32 4294901760, %v11467_v4  ;;  %v1368_v4 = vand.u32 4294901760, %v204_v56 }
  0x47   : > { %9807 = vmatprep.subr.bf16.mxu0 %v9806_v46  ;;  %445 = vmatmul.mubr.f32.gmra.mrb[10].mxu1 %v11597_v5  ;;  %v11627_v46 = vpack.c.bf16 %v1370_v49, %v1366_v30  ;;  %v230_v5 = vld [vmem:[%s15867_s1 + $0xe0] sm:$0xff] }
  0x48   : > { %677 = vmatmul.mubr.f32.gmra.mrb[8].mxu0 %v11507_v53  ;;  %450 = vmatprep.mubr.f32.mxu1 %v16414_v10  ;;  %v220_v53 = vld [vmem:[%s15867_s1 + $0x90] sm:$0xff]  ;;  %v11685_v49 = vsub.f32 %v204_v56, %v1368_v4 }
  0x49   : > { %682 = vmatprep.mubr.f32.mxu0 %v16414_v10  ;;  %10787 = vmatprep.subr.mxu1 %v16429_v8  ;;  %16430 = vst [vmem:[#allocation46_spill] sm:$0xff] %v11627_v46  ;;  %v1372_v8 = vand.u32 4294901760, %v209_v45  ;;  %v240_v56 = vld [vmem:[%s15867_s1 + $0x130] sm:$0xff] }
  0x4a   : > { %9809 = vmatpush1.bf16.msra.mxu0 %v9808_v38  ;;  %10793 = vmatpush1.msra.mxu1 %v16431_v55  ;;  %v11639_v38 = vand.u32 4294901760, %v465_v25  ;;  %v1374_v25 = vand.u32 4294901760, %v215_v0 }
  0x4b   : > { %766 = vmatprep.subr.mxu0 %v11437_v37  ;;  %456 = vmatmul.mubr.f32.gmra.mrb[12].mxu1 %v11612_v31  ;;  %v16433_v37 = vand.u32 4294901760, %v11184_v17  ;;  %v225_v31 = vld [vmem:[%s15867_s1 + $0xb8] sm:$0xff]  ;;  %v16435_v17 = vand.u32 4294901760, %v11193_v21  ;;  %v224_v21 = vld [vmem:[%s15867_s1 + $0xb0] sm:$0xff] }
  0x4c   : > { %16432 = vst [vmem:[#allocation47_spill] sm:$0xff] %v11639_v38  ;;  %684 = vmatmul.mubr.f32.gmra.mrb[10].mxu0 %v11525_v7  ;;  %461 = vmatprep.mubr.f32.mxu1 %v16414_v10  ;;  %v1378_v7 = vand.u32 4294901760, %v220_v53  ;;  %v1382_v62 = vand.u32 4294901760, %v225_v31 }
  0x4d   : > { %v11652_v55 = vpack.c.bf16 %v16434_v26, %v16433_v37  ;;  %812 = vmatprep.mubr.f32.mxu0 %v16414_v10  ;;  %v11666_v37 = vpack.c.bf16 %v16436_v18, %v16435_v17  ;;  %9871 = vmatprep.subr.bf16.mxu1 %v11627_v46  ;;  %v11670_v26 = vsub.f32 %v205_v6, %v1366_v30  ;;  %v1386_v30 = vand.u32 4294901760, %v230_v5 }
  0x4e   : > { %769 = vmatpush1.msra.mxu0 %v11441_v50  ;;  %v11683_v6 = vpack.c.bf16 %v1372_v8, %v1368_v4  ;;  %v11688_v17 = vsub.f32 %v209_v45, %v1372_v8  ;;  %v11691_v18 = vpack.c.bf16 %v1378_v7, %v1374_v25  ;;  %v11693_v46 = vsub.f32 %v215_v0, %v1374_v25  ;;  %v234_v0 = vld [vmem:[%s15867_s1 + $0x100] sm:$0xff]  ;;  %v239_v25 = vld [vmem:[%s15867_s1 + $0x128] sm:$0xff]  ;;  %v245_v50 = vld [vmem:[%s15867_s1 + $0x158] sm:$0xff] }
  0x4f   : > { %16437 = vst [vmem:[#allocation48_spill] sm:$0xff] %v11666_v37  ;;  %9811 = vmatprep.subr.bf16.mxu0 %v11182_v16  ;;  %467 = vmatmul.mubr.f32.gmra.mrb[14].mxu1 %v11639_v38  ;;  %v11702_v4 = vsub.f32 %v220_v53, %v1378_v7  ;;  %v1384_v45 = vand.u32 4294901760, %v224_v21  ;;  %v1388_v8 = vand.u32 4294901760, %v229_v24  ;;  %v16441_v16 = vand.u32 4294901760, %v11212_v33  ;;  %v250_v37 = vld [vmem:[%s15867_s1 + $0x180] sm:$0xff] }
  0x50   : > { %815 = vmatmul.mubr.f32.vlgmr.msra.gmra.mrb[0].mxu0 %v11415_v15  ;;  %16438 = vst [vmem:[#allocation49_spill] sm:$0xff] %v11683_v6  ;;  %689 = vmatprep.mubr.f32.mxu1 %v16414_v10  ;;  %16439 = vst [vmem:[#allocation50_spill] sm:$0xff] %v11691_v18  ;;  %v235_v15 = vld [vmem:[%s15867_s1 + $0x108] sm:$0xff]  ;;  %v11717_v53 = vpack.c.bf16 %v1380_v48, %v1376_v42  ;;  %v11719_v7 = vsub.f32 %v214_v41, %v1376_v42  ;;  %v16444_v33 = vand.u32 4294901760, %v11224_v39 }
  0x51   : > { %9813 = vmatpush1.bf16.msra.mxu0 %v11191_v20  ;;  %820 = vmatprep.mubr.f32.mxu0 %v16414_v10  ;;  %v16440_v20 = vand.u32 4294901760, %v11204_v28  ;;  %v16443_v28 = vand.u32 4294901760, %v11216_v35  ;;  %v1394_v42 = vand.u32 4294901760, %v240_v56  ;;  %v11743_v41 = vsub.f32 %v230_v5, %v1386_v30 }
  0x52   : > { %9815 = vmatprep.subr.bf16.mxu0 %v11195_v22  ;;  %16442 = vst [vmem:[#allocation51_spill] sm:$0xff] %v11717_v53  ;;  %v11721_v22 = vsub.f32 %v219_v47, %v1380_v48  ;;  %v11739_v48 = vsub.f32 %v225_v31, %v1382_v62  ;;  %v1390_v47 = vand.u32 4294901760, %v235_v15  ;;  %v1392_v35 = vand.u32 4294901760, %v234_v0 }
  0x53   : > { %v11715_v38 = vpack.c.bf16 %v16441_v16, %v16440_v20  ;;  %v11733_v16 = vpack.c.bf16 %v16444_v33, %v16443_v28  ;;  %691 = vmatmul.mubr.f32.vlgmr.msra.gmra.mrb[12].mxu1 %v11533_v63  ;;  %v11737_v20 = vpack.c.bf16 %v1386_v30, %v1382_v62  ;;  %v1396_v39 = vand.u32 4294901760, %v239_v25  ;;  %v11748_v28 = vld [vmem:[%s15867_s1 + $0x150] sm:$0xff]  ;;  %v11765_v63 = vld [vmem:[%s15867_s1 + $0x178] sm:$0xff] }
  0x54   : > { %823 = vmatmul.mubr.f32.gmra.mrb[2].mxu0 %v11449_v11  ;;  %9873 = vmatpush1.bf16.msra.mxu1 %v11683_v6  ;;  %v16446_v33 = vand.u32 4294901760, %v11234_v43  ;;  %v16447_v31 = vand.u32 4294901760, %v11240_v51  ;;  %v11758_v11 = vpack.c.bf16 %v1388_v8, %v1384_v45  ;;  %v11760_v5 = vsub.f32 %v224_v21, %v1384_v45 }
  0x55   : > { %16445 = vst [vmem:[#allocation52_spill] sm:$0xff] %v11737_v20  ;;  %828 = vmatprep.mubr.f32.mxu0 %v16414_v10  ;;  %9875 = vmatprep.subr.bf16.mxu1 %v11691_v18  ;;  %v1398_v30 = vand.u32 4294901760, %v245_v50  ;;  %v1402_v6 = vand.u32 4294901760, %v250_v37  ;;  %v11767_v43 = vsub.f32 %v229_v24, %v1388_v8  ;;  %v11770_v51 = vsub.f32 %v235_v15, %v1390_v47 }
  0x56   : > { %v11754_v62 = vpack.c.bf16 %v16447_v31, %v16446_v33  ;;  %9817 = vmatpush1.bf16.msra.mxu0 %v11214_v34  ;;  %16448 = vst [vmem:[#allocation53_spill] sm:$0xff] %v11758_v11  ;;  %696 = vmatprep.mubr.f32.mxu1 %v16414_v10  ;;  %v15966_v33 = vand.u32 4294901760, %v11670_v26  ;;  %v16449_v21 = vand.u32 4294901760, %v11264_v58  ;;  %v16450_v45 = vand.u32 4294901760, %v11266_v59 }
  0x57   : > { %9819 = vmatprep.subr.bf16.mxu0 %v11226_v40  ;;  %v11781_v18 = vpack.c.bf16 %v1394_v42, %v1390_v47  ;;  %v11783_v24 = vsub.f32 %v240_v56, %v1394_v42  ;;  %v11785_v8 = vsub.f32 %v234_v0, %v1392_v35  ;;  %v1400_v15 = vand.u32 4294901760, %v11748_v28  ;;  %698 = vmatmul.mubr.f32.gmra.mrb[14].mxu1 %v11560_v29  ;;  %v255_v56 = vld [vmem:[%s15867_s1 + $0x1a8] sm:$0x1] }
  0x58   : > { %v11778_v31 = vpack.c.bf16 %v16450_v45, %v16449_v21  ;;  %831 = vmatmul.mubr.f32.gmra.mrb[4].mxu0 %v11477_v3  ;;  %9877 = vmatpush1.bf16.msra.mxu1 %v11717_v53  ;;  %v11791_v58 = vpack.c.bf16 %v1396_v39, %v1392_v35  ;;  %v11793_v59 = vsub.f32 %v239_v25, %v1396_v39  ;;  %v254_v25 = vld [vmem:[%s15867_s1 + $0x1a0] sm:$0x1]  ;;  %v11822_v35 = vsel %vm282_vm0, %v255_v56, 0 }
  0x59   : > { %16451 = vst [vmem:[#allocation54_spill] sm:$0xff] %v11781_v18  ;;  %836 = vmatprep.mubr.f32.mxu0 %v16414_v10  ;;  %9879 = vmatprep.subr.bf16.mxu1 %v11737_v20  ;;  %v11802_v47 = vpack.c.bf16 %v1402_v6, %v1398_v30  ;;  %v11804_v42 = vsub.f32 %v245_v50, %v1398_v30  ;;  %v16454_v39 = vand.u32 4294901760, %v11297_v12  ;;  %v16455_v21 = vand.u32 4294901760, %v11299_v13  ;;  %v16463_v12 = vld [vmem:[#allocation9_spill] sm:$0xff] }
  0x5a   : > { %16452 = vst [vmem:[#allocation55_spill] sm:$0xff] %v11791_v58  ;;  %9821 = vmatpush1.bf16.msra.mxu0 %v11242_v52  ;;  %v11811_v45 = vsub.f32 %v250_v37, %v1402_v6  ;;  %1452 = vmatprep.mubr.f32.mxu1 %v16414_v10  ;;  %v1544_v0 = vsub.f32 %v11670_v26, %v15966_v33  ;;  %v16456_v33 = vand.u32 4294901760, %v11765_v63  ;;  %v11839_v56 = vsel %vm282_vm0, %v254_v25, 0 }
  0x5b   : > { %16453 = vst [vmem:[#allocation56_spill] sm:$0xff] %v11802_v47  ;;  %9823 = vmatprep.subr.bf16.mxu0 %v11268_v60  ;;  %v11830_v3 = vpack.c.bf16 %v16455_v21, %v16454_v39  ;;  %v16458_v37 = vand.u32 4294901760, %v11672_v1  ;;  %v16459_v13 = vand.u32 4294901760, %v11685_v49  ;;  %v16461_v50 = vand.u32 4294901760, %v11317_v32 }
  0x5c   : > { %839 = vmatmul.mubr.f32.gmra.mrb[6].mxu0 %v11504_v57  ;;  %9881 = vmatpush1.bf16.msra.mxu1 %v11758_v11  ;;  %v11836_v30 = vpack.c.bf16 %v16456_v33, %v1400_v15  ;;  %v16460_v33 = vand.u32 4294901760, %v11688_v17  ;;  %v16464_v11 = vand.u32 4294901760, %v11693_v46  ;;  %v16467_v25 = vand.u32 4294901760, %v11357_v19 }
  0x5d   : > { %844 = vmatprep.mubr.f32.mxu0 %v16414_v10  ;;  %v1556_v6 = vsub.f32 %v11672_v1, %v16458_v37  ;;  %9883 = vmatprep.subr.bf16.mxu1 %v11781_v18  ;;  %v1550_v21 = vsub.f32 %v11685_v49, %v16459_v13  ;;  %v16462_v37 = vand.u32 4294901760, %v11326_v44  ;;  %v1545_v18 = vand.u32 4294901760, %v1544_v0 }
  0x5e   : > { %16457 = vst [vmem:[#allocation57_spill] sm:$0xff] %v11836_v30  ;;  %9825 = vmatpush1.bf16.msra.mxu0 %v11301_v14  ;;  %v1562_v39 = vsub.f32 %v11688_v17, %v16460_v33  ;;  %v1568_v20 = vsub.f32 %v11693_v46, %v16464_v11  ;;  %v16465_v13 = vand.u32 4294901760, %v11702_v4  ;;  %v16466_v33 = vand.u32 4294901760, %v11344_v2 }
  0x5f   : > { %v11858_v57 = vpack.c.bf16 %v16462_v37, %v16461_v50  ;;  %9827 = vmatprep.subr.bf16.mxu0 %v16463_v12  ;;  %v16468_v44 = vand.u32 4294901760, %v11719_v7  ;;  %v16469_v50 = vand.u32 4294901760, %v11721_v22  ;;  %v16471_v2 = vand.u32 4294901760, %v11370_v36  ;;  %v16476_v37 = vld [vmem:[#allocation11_spill] sm:$0xff] }
  0x60   : > { %v1580_v53 = vsub.f32 %v11702_v4, %v16465_v13  ;;  %v11871_v32 = vpack.c.bf16 %v16467_v25, %v16466_v33  ;;  %847 = vmatmul.mubr.f32.gmra.mrb[8].mxu0 %v11523_v54  ;;  %v16470_v13 = vand.u32 4294901760, %v11359_v61  ;;  %9885 = vmatpush1.bf16.msra.mxu1 %v11791_v58  ;;  %v1557_v19 = vand.u32 4294901760, %v1556_v6 }
  0x61   : > { %v1574_v0 = vsub.f32 %v11719_v7, %v16468_v44  ;;  %v1586_v11 = vsub.f32 %v11721_v22, %v16469_v50  ;;  %852 = vmatprep.mubr.f32.mxu0 %v16414_v10  ;;  %v16472_v25 = vand.u32 4294901760, %v11739_v48  ;;  %9887 = vmatprep.subr.bf16.mxu1 %v11802_v47  ;;  %v11896_v61 = vsub.f32 %v11748_v28, %v1400_v15 }
  0x62   : > { %v11885_v29 = vpack.c.bf16 %v16471_v2, %v16470_v13  ;;  %v11899_v36 = vand.u32 4294901760, %v11822_v35  ;;  %v16474_v13 = vld [vmem:[#allocation10_spill] sm:$0xff]  ;;  %v16475_v6 = vand.u32 4294901760, %v11743_v41  ;;  %v1551_v44 = vand.u32 4294901760, %v1550_v21 }
  0x63   : > { %v1592_v33 = vsub.f32 %v11739_v48, %v16472_v25  ;;  %9829 = vmatpush1.bf16.msra.mxu0 %v16474_v13  ;;  %v1627_v25 = vand.u32 4294901760, %v11783_v24  ;;  %v1563_v50 = vand.u32 4294901760, %v1562_v39  ;;  %v1569_v54 = vand.u32 4294901760, %v1568_v20 }
  0x64   : > { %16473 = vst [vmem:[#allocation58_spill] sm:$0xff] %v11899_v36  ;;  %v1604_v2 = vsub.f32 %v11743_v41, %v16475_v6  ;;  %918 = vmatprep.subr.mxu0 %v16476_v37  ;;  %v1581_v47 = vand.u32 4294901760, %v1580_v53  ;;  %855 = vmatmul.mubr.f32.gmra.mrb[10].mxu0 %v11542_v23  ;;  %v11909_v28 = vand.u32 4294901760, %v11839_v56  ;;  %v1575_v15 = vand.u32 4294901760, %v1574_v0  ;;  %v16481_v0 = vld [vmem:[#allocation12_spill] sm:$0xff] }
  0x65   : > { %v1587_v58 = vand.u32 4294901760, %v1586_v11  ;;  %v16478_v13 = vand.u32 4294901760, %v11760_v5  ;;  %9889 = vmatpush1.bf16.msra.mxu1 %v11836_v30  ;;  %860 = vmatprep.mubr.f32.mxu0 %v16414_v10  ;;  %v9890_v6 = vpack.c.bf16 %v1557_v19, %v1545_v18  ;;  %v1593_v21 = vand.u32 4294901760, %v1592_v33 }
  0x66   : > { %16477 = vst [vmem:[#allocation59_spill] sm:$0xff] %v11909_v28  ;;  %v16479_v20 = vand.u32 4294901760, %v11767_v43  ;;  %v16480_v39 = vand.u32 4294901760, %v11770_v51  ;;  %1407 = vmatprep.subr.mxu1 %v11899_v36  ;;  %v1605_v11 = vand.u32 4294901760, %v1604_v2  ;;  %v1621_v30 = vand.u32 4294901760, %v11785_v8 }
  0x67   : > { %v1598_v12 = vsub.f32 %v11760_v5, %v16478_v13  ;;  %920 = vmatpush1.msra.mxu0 %v16481_v0  ;;  %v1628_v13 = vsub.f32 %v11783_v24, %v1627_v25  ;;  %v1633_v18 = vand.u32 4294901760, %v11793_v59  ;;  %v16482_v19 = vand.u32 4294901760, %v11765_v63 }
  0x68   : > { %v1610_v53 = vsub.f32 %v11767_v43, %v16479_v20  ;;  %v1616_v23 = vsub.f32 %v11770_v51, %v16480_v39  ;;  %9831 = vmatprep.subr.bf16.mxu0 %v11652_v55  ;;  %v9892_v20 = vpack.c.bf16 %v1563_v50, %v1551_v44  ;;  %v9894_v39 = vpack.c.bf16 %v1581_v47, %v1569_v54  ;;  %v16491_v50 = vld [vmem:[#allocation21_spill] sm:$0xff] }
  0x69   : > { %v11930_v33 = vsub.f32 %v11765_v63, %v16482_v19  ;;  %v16483_v37 = vand.u32 4294901760, %v11670_v26  ;;  %v16484_v0 = vand.u32 4294901760, %v11672_v1  ;;  %863 = vmatmul.mubr.f32.gmra.mrb[12].mxu0 %v11549_v9  ;;  %v9896_v14 = vpack.c.bf16 %v1587_v58, %v1575_v15  ;;  %1409 = vmatpush1.msra.mxu1 %v11909_v28 }
  0x6a   : > { %v1599_v60 = vand.u32 4294901760, %v1598_v12  ;;  %v1639_v52 = vand.u32 4294901760, %v11804_v42  ;;  %v1651_v40 = vand.u32 4294901760, %v11811_v45  ;;  %868 = vmatprep.mubr.f32.mxu0 %v16414_v10  ;;  %v1611_v63 = vand.u32 4294901760, %v1610_v53  ;;  %1458 = vmatmul.mubr.f32.vlgmr.msra.gmra.mrb[16].mxu1 %v16491_v50 }
  0x6b   : > { %v11937_v2 = vpack.c.bf16 %v16484_v0, %v16483_v37  ;;  %v1617_v54 = vand.u32 4294901760, %v1616_v23  ;;  %v16485_v55 = vand.u32 4294901760, %v11685_v49  ;;  %v16486_v47 = vand.u32 4294901760, %v11688_v17  ;;  %9891 = vmatprep.subr.bf16.mxu1 %v9890_v6  ;;  %1463 = vmatprep.mubr.f32.mxu1 %v16414_v10 }
  0x6c   : > { %v16488_v44 = vand.u32 4294901760, %v11693_v46  ;;  %v16489_v58 = vand.u32 4294901760, %v11702_v4  ;;  %v9898_v15 = vpack.c.bf16 %v1605_v11, %v1593_v21  ;;  %v1629_v0 = vand.u32 4294901760, %v1628_v13  ;;  %9893 = vmatpush1.bf16.msra.mxu1 %v9892_v20 }
  0x6d   : > { %v11948_v37 = vpack.c.bf16 %v16486_v47, %v16485_v55  ;;  %v1622_v53 = vsub.f32 %v11785_v8, %v1621_v30  ;;  %v1634_v23 = vsub.f32 %v11793_v59, %v1633_v18  ;;  %v1645_v19 = vand.u32 4294901760, %v11896_v61  ;;  %871 = vmatmul.mubr.f32.gmra.mrb[14].mxu0 %v11580_v27  ;;  %9895 = vmatprep.subr.bf16.mxu1 %v9894_v39 }
  0x6e   : > { %v11954_v12 = vpack.c.bf16 %v16489_v58, %v16488_v44  ;;  %v1657_v55 = vand.u32 4294901760, %v11930_v33  ;;  %v16492_v47 = vand.u32 4294901760, %v11719_v7  ;;  %v16493_v44 = vand.u32 4294901760, %v11721_v22  ;;  %963 = vmatprep.mubr.f32.mxu0 %v16414_v10 }
  0x6f   : > { %16487 = vst [vmem:[#allocation60_spill] sm:$0xff] %v11948_v37  ;;  %v16495_v6 = vand.u32 4294901760, %v11739_v48  ;;  %v16496_v21 = vand.u32 4294901760, %v11743_v41  ;;  %v1640_v13 = vsub.f32 %v11804_v42, %v1639_v52  ;;  %v1652_v20 = vsub.f32 %v11811_v45, %v1651_v40 }
  0x70   : > { %16490 = vst [vmem:[#allocation61_spill] sm:$0xff] %v11954_v12  ;;  %v11966_v58 = vpack.c.bf16 %v16493_v44, %v16492_v47  ;;  %v11979_v50 = vsub.f32 %v11822_v35, %v11899_v36  ;;  %v16498_v47 = vand.u32 4294901760, %v11760_v5  ;;  %v16499_v44 = vand.u32 4294901760, %v11767_v43  ;;  %9897 = vmatpush1.bf16.msra.mxu1 %v9896_v14  ;;  %v16506_v14 = vld [vmem:[#allocation32_spill] sm:$0xff] }
  0x71   : > { %v11972_v11 = vpack.c.bf16 %v16496_v21, %v16495_v6  ;;  %v16501_v6 = vand.u32 4294901760, %v11770_v51  ;;  %v11994_v39 = vsub.f32 %v11839_v56, %v11909_v28  ;;  %v9900_v35 = vpack.c.bf16 %v1611_v63, %v1599_v60  ;;  %9899 = vmatprep.subr.bf16.mxu1 %v9898_v15  ;;  %v16505_v60 = vld [vmem:[#allocation48_spill] sm:$0xff] }
  0x72   : > { %16494 = vst [vmem:[#allocation62_spill] sm:$0xff] %v11966_v58  ;;  %v11986_v58 = vpack.c.bf16 %v16499_v44, %v16498_v47  ;;  %v9902_v12 = vpack.c.bf16 %v1629_v0, %v1617_v54  ;;  %v1623_v37 = vand.u32 4294901760, %v1622_v53  ;;  %v1635_v27 = vand.u32 4294901760, %v1634_v23 }
  0x73   : > { %16497 = vst [vmem:[#allocation63_spill] sm:$0xff] %v11972_v11  ;;  %v11990_v21 = vpack.c.bf16 %v1627_v25, %v16501_v6  ;;  %v16503_v11 = vld [vmem:[#allocation26_spill] sm:$0xff]  ;;  %v1646_v47 = vsub.f32 %v11896_v61, %v1645_v19  ;;  %v1658_v44 = vsub.f32 %v11930_v33, %v1657_v55  ;;  %v1641_v25 = vand.u32 4294901760, %v1640_v13 }
  0x74   : > { %16500 = vst [vmem:[#allocation64_spill] sm:$0xff] %v11986_v58  ;;  %1469 = vmatmul.mubr.f32.gmra.mrb[18].mxu1 %v16503_v11  ;;  %v16504_v58 = vld [vmem:[#allocation15_spill] sm:$0xff]  ;;  %v1653_v6 = vand.u32 4294901760, %v1652_v20  ;;  %v15996_v56 = vand.u32 4294901760, %v11979_v50  ;;  %v12008_v63 = vpack.c.bf16 %v1651_v40, %v1639_v52  ;;  %v9904_v54 = vpack.c.bf16 %v1635_v27, %v1623_v37  ;;  %v16508_v40 = vld [vmem:[#allocation37_spill] sm:$0xff] }
  0x75   : > { %16502 = vst [vmem:[#allocation65_spill] sm:$0xff] %v11990_v21  ;;  %1474 = vmatprep.mubr.f32.mxu1 %v16414_v10  ;;  %967 = vmatmul.mubr.f32.vlgmr.msra.gmra.mrb[0].mxu0 %v16504_v58  ;;  %v12002_v21 = vpack.c.bf16 %v1633_v18, %v1621_v30  ;;  %v1647_v15 = vand.u32 4294901760, %v1646_v47  ;;  %v1659_v0 = vand.u32 4294901760, %v1658_v44  ;;  %v15995_v53 = vand.u32 4294901760, %v11994_v39  ;;  %v16507_v30 = vld [vmem:[#allocation22_spill] sm:$0xff]  ;;  %v16522_v44 = vld [vmem:[#allocation41_spill] sm:$0xff] }
  0x76   : > { %9833 = vmatpush1.bf16.msra.mxu0 %v16505_v60  ;;  %972 = vmatprep.mubr.f32.mxu0 %v16414_v10  ;;  %v9906_v18 = vpack.c.bf16 %v1653_v6, %v1641_v25  ;;  %v1664_v23 = vsub.f32 %v11979_v50, %v15996_v56  ;;  %v12016_v13 = vpack.c.bf16 %v1657_v55, %v1645_v19  ;;  %v16512_v55 = vld [vmem:[#allocation43_spill] sm:$0xff]  ;;  %v16521_v47 = vld [vmem:[#allocation2_spill] sm:$0xff] }
  0x77   : > { %9835 = vmatprep.subr.bf16.mxu0 %v11715_v38  ;;  %9901 = vmatpush1.bf16.msra.mxu1 %v9900_v35  ;;  %v9908_v52 = vpack.c.bf16 %v1659_v0, %v1647_v15  ;;  %v1670_v27 = vsub.f32 %v11994_v39, %v15995_v53  ;;  %v16509_v38 = vld [vmem:[#allocation25_spill] sm:$0xff]  ;;  %v9910_v19 = vpack.c.bf16 %v11672_v1, %v11670_v26  ;;  %v16520_v35 = vld [vmem:[#allocation47_spill] sm:$0xff]  ;;  %v12063_v6 = vld [vmem:[%s15867_s1 + $0x20] sm:$0xff] }
  0x78   : > { %1480 = vmatmul.mubr.f32.gmra.mrb[20].mxu1 %v16506_v14  ;;  %9903 = vmatprep.subr.bf16.mxu1 %v9902_v12  ;;  %v1665_v37 = vand.u32 4294901760, %v1664_v23  ;;  %v16511_v12 = vld [vmem:[#allocation29_spill] sm:$0xff]  ;;  %v9914_v25 = vpack.c.bf16 %v11702_v4, %v11693_v46  ;;  %v12068_v60 = vld [vmem:[%s15867_s1 + $0x48] sm:$0xff]  ;;  %v9916_v46 = vpack.c.bf16 %v11721_v22, %v11719_v7  ;;  %v2435_v4 = vand.u32 4294901760, %v12063_v6  ;;  %v12083_v0 = vld [vmem:[%s15867_s1 + $0x70] sm:$0xff] }
  0x79   : > { %1485 = vmatprep.mubr.f32.mxu1 %v16414_v10  ;;  %976 = vmatmul.mubr.f32.gmra.mrb[2].mxu0 %v16507_v30  ;;  %v16515_v1 = vld [vmem:[#allocation17_spill] sm:$0xff]  ;;  %v2438_v15 = vand.u32 4294901760, %v12068_v60  ;;  %v16525_v7 = vld [vmem:[#allocation16_spill] sm:$0xff]  ;;  %v9922_v23 = vpack.c.bf16 %v11783_v24, %v11770_v51  ;;  %v16533_v53 = vld [vmem:[#allocation6_spill] sm:$0xff] }
  0x7a   : > { %981 = vmatprep.mubr.f32.mxu0 %v16414_v10  ;;  %9837 = vmatpush1.bf16.msra.mxu0 %v11733_v16  ;;  %v16510_v16 = vld [vmem:[#allocation40_spill] sm:$0xff]  ;;  %v16516_v26 = vand.u32 4294901760, %v16515_v1  ;;  %v12088_v22 = vld [vmem:[%s15867_s1 + $0x98] sm:$0xff] }
  0x7b   : > { %9839 = vmatprep.subr.bf16.mxu0 %v11754_v62  ;;  %9905 = vmatpush1.bf16.msra.mxu1 %v9904_v54  ;;  %v1671_v62 = vand.u32 4294901760, %v1670_v27  ;;  %v16523_v54 = vld [vmem:[#allocation13_spill] sm:$0xff]  ;;  %v16005_v27 = vand.u32 4294901760, %v12088_v22  ;;  %v16528_v51 = vld [vmem:[#allocation4_spill] sm:$0xff] }
  0x7c   : > { %1491 = vmatmul.mubr.f32.gmra.mrb[22].mxu1 %v16508_v40  ;;  %9907 = vmatprep.subr.bf16.mxu1 %v9906_v18  ;;  %v9920_v18 = vpack.c.bf16 %v11767_v43, %v11760_v5  ;;  %v12119_v5 = vld [vmem:[%s15867_s1 + $0xe8] sm:$0xff]  ;;  %v16527_v43 = vld [vmem:[#allocation20_spill] sm:$0xff] }
  0x7d   : > { %1496 = vmatprep.mubr.f32.mxu1 %v16414_v10  ;;  %985 = vmatmul.mubr.f32.gmra.mrb[4].mxu0 %v16509_v38 }
  0x7e   : > { %990 = vmatprep.mubr.f32.mxu0 %v16414_v10  ;;  %9841 = vmatpush1.bf16.msra.mxu0 %v11778_v31  ;;  %v16514_v31 = vld [vmem:[#allocation45_spill] sm:$0xff] }
  0x7f   : > { %9843 = vmatprep.subr.bf16.mxu0 %v11830_v3  ;;  %9909 = vmatpush1.bf16.msra.mxu1 %v9908_v52  ;;  %v16513_v3 = vld [vmem:[#allocation34_spill] sm:$0xff]  ;;  %v16010_v52 = vand.u32 4294901760, %v12083_v0 }
  0x80   : > { %1502 = vmatmul.mubr.f32.gmra.mrb[24].mxu1 %v16510_v16  ;;  %1666 = vmatprep.subr.mxu1 %v1665_v37  ;;  %v16526_v37 = vld [vmem:[#allocation3_spill] sm:$0xff] }
  0x81   : > { %1507 = vmatprep.mubr.f32.mxu1 %v16414_v10  ;;  %994 = vmatmul.mubr.f32.gmra.mrb[6].mxu0 %v16511_v12  ;;  %v12128_v1 = vsub.f32 %v12083_v0, %v16010_v52  ;;  %v12258_v52 = vpack.c.bf16 %v2438_v15, %v2435_v4 }
  0x82   : > { %999 = vmatprep.mubr.f32.mxu0 %v16414_v10  ;;  %9845 = vmatpush1.bf16.msra.mxu0 %v11858_v57  ;;  %v16517_v57 = vld [vmem:[#allocation38_spill] sm:$0xff] }
  0x83   : > { %9847 = vmatprep.subr.bf16.mxu0 %v11871_v32  ;;  %1672 = vmatpush1.msra.mxu1 %v1671_v62  ;;  %v16518_v32 = vld [vmem:[#allocation18_spill] sm:$0xff]  ;;  %16545 = vst [vmem:[#allocation40_spill] sm:$0xff] %v12258_v52 }
  0x84   : > { %1513 = vmatmul.mubr.f32.gmra.mrb[26].mxu1 %v16512_v55  ;;  %9911 = vmatprep.subr.bf16.mxu1 %v9910_v19  ;;  %v16519_v20 = vand.u32 4294901760, %v16518_v32  ;;  %v12114_v62 = vld [vmem:[%s15867_s1 + $0xc0] sm:$0xff]  ;;  %v9924_v32 = vpack.c.bf16 %v11793_v59, %v11785_v8  ;;  %v12154_v8 = vld [vmem:[%s15867_s1 + $0x110] sm:$0xff]  ;;  %v12159_v59 = vld [vmem:[%s15867_s1 + $0x138] sm:$0xff] }
  0x85   : > { %1518 = vmatprep.mubr.f32.mxu1 %v16414_v10  ;;  %1003 = vmatmul.mubr.f32.gmra.mrb[8].mxu0 %v16513_v3 }
  0x86   : > { %1008 = vmatprep.mubr.f32.mxu0 %v16414_v10  ;;  %9849 = vmatpush1.bf16.msra.mxu0 %v11885_v29  ;;  %v9912_v29 = vpack.c.bf16 %v11688_v17, %v11685_v49  ;;  %v16524_v49 = vld [vmem:[#allocation44_spill] sm:$0xff]  ;;  %v9918_v17 = vpack.c.bf16 %v11743_v41, %v11739_v48  ;;  %v12094_v48 = vsub.f32 %v12063_v6, %v2435_v4  ;;  %v16549_v4 = vld [vmem:[#allocation14_spill] sm:$0xff] }
  0x87   : > { %1119 = vmatprep.subr.mxu0 %v16516_v26  ;;  %v12099_v41 = vsub.f32 %v12068_v60, %v2438_v15  ;;  %v12133_v26 = vsub.f32 %v12088_v22, %v16005_v27  ;;  %v16547_v6 = vld [vmem:[#allocation12_spill] sm:$0xff]  ;;  %v16548_v60 = vld [vmem:[#allocation39_spill] sm:$0xff]  ;;  %v16550_v15 = vld [vmem:[#allocation49_spill] sm:$0xff] }
  0x88   : > { %1524 = vmatmul.mubr.f32.gmra.mrb[28].mxu1 %v16514_v31  ;;  %v16000_v24 = vand.u32 4294901760, %v12094_v48 }
  0x89   : > { %1529 = vmatprep.mubr.f32.mxu1 %v16414_v10  ;;  %1012 = vmatmul.mubr.f32.gmra.mrb[10].mxu0 %v16517_v57  ;;  %v15999_v19 = vand.u32 4294901760, %v12099_v41 }
  0x8a   : > { %1017 = vmatprep.mubr.f32.mxu0 %v16414_v10  ;;  %1123 = vmatpush1.msra.mxu0 %v16519_v20  ;;  %v9926_v20 = vpack.c.bf16 %v11811_v45, %v11804_v42  ;;  %v16530_v42 = vld [vmem:[#allocation24_spill] sm:$0xff]  ;;  %v16531_v45 = vld [vmem:[#allocation5_spill] sm:$0xff] }
  0x8b   : > { %9851 = vmatprep.subr.bf16.mxu0 %v16521_v47  ;;  %v16004_v47 = vand.u32 4294901760, %v12114_v62 }
  0x8c   : > { %1535 = vmatmul.mubr.f32.gmra.mrb[30].mxu1 %v16520_v35 }
  0x8d   : > { %1715 = vmatprep.mubr.f32.mxu1 %v16414_v10  ;;  %1021 = vmatmul.mubr.f32.gmra.mrb[12].mxu0 %v16522_v44 }
  0x8e   : > { %1026 = vmatprep.mubr.f32.mxu0 %v16414_v10 }
  0x90   : > { %1717 = vmatmul.mubr.f32.vlgmr.msra.gmra.mrb[16].mxu1 %v16523_v54 }
  0x91   : > { %1722 = vmatprep.mubr.f32.mxu1 %v16414_v10  ;;  %9913 = vmatpush1.bf16.msra.mxu1 %v9912_v29  ;;  %v16003_v29 = vand.u32 4294901760, %v12119_v5 }
  0x92   : > { %1030 = vmatmul.mubr.f32.gmra.mrb[14].mxu0 %v16524_v49  ;;  %9915 = vmatprep.subr.bf16.mxu1 %v9914_v25  ;;  %v12147_v25 = vpack.c.bf16 %v15999_v19, %v16000_v24 }
  0x93   : > { %1166 = vmatprep.mubr.f32.mxu0 %v16414_v10 }
  0x94   : > { %1724 = vmatmul.mubr.f32.gmra.mrb[18].mxu1 %v16525_v7  ;;  %16529 = vst [vmem:[#allocation26_spill] sm:$0xff] %v12147_v25  ;;  %v16563_v25 = vld [vmem:[#allocation54_spill] sm:$0xff] }
  0x95   : > { %1729 = vmatprep.mubr.f32.mxu1 %v16414_v10  ;;  %9917 = vmatpush1.bf16.msra.mxu1 %v9916_v46  ;;  %v15998_v46 = vand.u32 4294901760, %v12128_v1 }
  0x96   : > { %1168 = vmatmul.mubr.f32.vlgmr.msra.gmra.mrb[0].mxu0 %v16523_v54  ;;  %9919 = vmatprep.subr.bf16.mxu1 %v9918_v17  ;;  %v15997_v17 = vand.u32 4294901760, %v12133_v26 }
  0x97   : > { %9853 = vmatpush1.bf16.msra.mxu0 %v16526_v37  ;;  %1173 = vmatprep.mubr.f32.mxu0 %v16414_v10  ;;  %v16002_v37 = vand.u32 4294901760, %v12154_v8 }
  0x98   : > { %1731 = vmatmul.mubr.f32.gmra.mrb[20].mxu1 %v16527_v43  ;;  %9855 = vmatprep.subr.bf16.mxu0 %v16528_v51  ;;  %v16001_v51 = vand.u32 4294901760, %v12159_v59 }
  0x99   : > { %1736 = vmatprep.mubr.f32.mxu1 %v16414_v10  ;;  %9921 = vmatpush1.bf16.msra.mxu1 %v9920_v18  ;;  %v12173_v18 = vsub.f32 %v12119_v5, %v16003_v29 }
  0x9a   : > { %1175 = vmatmul.mubr.f32.gmra.mrb[2].mxu0 %v16525_v7  ;;  %9923 = vmatprep.subr.bf16.mxu1 %v9922_v23  ;;  %v9928_v23 = vpack.c.bf16 %v11930_v33, %v11896_v61  ;;  %v12192_v61 = vld [vmem:[%s15867_s1 + $0x160] sm:$0xff]  ;;  %v12197_v33 = vld [vmem:[%s15867_s1 + $0x188] sm:$0xff] }
  0x9b   : > { %1180 = vmatprep.mubr.f32.mxu0 %v16414_v10  ;;  %9857 = vmatpush1.bf16.msra.mxu0 %v11214_v34  ;;  %v12168_v34 = vsub.f32 %v12114_v62, %v16004_v47  ;;  %v16008_v19 = vand.u32 4294901760, %v12197_v33 }
  0x9c   : > { %1738 = vmatmul.mubr.f32.gmra.mrb[22].mxu1 %v16530_v42  ;;  %9859 = vmatprep.subr.bf16.mxu0 %v16531_v45  ;;  %v12185_v45 = vpack.c.bf16 %v15997_v17, %v15998_v46  ;;  %v16006_v17 = vand.u32 4294901760, %v12173_v18  ;;  %v12211_v46 = vsub.f32 %v12159_v59, %v16001_v51  ;;  %v16537_v51 = vld [vmem:[#allocation8_spill] sm:$0xff] }
  0x9d   : > { %1743 = vmatprep.mubr.f32.mxu1 %v16414_v10  ;;  %9925 = vmatpush1.bf16.msra.mxu1 %v9924_v32  ;;  %v16534_v32 = vld [vmem:[#allocation28_spill] sm:$0xff]  ;;  %v16007_v56 = vand.u32 4294901760, %v12168_v34 }
  0x9e   : > { %1182 = vmatmul.mubr.f32.gmra.mrb[4].mxu0 %v16527_v43  ;;  %9927 = vmatprep.subr.bf16.mxu1 %v9926_v20  ;;  %16532 = vst [vmem:[#allocation48_spill] sm:$0xff] %v12185_v45  ;;  %v16535_v20 = vld [vmem:[#allocation7_spill] sm:$0xff]  ;;  %v16015_v47 = vand.u32 4294901760, %v12211_v46 }
  0x9f   : > { %1187 = vmatprep.mubr.f32.mxu0 %v16414_v10  ;;  %9861 = vmatpush1.bf16.msra.mxu0 %v16533_v53  ;;  %v12206_v53 = vsub.f32 %v12154_v8, %v16002_v37  ;;  %v12222_v24 = vpack.c.bf16 %v16006_v17, %v16007_v56  ;;  %v16538_v37 = vld [vmem:[#allocation31_spill] sm:$0xff]  ;;  %v12238_v17 = vsub.f32 %v12197_v33, %v16008_v19  ;;  %v16542_v56 = vld [vmem:[#allocation10_spill] sm:$0xff]  ;;  %v16543_v19 = vld [vmem:[#allocation33_spill] sm:$0xff] }
  0xa0   : > { %1745 = vmatmul.mubr.f32.gmra.mrb[24].mxu1 %v16534_v32  ;;  %9863 = vmatprep.subr.bf16.mxu0 %v16535_v20  ;;  %v16009_v20 = vand.u32 4294901760, %v12192_v61 }
  0xa1   : > { %1750 = vmatprep.mubr.f32.mxu1 %v16414_v10  ;;  %9929 = vmatpush1.bf16.msra.mxu1 %v9928_v23  ;;  %16536 = vst [vmem:[#allocation32_spill] sm:$0xff] %v12222_v24  ;;  %v16539_v23 = vld [vmem:[#allocation9_spill] sm:$0xff]  ;;  %v16016_v29 = vand.u32 4294901760, %v12206_v53  ;;  %v16013_v45 = vand.u32 4294901760, %v12238_v17 }
  0xa2   : > { %1189 = vmatmul.mubr.f32.gmra.mrb[6].mxu0 %v16530_v42  ;;  %1834 = vmatprep.subr.mxu1 %v11979_v50  ;;  %v12233_v27 = vsub.f32 %v12192_v61, %v16009_v20  ;;  %v16544_v20 = vld [vmem:[#allocation11_spill] sm:$0xff] }
  0xa3   : > { %1194 = vmatprep.mubr.f32.mxu0 %v16414_v10  ;;  %9865 = vmatpush1.bf16.msra.mxu0 %v16537_v51  ;;  %v16540_v51 = vld [vmem:[#allocation46_spill] sm:$0xff] }
  0xa4   : > { %1752 = vmatmul.mubr.f32.gmra.mrb[26].mxu1 %v16538_v37  ;;  %9867 = vmatprep.subr.bf16.mxu0 %v16539_v23  ;;  %v12248_v23 = vpack.c.bf16 %v16015_v47, %v16016_v29  ;;  %v16014_v24 = vand.u32 4294901760, %v12233_v27  ;;  %v16556_v29 = vld [vmem:[#allocation51_spill] sm:$0xff] }
  0xa5   : > { %1757 = vmatprep.mubr.f32.mxu1 %v16414_v10  ;;  %1837 = vmatpush1.msra.mxu1 %v11994_v39 }
  0xa6   : > { %1196 = vmatmul.mubr.f32.gmra.mrb[8].mxu0 %v16534_v32  ;;  %9931 = vmatprep.subr.bf16.mxu1 %v16540_v51  ;;  %16541 = vst [vmem:[#allocation37_spill] sm:$0xff] %v12248_v23  ;;  %v16558_v23 = vld [vmem:[#allocation23_spill] sm:$0xff] }
  0xa7   : > { %1201 = vmatprep.mubr.f32.mxu0 %v16414_v10  ;;  %9869 = vmatpush1.bf16.msra.mxu0 %v16542_v56  ;;  %v12268_v56 = vpack.c.bf16 %v16013_v45, %v16014_v24  ;;  %v16553_v45 = vand.u32 4294901760, %v12083_v0  ;;  %v16554_v24 = vand.u32 4294901760, %v12088_v22  ;;  %v16559_v0 = vand.u32 4294901760, %v12114_v62 }
  0xa8   : > { %1759 = vmatmul.mubr.f32.gmra.mrb[28].mxu1 %v16543_v19  ;;  %1264 = vmatprep.subr.mxu0 %v16544_v20  ;;  %v16551_v20 = vld [vmem:[#allocation50_spill] sm:$0xff]  ;;  %v16560_v22 = vand.u32 4294901760, %v12119_v5  ;;  %v16565_v62 = vand.u32 4294901760, %v12154_v8  ;;  %v16566_v5 = vand.u32 4294901760, %v12159_v59  ;;  %v16571_v59 = vand.u32 4294901760, %v12192_v61 }
  0xa9   : > { %1764 = vmatprep.mubr.f32.mxu1 %v16414_v10  ;;  %16546 = vst [vmem:[#allocation43_spill] sm:$0xff] %v12268_v56  ;;  %v12288_v47 = vpack.c.bf16 %v16554_v24, %v16553_v45  ;;  %v16557_v56 = vld [vmem:[#allocation52_spill] sm:$0xff]  ;;  %v16562_v45 = vld [vmem:[#allocation53_spill] sm:$0xff]  ;;  %v16570_v8 = vld [vmem:[#allocation30_spill] sm:$0xff] }
  0xaa   : > { %1203 = vmatmul.mubr.f32.gmra.mrb[10].mxu0 %v16538_v37  ;;  %v12302_v24 = vpack.c.bf16 %v16560_v22, %v16559_v0  ;;  %v12316_v0 = vpack.c.bf16 %v16566_v5, %v16565_v62  ;;  %v16568_v22 = vld [vmem:[#allocation55_spill] sm:$0xff]  ;;  %v16572_v62 = vand.u32 4294901760, %v12197_v33 }
  0xab   : > { %1208 = vmatprep.mubr.f32.mxu0 %v16414_v10  ;;  %1266 = vmatpush1.msra.mxu0 %v16547_v6  ;;  %v16552_v6 = vld [vmem:[#allocation19_spill] sm:$0xff]  ;;  %16555 = vst [vmem:[#allocation34_spill] sm:$0xff] %v12288_v47 }
  0xac   : > { %1766 = vmatmul.mubr.f32.gmra.mrb[30].mxu1 %v16548_v60  ;;  %9991 = vmatprep.subr.bf16.mxu0 %v12258_v52  ;;  %16561 = vst [vmem:[#allocation45_spill] sm:$0xff] %v12302_v24  ;;  %16567 = vst [vmem:[#allocation17_spill] sm:$0xff] %v12316_v0  ;;  %v12333_v5 = vpack.c.bf16 %v16572_v62, %v16571_v59  ;;  %v16578_v33 = vld [vmem:[#allocation35_spill] sm:$0xff]  ;;  %v16581_v62 = vld [vmem:[#allocation42_spill] sm:$0xff] }
  0xad   : > { %1880 = vmatprep.mubr.f32.mxu1 %v16414_v10 }
  0xae   : > { %1210 = vmatmul.mubr.f32.gmra.mrb[12].mxu0 %v16543_v19  ;;  %16573 = vst [vmem:[#allocation38_spill] sm:$0xff] %v12333_v5 }
  0xaf   : > { %1215 = vmatprep.mubr.f32.mxu0 %v16414_v10 }
  0xb0   : > { %1883 = vmatmul.mubr.f32.vlgmr.msra.gmra.mrb[16].mxu1 %v16549_v4 }
  0xb1   : > { %1888 = vmatprep.mubr.f32.mxu1 %v16414_v10  ;;  %9933 = vmatpush1.bf16.msra.mxu1 %v16550_v15 }
  0xb2   : > { %1217 = vmatmul.mubr.f32.gmra.mrb[14].mxu0 %v16548_v60  ;;  %9935 = vmatprep.subr.bf16.mxu1 %v16551_v20 }
  0xb3   : > { %1309 = vmatprep.mubr.f32.mxu0 %v16414_v10 }
  0xb4   : > { %1891 = vmatmul.mubr.f32.gmra.mrb[18].mxu1 %v16552_v6  ;;  %v256_v6 = vld [vmem:[%s15867_s1 + $0x1b0] sm:$0x1] }
  0xb5   : > { %1896 = vmatprep.mubr.f32.mxu1 %v16414_v10  ;;  %9937 = vmatpush1.bf16.msra.mxu1 %v16556_v29 }
  0xb6   : > { %1311 = vmatmul.mubr.f32.vlgmr.msra.gmra.mrb[0].mxu0 %v16523_v54  ;;  %9939 = vmatprep.subr.bf16.mxu1 %v16557_v56 }
  0xb7   : > { %1316 = vmatprep.mubr.f32.mxu0 %v16414_v10  ;;  %9993 = vmatpush3.bf16.msra.mxu0 %v12258_v52 }
  0xb8   : > { %1899 = vmatmul.mubr.f32.gmra.mrb[20].mxu1 %v16558_v23  ;;  %9995 = vmatprep.subr.bf16.mxu0 %v12288_v47  ;;  %v16564_v23 = vld [vmem:[#allocation27_spill] sm:$0xff] }
  0xb9   : > { %1904 = vmatprep.mubr.f32.mxu1 %v16414_v10  ;;  %9941 = vmatpush1.bf16.msra.mxu1 %v16562_v45 }
  0xba   : > { %1318 = vmatmul.mubr.f32.gmra.mrb[2].mxu0 %v16525_v7  ;;  %9943 = vmatprep.subr.bf16.mxu1 %v16563_v25 }
  0xbb   : > { %1323 = vmatprep.mubr.f32.mxu0 %v16414_v10  ;;  %9997 = vmatpush3.bf16.msra.mxu0 %v12288_v47  ;;  %v16569_v47 = vld [vmem:[#allocation56_spill] sm:$0xff] }
  0xbc   : > { %1907 = vmatmul.mubr.f32.gmra.mrb[22].mxu1 %v16564_v23  ;;  %9999 = vmatprep.subr.bf16.mxu0 %v12302_v24  ;;  %v16574_v23 = vand.u32 4294901760, %v12094_v48 }
  0xbd   : > { %1912 = vmatprep.mubr.f32.mxu1 %v16414_v10  ;;  %9945 = vmatpush1.bf16.msra.mxu1 %v16568_v22 }
  0xbe   : > { %1325 = vmatmul.mubr.f32.gmra.mrb[4].mxu0 %v16527_v43  ;;  %9947 = vmatprep.subr.bf16.mxu1 %v16569_v47  ;;  %v2594_v52 = vsub.f32 %v12094_v48, %v16574_v23  ;;  %v16575_v47 = vand.u32 4294901760, %v12099_v41 }
  0xbf   : > { %1330 = vmatprep.mubr.f32.mxu0 %v16414_v10  ;;  %10001 = vmatpush3.bf16.msra.mxu0 %v12302_v24  ;;  %v296_v24 = vsel %vm282_vm0, %v256_v6, 0 }
  0xc0   : > { %1915 = vmatmul.mubr.f32.gmra.mrb[24].mxu1 %v16570_v8  ;;  %10003 = vmatprep.subr.bf16.mxu0 %v12316_v0  ;;  %v2601_v22 = vsub.f32 %v12099_v41, %v16575_v47  ;;  %v16576_v8 = vld [vmem:[#allocation57_spill] sm:$0xff]  ;;  %v12348_v61 = vand.u32 4294901760, %v296_v24  ;;  %v2595_v47 = vand.u32 4294901760, %v2594_v52  ;;  %v16579_v52 = vand.u32 4294901760, %v12128_v1 }
  0xc1   : > { %1920 = vmatprep.mubr.f32.mxu1 %v16414_v10  ;;  %9949 = vmatpush1.bf16.msra.mxu1 %v16576_v8 }
  0xc2   : > { %1332 = vmatmul.mubr.f32.gmra.mrb[6].mxu0 %v16530_v42  ;;  %1986 = vmatprep.subr.mxu1 %v11899_v36  ;;  %16577 = vst [vmem:[#allocation18_spill] sm:$0xff] %v12348_v61  ;;  %v2602_v23 = vand.u32 4294901760, %v2601_v22  ;;  %v16580_v22 = vand.u32 4294901760, %v12133_v26  ;;  %v12433_v36 = vld [vmem:[%s15868_s2 + $0x18] sm:$0xff] }
  0xc3   : > { %1337 = vmatprep.mubr.f32.mxu0 %v16414_v10  ;;  %10005 = vmatpush3.bf16.msra.mxu0 %v12316_v0  ;;  %16592 = vst [vmem:[#allocation13_spill] sm:$0xff] %v12433_v36 }
  0xc4   : > { %1923 = vmatmul.mubr.f32.gmra.mrb[26].mxu1 %v16578_v33  ;;  %10007 = vmatprep.subr.bf16.mxu0 %v12333_v5  ;;  %v10010_v6 = vpack.c.bf16 %v2602_v23, %v2595_v47  ;;  %v2615_v59 = vsub.f32 %v12133_v26, %v16580_v22  ;;  %v16582_v47 = vand.u32 4294901760, %v12168_v34  ;;  %v16584_v33 = vand.u32 4294901760, %v12206_v53 }
  0xc5   : > { %1928 = vmatprep.mubr.f32.mxu1 %v16414_v10  ;;  %1988 = vmatpush1.msra.mxu1 %v11909_v28  ;;  %v16586_v28 = vld [vmem:[#allocation61_spill] sm:$0xff] }
  0xc6   : > { %1339 = vmatmul.mubr.f32.gmra.mrb[8].mxu0 %v16534_v32  ;;  %9951 = vmatprep.subr.bf16.mxu1 %v11937_v2  ;;  %v2608_v2 = vsub.f32 %v12128_v1, %v16579_v52  ;;  %v2622_v23 = vsub.f32 %v12168_v34, %v16582_v47  ;;  %v2616_v0 = vand.u32 4294901760, %v2615_v59  ;;  %v12384_v47 = vsub.f32 %v12206_v53, %v16584_v33  ;;  %v16587_v59 = vld [vmem:[#allocation21_spill] sm:$0xff] }
  0xc7   : > { %1344 = vmatprep.mubr.f32.mxu0 %v16414_v10  ;;  %10009 = vmatpush3.bf16.msra.mxu0 %v12333_v5  ;;  %v16583_v5 = vand.u32 4294901760, %v12173_v18 }
  0xc8   : > { %1931 = vmatmul.mubr.f32.gmra.mrb[28].mxu1 %v11549_v9  ;;  %9134 = vmatprep.subr.mxu0 %v12348_v61  ;;  %v2609_v52 = vand.u32 4294901760, %v2608_v2  ;;  %v2623_v22 = vand.u32 4294901760, %v2622_v23  ;;  %v12393_v2 = vld [vmem:[%s15868_s2] sm:$0xff]  ;;  %v16588_v23 = vand.u32 4294901760, %v12211_v46 }
  0xc9   : > { %1936 = vmatprep.mubr.f32.mxu1 %v16414_v10  ;;  %v2629_v9 = vsub.f32 %v12173_v18, %v16583_v5  ;;  %v16585_v5 = vld [vmem:[#allocation60_spill] sm:$0xff] }
  0xca   : > { %1346 = vmatmul.mubr.f32.gmra.mrb[10].mxu0 %v16538_v37  ;;  %v12399_v33 = vsub.f32 %v12211_v46, %v16588_v23 }
  0xcb   : > { %1351 = vmatprep.mubr.f32.mxu0 %v16414_v10  ;;  %9135 = vmatpush3.msra.mxu0 %v12348_v61 }
  0xcc   : > { %1939 = vmatmul.mubr.f32.gmra.mrb[30].mxu1 %v16581_v62  ;;  %10011 = vmatprep.subr.bf16.mxu0 %v10010_v6  ;;  %v2630_v62 = vand.u32 4294901760, %v2629_v9  ;;  %v10014_v9 = vpack.c.bf16 %v2616_v0, %v2609_v52  ;;  %v12417_v0 = vld [vmem:[%s15868_s2 + $0x98] sm:$0xff] }
  0xcd   : > { %2031 = vmatprep.mubr.f32.mxu1 %v16414_v10  ;;  %16590 = vst [vmem:[#allocation2_spill] sm:$0xff] %v12417_v0  ;;  %v16603_v45 = vand.u32 4294901760, %v12417_v0 }
  0xce   : > { %1353 = vmatmul.mubr.f32.gmra.mrb[12].mxu0 %v16543_v19  ;;  %v12420_v52 = vpack.c.bf16 %v2630_v62, %v2623_v22  ;;  %v12438_v62 = vld [vmem:[%s15868_s2 + $0xa0] sm:$0xff] }
  0xcf   : > { %1358 = vmatprep.mubr.f32.mxu0 %v16414_v10  ;;  %v16593_v22 = vld [vmem:[#allocation62_spill] sm:$0xff] }
  0xd0   : > { %2035 = vmatmul.mubr.f32.vlgmr.msra.gmra.mrb[16].mxu1 %v16504_v58  ;;  %v12402_v58 = vsub.f32 %v296_v24, %v12348_v61  ;;  %v2637_v24 = vand.u32 4294901760, %v12384_v47  ;;  %v12428_v61 = vld [vmem:[%s15868_s2 + $0x10] sm:$0xff]  ;;  %v16594_v47 = vand.u32 4294901760, %v12233_v27 }
  0xd1   : > { %2040 = vmatprep.mubr.f32.mxu1 %v16414_v10  ;;  %9953 = vmatpush1.bf16.msra.mxu1 %v16585_v5  ;;  %v12412_v5 = vld [vmem:[%s15868_s2 + $0x90] sm:$0xff]  ;;  %16591 = vst [vmem:[#allocation41_spill] sm:$0xff] %v12428_v61 }
  0xd2   : > { %1360 = vmatmul.mubr.f32.gmra.mrb[14].mxu0 %v16548_v60  ;;  %9955 = vmatprep.subr.bf16.mxu1 %v16586_v28  ;;  %v12407_v28 = vld [vmem:[%s15868_s2 + $0x8] sm:$0xff]  ;;  %16589 = vst [vmem:[#allocation47_spill] sm:$0xff] %v12412_v5  ;;  %v12445_v23 = vsub.f32 %v12233_v27, %v16594_v47  ;;  %v16597_v47 = vand.u32 4294901760, %v12393_v2 }
  0xd3   : > { %9136 = vmatprep.mubr.f32.mxu0 %v16587_v59  ;;  %v16595_v59 = vand.u32 4294901760, %v12238_v17  ;;  %v12457_v60 = vld [vmem:[%s15868_s2 + $0xa8] sm:$0xff] }
  0xd4   : > { %2044 = vmatmul.mubr.f32.gmra.mrb[18].mxu1 %v16507_v30  ;;  %v12464_v25 = vsub.f32 %v12393_v2, %v16597_v47  ;;  %v2644_v47 = vand.u32 4294901760, %v12399_v33  ;;  %v12508_v33 = vand.u32 4294901760, %v12402_v58 }
  0xd5   : > { %2049 = vmatprep.mubr.f32.mxu1 %v16414_v10  ;;  %9957 = vmatpush1.bf16.msra.mxu1 %v16593_v22  ;;  %v12450_v30 = vsub.f32 %v12238_v17, %v16595_v59  ;;  %v16596_v22 = vld [vmem:[#allocation63_spill] sm:$0xff]  ;;  %v16599_v59 = vand.u32 4294901760, %v12407_v28 }
  0xd6   : > { %9137 = vmatmul.mubr.f32.vlgmr.msra.gmra.mrb[16].mxu0 %v16503_v11  ;;  %9959 = vmatprep.subr.bf16.mxu1 %v16596_v22  ;;  %16598 = vst [vmem:[#allocation44_spill] sm:$0xff] %v12464_v25  ;;  %v12476_v11 = vld [vmem:[%s15868_s2 + $0x20] sm:$0xff]  ;;  %v12481_v22 = vld [vmem:[%s15868_s2 + $0x28] sm:$0xff]  ;;  %16605 = vst [vmem:[#allocation4_spill] sm:$0xff] %v12508_v33  ;;  %v16608_v25 = vand.u32 4294901760, %v12433_v36 }
  0xd7   : > { %v12469_v8 = vsub.f32 %v12407_v28, %v16599_v59  ;;  %10013 = vmatpush3.bf16.msra.mxu0 %v10010_v6  ;;  %9139 = vmatprep.mubr.f32.mxu0 %v16506_v14  ;;  %v16601_v59 = vand.u32 4294901760, %v12412_v5  ;;  %v12499_v6 = vld [vmem:[%s15868_s2 + $0xb0] sm:$0xff]  ;;  %v12504_v14 = vld [vmem:[%s15868_s2 + $0xb8] sm:$0xff] }
  0xd8   : > { %2053 = vmatmul.mubr.f32.gmra.mrb[20].mxu1 %v16509_v38  ;;  %10015 = vmatprep.subr.bf16.mxu0 %v10014_v9  ;;  %v12524_v38 = vld [vmem:[%s15868_s2 + $0x30] sm:$0xff] }
  0xd9   : > { %16600 = vst [vmem:[#allocation16_spill] sm:$0xff] %v12469_v8  ;;  %v12488_v4 = vsub.f32 %v12412_v5, %v16601_v59  ;;  %v12493_v8 = vsub.f32 %v12417_v0, %v16603_v45  ;;  %v16606_v45 = vand.u32 4294901760, %v12428_v61  ;;  %v12529_v0 = vld [vmem:[%s15868_s2 + $0x38] sm:$0xff]  ;;  %2058 = vmatprep.mubr.f32.mxu1 %v16414_v10 }
  0xda   : > { %16610 = vst [vmem:[#allocation6_spill] sm:$0xff] %v12529_v0  ;;  %9140 = vmatmul.mubr.f32.gmra.mrb[18].mxu0 %v16508_v40  ;;  %v16614_v5 = vld [vmem:[#allocation65_spill] sm:$0xff]  ;;  %v16617_v40 = vand.u32 4294901760, %v12476_v11 }
  0xdb   : > { %16602 = vst [vmem:[#allocation3_spill] sm:$0xff] %v12488_v4  ;;  %16604 = vst [vmem:[#allocation20_spill] sm:$0xff] %v12493_v8  ;;  %v12513_v59 = vsub.f32 %v12428_v61, %v16606_v45  ;;  %v12518_v8 = vsub.f32 %v12433_v36, %v16608_v25  ;;  %v16611_v45 = vld [vmem:[#allocation64_spill] sm:$0xff]  ;;  %v16612_v25 = vand.u32 4294901760, %v12438_v62  ;;  %v12544_v61 = vld [vmem:[%s15868_s2 + $0xc0] sm:$0xff]  ;;  %10017 = vmatpush3.bf16.msra.mxu0 %v10014_v9  ;;  %9142 = vmatprep.mubr.f32.mxu0 %v16510_v16 }
  0xdc   : > { %9961 = vmatpush1.bf16.msra.mxu1 %v16611_v45  ;;  %v16615_v45 = vand.u32 4294901760, %v12457_v60  ;;  %v12577_v9 = vld [vmem:[%s15868_s2 + $0x40] sm:$0xff]  ;;  %v12582_v16 = vld [vmem:[%s15868_s2 + $0x48] sm:$0xff]  ;;  %10019 = vmatprep.subr.bf16.mxu0 %v12420_v52 }
  0xdd   : > { %16607 = vst [vmem:[#allocation24_spill] sm:$0xff] %v12513_v59  ;;  %16609 = vst [vmem:[#allocation5_spill] sm:$0xff] %v12518_v8  ;;  %v2651_v59 = vand.u32 4294901760, %v12445_v23  ;;  %v12537_v4 = vsub.f32 %v12438_v62, %v16612_v25  ;;  %9963 = vmatprep.subr.bf16.mxu1 %v16614_v5  ;;  %v2658_v23 = vand.u32 4294901760, %v12450_v30  ;;  %v12565_v30 = vsub.f32 %v12476_v11, %v16617_v40 }
  0xde   : > { %v12552_v25 = vsub.f32 %v12457_v60, %v16615_v45  ;;  %v16619_v5 = vand.u32 4294901760, %v12481_v22  ;;  %2062 = vmatmul.mubr.f32.gmra.mrb[22].mxu1 %v16511_v12  ;;  %v10022_v40 = vpack.c.bf16 %v2644_v47, %v2637_v24  ;;  %v16623_v8 = vand.u32 4294901760, %v12504_v14  ;;  %v12605_v24 = vld [vmem:[%s15868_s2 + $0xd8] sm:$0xff]  ;;  %9143 = vmatmul.mubr.f32.gmra.mrb[20].mxu0 %v16512_v55 }
  0xdf   : > { %16613 = vst [vmem:[#allocation28_spill] sm:$0xff] %v12537_v4  ;;  %v12559_v4 = vld [vmem:[%s15868_s2 + $0xc8] sm:$0xff]  ;;  %16618 = vst [vmem:[#allocation8_spill] sm:$0xff] %v12565_v30  ;;  %2067 = vmatprep.mubr.f32.mxu1 %v16414_v10  ;;  %v16625_v47 = vand.u32 4294901760, %v12524_v38  ;;  %10021 = vmatpush3.bf16.msra.mxu0 %v12420_v52  ;;  %v10026_v12 = vpack.c.bf16 %v2658_v23, %v2651_v59 }
  0xe0   : > { %16616 = vst [vmem:[#allocation7_spill] sm:$0xff] %v12552_v25  ;;  %v12570_v45 = vsub.f32 %v12481_v22, %v16619_v5  ;;  %v16621_v5 = vand.u32 4294901760, %v12499_v6  ;;  %v12600_v25 = vld [vmem:[%s15868_s2 + $0xd0] sm:$0xff]  ;;  %9965 = vmatpush1.bf16.msra.mxu1 %v12002_v21  ;;  %v12628_v21 = vld [vmem:[%s15868_s2 + $0x58] sm:$0xff]  ;;  %9145 = vmatprep.mubr.f32.mxu0 %v16514_v31  ;;  %v16631_v55 = vand.u32 4294901760, %v12559_v4 }
  0xe1   : > { %9967 = vmatprep.subr.bf16.mxu1 %v12008_v63  ;;  %10023 = vmatprep.subr.bf16.mxu0 %v10022_v40  ;;  %v16063_v59 = vand.u32 4294901760, %v12628_v21 }
  0xe2   : > { %16620 = vst [vmem:[#allocation31_spill] sm:$0xff] %v12570_v45  ;;  %v12589_v36 = vsub.f32 %v12499_v6, %v16621_v5  ;;  %v12594_v45 = vsub.f32 %v12504_v14, %v16623_v8  ;;  %v12612_v8 = vsub.f32 %v12524_v38, %v16625_v47  ;;  %v16627_v5 = vand.u32 4294901760, %v12529_v0  ;;  %2071 = vmatmul.mubr.f32.gmra.mrb[24].mxu1 %v16513_v3 }
  0xe3   : > { %v2664_v47 = vsub.f32 %v12402_v58, %v12508_v33  ;;  %v12646_v63 = vsub.f32 %v12559_v4, %v16631_v55  ;;  %v16066_v33 = vand.u32 4294901760, %v12600_v25  ;;  %2076 = vmatprep.mubr.f32.mxu1 %v16414_v10  ;;  %9146 = vmatmul.mubr.f32.gmra.mrb[22].mxu0 %v16520_v35 }
  0xe4   : > { %16622 = vst [vmem:[#allocation9_spill] sm:$0xff] %v12589_v36  ;;  %16624 = vst [vmem:[#allocation46_spill] sm:$0xff] %v12594_v45  ;;  %v12617_v30 = vsub.f32 %v12529_v0, %v16627_v5  ;;  %v12623_v36 = vld [vmem:[%s15868_s2 + $0x50] sm:$0xff]  ;;  %v16629_v5 = vand.u32 4294901760, %v12544_v61  ;;  %v16065_v0 = vand.u32 4294901760, %v12605_v24  ;;  %9969 = vmatpush1.bf16.msra.mxu1 %v12016_v13  ;;  %v12686_v13 = vsub.f32 %v12628_v21, %v16063_v59  ;;  %v12840_v59 = vld [vmem:[%s15868_s2 + $0x78] sm:$0xff] }
  0xe5   : > { %16626 = vst [vmem:[#allocation10_spill] sm:$0xff] %v12612_v8  ;;  %v16061_v8 = vand.u32 4294901760, %v12582_v16  ;;  %16632 = vst [vmem:[#allocation12_spill] sm:$0xff] %v12646_v63  ;;  %v16064_v52 = vand.u32 4294901760, %v12623_v36  ;;  %v12668_v23 = vsub.f32 %v12600_v25, %v16066_v33  ;;  %10025 = vmatpush3.bf16.msra.mxu0 %v10022_v40  ;;  %9170 = vmatprep.mubr.f32.mxu0 %v16523_v54  ;;  %v2665_v35 = vand.u32 4294901760, %v2664_v47  ;;  %v16651_v47 = vld [vmem:[#allocation34_spill] sm:$0xff] }
  0xe6   : > { %16628 = vst [vmem:[#allocation33_spill] sm:$0xff] %v12617_v30  ;;  %v12637_v45 = vsub.f32 %v12544_v61, %v16629_v5  ;;  %v16062_v30 = vand.u32 4294901760, %v12577_v9  ;;  %v12673_v55 = vsub.f32 %v12605_v24, %v16065_v0  ;;  %16639 = vst [vmem:[#allocation61_spill] sm:$0xff] %v12686_v13  ;;  %2080 = vmatmul.mubr.f32.gmra.mrb[26].mxu1 %v16517_v57  ;;  %10027 = vmatprep.subr.bf16.mxu0 %v10026_v12 }
  0xe7   : > { %v12659_v31 = vsub.f32 %v12582_v16, %v16061_v8  ;;  %16635 = vst [vmem:[#allocation51_spill] sm:$0xff] %v12668_v23  ;;  %v16637_v8 = vand.u32 4294901760, %v11979_v50  ;;  %2085 = vmatprep.mubr.f32.mxu1 %v16414_v10  ;;  %v16640_v50 = vand.u32 4294901760, %v11994_v39  ;;  %v10030_v40 = vpack.c.bf16 %v12099_v41, %v12094_v48  ;;  %v16641_v41 = vld [vmem:[#allocation53_spill] sm:$0xff] }
  0xe8   : > { %16630 = vst [vmem:[#allocation11_spill] sm:$0xff] %v12637_v45  ;;  %v12654_v5 = vsub.f32 %v12577_v9, %v16062_v30  ;;  %16636 = vst [vmem:[#allocation52_spill] sm:$0xff] %v12673_v55  ;;  %v12681_v30 = vsub.f32 %v12623_v36, %v16064_v52  ;;  %v10038_v39 = vpack.c.bf16 %v12173_v18, %v12168_v34  ;;  %v12738_v34 = vld [vmem:[%s15868_s2 + $0x88] sm:$0xff]  ;;  %v16647_v18 = vld [vmem:[#allocation57_spill] sm:$0xff] }
  0xe9   : > { %16634 = vst [vmem:[#allocation50_spill] sm:$0xff] %v12659_v31  ;;  %2187 = vmatprep.subr.mxu1 %v16637_v8  ;;  %10029 = vmatpush3.bf16.msra.mxu0 %v10026_v12  ;;  %v10034_v8 = vpack.c.bf16 %v12133_v26, %v12128_v1  ;;  %v10042_v12 = vpack.c.bf16 %v12211_v46, %v12206_v53  ;;  %v16642_v1 = vld [vmem:[#allocation54_spill] sm:$0xff]  ;;  %v16643_v26 = vld [vmem:[#allocation39_spill] sm:$0xff]  ;;  %v16646_v46 = vld [vmem:[#allocation56_spill] sm:$0xff] }
  0xea   : > { %16633 = vst [vmem:[#allocation49_spill] sm:$0xff] %v12654_v5  ;;  %16638 = vst [vmem:[#allocation60_spill] sm:$0xff] %v12681_v30  ;;  %2191 = vmatpush1.msra.mxu1 %v16640_v50  ;;  %9168 = vmatprep.subr.mxu0 %v2665_v35  ;;  %v10046_v48 = vpack.c.bf16 %v12238_v17, %v12233_v27  ;;  %v16645_v27 = vld [vmem:[#allocation55_spill] sm:$0xff]  ;;  %v3447_v17 = vld [vmem:[%s15868_s2 + $0x80] sm:$0xff] }
  0xeb   : > { %9971 = vmatprep.subr.bf16.mxu1 %v16540_v51  ;;  %2089 = vmatmul.mubr.f32.gmra.mrb[28].mxu1 %v16522_v44  ;;  %v3577_v53 = vand.u32 4294901760, %v3447_v17  ;;  %v16067_v51 = vand.u32 4294901760, %v12738_v34  ;;  %v16653_v50 = vld [vmem:[#allocation59_spill] sm:$0xff]  ;;  %v16678_v52 = vld [vmem:[#allocation13_spill] sm:$0xff] }
  0xec   : > { %2094 = vmatprep.mubr.f32.mxu1 %v16414_v10  ;;  %v16679_v0 = vand.u32 4294901760, %v16678_v52 }
  0xed   : > { %9169 = vmatpush3.msra.mxu0 %v2665_v35  ;;  %v12755_v35 = vpack.c.bf16 %v16067_v51, %v3577_v53  ;;  %v16681_v51 = vand.u32 4294901760, %v12438_v62 }
  0xee   : > { %10031 = vmatprep.subr.bf16.mxu0 %v10030_v40  ;;  %9171 = vmatmul.mubr.f32.vlgmr.msra.gmra.mrb[16].mxu0 %v16525_v7 }
  0xef   : > { %2098 = vmatmul.mubr.f32.gmra.mrb[30].mxu1 %v16524_v49  ;;  %10033 = vmatpush3.bf16.msra.mxu0 %v10030_v40  ;;  %16652 = vst [vmem:[#allocation21_spill] sm:$0xff] %v12755_v35  ;;  %v16655_v40 = vld [vmem:[#allocation27_spill] sm:$0xff] }
  0xf0   : > { %2234 = vmatprep.mubr.f32.mxu1 %v16414_v10  ;;  %9173 = vmatprep.mubr.f32.mxu0 %v16527_v43 }
  0xf1   : > { %10035 = vmatprep.subr.bf16.mxu0 %v10034_v8 }
  0xf2   : > { %9174 = vmatmul.mubr.f32.gmra.mrb[18].mxu0 %v16530_v42 }
  0xf3   : > { %2236 = vmatmul.mubr.f32.vlgmr.msra.gmra.mrb[16].mxu1 %v16523_v54  ;;  %10037 = vmatpush3.bf16.msra.mxu0 %v10034_v8  ;;  %v16656_v8 = vld [vmem:[#allocation45_spill] sm:$0xff] }
  0xf4   : > { %2241 = vmatprep.mubr.f32.mxu1 %v16414_v10  ;;  %9973 = vmatpush1.bf16.msra.mxu1 %v16550_v15  ;;  %v16649_v15 = vld [vmem:[#allocation40_spill] sm:$0xff] }
  0xf5   : > { %9975 = vmatprep.subr.bf16.mxu1 %v16551_v20  ;;  %10039 = vmatprep.subr.bf16.mxu0 %v10038_v39  ;;  %v16650_v20 = vld [vmem:[#allocation19_spill] sm:$0xff] }
  0xf6   : > { %9176 = vmatprep.mubr.f32.mxu0 %v16534_v32 }
  0xf7   : > { %2243 = vmatmul.mubr.f32.gmra.mrb[18].mxu1 %v16525_v7  ;;  %10041 = vmatpush3.bf16.msra.mxu0 %v10038_v39  ;;  %v16657_v39 = vld [vmem:[#allocation30_spill] sm:$0xff] }
  0xf8   : > { %2248 = vmatprep.mubr.f32.mxu1 %v16414_v10  ;;  %9977 = vmatpush1.bf16.msra.mxu1 %v16556_v29  ;;  %v16644_v29 = vld [vmem:[#allocation14_spill] sm:$0xff] }
  0xf9   : > { %9979 = vmatprep.subr.bf16.mxu1 %v16557_v56  ;;  %10043 = vmatprep.subr.bf16.mxu0 %v10042_v12  ;;  %v16648_v56 = vld [vmem:[#allocation58_spill] sm:$0xff] }
  0xfa   : > { %9177 = vmatmul.mubr.f32.gmra.mrb[20].mxu0 %v16538_v37 }
  0xfb   : > { %2250 = vmatmul.mubr.f32.gmra.mrb[20].mxu1 %v16527_v43  ;;  %9179 = vmatprep.mubr.f32.mxu0 %v16543_v19 }
  0xfc   : > { %2255 = vmatprep.mubr.f32.mxu1 %v16414_v10  ;;  %9981 = vmatpush1.bf16.msra.mxu1 %v16641_v41 }
  0xfd   : > { %10045 = vmatpush3.bf16.msra.mxu0 %v10042_v12  ;;  %9983 = vmatprep.subr.bf16.mxu1 %v16642_v1  ;;  %v16658_v12 = vld [vmem:[#allocation35_spill] sm:$0xff]  ;;  %v16661_v1 = vld [vmem:[#allocation36_spill] sm:$0xff] }
  0xfe   : > { %10047 = vmatprep.subr.bf16.mxu0 %v10046_v48  ;;  %9180 = vmatmul.mubr.f32.gmra.mrb[22].mxu0 %v16643_v26 }
  0xff   : > { %2257 = vmatmul.mubr.f32.gmra.mrb[22].mxu1 %v16530_v42  ;;  %9204 = vmatprep.mubr.f32.mxu0 %v16644_v29 }
 0x100   : > { %2262 = vmatprep.mubr.f32.mxu1 %v16414_v10  ;;  %9985 = vmatpush1.bf16.msra.mxu1 %v16645_v27  ;;  %v16663_v27 = vld [vmem:[#allocation42_spill] sm:$0xff] }
 0x101   : > { %10049 = vmatpush3.bf16.msra.mxu0 %v10046_v48  ;;  %9987 = vmatprep.subr.bf16.mxu1 %v16646_v46  ;;  %v16659_v48 = vld [vmem:[#allocation17_spill] sm:$0xff]  ;;  %v16664_v46 = vand.u32 4294901760, %v12393_v2  ;;  %v12798_v2 = vld [vmem:[%s15868_s2 + $0xe0] sm:$0xff] }
 0x102   : > { %9202 = vmatprep.subr.mxu0 %v12402_v58 }
 0x103   : > { %2264 = vmatmul.mubr.f32.gmra.mrb[24].mxu1 %v16534_v32 }
 0x104   : > { %2269 = vmatprep.mubr.f32.mxu1 %v16414_v10  ;;  %9989 = vmatpush1.bf16.msra.mxu1 %v16647_v18  ;;  %v16665_v18 = vand.u32 4294901760, %v12407_v28  ;;  %v12803_v28 = vld [vmem:[%s15868_s2 + $0xe8] sm:$0xff] }
 0x105   : > { %9203 = vmatpush3.msra.mxu0 %v12402_v58  ;;  %2332 = vmatprep.subr.mxu1 %v16648_v56  ;;  %v16654_v58 = vld [vmem:[#allocation23_spill] sm:$0xff]  ;;  %v16073_v62 = vand.u32 4294901760, %v12803_v28 }
 0x106   : > { %10051 = vmatprep.subr.bf16.mxu0 %v16649_v15  ;;  %9205 = vmatmul.mubr.f32.vlgmr.msra.gmra.mrb[16].mxu0 %v16650_v20  ;;  %v12771_v41 = vpop.f32.mrb[0].mxu1  ;;  %v12783_v56 = vpack.c.bf16 %v16665_v18, %v16664_v46  ;;  %v16667_v20 = vld [vmem:[#allocation38_spill] sm:$0xff] }
 0x107   : > { %2271 = vmatmul.mubr.f32.gmra.mrb[26].mxu1 %v16538_v37  ;;  %10053 = vmatpush3.bf16.msra.mxu0 %v16649_v15  ;;  %16660 = vst [vmem:[#allocation62_spill] sm:$0xff] %v12771_v41  ;;  %v12774_v29 = vpop.f32.mrb[1].mxu1  ;;  %v12812_v18 = vld [vmem:[%s15868_s2 + $0x60] sm:$0xff]  ;;  %v16685_v41 = vand.u32 4294901760, %v12481_v22 }
 0x108   : > { %2276 = vmatprep.mubr.f32.mxu1 %v16414_v10  ;;  %10055 = vmatprep.subr.bf16.mxu0 %v16651_v47  ;;  %16662 = vst [vmem:[#allocation63_spill] sm:$0xff] %v12774_v29  ;;  %16666 = vst [vmem:[#allocation64_spill] sm:$0xff] %v12783_v56  ;;  %v16684_v29 = vand.u32 4294901760, %v12476_v11 }
 0x109   : > { %2334 = vmatpush1.msra.mxu1 %v16653_v50  ;;  %9207 = vmatprep.mubr.f32.mxu0 %v16654_v58  ;;  %v16669_v58 = vld [vmem:[#allocation47_spill] sm:$0xff] }
 0x10a   : > { %9208 = vmatmul.mubr.f32.gmra.mrb[18].mxu0 %v16655_v40  ;;  %10111 = vmatprep.subr.bf16.mxu1 %v12755_v35  ;;  %v12787_v50 = vpop.f32.mrb[2].mxu1  ;;  %v16670_v40 = vand.u32 4294901760, %v16669_v58  ;;  %v12817_v58 = vld [vmem:[%s15868_s2 + $0x68] sm:$0xff] }
 0x10b   : > { %2278 = vmatmul.mubr.f32.gmra.mrb[28].mxu1 %v16543_v19  ;;  %10057 = vmatpush3.bf16.msra.mxu0 %v16651_v47  ;;  %16668 = vst [vmem:[#allocation65_spill] sm:$0xff] %v12787_v50  ;;  %v12806_v46 = vpop.f32.mrb[3].mxu1  ;;  %v16075_v52 = vand.u32 4294901760, %v12817_v58 }
 0x10c   : > { %2283 = vmatprep.mubr.f32.mxu1 %v16414_v10  ;;  %10059 = vmatprep.subr.bf16.mxu0 %v16656_v8  ;;  %16675 = vst [vmem:[#allocation54_spill] sm:$0xff] %v12806_v46  ;;  %v16682_v46 = vand.u32 4294901760, %v12457_v60  ;;  %v16074_v60 = vand.u32 4294901760, %v12812_v18 }
 0x10d   : > { %9210 = vmatprep.mubr.f32.mxu0 %v16657_v39  ;;  %v16671_v39 = vld [vmem:[#allocation2_spill] sm:$0xff] }
 0x10e   : > { %9211 = vmatmul.mubr.f32.gmra.mrb[20].mxu0 %v16658_v12  ;;  %v16672_v12 = vand.u32 4294901760, %v16671_v39  ;;  %v12824_v39 = vsub.f32 %v3447_v17, %v3577_v53  ;;  %v16676_v17 = vld [vmem:[#allocation41_spill] sm:$0xff]  ;;  %v12854_v50 = vpack.c.bf16 %v16682_v46, %v16681_v51  ;;  %v12891_v22 = vsub.f32 %v12812_v18, %v16074_v60 }
 0x10f   : > { %2285 = vmatmul.mubr.f32.gmra.mrb[30].mxu1 %v16643_v26  ;;  %10061 = vmatpush3.bf16.msra.mxu0 %v16656_v8  ;;  %v16677_v53 = vand.u32 4294901760, %v16676_v17  ;;  %v12864_v17 = vpop.f32.mrb[4].mxu1 }
 0x110   : > { %2377 = vmatprep.mubr.f32.mxu1 %v16414_v10  ;;  %10063 = vmatprep.subr.bf16.mxu0 %v16659_v48  ;;  %16683 = vst [vmem:[#allocation14_spill] sm:$0xff] %v12854_v50  ;;  %16688 = vst [vmem:[#allocation56_spill] sm:$0xff] %v12864_v17  ;;  %v12870_v51 = vpop.f32.mrb[5].mxu1 }
 0x111   : > { %9213 = vmatprep.mubr.f32.mxu0 %v16661_v1  ;;  %v12793_v1 = vpack.c.bf16 %v16672_v12, %v16670_v40  ;;  %v12822_v40 = vld [vmem:[%s15868_s2 + $0xf0] sm:$0xff]  ;;  %v12830_v12 = vld [vmem:[%s15868_s2 + $0xf8] sm:$0xff]  ;;  %v12848_v33 = vpack.c.bf16 %v16679_v0, %v16677_v53  ;;  %v16072_v0 = vand.u32 4294901760, %v12798_v2  ;;  %16689 = vst [vmem:[#allocation57_spill] sm:$0xff] %v12870_v51  ;;  %v12886_v53 = vsub.f32 %v12803_v28, %v16073_v62 }
 0x112   : > { %9214 = vmatmul.mubr.f32.gmra.mrb[22].mxu0 %v16663_v27  ;;  %v16674_v27 = vld [vmem:[#allocation15_spill] sm:$0xff]  ;;  %v16078_v11 = vand.u32 4294901760, %v12822_v40  ;;  %16692 = vst [vmem:[#allocation19_spill] sm:$0xff] %v12891_v22  ;;  %v16695_v62 = vand.u32 4294901760, %v12830_v12  ;;  %v12917_v17 = vpop.f32.mrb[6].mxu1 }
 0x113   : > { %2379 = vmatmul.mubr.f32.vlgmr.msra.gmra.mrb[16].mxu1 %v16523_v54  ;;  %10065 = vmatpush3.bf16.msra.mxu0 %v16659_v48  ;;  %16673 = vst [vmem:[#allocation53_spill] sm:$0xff] %v12793_v1  ;;  %16680 = vst [vmem:[#allocation39_spill] sm:$0xff] %v12848_v33  ;;  %v12881_v46 = vsub.f32 %v12798_v2, %v16072_v0  ;;  %v12927_v48 = vpop.f32.mrb[7].mxu1 }
 0x114   : > { %2384 = vmatprep.mubr.f32.mxu1 %v16414_v10  ;;  %10067 = vmatprep.subr.bf16.mxu0 %v16667_v20  ;;  %16691 = vst [vmem:[#allocation40_spill] sm:$0xff] %v12886_v53  ;;  %v12903_v0 = vsub.f32 %v12822_v40, %v16078_v11  ;;  %16700 = vst [vmem:[#allocation45_spill] sm:$0xff] %v12917_v17  ;;  %v16708_v17 = vand.u32 4294901760, %v12499_v6 }
 0x115   : > { %9238 = vmatprep.mubr.f32.mxu0 %v16674_v27  ;;  %10113 = vmatpush3.bf16.msra.mxu1 %v12783_v56  ;;  %v12835_v27 = vld [vmem:[%s15868_s2 + $0x70] sm:$0xff]  ;;  %v16687_v56 = vld [vmem:[#allocation18_spill] sm:$0xff]  ;;  %16690 = vst [vmem:[#allocation58_spill] sm:$0xff] %v12881_v46  ;;  %16706 = vst [vmem:[#allocation35_spill] sm:$0xff] %v12927_v48 }
 0x116   : > { %10115 = vmatprep.subr.bf16.mxu1 %v12793_v1  ;;  %v12860_v1 = vpack.c.bf16 %v16685_v41, %v16684_v29  ;;  %v12896_v29 = vsub.f32 %v12817_v58, %v16075_v52  ;;  %16694 = vst [vmem:[#allocation59_spill] sm:$0xff] %v12903_v0  ;;  %v12908_v41 = vsub.f32 %v12830_v12, %v16695_v62  ;;  %v16697_v60 = vand.u32 4294901760, %v12835_v27  ;;  %v16699_v52 = vld [vmem:[#allocation26_spill] sm:$0xff]  ;;  %v16704_v62 = vld [vmem:[#allocation16_spill] sm:$0xff] }
 0x117   : > { %2386 = vmatmul.mubr.f32.gmra.mrb[18].mxu1 %v16525_v7  ;;  %10069 = vmatpush3.bf16.msra.mxu0 %v16667_v20  ;;  %v16705_v20 = vld [vmem:[#allocation22_spill] sm:$0xff] }
 0x118   : > { %16686 = vst [vmem:[#allocation55_spill] sm:$0xff] %v12860_v1  ;;  %2391 = vmatprep.mubr.f32.mxu1 %v16414_v10  ;;  %9236 = vmatprep.subr.mxu0 %v16687_v56  ;;  %16693 = vst [vmem:[#allocation34_spill] sm:$0xff] %v12896_v29  ;;  %v12913_v51 = vsub.f32 %v12835_v27, %v16697_v60  ;;  %v16707_v60 = vand.u32 4294901760, %v12738_v34 }
 0x119   : > { %10117 = vmatpush3.bf16.msra.mxu1 %v12848_v33  ;;  %16696 = vst [vmem:[#allocation23_spill] sm:$0xff] %v12908_v41  ;;  %v16703_v33 = vld [vmem:[#allocation44_spill] sm:$0xff]  ;;  %v16709_v41 = vand.u32 4294901760, %v12504_v14 }
 0x11a   : > { %10119 = vmatprep.subr.bf16.mxu1 %v12854_v50  ;;  %16698 = vst [vmem:[#allocation27_spill] sm:$0xff] %v12913_v51  ;;  %v16701_v50 = vand.u32 4294901760, %v12840_v59  ;;  %v12932_v51 = vsub.f32 %v12738_v34, %v16707_v60  ;;  %v16716_v6 = vand.u32 4294901760, %v16703_v33  ;;  %v16722_v60 = vand.u32 4294901760, %v12577_v9 }
 0x11b   : > { %2393 = vmatmul.mubr.f32.gmra.mrb[20].mxu1 %v16527_v43  ;;  %9237 = vmatpush3.msra.mxu0 %v16687_v56  ;;  %v12938_v0 = vpack.c.bf16 %v16709_v41, %v16708_v17  ;;  %v16713_v56 = vld [vmem:[#allocation6_spill] sm:$0xff]  ;;  %v16717_v17 = vand.u32 4294901760, %v16704_v62 }
 0x11c   : > { %2398 = vmatprep.mubr.f32.mxu1 %v16414_v10  ;;  %10071 = vmatprep.subr.bf16.mxu0 %v16699_v52  ;;  %v12922_v11 = vsub.f32 %v12840_v59, %v16701_v50  ;;  %v16711_v50 = vld [vmem:[#allocation25_spill] sm:$0xff]  ;;  %v16714_v35 = vand.u32 4294901760, %v16713_v56  ;;  %v3749_v14 = vsub.f32 %v16703_v33, %v16716_v6  ;;  %v16720_v56 = vand.u32 4294901760, %v12559_v4  ;;  %v16725_v6 = vld [vmem:[#allocation3_spill] sm:$0xff] }
 0x11d   : > { %9239 = vmatmul.mubr.f32.vlgmr.msra.gmra.mrb[16].mxu0 %v16705_v20  ;;  %16710 = vst [vmem:[#allocation36_spill] sm:$0xff] %v12938_v0  ;;  %10121 = vmatpush3.bf16.msra.mxu1 %v12860_v1  ;;  %v16712_v20 = vand.u32 4294901760, %v12524_v38  ;;  %v3756_v41 = vsub.f32 %v16704_v62, %v16717_v17  ;;  %v16719_v38 = vand.u32 4294901760, %v12544_v61  ;;  %v16726_v1 = vld [vmem:[#allocation20_spill] sm:$0xff]  ;;  %v12973_v62 = vpop.f32.mrb[8].mxu1  ;;  %v16728_v4 = vand.u32 4294901760, %v12600_v25 }
 0x11e   : > { %16702 = vst [vmem:[#allocation30_spill] sm:$0xff] %v12922_v11  ;;  %10073 = vmatpush3.bf16.msra.mxu0 %v16699_v52  ;;  %9241 = vmatprep.mubr.f32.mxu0 %v16711_v50  ;;  %v16718_v52 = vld [vmem:[#allocation48_spill] sm:$0xff]  ;;  %v16723_v50 = vand.u32 4294901760, %v12582_v16  ;;  %16727 = vst [vmem:[#allocation15_spill] sm:$0xff] %v12973_v62  ;;  %v16729_v61 = vand.u32 4294901760, %v12605_v24  ;;  %v3750_v9 = vand.u32 4294901760, %v3749_v14 }
 0x11f   : > { %v12947_v48 = vpack.c.bf16 %v16714_v35, %v16712_v20  ;;  %2400 = vmatmul.mubr.f32.gmra.mrb[22].mxu1 %v16530_v42  ;;  %10075 = vmatprep.subr.bf16.mxu0 %v16718_v52  ;;  %v12962_v35 = vpack.c.bf16 %v16720_v56, %v16719_v38  ;;  %v3757_v16 = vand.u32 4294901760, %v3756_v41  ;;  %v16731_v56 = vld [vmem:[#allocation24_spill] sm:$0xff]  ;;  %v12984_v34 = vpop.f32.mrb[9].mxu1  ;;  %v16734_v62 = vand.u32 4294901760, %v16725_v6  ;;  %v16736_v14 = vld [vmem:[#allocation5_spill] sm:$0xff] }
 0x120   : > { %v12968_v20 = vpack.c.bf16 %v16723_v50, %v16722_v60  ;;  %2405 = vmatprep.mubr.f32.mxu1 %v16414_v10  ;;  %10123 = vmatprep.subr.bf16.mxu1 %v12938_v0  ;;  %v12980_v38 = vpack.c.bf16 %v16729_v61, %v16728_v4  ;;  %v16096_v60 = vand.u32 4294901760, %v16731_v56  ;;  %v16732_v50 = vld [vmem:[#allocation29_spill] sm:$0xff]  ;;  %16733 = vst [vmem:[#allocation13_spill] sm:$0xff] %v12984_v34  ;;  %v16735_v24 = vand.u32 4294901760, %v16726_v1 }
 0x121   : > { %16715 = vst [vmem:[#allocation42_spill] sm:$0xff] %v12947_v48  ;;  %16721 = vst [vmem:[#allocation47_spill] sm:$0xff] %v12962_v35  ;;  %9242 = vmatmul.mubr.f32.gmra.mrb[18].mxu0 %v16732_v50  ;;  %10125 = vmatpush3.bf16.msra.mxu1 %v12947_v48  ;;  %v3875_v25 = vsub.f32 %v16725_v6, %v16734_v62  ;;  %v16737_v61 = vand.u32 4294901760, %v12824_v39  ;;  %v13002_v17 = vpack.c.bf16 %v3757_v16, %v3750_v9  ;;  %v16741_v48 = vld [vmem:[#allocation28_spill] sm:$0xff]  ;;  %v13014_v9 = vpop.f32.mrb[10].mxu1 }
 0x122   : > { %16724 = vst [vmem:[#allocation2_spill] sm:$0xff] %v12968_v20  ;;  %16730 = vst [vmem:[#allocation41_spill] sm:$0xff] %v12980_v38  ;;  %v3882_v4 = vsub.f32 %v16726_v1, %v16735_v24  ;;  %10077 = vmatpush3.bf16.msra.mxu0 %v16718_v52  ;;  %9244 = vmatprep.mubr.f32.mxu0 %v16513_v3  ;;  %v3763_v62 = vsub.f32 %v16731_v56, %v16096_v60  ;;  %v16739_v24 = vld [vmem:[#allocation32_spill] sm:$0xff]  ;;  %v16740_v52 = vand.u32 4294901760, %v16736_v14  ;;  %v16745_v1 = vld [vmem:[#allocation31_spill] sm:$0xff] }
 0x123   : > { %v13000_v50 = vsub.f32 %v12824_v39, %v16737_v61  ;;  %16738 = vst [vmem:[#allocation26_spill] sm:$0xff] %v13002_v17  ;;  %2407 = vmatmul.mubr.f32.gmra.mrb[24].mxu1 %v16534_v32  ;;  %10079 = vmatprep.subr.bf16.mxu0 %v16739_v24  ;;  %v3876_v41 = vand.u32 4294901760, %v3875_v25  ;;  %16742 = vst [vmem:[#allocation44_spill] sm:$0xff] %v13014_v9  ;;  %v16743_v61 = vld [vmem:[#allocation7_spill] sm:$0xff]  ;;  %v16744_v17 = vld [vmem:[#allocation8_spill] sm:$0xff] }
 0x124   : > { %v3883_v34 = vand.u32 4294901760, %v3882_v4  ;;  %v3770_v3 = vsub.f32 %v16736_v14, %v16740_v52  ;;  %2412 = vmatprep.mubr.f32.mxu1 %v16414_v10  ;;  %10127 = vmatprep.subr.bf16.mxu1 %v12962_v35  ;;  %v3764_v16 = vand.u32 4294901760, %v3763_v62  ;;  %v16101_v56 = vand.u32 4294901760, %v16744_v17  ;;  %v13021_v4 = vpop.f32.mrb[11].mxu1 }
 0x125   : > { %9245 = vmatmul.mubr.f32.gmra.mrb[20].mxu0 %v16517_v57  ;;  %16746 = vst [vmem:[#allocation22_spill] sm:$0xff] %v13021_v4  ;;  %10129 = vmatpush3.bf16.msra.mxu1 %v12968_v20  ;;  %v16747_v52 = vand.u32 4294901760, %v12932_v51  ;;  %v16749_v62 = vand.u32 4294901760, %v16741_v48  ;;  %v16750_v57 = vand.u32 4294901760, %v16743_v61 }
 0x126   : > { %v13027_v9 = vpack.c.bf16 %v3883_v34, %v3876_v41  ;;  %v3771_v35 = vand.u32 4294901760, %v3770_v3  ;;  %10081 = vmatpush3.bf16.msra.mxu0 %v16739_v24  ;;  %9247 = vmatprep.mubr.f32.mxu0 %v16522_v44  ;;  %v3777_v4 = vsub.f32 %v16744_v17, %v16101_v56  ;;  %v16751_v34 = vand.u32 4294901760, %v16745_v1  ;;  %v16752_v3 = vld [vmem:[#allocation37_spill] sm:$0xff] }
 0x127   : > { %v3868_v0 = vsub.f32 %v12932_v51, %v16747_v52  ;;  %v3889_v60 = vsub.f32 %v16741_v48, %v16749_v62  ;;  %v3896_v25 = vsub.f32 %v16743_v61, %v16750_v57  ;;  %2414 = vmatmul.mubr.f32.gmra.mrb[26].mxu1 %v16538_v37  ;;  %10083 = vmatprep.subr.bf16.mxu0 %v16752_v3  ;;  %v16753_v24 = vand.u32 4294901760, %v12623_v36 }
 0x128   : > { %16748 = vst [vmem:[#allocation25_spill] sm:$0xff] %v13027_v9  ;;  %v3784_v41 = vsub.f32 %v16745_v1, %v16751_v34  ;;  %v16754_v44 = vand.u32 4294901760, %v12628_v21  ;;  %v13051_v62 = vpack.c.bf16 %v3771_v35, %v3764_v16  ;;  %2419 = vmatprep.mubr.f32.mxu1 %v16414_v10  ;;  %v16756_v56 = vand.u32 4294901760, %v12798_v2  ;;  %10131 = vmatprep.subr.bf16.mxu1 %v12980_v38 }
 0x129   : > { %v3890_v57 = vand.u32 4294901760, %v3889_v60  ;;  %v16757_v9 = vand.u32 4294901760, %v12803_v28  ;;  %v3897_v20 = vand.u32 4294901760, %v3896_v25  ;;  %v3778_v1 = vand.u32 4294901760, %v3777_v4  ;;  %9248 = vmatmul.mubr.f32.gmra.mrb[22].mxu0 %v16524_v49  ;;  %v16759_v60 = vld [vmem:[#allocation9_spill] sm:$0xff] }
 0x12a   : > { %v13049_v52 = vpack.c.bf16 %v16754_v44, %v16753_v24  ;;  %v3785_v36 = vand.u32 4294901760, %v3784_v41  ;;  %v3862_v21 = vand.u32 4294901760, %v13000_v50  ;;  %v3869_v35 = vand.u32 4294901760, %v3868_v0  ;;  %v16760_v24 = vld [vmem:[#allocation46_spill] sm:$0xff]  ;;  %10085 = vmatpush3.bf16.msra.mxu0 %v16752_v3  ;;  %9272 = vmatprep.mubr.f32.mxu0 %v16523_v54  ;;  %v16762_v49 = vld [vmem:[#allocation33_spill] sm:$0xff]  ;;  %v16763_v50 = vld [vmem:[#allocation43_spill] sm:$0xff] }
 0x12b   : > { %v13058_v34 = vpack.c.bf16 %v16757_v9, %v16756_v56  ;;  %v16111_v16 = vand.u32 4294901760, %v16759_v60  ;;  %v16107_v2 = vand.u32 4294901760, %v16760_v24  ;;  %v13068_v28 = vpack.c.bf16 %v3897_v20, %v3890_v57  ;;  %v16761_v9 = vld [vmem:[#allocation10_spill] sm:$0xff]  ;;  %2421 = vmatmul.mubr.f32.gmra.mrb[28].mxu1 %v16543_v19  ;;  %10087 = vmatprep.subr.bf16.mxu0 %v16763_v50 }
 0x12c   : > { %16755 = vst [vmem:[#allocation6_spill] sm:$0xff] %v13049_v52  ;;  %10133 = vmatpush3.bf16.msra.mxu1 %v13049_v52  ;;  %v13070_v56 = vpack.c.bf16 %v3785_v36, %v3778_v1  ;;  %v16105_v25 = vand.u32 4294901760, %v16761_v9  ;;  %v16106_v4 = vand.u32 4294901760, %v16762_v49  ;;  %v16764_v0 = vand.u32 4294901760, %v12812_v18  ;;  %2426 = vmatprep.mubr.f32.mxu1 %v16414_v10 }
 0x12d   : > { %16758 = vst [vmem:[#allocation48_spill] sm:$0xff] %v13058_v34  ;;  %v16765_v41 = vand.u32 4294901760, %v12817_v58  ;;  %v3903_v20 = vsub.f32 %v16759_v60, %v16111_v16  ;;  %v3910_v1 = vsub.f32 %v16760_v24, %v16107_v2  ;;  %v16767_v3 = vand.u32 4294901760, %v12822_v40  ;;  %10135 = vmatprep.subr.bf16.mxu1 %v13058_v34 }
 0x12e   : > { %v16768_v57 = vand.u32 4294901760, %v12830_v12  ;;  %v3791_v18 = vsub.f32 %v16761_v9, %v16105_v25  ;;  %v3798_v58 = vsub.f32 %v16762_v49, %v16106_v4  ;;  %10089 = vmatpush3.bf16.msra.mxu0 %v16763_v50  ;;  %v16770_v25 = vld [vmem:[#allocation4_spill] sm:$0xff]  ;;  %v16771_v4 = vand.u32 4294901760, %v12835_v27  ;;  %v13497_v9 = vld [vmem:[%s15868_s2 + $0x1c8] sm:$0xff] }
 0x12f   : > { %v13080_v44 = vpack.c.bf16 %v16765_v41, %v16764_v0  ;;  %v10142_v0 = vpack.c.bf16 %v3869_v35, %v3862_v21  ;;  %v3904_v10 = vand.u32 4294901760, %v3903_v20  ;;  %v3911_v41 = vand.u32 4294901760, %v3910_v1  ;;  %2428 = vmatmul.mubr.f32.gmra.mrb[30].mxu1 %v16643_v26  ;;  %9270 = vmatprep.subr.mxu0 %v16770_v25 }
 0x130   : > { %v13093_v36 = vpack.c.bf16 %v16768_v57, %v16767_v3  ;;  %v3792_v40 = vand.u32 4294901760, %v3791_v18  ;;  %v3799_v12 = vand.u32 4294901760, %v3798_v58  ;;  %v16109_v3 = vand.u32 4294901760, %v12637_v45  ;;  %v13119_v18 = vpop.f32.mrb[12].mxu1 }
 0x131   : > { %16766 = vst [vmem:[#allocation3_spill] sm:$0xff] %v13080_v44  ;;  %10137 = vmatpush3.bf16.msra.mxu1 %v13080_v44  ;;  %v16108_v57 = vand.u32 4294901760, %v12646_v63  ;;  %v16772_v21 = vand.u32 4294901760, %v12840_v59  ;;  %v13115_v20 = vpack.c.bf16 %v3911_v41, %v3904_v10  ;;  %v16110_v50 = vand.u32 4294901760, %v12654_v5  ;;  %v13129_v27 = vpop.f32.mrb[13].mxu1 }
 0x132   : > { %16769 = vst [vmem:[#allocation29_spill] sm:$0xff] %v13093_v36  ;;  %10139 = vmatprep.subr.bf16.mxu1 %v13093_v36  ;;  %v16113_v1 = vand.u32 4294901760, %v12659_v31  ;;  %v13121_v58 = vpack.c.bf16 %v3799_v12, %v3792_v40  ;;  %v3917_v2 = vsub.f32 %v12637_v45, %v16109_v3  ;;  %9271 = vmatpush3.msra.mxu0 %v16770_v25  ;;  %v16112_v12 = vand.u32 4294901760, %v12668_v23  ;;  %v13480_v45 = vld [vmem:[%s15868_s2 + $0x1c0] sm:$0xff] }
 0x133   : > { %v13113_v35 = vpack.c.bf16 %v16772_v21, %v16771_v4  ;;  %16774 = vst [vmem:[#allocation32_spill] sm:$0xff] %v13115_v20  ;;  %v3924_v59 = vsub.f32 %v12646_v63, %v16108_v57  ;;  %v3805_v4 = vsub.f32 %v12654_v5, %v16110_v50  ;;  %v16114_v21 = vand.u32 4294901760, %v12673_v55  ;;  %10091 = vmatprep.subr.bf16.mxu0 %v16649_v15 }
 0x134   : > { %16775 = vst [vmem:[#allocation37_spill] sm:$0xff] %v13121_v58  ;;  %v3812_v10 = vsub.f32 %v12659_v31, %v16113_v1  ;;  %v3918_v41 = vand.u32 4294901760, %v3917_v2  ;;  %9273 = vmatmul.mubr.f32.vlgmr.msra.gmra.mrb[16].mxu0 %v16525_v7  ;;  %v16115_v50 = vand.u32 4294901760, %v12681_v30  ;;  %v16116_v16 = vand.u32 4294901760, %v12686_v13  ;;  %v13147_v2 = vpop.f32.mrb[14].mxu1 }
 0x135   : > { %16773 = vst [vmem:[#allocation5_spill] sm:$0xff] %v13113_v35  ;;  %10141 = vmatpush3.bf16.msra.mxu1 %v13113_v35  ;;  %v3925_v40 = vand.u32 4294901760, %v3924_v59  ;;  %v3806_v57 = vand.u32 4294901760, %v3805_v4  ;;  %10093 = vmatpush3.bf16.msra.mxu0 %v16649_v15  ;;  %v3938_v59 = vsub.f32 %v12673_v55, %v16114_v21  ;;  %v13158_v4 = vpop.f32.mrb[15].mxu1  ;;  %v16117_v1 = vand.u32 4294901760, %v12881_v46 }
 0x136   : > { %10143 = vmatprep.subr.bf16.mxu1 %v10142_v0  ;;  %v3813_v3 = vand.u32 4294901760, %v3812_v10  ;;  %9275 = vmatprep.mubr.f32.mxu0 %v16527_v43  ;;  %v3931_v0 = vsub.f32 %v12668_v23, %v16112_v12  ;;  %v3819_v15 = vsub.f32 %v12681_v30, %v16115_v50  ;;  %v16118_v21 = vand.u32 4294901760, %v12886_v53 }
 0x137   : > { %v13149_v25 = vpack.c.bf16 %v3925_v40, %v3918_v41  ;;  %10095 = vmatprep.subr.bf16.mxu0 %v16651_v47  ;;  %v3826_v41 = vsub.f32 %v12686_v13, %v16116_v16  ;;  %v3939_v12 = vand.u32 4294901760, %v3938_v59  ;;  %v16780_v16 = vld [vmem:[#allocation59_spill] sm:$0xff] }
 0x138   : > { %v13160_v10 = vpack.c.bf16 %v3813_v3, %v3806_v57  ;;  %v3932_v40 = vand.u32 4294901760, %v3931_v0  ;;  %9276 = vmatmul.mubr.f32.gmra.mrb[18].mxu0 %v16530_v42  ;;  %v16119_v3 = vand.u32 4294901760, %v12891_v22  ;;  %v16120_v57 = vand.u32 4294901760, %v12896_v29 }
 0x139   : > { %16776 = vst [vmem:[#allocation43_spill] sm:$0xff] %v13149_v25  ;;  %v3820_v25 = vand.u32 4294901760, %v3819_v15  ;;  %v3827_v58 = vand.u32 4294901760, %v3826_v41  ;;  %10097 = vmatpush3.bf16.msra.mxu0 %v16651_v47  ;;  %9278 = vmatprep.mubr.f32.mxu0 %v16534_v32  ;;  %v3945_v0 = vsub.f32 %v12881_v46, %v16117_v1  ;;  %v3952_v59 = vsub.f32 %v12886_v53, %v16118_v21 }
 0x13a   : > { %16777 = vst [vmem:[#allocation4_spill] sm:$0xff] %v13160_v10  ;;  %v13175_v50 = vpack.c.bf16 %v3939_v12, %v3932_v40  ;;  %10099 = vmatprep.subr.bf16.mxu0 %v16656_v8  ;;  %v3833_v47 = vsub.f32 %v12891_v22, %v16119_v3  ;;  %v3840_v12 = vsub.f32 %v12896_v29, %v16120_v57  ;;  %v16121_v1 = vand.u32 4294901760, %v16780_v16 }
 0x13b   : > { %v13184_v15 = vpack.c.bf16 %v3827_v58, %v3820_v25  ;;  %v3946_v41 = vand.u32 4294901760, %v3945_v0  ;;  %v3953_v40 = vand.u32 4294901760, %v3952_v59  ;;  %v16782_v58 = vld [vmem:[#allocation27_spill] sm:$0xff] }
 0x13c   : > { %16778 = vst [vmem:[#allocation66_spill] sm:$0xff] %v13175_v50  ;;  %v16781_v50 = vld [vmem:[#allocation23_spill] sm:$0xff]  ;;  %9279 = vmatmul.mubr.f32.gmra.mrb[20].mxu0 %v16538_v37  ;;  %v3834_v21 = vand.u32 4294901760, %v3833_v47  ;;  %v3841_v20 = vand.u32 4294901760, %v3840_v12  ;;  %v16124_v25 = vand.u32 4294901760, %v16782_v58  ;;  %v3959_v0 = vsub.f32 %v16780_v16, %v16121_v1  ;;  %v16784_v47 = vld [vmem:[#allocation17_spill] sm:$0xff] }
 0x13d   : > { %16779 = vst [vmem:[#allocation67_spill] sm:$0xff] %v13184_v15  ;;  %v16122_v10 = vand.u32 4294901760, %v16781_v50  ;;  %v16123_v15 = vand.u32 4294901760, %v12922_v11  ;;  %10101 = vmatpush3.bf16.msra.mxu0 %v16656_v8  ;;  %9281 = vmatprep.mubr.f32.mxu0 %v16543_v19  ;;  %v13199_v3 = vpack.c.bf16 %v3953_v40, %v3946_v41 }
 0x13e   : > { %10103 = vmatprep.subr.bf16.mxu0 %v16784_v47  ;;  %v13208_v12 = vpack.c.bf16 %v3841_v20, %v3834_v21  ;;  %v3847_v8 = vsub.f32 %v16782_v58, %v16124_v25  ;;  %v3960_v40 = vand.u32 4294901760, %v3959_v0  ;;  %v16785_v21 = vld [vmem:[#allocation38_spill] sm:$0xff]  ;;  %v16796_v25 = vld [vmem:[#allocation55_spill] sm:$0xff] }
 0x13f   : > { %16783 = vst [vmem:[#allocation68_spill] sm:$0xff] %v13199_v3  ;;  %v3966_v59 = vsub.f32 %v16781_v50, %v16122_v10  ;;  %v3854_v41 = vsub.f32 %v12922_v11, %v16123_v15  ;;  %v16795_v15 = vld [vmem:[#allocation14_spill] sm:$0xff]  ;;  %v13419_v11 = vld [vmem:[%s15868_s2 + $0x130] sm:$0xff] }
 0x140   : > { %9282 = vmatmul.mubr.f32.gmra.mrb[22].mxu0 %v16643_v26  ;;  %v3848_v1 = vand.u32 4294901760, %v3847_v8  ;;  %v16787_v8 = vld [vmem:[#allocation16_spill] sm:$0xff] }
 0x141   : > { %v3967_v57 = vand.u32 4294901760, %v3966_v59  ;;  %v3855_v3 = vand.u32 4294901760, %v3854_v41  ;;  %10105 = vmatpush3.bf16.msra.mxu0 %v16784_v47  ;;  %9306 = vmatprep.mubr.f32.mxu0 %v16523_v54  ;;  %v16786_v59 = vld [vmem:[#allocation18_spill] sm:$0xff]  ;;  %v16788_v54 = vld [vmem:[#allocation20_spill] sm:$0xff]  ;;  %v16789_v47 = vld [vmem:[#allocation21_spill] sm:$0xff] }
 0x142   : > { %10107 = vmatprep.subr.bf16.mxu0 %v16785_v21 }
 0x143   : > { %v13219_v20 = vpack.c.bf16 %v3967_v57, %v3960_v40  ;;  %v13222_v10 = vpack.c.bf16 %v3855_v3, %v3848_v1  ;;  %v16790_v1 = vld [vmem:[#allocation24_spill] sm:$0xff]  ;;  %v16794_v3 = vld [vmem:[#allocation39_spill] sm:$0xff] }
 0x144   : > { %v16791_v40 = vld [vmem:[#allocation64_spill] sm:$0xff] }
 0x145   : > { %10109 = vmatpush3.bf16.msra.mxu0 %v16785_v21  ;;  %v16792_v21 = vld [vmem:[#allocation53_spill] sm:$0xff] }
 0x146   : > { %9304 = vmatprep.subr.mxu0 %v16786_v59 }
 0x149   : > { %9305 = vmatpush3.msra.mxu0 %v16786_v59  ;;  %v13245_v59 = vld [vmem:[%s15868_s2 + $0x180] sm:$0xff] }
 0x14a   : > { %9307 = vmatmul.mubr.f32.vlgmr.msra.gmra.mrb[16].mxu0 %v16525_v7  ;;  %10271 = vmatprep.subr.bf16.mxu0 %v16789_v47  ;;  %v13250_v7 = vld [vmem:[%s15868_s2 + $0x188] sm:$0xff]  ;;  %v16125_v57 = vand.u32 4294901760, %v13245_v59  ;;  %v13370_v47 = vld [vmem:[%s15868_s2 + $0x120] sm:$0xff] }
 0x14b   : > { %9309 = vmatprep.mubr.f32.mxu0 %v16527_v43  ;;  %10273 = vmatpush3.bf16.msra.mxu0 %v16791_v40  ;;  %v16126_v41 = vand.u32 4294901760, %v13250_v7  ;;  %v13375_v40 = vld [vmem:[%s15868_s2 + $0x128] sm:$0xff]  ;;  %v16819_v29 = vand.u32 4294901760, %v13370_v47 }
 0x14c   : > { %10275 = vmatprep.subr.bf16.mxu0 %v16792_v21 }
 0x14d   : > { %v13276_v0 = vsub.f32 %v13250_v7, %v16126_v41 }
 0x14e   : > { %9310 = vmatmul.mubr.f32.gmra.mrb[18].mxu0 %v16530_v42  ;;  %v16800_v42 = vld [vmem:[#allocation42_spill] sm:$0xff] }
 0x14f   : > { %9312 = vmatprep.mubr.f32.mxu0 %v16534_v32  ;;  %10277 = vmatpush3.bf16.msra.mxu0 %v16794_v3  ;;  %v16797_v32 = vld [vmem:[#allocation36_spill] sm:$0xff]  ;;  %16799 = vst [vmem:[#allocation38_spill] sm:$0xff] %v13276_v0  ;;  %v13307_v3 = vld [vmem:[%s15868_s2 + $0x108] sm:$0xff] }
 0x150   : > { %10279 = vmatprep.subr.bf16.mxu0 %v16795_v15  ;;  %v13271_v15 = vsub.f32 %v13245_v59, %v16125_v57  ;;  %v16138_v21 = vand.u32 4294901760, %v13307_v3 }
 0x152   : > { %9313 = vmatmul.mubr.f32.gmra.mrb[20].mxu0 %v16538_v37  ;;  %16798 = vst [vmem:[#allocation17_spill] sm:$0xff] %v13271_v15  ;;  %v16127_v57 = vand.u32 4294901760, %v13271_v15  ;;  %v16802_v37 = vld [vmem:[#allocation2_spill] sm:$0xff] }
 0x153   : > { %9315 = vmatprep.mubr.f32.mxu0 %v16543_v19  ;;  %10281 = vmatpush3.bf16.msra.mxu0 %v16796_v25  ;;  %v16128_v25 = vand.u32 4294901760, %v13276_v0 }
 0x154   : > { %10283 = vmatprep.subr.bf16.mxu0 %v16797_v32  ;;  %v16801_v32 = vld [vmem:[#allocation47_spill] sm:$0xff] }
 0x155   : > { %v5122_v19 = vsub.f32 %v13276_v0, %v16128_v25  ;;  %v13319_v25 = vld [vmem:[%s15868_s2 + $0x198] sm:$0xff]  ;;  %v13324_v0 = vld [vmem:[%s15868_s2 + $0x110] sm:$0xff] }
 0x156   : > { %9316 = vmatmul.mubr.f32.gmra.mrb[22].mxu0 %v16643_v26  ;;  %v5115_v26 = vsub.f32 %v13271_v15, %v16127_v57  ;;  %v13314_v57 = vld [vmem:[%s15868_s2 + $0x190] sm:$0xff]  ;;  %v13357_v15 = vld [vmem:[%s15868_s2 + $0x1a8] sm:$0xff] }
 0x157   : > { %10285 = vmatpush3.bf16.msra.mxu0 %v16800_v42  ;;  %v5123_v42 = vand.u32 4294901760, %v5122_v19  ;;  %v13352_v19 = vld [vmem:[%s15868_s2 + $0x1a0] sm:$0xff]  ;;  %v16806_v41 = vand.u32 4294901760, %v13314_v57 }
 0x158   : > { %10287 = vmatprep.subr.bf16.mxu0 %v16801_v32  ;;  %v13302_v32 = vld [vmem:[%s15868_s2 + $0x100] sm:$0xff] }
 0x159   : > { %v16803_v22 = vand.u32 4294901760, %v13302_v32  ;;  %v16846_v43 = vand.u32 4294901760, %v13302_v32 }
 0x15b   : > { %10289 = vmatpush3.bf16.msra.mxu0 %v16802_v37  ;;  %v5116_v37 = vand.u32 4294901760, %v5115_v26  ;;  %v13347_v26 = vsub.f32 %v13302_v32, %v16803_v22  ;;  %v13365_v22 = vsub.f32 %v13307_v3, %v16138_v21  ;;  %v16810_v21 = vand.u32 4294901760, %v13324_v0 }
 0x15c   : > { %10291 = vmatprep.subr.bf16.mxu0 %v12980_v38  ;;  %v13333_v38 = vld [vmem:[%s15868_s2 + $0x118] sm:$0xff] }
 0x15d   : > { %16804 = vst [vmem:[#allocation18_spill] sm:$0xff] %v13347_v26  ;;  %16805 = vst [vmem:[#allocation16_spill] sm:$0xff] %v13365_v22  ;;  %v16812_v58 = vand.u32 4294901760, %v13333_v38  ;;  %v16818_v16 = vand.u32 4294901760, %v13347_v26  ;;  %v16823_v13 = vand.u32 4294901760, %v13365_v22 }
 0x15f   : > { %10293 = vmatpush3.bf16.msra.mxu0 %v13049_v52  ;;  %v10334_v52 = vpack.c.bf16 %v5123_v42, %v5116_v37  ;;  %v16808_v42 = vand.u32 4294901760, %v13319_v25  ;;  %v5003_v50 = vsub.f32 %v13347_v26, %v16818_v16  ;;  %v5010_v23 = vsub.f32 %v13365_v22, %v16823_v13 }
 0x160   : > { %10295 = vmatprep.subr.bf16.mxu0 %v13058_v34  ;;  %v13395_v34 = vld [vmem:[%s15868_s2 + $0x1b0] sm:$0xff] }
 0x161   : > { %v13385_v37 = vsub.f32 %v13319_v25, %v16808_v42  ;;  %v13405_v42 = vsub.f32 %v13333_v38, %v16812_v58  ;;  %v16816_v58 = vand.u32 4294901760, %v13357_v15  ;;  %v16824_v55 = vand.u32 4294901760, %v13395_v34 }
 0x163   : > { %10297 = vmatpush3.bf16.msra.mxu0 %v13080_v44  ;;  %16809 = vst [vmem:[#allocation24_spill] sm:$0xff] %v13385_v37  ;;  %v13390_v44 = vsub.f32 %v13324_v0, %v16810_v21  ;;  %16813 = vst [vmem:[#allocation70_spill] sm:$0xff] %v13405_v42  ;;  %v13433_v53 = vsub.f32 %v13357_v15, %v16816_v58  ;;  %v13438_v21 = vld [vmem:[%s15868_s2 + $0x138] sm:$0xff]  ;;  %v13460_v16 = vsub.f32 %v13395_v34, %v16824_v55 }
 0x164   : > { %10299 = vmatprep.subr.bf16.mxu0 %v13093_v36  ;;  %v13380_v36 = vsub.f32 %v13314_v57, %v16806_v41  ;;  %v13400_v41 = vld [vmem:[%s15868_s2 + $0x1b8] sm:$0xff]  ;;  %v16829_v58 = vand.u32 4294901760, %v13385_v37  ;;  %v16832_v55 = vand.u32 4294901760, %v13419_v11  ;;  %v16834_v49 = vand.u32 4294901760, %v13438_v21 }
 0x165   : > { %16811 = vst [vmem:[#allocation69_spill] sm:$0xff] %v13390_v44  ;;  %16817 = vst [vmem:[#allocation72_spill] sm:$0xff] %v13433_v53  ;;  %v16826_v26 = vand.u32 4294901760, %v13400_v41  ;;  %v16830_v13 = vand.u32 4294901760, %v13390_v44 }
 0x166   : > { %16807 = vst [vmem:[#allocation20_spill] sm:$0xff] %v13380_v36  ;;  %16825 = vst [vmem:[#allocation75_spill] sm:$0xff] %v13460_v16  ;;  %v16828_v5 = vand.u32 4294901760, %v13380_v36  ;;  %v5136_v31 = vsub.f32 %v13385_v37, %v16829_v58  ;;  %v5004_v58 = vand.u32 4294901760, %v5003_v50  ;;  %v16841_v50 = vand.u32 4294901760, %v13250_v7 }
 0x167   : > { %10301 = vmatpush3.bf16.msra.mxu0 %v13113_v35  ;;  %v13446_v35 = vsub.f32 %v13370_v47, %v16819_v29  ;;  %v13465_v29 = vsub.f32 %v13400_v41, %v16826_v26  ;;  %v5017_v22 = vsub.f32 %v13390_v44, %v16830_v13  ;;  %v16831_v26 = vand.u32 4294901760, %v13405_v42 }
 0x168   : > { %10335 = vmatprep.subr.bf16.mxu0 %v10334_v52  ;;  %v16814_v52 = vand.u32 4294901760, %v13352_v19  ;;  %v13492_v44 = vsub.f32 %v13419_v11, %v16832_v55  ;;  %v13505_v55 = vsub.f32 %v13438_v21, %v16834_v49 }
 0x169   : > { %16820 = vst [vmem:[#allocation73_spill] sm:$0xff] %v13446_v35  ;;  %16827 = vst [vmem:[#allocation76_spill] sm:$0xff] %v13465_v29  ;;  %v5024_v63 = vsub.f32 %v13405_v42, %v16831_v26  ;;  %v5011_v26 = vand.u32 4294901760, %v5010_v23  ;;  %v5137_v42 = vand.u32 4294901760, %v5136_v31  ;;  %v5018_v13 = vand.u32 4294901760, %v5017_v22  ;;  %v13517_v31 = vld [vmem:[%s15868_s2 + $0x140] sm:$0xff] }
 0x16a   : > { %v13428_v46 = vsub.f32 %v13352_v19, %v16814_v52  ;;  %v16821_v52 = vand.u32 4294901760, %v13375_v40  ;;  %16833 = vst [vmem:[#allocation77_spill] sm:$0xff] %v13492_v44  ;;  %16835 = vst [vmem:[#allocation78_spill] sm:$0xff] %v13505_v55  ;;  %v16837_v23 = vand.u32 4294901760, %v13433_v53  ;;  %v16838_v22 = vand.u32 4294901760, %v13446_v35 }
 0x16b   : > { %v5025_v60 = vand.u32 4294901760, %v5024_v63 }
 0x16c   : > { %16815 = vst [vmem:[#allocation71_spill] sm:$0xff] %v13428_v46  ;;  %v13451_v30 = vsub.f32 %v13375_v40, %v16821_v52  ;;  %v5129_v52 = vsub.f32 %v13380_v36, %v16828_v5  ;;  %v16836_v24 = vand.u32 4294901760, %v13428_v46  ;;  %v5150_v5 = vsub.f32 %v13433_v53, %v16837_v23  ;;  %v13529_v23 = vld [vmem:[%s15868_s2 + $0x148] sm:$0xff] }
 0x16d   : > { %v5031_v49 = vsub.f32 %v13446_v35, %v16838_v22  ;;  %v16840_v36 = vand.u32 4294901760, %v13245_v59  ;;  %v16843_v35 = vand.u32 4294901760, %v13465_v29  ;;  %v16847_v59 = vand.u32 4294901760, %v13307_v3 }
 0x16e   : > { %16822 = vst [vmem:[#allocation74_spill] sm:$0xff] %v13451_v30  ;;  %v5130_v37 = vand.u32 4294901760, %v5129_v52  ;;  %v5143_v17 = vsub.f32 %v13428_v46, %v16836_v24  ;;  %v16839_v63 = vand.u32 4294901760, %v13451_v30  ;;  %v16842_v46 = vand.u32 4294901760, %v13460_v16 }
 0x16f   : > { %v13535_v53 = vpack.c.bf16 %v16841_v50, %v16840_v36  ;;  %v16844_v24 = vand.u32 4294901760, %v13480_v45  ;;  %v13552_v7 = vpack.c.bf16 %v16847_v59, %v16846_v43  ;;  %v4807_v50 = vand.u32 4294901760, %v13517_v31 }
 0x170   : > { %v5038_v52 = vsub.f32 %v13451_v30, %v16839_v63  ;;  %v5157_v22 = vsub.f32 %v13460_v16, %v16842_v46  ;;  %v5164_v63 = vsub.f32 %v13465_v29, %v16843_v35  ;;  %v16849_v46 = vand.u32 4294901760, %v13314_v57 }
 0x171   : > { %v13546_v30 = vsub.f32 %v13480_v45, %v16844_v24  ;;  %16848 = vst [vmem:[#allocation80_spill] sm:$0xff] %v13552_v7  ;;  %v16850_v16 = vand.u32 4294901760, %v13319_v25  ;;  %v16852_v29 = vand.u32 4294901760, %v13324_v0  ;;  %v16853_v24 = vand.u32 4294901760, %v13333_v38 }
 0x172   : > { %v5144_v32 = vand.u32 4294901760, %v5143_v17  ;;  %v5151_v3 = vand.u32 4294901760, %v5150_v5  ;;  %v16855_v43 = vand.u32 4294901760, %v13497_v9  ;;  %v4810_v36 = vand.u32 4294901760, %v13529_v23  ;;  %v3489_v5 = vld [vmem:[%s15868_s2 + $0x1d0] sm:$0xff] }
 0x173   : > { %16845 = vst [vmem:[#allocation79_spill] sm:$0xff] %v13546_v30  ;;  %v13560_v35 = vpack.c.bf16 %v16850_v16, %v16849_v46  ;;  %v13566_v48 = vpack.c.bf16 %v16853_v24, %v16852_v29  ;;  %v13574_v57 = vpack.c.bf16 %v5011_v26, %v5004_v58  ;;  %v5032_v25 = vand.u32 4294901760, %v5031_v49  ;;  %v3490_v58 = vld [vmem:[%s15868_s2 + $0x1d8] sm:$0xff] }
 0x174   : > { %v13571_v59 = vsub.f32 %v13497_v9, %v16855_v43  ;;  %v5039_v16 = vand.u32 4294901760, %v5038_v52  ;;  %v16857_v46 = vand.u32 4294901760, %v13492_v44  ;;  %v13579_v38 = vpack.c.bf16 %v5137_v42, %v5130_v37  ;;  %v3473_v43 = vld [vmem:[%s15868_s2 + $0x150] sm:$0xff] }
 0x175   : > { %16851 = vst [vmem:[#allocation81_spill] sm:$0xff] %v13560_v35  ;;  %16854 = vst [vmem:[#allocation82_spill] sm:$0xff] %v13566_v48  ;;  %v5158_v29 = vand.u32 4294901760, %v5157_v22  ;;  %v16858_v26 = vand.u32 4294901760, %v13352_v19  ;;  %v16859_v49 = vand.u32 4294901760, %v13357_v15  ;;  %v5165_v24 = vand.u32 4294901760, %v5164_v63 }
 0x176   : > { %16856 = vst [vmem:[#allocation83_spill] sm:$0xff] %v13571_v59  ;;  %v5045_v0 = vsub.f32 %v13492_v44, %v16857_v46  ;;  %v16861_v37 = vand.u32 4294901760, %v13505_v55  ;;  %v13598_v22 = vsub.f32 %v13517_v31, %v4807_v50  ;;  %v3474_v19 = vld [vmem:[%s15868_s2 + $0x158] sm:$0xff]  ;;  %v16863_v15 = vand.u32 4294901760, %v13370_v47  ;;  %v3491_v47 = vld [vmem:[%s15868_s2 + $0x1e0] sm:$0xff] }
 0x177   : > { %v13592_v52 = vpack.c.bf16 %v16859_v49, %v16858_v26  ;;  %v16864_v46 = vand.u32 4294901760, %v13375_v40  ;;  %v13612_v26 = vpack.c.bf16 %v5025_v60, %v5018_v13  ;;  %v13614_v49 = vpack.c.bf16 %v5151_v3, %v5144_v32  ;;  %v3492_v60 = vld [vmem:[%s15868_s2 + $0x1e8] sm:$0xff]  ;;  %v3475_v3 = vld [vmem:[%s15868_s2 + $0x160] sm:$0xff] }
 0x178   : > { %v5052_v42 = vsub.f32 %v13505_v55, %v16861_v37  ;;  %16862 = vst [vmem:[#allocation85_spill] sm:$0xff] %v13598_v22  ;;  %v13618_v37 = vsub.f32 %v13529_v23, %v4810_v36  ;;  %v13620_v17 = vpack.c.bf16 %v5039_v16, %v5032_v25  ;;  %v5046_v55 = vand.u32 4294901760, %v5045_v0  ;;  %v3476_v25 = vld [vmem:[%s15868_s2 + $0x168] sm:$0xff] }
 0x179   : > { %16860 = vst [vmem:[#allocation84_spill] sm:$0xff] %v13592_v52  ;;  %v13610_v63 = vpack.c.bf16 %v16864_v46, %v16863_v15  ;;  %v4861_v44 = vand.u32 4294901760, %v3489_v5  ;;  %v4864_v52 = vand.u32 4294901760, %v3490_v58  ;;  %v16867_v40 = vand.u32 4294901760, %v13546_v30 }
 0x17a   : > { %16866 = vst [vmem:[#allocation87_spill] sm:$0xff] %v13618_v37  ;;  %v4813_v23 = vand.u32 4294901760, %v3473_v43  ;;  %v4816_v32 = vand.u32 4294901760, %v3474_v19  ;;  %v16868_v16 = vand.u32 4294901760, %v13395_v34  ;;  %v16869_v0 = vand.u32 4294901760, %v13400_v41 }
 0x17b   : > { %16865 = vst [vmem:[#allocation86_spill] sm:$0xff] %v13610_v63  ;;  %v13631_v13 = vsub.f32 %v13546_v30, %v16867_v40  ;;  %v13645_v46 = vpack.c.bf16 %v5165_v24, %v5158_v29  ;;  %v5053_v40 = vand.u32 4294901760, %v5052_v42  ;;  %v16871_v30 = vand.u32 4294901760, %v13419_v11  ;;  %v3493_v29 = vld [vmem:[%s15868_s2 + $0x1f0] sm:$0xff]  ;;  %v3494_v11 = vld [vmem:[%s15868_s2 + $0x1f8] sm:$0xff] }
 0x17c   : > { %v13643_v15 = vpack.c.bf16 %v16869_v0, %v16868_v16  ;;  %v16872_v63 = vand.u32 4294901760, %v13438_v21  ;;  %v16874_v35 = vand.u32 4294901760, %v13571_v59  ;;  %v4867_v41 = vand.u32 4294901760, %v3491_v47 }
 0x17d   : > { %v4870_v16 = vand.u32 4294901760, %v3492_v60  ;;  %v13664_v24 = vsub.f32 %v3489_v5, %v4861_v44  ;;  %v4819_v21 = vand.u32 4294901760, %v3475_v3  ;;  %v4822_v42 = vand.u32 4294901760, %v3476_v25 }
 0x17e   : > { %16870 = vst [vmem:[#allocation88_spill] sm:$0xff] %v13643_v15  ;;  %v13652_v48 = vpack.c.bf16 %v16872_v63, %v16871_v30  ;;  %v5178_v7 = vsub.f32 %v13571_v59, %v16874_v35  ;;  %v13666_v30 = vsub.f32 %v3490_v58, %v4864_v52  ;;  %v5172_v35 = vand.u32 4294901760, %v13631_v13  ;;  %v3477_v13 = vld [vmem:[%s15868_s2 + $0x170] sm:$0xff] }
 0x17f   : > { %16875 = vst [vmem:[#allocation90_spill] sm:$0xff] %v13664_v24  ;;  %v13669_v63 = vsub.f32 %v3473_v43, %v4813_v23  ;;  %v13671_v0 = vsub.f32 %v3474_v19, %v4816_v32  ;;  %v16879_v34 = vand.u32 4294901760, %v13480_v45  ;;  %v16880_v31 = vand.u32 4294901760, %v13497_v9 }
 0x180   : > { %16873 = vst [vmem:[#allocation89_spill] sm:$0xff] %v13652_v48  ;;  %16876 = vst [vmem:[#allocation91_spill] sm:$0xff] %v13666_v30  ;;  %v16882_v48 = vand.u32 4294901760, %v13598_v22  ;;  %v4873_v58 = vand.u32 4294901760, %v3493_v29  ;;  %v4876_v15 = vand.u32 4294901760, %v3494_v11  ;;  %v13685_v43 = vpack.c.bf16 %v4810_v36, %v4807_v50  ;;  %v3478_v36 = vld [vmem:[%s15868_s2 + $0x178] sm:$0xff] }
 0x181   : > { %16877 = vst [vmem:[#allocation92_spill] sm:$0xff] %v13669_v63  ;;  %16878 = vst [vmem:[#allocation93_spill] sm:$0xff] %v13671_v0  ;;  %v13677_v59 = vpack.c.bf16 %v16880_v31, %v16879_v34  ;;  %v13687_v19 = vpack.c.bf16 %v5053_v40, %v5046_v55  ;;  %v5179_v61 = vand.u32 4294901760, %v5178_v7  ;;  %v13689_v45 = vsub.f32 %v3491_v47, %v4867_v41 }
 0x182   : > { %v5059_v5 = vsub.f32 %v13598_v22, %v16882_v48  ;;  %16883 = vst [vmem:[#allocation95_spill] sm:$0xff] %v13685_v43  ;;  %v13691_v9 = vsub.f32 %v3492_v60, %v4870_v16  ;;  %v13695_v48 = vsub.f32 %v3475_v3, %v4819_v21  ;;  %v13697_v22 = vsub.f32 %v3476_v25, %v4822_v42 }
 0x183   : > { %16881 = vst [vmem:[#allocation94_spill] sm:$0xff] %v13677_v59  ;;  %16884 = vst [vmem:[#allocation96_spill] sm:$0xff] %v13689_v45  ;;  %v4825_v50 = vand.u32 4294901760, %v3477_v13  ;;  %v13704_v47 = vpack.c.bf16 %v4864_v52, %v4861_v44  ;;  %v16889_v60 = vand.u32 4294901760, %v13618_v37  ;;  %v13709_v34 = vsub.f32 %v3493_v29, %v4873_v58 }
 0x184   : > { %16885 = vst [vmem:[#allocation97_spill] sm:$0xff] %v13691_v9  ;;  %16886 = vst [vmem:[#allocation98_spill] sm:$0xff] %v13695_v48  ;;  %v13711_v3 = vsub.f32 %v3494_v11, %v4876_v15  ;;  %v13713_v25 = vpack.c.bf16 %v4816_v32, %v4813_v23  ;;  %v5060_v31 = vand.u32 4294901760, %v5059_v5  ;;  %v4828_v59 = vand.u32 4294901760, %v3478_v36 }
 0x185   : > { %16887 = vst [vmem:[#allocation99_spill] sm:$0xff] %v13697_v22  ;;  %16888 = vst [vmem:[#allocation100_spill] sm:$0xff] %v13704_v47  ;;  %v5066_v40 = vsub.f32 %v13618_v37, %v16889_v60  ;;  %v16893_v7 = vand.u32 4294901760, %v13664_v24  ;;  %v16894_v52 = vand.u32 4294901760, %v13666_v30  ;;  %v16895_v23 = vand.u32 4294901760, %v13669_v63  ;;  %v16933_v47 = vld [vmem:[#allocation22_spill] sm:$0xff] }
 0x186   : > { %16890 = vst [vmem:[#allocation101_spill] sm:$0xff] %v13709_v34  ;;  %16891 = vst [vmem:[#allocation102_spill] sm:$0xff] %v13711_v3  ;;  %v16896_v5 = vand.u32 4294901760, %v13671_v0  ;;  %v13731_v43 = vsub.f32 %v3477_v13, %v4825_v50  ;;  %v13733_v37 = vpack.c.bf16 %v4870_v16, %v4867_v41  ;;  %v13737_v29 = vpack.c.bf16 %v4822_v42, %v4819_v21 }
 0x187   : > { %16892 = vst [vmem:[#allocation103_spill] sm:$0xff] %v13713_v25  ;;  %v5185_v44 = vsub.f32 %v13664_v24, %v16893_v7  ;;  %v5192_v60 = vsub.f32 %v13666_v30, %v16894_v52  ;;  %v5073_v32 = vsub.f32 %v13669_v63, %v16895_v23  ;;  %v5067_v7 = vand.u32 4294901760, %v5066_v40 }
 0x188   : > { %v5080_v55 = vsub.f32 %v13671_v0, %v16896_v5  ;;  %16897 = vst [vmem:[#allocation104_spill] sm:$0xff] %v13731_v43  ;;  %16898 = vst [vmem:[#allocation105_spill] sm:$0xff] %v13733_v37  ;;  %v13739_v11 = vpack.c.bf16 %v5179_v61, %v5172_v35  ;;  %v16900_v30 = vand.u32 4294901760, %v13689_v45  ;;  %v16901_v63 = vand.u32 4294901760, %v13691_v9 }
 0x189   : > { %16899 = vst [vmem:[#allocation106_spill] sm:$0xff] %v13737_v29  ;;  %v13747_v5 = vsub.f32 %v3478_v36, %v4828_v59  ;;  %v5186_v41 = vand.u32 4294901760, %v5185_v44  ;;  %v5193_v16 = vand.u32 4294901760, %v5192_v60  ;;  %v16903_v40 = vand.u32 4294901760, %v13695_v48  ;;  %v16927_v29 = vld [vmem:[#allocation13_spill] sm:$0xff] }
 0x18a   : > { %v5199_v23 = vsub.f32 %v13689_v45, %v16900_v30  ;;  %v5206_v13 = vsub.f32 %v13691_v9, %v16901_v63  ;;  %v16904_v21 = vand.u32 4294901760, %v13697_v22  ;;  %v5074_v42 = vand.u32 4294901760, %v5073_v32  ;;  %v1312_v45 = vpop.f32.mrb[0].mxu0 }
 0x18b   : > { %16902 = vst [vmem:[#allocation107_spill] sm:$0xff] %v13747_v5  ;;  %v5087_v52 = vsub.f32 %v13695_v48, %v16903_v40  ;;  %v5081_v35 = vand.u32 4294901760, %v5080_v55  ;;  %v13756_v24 = vpack.c.bf16 %v4876_v15, %v4873_v58  ;;  %v13758_v63 = vpack.c.bf16 %v5067_v7, %v5060_v31  ;;  %v1314_v55 = vpop.f32.mrb[1].mxu0  ;;  %v16910_v58 = vld [vmem:[#allocation63_spill] sm:$0xff] }
 0x18c   : > { %v5094_v61 = vsub.f32 %v13697_v22, %v16904_v21  ;;  %v16906_v36 = vand.u32 4294901760, %v13709_v34  ;;  %v16907_v60 = vand.u32 4294901760, %v13711_v3  ;;  %v13766_v48 = vpack.c.bf16 %v4828_v59, %v4825_v50  ;;  %v16909_v21 = vld [vmem:[#allocation62_spill] sm:$0xff] }
 0x18d   : > { %16905 = vst [vmem:[#allocation108_spill] sm:$0xff] %v13756_v24  ;;  %v10794_v32 = vadd.f32 %v1312_v45, %v16909_v21  ;;  %v5200_v22 = vand.u32 4294901760, %v5199_v23  ;;  %v5207_v30 = vand.u32 4294901760, %v5206_v13  ;;  %v16241_v15 = vand.u32 4294901760, %v13747_v5  ;;  %v1319_v23 = vpop.f32.mrb[2].mxu0 }
 0x18e   : > { %v5213_v44 = vsub.f32 %v13709_v34, %v16906_v36  ;;  %v5220_v40 = vsub.f32 %v13711_v3, %v16907_v60  ;;  %16908 = vst [vmem:[#allocation109_spill] sm:$0xff] %v13766_v48  ;;  %v10795_v31 = vadd.f32 %v1314_v55, %v16910_v58  ;;  %v13771_v7 = vpack.c.bf16 %v5193_v16, %v5186_v41  ;;  %v16912_v55 = vld [vmem:[#allocation65_spill] sm:$0xff]  ;;  %v1321_v16 = vpop.f32.mrb[3].mxu0  ;;  %v16914_v58 = vld [vmem:[#allocation54_spill] sm:$0xff]  ;;  %v16923_v48 = vld [vmem:[#allocation35_spill] sm:$0xff] }
 0x18f   : > { %v5088_v9 = vand.u32 4294901760, %v5087_v52  ;;  %v5095_v0 = vand.u32 4294901760, %v5094_v61  ;;  %vm3311_vm2 = vcmp.ge.f32.partialorder %v10794_v32, 0.0  ;;  %v3351_v36 = vmul.f32 0.2, %v10794_v32 }
 0x190   : > { %v13773_v34 = vpack.c.bf16 %v5081_v35, %v5074_v42  ;;  %v16911_v59 = vand.u32 4294901760, %v13731_v43  ;;  %vm3312_vm3 = vcmp.ge.f32.partialorder %v10795_v31, 0.0  ;;  %v3352_v45 = vmul.f32 0.2, %v10795_v31 }
 0x191   : > { %v5214_v13 = vand.u32 4294901760, %v5213_v44  ;;  %v5221_v60 = vand.u32 4294901760, %v5220_v40  ;;  %v3391_v21 = vsel %vm3311_vm2, %v10794_v32, %v3351_v36  ;;  %v10796_v41 = vadd.f32 %v1319_v23, %v16912_v55  ;;  %v1326_v36 = vpop.f32.mrb[4].mxu0  ;;  %v16918_v32 = vld [vmem:[#allocation57_spill] sm:$0xff] }
 0x192   : > { %v13778_v50 = vsub.f32 %v13731_v43, %v16911_v59  ;;  %v13781_v52 = vpack.c.bf16 %v5207_v30, %v5200_v22  ;;  %v13786_v61 = vsub.f32 %v13747_v5, %v16241_v15  ;;  %v13788_v42 = vand.u32 4294901760, %v3391_v21  ;;  %v1328_v55 = vpop.f32.mrb[5].mxu0 }
 0x193   : > { %v3392_v35 = vsel %vm3312_vm3, %v10795_v31, %v3352_v45  ;;  %v10797_v59 = vadd.f32 %v1321_v16, %v16914_v58  ;;  %v13791_v43 = vpack.c.bf16 %v5095_v0, %v5088_v9  ;;  %vm3316_vm4 = vcmp.ge.f32.partialorder %v10796_v41, 0.0  ;;  %v16916_v0 = vld [vmem:[#allocation56_spill] sm:$0xff] }
 0x194   : > { %16913 = vst [vmem:[#allocation62_spill] sm:$0xff] %v13788_v42  ;;  %v13793_v44 = vand.u32 4294901760, %v3392_v35  ;;  %v3356_v40 = vmul.f32 0.2, %v10796_v41  ;;  %v13797_v22 = vsub.f32 %v3391_v21, %v13788_v42  ;;  %v13799_v23 = vpack.c.bf16 %v5221_v60, %v5214_v13 }
 0x195   : > { %vm3317_vm5 = vcmp.ge.f32.partialorder %v10797_v59, 0.0  ;;  %v3357_v30 = vmul.f32 0.2, %v10797_v59  ;;  %v10798_v9 = vadd.f32 %v1326_v36, %v16916_v0  ;;  %v10799_v5 = vadd.f32 %v1328_v55, %v16918_v32  ;;  %v1333_v32 = vpop.f32.mrb[6].mxu0  ;;  %v16921_v0 = vld [vmem:[#allocation45_spill] sm:$0xff] }
 0x196   : > { %16915 = vst [vmem:[#allocation63_spill] sm:$0xff] %v13793_v44  ;;  %v13802_v31 = vsub.f32 %v3392_v35, %v13793_v44  ;;  %v3396_v45 = vsel %vm3316_vm4, %v10796_v41, %v3356_v40  ;;  %4726 = vmatprep.mubr.f32.mxu0 %v13793_v44  ;;  %v16244_v58 = vand.u32 4294901760, %v13797_v22  ;;  %v10800_v55 = vadd.f32 %v1333_v32, %v16921_v0  ;;  %v1335_v16 = vpop.f32.mrb[7].mxu0 }
 0x197   : > { %v13808_v21 = vand.u32 4294901760, %v3396_v45  ;;  %v3397_v15 = vsel %vm3317_vm5, %v10797_v59, %v3357_v30  ;;  %4728 = vmatmul.mubr.f32.vlgmr.msra.gmra.mrb[24].mxu0 %v13788_v42  ;;  %vm3321_vm6 = vcmp.ge.f32.partialorder %v10798_v9, 0.0  ;;  %v3361_v60 = vmul.f32 0.2, %v10798_v9 }
 0x198   : > { %v13812_v13 = vand.u32 4294901760, %v3397_v15  ;;  %v16249_v41 = vand.u32 4294901760, %v13802_v31  ;;  %10337 = vmatpush3.bf16.msra.mxu0 %v13574_v57  ;;  %v3633_v35 = vsub.f32 %v13797_v22, %v16244_v58  ;;  %vm3322_vm7 = vcmp.ge.f32.partialorder %v10799_v5, 0.0 }
 0x199   : > { %16917 = vst [vmem:[#allocation65_spill] sm:$0xff] %v13808_v21  ;;  %v13820_v40 = vsub.f32 %v3396_v45, %v13808_v21  ;;  %v3362_v59 = vmul.f32 0.2, %v10799_v5  ;;  %10339 = vmatprep.subr.bf16.mxu0 %v13579_v38  ;;  %v3401_v36 = vsel %vm3321_vm6, %v10798_v9, %v3361_v60  ;;  %v10801_v24 = vadd.f32 %v1335_v16, %v16923_v48  ;;  %v16925_v16 = vld [vmem:[#allocation15_spill] sm:$0xff] }
 0x19a   : > { %16919 = vst [vmem:[#allocation54_spill] sm:$0xff] %v13812_v13  ;;  %v13824_v30 = vsub.f32 %v3397_v15, %v13812_v13  ;;  %4733 = vmatprep.mubr.f32.mxu0 %v13812_v13  ;;  %v3627_v57 = vsub.f32 %v13802_v31, %v16249_v41  ;;  %v3634_v45 = vand.u32 4294901760, %v3633_v35  ;;  %v13831_v58 = vand.u32 4294901760, %v3401_v36  ;;  %v1340_v35 = vpop.f32.mrb[8].mxu0 }
 0x19b   : > { %16920 = vst [vmem:[#allocation56_spill] sm:$0xff] %v13820_v40  ;;  %v3402_v3 = vsel %vm3322_vm7, %v10799_v5, %v3362_v59  ;;  %4735 = vmatmul.mubr.f32.gmra.mrb[26].mxu0 %v13808_v21  ;;  %vm3326_vm8 = vcmp.ge.f32.partialorder %v10800_v55, 0.0  ;;  %v3366_v15 = vmul.f32 0.2, %v10800_v55  ;;  %vm3327_vm9 = vcmp.ge.f32.partialorder %v10801_v24, 0.0  ;;  %v1342_v41 = vpop.f32.mrb[9].mxu0 }
 0x19c   : > { %16922 = vst [vmem:[#allocation57_spill] sm:$0xff] %v13831_v58  ;;  %v13835_v38 = vand.u32 4294901760, %v3402_v3  ;;  %v3628_v9 = vand.u32 4294901760, %v3627_v57  ;;  %10341 = vmatpush3.bf16.msra.mxu0 %v13612_v26  ;;  %v13839_v60 = vsub.f32 %v3401_v36, %v13831_v58  ;;  %v3367_v32 = vmul.f32 0.2, %v10801_v24 }
 0x19d   : > { %v16252_v0 = vand.u32 4294901760, %v13824_v30  ;;  %10343 = vmatprep.subr.bf16.mxu0 %v13614_v49  ;;  %v3406_v5 = vsel %vm3326_vm8, %v10800_v55, %v3366_v15  ;;  %v10802_v59 = vadd.f32 %v1340_v35, %v16925_v16  ;;  %v16253_v26 = vand.u32 4294901760, %v13820_v40  ;;  %v16929_v15 = vld [vmem:[#allocation26_spill] sm:$0xff] }
 0x19e   : > { %16924 = vst [vmem:[#allocation45_spill] sm:$0xff] %v13835_v38  ;;  %v13844_v48 = vsub.f32 %v3402_v3, %v13835_v38  ;;  %3629 = vmatprep.mubr.f32.mxu1 %v3628_v9  ;;  %4740 = vmatprep.mubr.f32.mxu0 %v13835_v38  ;;  %v13849_v36 = vand.u32 4294901760, %v3406_v5  ;;  %v3407_v57 = vsel %vm3327_vm9, %v10801_v24, %v3367_v32  ;;  %v16930_v32 = vld [vmem:[#allocation25_spill] sm:$0xff] }
 0x19f   : > { %v10803_v37 = vadd.f32 %v1342_v41, %v16927_v29  ;;  %3635 = vmatmul.mubr.f32.vlgmr.msra.gmra.mrb[32].mxu1 %v3634_v45  ;;  %4742 = vmatmul.mubr.f32.gmra.mrb[28].mxu0 %v13831_v58  ;;  %v3642_v49 = vsub.f32 %v13824_v30, %v16252_v0  ;;  %v13856_v3 = vand.u32 4294901760, %v3407_v57  ;;  %vm3331_vm10 = vcmp.ge.f32.partialorder %v10802_v59, 0.0  ;;  %v1347_v41 = vpop.f32.mrb[10].mxu0 }
 0x1a0   : > { %16926 = vst [vmem:[#allocation35_spill] sm:$0xff] %v13849_v36  ;;  %v3371_v55 = vmul.f32 0.2, %v10802_v59  ;;  %10145 = vmatpush3.bf16.msra.mxu1 %v16929_v15  ;;  %v3648_v9 = vsub.f32 %v13820_v40, %v16253_v26  ;;  %10345 = vmatpush3.bf16.msra.mxu0 %v13620_v17  ;;  %v13864_v24 = vsub.f32 %v3406_v5, %v13849_v36  ;;  %v16931_v15 = vld [vmem:[#allocation44_spill] sm:$0xff]  ;;  %v1349_v26 = vpop.f32.mrb[11].mxu0 }
 0x1a1   : > { %16928 = vst [vmem:[#allocation15_spill] sm:$0xff] %v13856_v3  ;;  %vm3332_vm11 = vcmp.ge.f32.partialorder %v10803_v37, 0.0  ;;  %v3372_v29 = vmul.f32 0.2, %v10803_v37  ;;  %v3643_v45 = vand.u32 4294901760, %v3642_v49  ;;  %10147 = vmatprep.subr.bf16.mxu1 %v16930_v32  ;;  %10347 = vmatprep.subr.bf16.mxu0 %v13645_v46  ;;  %v13869_v35 = vsub.f32 %v3407_v57, %v13856_v3 }
 0x1a2   : > { %v3411_v16 = vsel %vm3331_vm10, %v10802_v59, %v3371_v55  ;;  %v10804_v0 = vadd.f32 %v1347_v41, %v16931_v15  ;;  %4747 = vmatprep.mubr.f32.mxu0 %v13856_v3  ;;  %v3649_v17 = vand.u32 4294901760, %v3648_v9  ;;  %v10805_v40 = vadd.f32 %v1349_v26, %v16933_v47  ;;  %v1354_v47 = vpop.f32.mrb[12].mxu0 }
 0x1a3   : > { %v13873_v5 = vand.u32 4294901760, %v3411_v16  ;;  %v3412_v25 = vsel %vm3332_vm11, %v10803_v37, %v3372_v29  ;;  %3644 = vmatprep.mubr.f32.mxu1 %v3643_v45  ;;  %4749 = vmatmul.mubr.f32.gmra.mrb[30].mxu0 %v13849_v36  ;;  %v16269_v46 = vand.u32 4294901760, %v13844_v48  ;;  %v16268_v57 = vand.u32 4294901760, %v13839_v60  ;;  %v1356_v41 = vpop.f32.mrb[13].mxu0 }
 0x1a4   : > { %v13878_v49 = vand.u32 4294901760, %v3412_v25  ;;  %vm3336_vm12 = vcmp.ge.f32.partialorder %v10804_v0, 0.0  ;;  %v3376_v59 = vmul.f32 0.2, %v10804_v0  ;;  %3650 = vmatmul.mubr.f32.gmra.mrb[34].mxu1 %v3649_v17  ;;  %10349 = vmatpush3.bf16.msra.mxu0 %v13687_v19  ;;  %vm3337_vm13 = vcmp.ge.f32.partialorder %v10805_v40, 0.0 }
 0x1a5   : > { %16932 = vst [vmem:[#allocation13_spill] sm:$0xff] %v13873_v5  ;;  %v13883_v55 = vsub.f32 %v3411_v16, %v13873_v5  ;;  %v3377_v37 = vmul.f32 0.2, %v10805_v40  ;;  %10149 = vmatpush3.bf16.msra.mxu1 %v13051_v62  ;;  %v3657_v26 = vsub.f32 %v13844_v48, %v16269_v46  ;;  %10351 = vmatprep.subr.bf16.mxu0 %v13739_v11 }
 0x1a6   : > { %16934 = vst [vmem:[#allocation26_spill] sm:$0xff] %v13878_v49  ;;  %v13891_v9 = vsub.f32 %v3412_v25, %v13878_v49  ;;  %v3416_v29 = vsel %vm3336_vm12, %v10804_v0, %v3376_v59  ;;  %v10806_v19 = vadd.f32 %v1354_v47, %v13119_v18  ;;  %4754 = vmatprep.mubr.f32.mxu0 %v13878_v49 }
 0x1a7   : > { %16935 = vst [vmem:[#allocation25_spill] sm:$0xff] %v13883_v55  ;;  %v3663_v62 = vsub.f32 %v13839_v60, %v16268_v57  ;;  %v13898_v45 = vand.u32 4294901760, %v3416_v29  ;;  %v3417_v32 = vsel %vm3337_vm13, %v10805_v40, %v3377_v37  ;;  %v10807_v16 = vadd.f32 %v1356_v41, %v13129_v27  ;;  %10151 = vmatprep.subr.bf16.mxu1 %v13068_v28  ;;  %v1361_v27 = vpop.f32.mrb[14].mxu0  ;;  %v16989_v57 = vld [vmem:[#allocation19_spill] sm:$0xff] }
 0x1a8   : > { %v3658_v15 = vand.u32 4294901760, %v3657_v26  ;;  %4756 = vmatmul.mubr.f32.gmra.mrb[32].mxu0 %v13873_v5  ;;  %v13903_v25 = vand.u32 4294901760, %v3417_v32  ;;  %vm3341_vm14 = vcmp.ge.f32.partialorder %v10806_v19, 0.0  ;;  %v3381_v18 = vmul.f32 0.2, %v10806_v19  ;;  %v1363_v47 = vpop.f32.mrb[15].mxu0 }
 0x1a9   : > { %16936 = vst [vmem:[#allocation44_spill] sm:$0xff] %v13898_v45  ;;  %v3664_v11 = vand.u32 4294901760, %v3663_v62  ;;  %10353 = vmatpush3.bf16.msra.mxu0 %v13758_v63  ;;  %v13907_v0 = vsub.f32 %v3416_v29, %v13898_v45  ;;  %vm3342_vm15 = vcmp.ge.f32.partialorder %v10807_v16, 0.0  ;;  %v3382_v17 = vmul.f32 0.2, %v10807_v16  ;;  %10153 = vmatpush3.bf16.msra.mxu1 %v13070_v56  ;;  %v16941_v62 = vld [vmem:[#allocation32_spill] sm:$0xff] }
 0x1aa   : > { %16937 = vst [vmem:[#allocation22_spill] sm:$0xff] %v13903_v25  ;;  %3659 = vmatprep.mubr.f32.mxu1 %v3658_v15  ;;  %v16267_v28 = vand.u32 4294901760, %v13869_v35  ;;  %v13912_v40 = vsub.f32 %v3417_v32, %v13903_v25  ;;  %v3421_v59 = vsel %vm3341_vm14, %v10806_v19, %v3381_v18  ;;  %v10808_v37 = vadd.f32 %v1361_v27, %v13147_v2  ;;  %v16944_v18 = vld [vmem:[#allocation37_spill] sm:$0xff] }
 0x1ab   : > { %16938 = vst [vmem:[#allocation110_spill] sm:$0xff] %v13907_v0  ;;  %3665 = vmatmul.mubr.f32.gmra.mrb[36].mxu1 %v3664_v11  ;;  %4761 = vmatprep.mubr.f32.mxu0 %v13903_v25  ;;  %v16266_v63 = vand.u32 4294901760, %v13864_v24  ;;  %v13917_v26 = vand.u32 4294901760, %v3421_v59  ;;  %v3422_v29 = vsel %vm3342_vm15, %v10807_v16, %v3382_v17  ;;  %v10809_v56 = vadd.f32 %v1363_v47, %v13158_v4 }
 0x1ac   : > { %16939 = vst [vmem:[#allocation111_spill] sm:$0xff] %v13912_v40  ;;  %v3672_v41 = vsub.f32 %v13869_v35, %v16267_v28  ;;  %10155 = vmatprep.subr.bf16.mxu1 %v16941_v62  ;;  %4763 = vmatmul.mubr.f32.gmra.mrb[34].mxu0 %v13898_v45  ;;  %v13925_v19 = vand.u32 4294901760, %v3422_v29  ;;  %vm3346_vm0 = vcmp.ge.f32.partialorder %v10808_v37, 0.0  ;;  %v3386_v2 = vmul.f32 0.2, %v10808_v37 }
 0x1ad   : > { %16940 = vst [vmem:[#allocation112_spill] sm:$0xff] %v13917_v26  ;;  %v3678_v32 = vsub.f32 %v13864_v24, %v16266_v63  ;;  %10355 = vmatprep.subr.bf16.mxu0 %v13771_v7  ;;  %v13932_v4 = vsub.f32 %v3421_v59, %v13917_v26  ;;  %vm3347_vm1 = vcmp.ge.f32.partialorder %v10809_v56, 0.0  ;;  %v3387_v16 = vmul.f32 0.2, %v10809_v56  ;;  %10157 = vmatpush3.bf16.msra.mxu1 %v16944_v18  ;;  %v16946_v7 = vld [vmem:[#allocation43_spill] sm:$0xff]  ;;  %v16986_v63 = vld [vmem:[#allocation58_spill] sm:$0xff] }
 0x1ae   : > { %16942 = vst [vmem:[#allocation32_spill] sm:$0xff] %v13925_v19  ;;  %v3673_v15 = vand.u32 4294901760, %v3672_v41  ;;  %10357 = vmatpush3.bf16.msra.mxu0 %v13773_v34  ;;  %v13937_v11 = vsub.f32 %v3422_v29, %v13925_v19  ;;  %v3426_v17 = vsel %vm3346_vm0, %v10808_v37, %v3386_v2  ;;  %v16258_v47 = vand.u32 4294901760, %v13891_v9  ;;  %4768 = vmatprep.mubr.f32.mxu0 %v13925_v19 }
 0x1af   : > { %16943 = vst [vmem:[#allocation113_spill] sm:$0xff] %v13932_v4  ;;  %v3679_v27 = vand.u32 4294901760, %v3678_v32  ;;  %10159 = vmatprep.subr.bf16.mxu1 %v16946_v7  ;;  %v13942_v59 = vand.u32 4294901760, %v3426_v17  ;;  %v3427_v62 = vsel %vm3347_vm1, %v10809_v56, %v3387_v16  ;;  %v16259_v41 = vand.u32 4294901760, %v13883_v55  ;;  %10359 = vmatprep.subr.bf16.mxu0 %v13781_v52  ;;  %v16949_v16 = vld [vmem:[#allocation4_spill] sm:$0xff] }
 0x1b0   : > { %16945 = vst [vmem:[#allocation37_spill] sm:$0xff] %v13937_v11  ;;  %3674 = vmatprep.mubr.f32.mxu1 %v3673_v15  ;;  %4770 = vmatmul.mubr.f32.gmra.mrb[36].mxu0 %v13917_v26  ;;  %v16260_v34 = vand.u32 4294901760, %v13912_v40  ;;  %v13947_v29 = vand.u32 4294901760, %v3427_v62  ;;  %v3687_v37 = vsub.f32 %v13891_v9, %v16258_v47  ;;  %v16265_v2 = vand.u32 4294901760, %v13907_v0 }
 0x1b1   : > { %16947 = vst [vmem:[#allocation43_spill] sm:$0xff] %v13942_v59  ;;  %3680 = vmatmul.mubr.f32.gmra.mrb[38].mxu1 %v3679_v27  ;;  %v16264_v32 = vand.u32 4294901760, %v13937_v11  ;;  %v3693_v56 = vsub.f32 %v13883_v55, %v16259_v41  ;;  %v16950_v18 = vand.u32 4294901760, %v13778_v50  ;;  %v16951_v27 = vand.u32 4294901760, %v13786_v61 }
 0x1b2   : > { %16948 = vst [vmem:[#allocation114_spill] sm:$0xff] %v13947_v29  ;;  %10161 = vmatpush3.bf16.msra.mxu1 %v16949_v16  ;;  %v3702_v15 = vsub.f32 %v13912_v40, %v16260_v34  ;;  %10361 = vmatpush3.bf16.msra.mxu0 %v13791_v43  ;;  %v13968_v47 = vsub.f32 %v3426_v17, %v13942_v59  ;;  %v3688_v41 = vand.u32 4294901760, %v3687_v37  ;;  %v16954_v16 = vld [vmem:[#allocation66_spill] sm:$0xff]  ;;  %v16263_v17 = vand.u32 4294901760, %v13932_v4  ;;  %v16955_v37 = vld [vmem:[#allocation67_spill] sm:$0xff] }
 0x1b3   : > { %v10364_v7 = vpack.c.bf16 %v16951_v27, %v16950_v18  ;;  %v13971_v52 = vsub.f32 %v3427_v62, %v13947_v29  ;;  %4775 = vmatprep.mubr.f32.mxu0 %v13947_v29  ;;  %10163 = vmatprep.subr.bf16.mxu1 %v16954_v16  ;;  %v3717_v43 = vsub.f32 %v13937_v11, %v16264_v32  ;;  %v3694_v34 = vand.u32 4294901760, %v3693_v56  ;;  %v16956_v16 = vld [vmem:[#allocation68_spill] sm:$0xff] }
 0x1b4   : > { %16952 = vst [vmem:[#allocation4_spill] sm:$0xff] %v13968_v47  ;;  %v3703_v50 = vand.u32 4294901760, %v3702_v15  ;;  %v3708_v61 = vsub.f32 %v13907_v0, %v16265_v2  ;;  %4777 = vmatmul.mubr.f32.gmra.mrb[38].mxu0 %v13942_v59  ;;  %10363 = vmatprep.subr.bf16.mxu0 %v13799_v23  ;;  %v3723_v27 = vsub.f32 %v13932_v4, %v16263_v17  ;;  %v16261_v23 = vand.u32 4294901760, %v13968_v47  ;;  %v16983_v32 = vld [vmem:[#allocation60_spill] sm:$0xff] }
 0x1b5   : > { %16953 = vst [vmem:[#allocation115_spill] sm:$0xff] %v13971_v52  ;;  %3689 = vmatprep.mubr.f32.mxu1 %v3688_v41  ;;  %v16262_v62 = vand.u32 4294901760, %v13971_v52  ;;  %v3718_v56 = vand.u32 4294901760, %v3717_v43 }
 0x1b6   : > { %3695 = vmatmul.mubr.f32.gmra.mrb[40].mxu1 %v3694_v34  ;;  %10365 = vmatpush3.bf16.msra.mxu0 %v10364_v7  ;;  %v3709_v18 = vand.u32 4294901760, %v3708_v61  ;;  %v3724_v34 = vand.u32 4294901760, %v3723_v27  ;;  %v3738_v7 = vsub.f32 %v13968_v47, %v16261_v23  ;;  %v16961_v61 = vld [vmem:[#allocation7_spill] sm:$0xff] }
 0x1b7   : > { %3704 = vmatprep.mubr.f32.mxu1 %v3703_v50  ;;  %10165 = vmatpush3.bf16.msra.mxu1 %v16955_v37  ;;  %v3732_v15 = vsub.f32 %v13971_v52, %v16262_v62  ;;  %v16957_v50 = vpack.c.bf16 %v12932_v51, %v12824_v39  ;;  %v16962_v37 = vld [vmem:[#allocation28_spill] sm:$0xff]  ;;  %v16980_v62 = vld [vmem:[#allocation51_spill] sm:$0xff] }
 0x1b8   : > { %10167 = vmatprep.subr.bf16.mxu1 %v16956_v16  ;;  %10399 = vmatprep.subr.bf16.mxu0 %v13535_v53  ;;  %v3739_v43 = vand.u32 4294901760, %v3738_v7  ;;  %v16967_v16 = vld [vmem:[#allocation46_spill] sm:$0xff]  ;;  %v16970_v7 = vld [vmem:[#allocation33_spill] sm:$0xff] }
 0x1b9   : > { %v3733_v41 = vand.u32 4294901760, %v3732_v15  ;;  %v16964_v15 = vld [vmem:[#allocation31_spill] sm:$0xff] }
 0x1ba   : > { %3710 = vmatmul.mubr.f32.gmra.mrb[42].mxu1 %v3709_v18  ;;  %v16965_v18 = vld [vmem:[#allocation8_spill] sm:$0xff] }
 0x1bb   : > { %3719 = vmatprep.mubr.f32.mxu1 %v3718_v56  ;;  %10169 = vmatpush3.bf16.msra.mxu1 %v13208_v12  ;;  %v16958_v12 = vpack.c.bf16 %v16787_v8, %v16703_v33  ;;  %v16963_v56 = vpack.c.bf16 %v16961_v61, %v16962_v37  ;;  %v16966_v27 = vpack.c.bf16 %v16964_v15, %v16965_v18 }
 0x1bc   : > { %10171 = vmatprep.subr.bf16.mxu1 %v13219_v20  ;;  %v16959_v20 = vpack.c.bf16 %v16788_v54, %v16725_v6 }
 0x1be   : > { %3725 = vmatmul.mubr.f32.gmra.mrb[44].mxu1 %v3724_v34 }
 0x1bf   : > { %3734 = vmatprep.mubr.f32.mxu1 %v3733_v41  ;;  %10173 = vmatpush3.bf16.msra.mxu1 %v13222_v10  ;;  %v16960_v10 = vpack.c.bf16 %v16736_v14, %v16790_v1  ;;  %v16968_v41 = vld [vmem:[#allocation9_spill] sm:$0xff] }
 0x1c0   : > { %10175 = vmatprep.subr.bf16.mxu1 %v16957_v50  ;;  %v16969_v34 = vpack.c.bf16 %v16967_v16, %v16968_v41 }
 0x1c2   : > { %3740 = vmatmul.mubr.f32.gmra.mrb[46].mxu1 %v3739_v43  ;;  %v16971_v43 = vld [vmem:[#allocation10_spill] sm:$0xff] }
 0x1c3   : > { %3970 = vmatprep.mubr.f32.mxu1 %v13793_v44  ;;  %v16972_v50 = vpack.c.bf16 %v16970_v7, %v16971_v43 }
 0x1c6   : > { %3972 = vmatmul.mubr.f32.vlgmr.msra.gmra.mrb[48].mxu1 %v13788_v42 }
 0x1c7   : > { %3977 = vmatprep.mubr.f32.mxu1 %v13812_v13  ;;  %10177 = vmatpush3.bf16.msra.mxu1 %v16958_v12  ;;  %v16973_v12 = vld [vmem:[#allocation12_spill] sm:$0xff] }
 0x1c8   : > { %10179 = vmatprep.subr.bf16.mxu1 %v16959_v20  ;;  %v16974_v20 = vld [vmem:[#allocation11_spill] sm:$0xff] }
 0x1ca   : > { %3979 = vmatmul.mubr.f32.gmra.mrb[50].mxu1 %v13808_v21 }
 0x1cb   : > { %3984 = vmatprep.mubr.f32.mxu1 %v13835_v38  ;;  %10181 = vmatpush3.bf16.msra.mxu1 %v16960_v10  ;;  %v16975_v10 = vpack.c.bf16 %v16973_v12, %v16974_v20 }
 0x1cc   : > { %10183 = vmatprep.subr.bf16.mxu1 %v16963_v56  ;;  %v16976_v56 = vld [vmem:[#allocation50_spill] sm:$0xff] }
 0x1ce   : > { %3986 = vmatmul.mubr.f32.gmra.mrb[52].mxu1 %v13831_v58 }
 0x1cf   : > { %3991 = vmatprep.mubr.f32.mxu1 %v13856_v3  ;;  %10185 = vmatpush3.bf16.msra.mxu1 %v16966_v27  ;;  %v16977_v27 = vld [vmem:[#allocation49_spill] sm:$0xff] }
 0x1d0   : > { %10187 = vmatprep.subr.bf16.mxu1 %v16969_v34  ;;  %v16978_v23 = vpack.c.bf16 %v16976_v56, %v16977_v27  ;;  %v16979_v34 = vld [vmem:[#allocation52_spill] sm:$0xff] }
 0x1d1   : > { %v16981_v17 = vpack.c.bf16 %v16979_v34, %v16980_v62  ;;  %v17025_v34 = vld [vmem:[#allocation88_spill] sm:$0xff] }
 0x1d2   : > { %3993 = vmatmul.mubr.f32.gmra.mrb[54].mxu1 %v13849_v36  ;;  %v17000_v36 = vld [vmem:[#allocation56_spill] sm:$0xff] }
 0x1d3   : > { %3998 = vmatprep.mubr.f32.mxu1 %v13878_v49  ;;  %10189 = vmatpush3.bf16.msra.mxu1 %v16972_v50  ;;  %v16982_v50 = vld [vmem:[#allocation61_spill] sm:$0xff] }
 0x1d4   : > { %10191 = vmatprep.subr.bf16.mxu1 %v16975_v10  ;;  %v16984_v2 = vpack.c.bf16 %v16982_v50, %v16983_v32  ;;  %v16985_v10 = vld [vmem:[#allocation40_spill] sm:$0xff] }
 0x1d5   : > { %v16987_v28 = vpack.c.bf16 %v16985_v10, %v16986_v63  ;;  %v17012_v10 = vld [vmem:[#allocation47_spill] sm:$0xff]  ;;  %v17017_v50 = vld [vmem:[#allocation84_spill] sm:$0xff] }
 0x1d6   : > { %4000 = vmatmul.mubr.f32.gmra.mrb[56].mxu1 %v13873_v5 }
 0x1d7   : > { %4005 = vmatprep.mubr.f32.mxu1 %v13903_v25  ;;  %10193 = vmatpush3.bf16.msra.mxu1 %v16978_v23  ;;  %v16988_v23 = vld [vmem:[#allocation34_spill] sm:$0xff] }
 0x1d8   : > { %10195 = vmatprep.subr.bf16.mxu1 %v16981_v17  ;;  %v16990_v46 = vpack.c.bf16 %v16988_v23, %v16989_v57  ;;  %v16991_v17 = vld [vmem:[#allocation23_spill] sm:$0xff] }
 0x1da   : > { %4007 = vmatmul.mubr.f32.gmra.mrb[58].mxu1 %v13898_v45  ;;  %v16992_v45 = vld [vmem:[#allocation59_spill] sm:$0xff] }
 0x1db   : > { %4012 = vmatprep.mubr.f32.mxu1 %v13925_v19  ;;  %10197 = vmatpush3.bf16.msra.mxu1 %v16984_v2  ;;  %v16993_v25 = vpack.c.bf16 %v16991_v17, %v16992_v45  ;;  %v16994_v19 = vld [vmem:[#allocation30_spill] sm:$0xff]  ;;  %v16995_v2 = vld [vmem:[#allocation27_spill] sm:$0xff]  ;;  %v17010_v17 = vld [vmem:[#allocation81_spill] sm:$0xff] }
 0x1dc   : > { %10199 = vmatprep.subr.bf16.mxu1 %v16987_v28  ;;  %v16996_v5 = vpack.c.bf16 %v16994_v19, %v16995_v2  ;;  %v16997_v28 = vld [vmem:[#allocation21_spill] sm:$0xff] }
 0x1de   : > { %4014 = vmatmul.mubr.f32.gmra.mrb[60].mxu1 %v13917_v26  ;;  %v16999_v26 = vld [vmem:[#allocation53_spill] sm:$0xff] }
 0x1df   : > { %4019 = vmatprep.mubr.f32.mxu1 %v13947_v29  ;;  %10201 = vmatpush3.bf16.msra.mxu1 %v16990_v46  ;;  %v16998_v29 = vld [vmem:[#allocation64_spill] sm:$0xff] }
 0x1e0   : > { %10203 = vmatprep.subr.bf16.mxu1 %v16993_v25 }
 0x1e2   : > { %4021 = vmatmul.mubr.f32.gmra.mrb[62].mxu1 %v13942_v59 }
 0x1e3   : > { %10205 = vmatpush3.bf16.msra.mxu1 %v16996_v5  ;;  %4156 = vmatprep.mubr.f32.mxu1 %v13802_v31  ;;  %v17001_v5 = vld [vmem:[#allocation39_spill] sm:$0xff] }
 0x1e4   : > { %10207 = vmatprep.subr.bf16.mxu1 %v16997_v28 }
 0x1e6   : > { %4159 = vmatmul.mubr.f32.vlgmr.msra.gmra.mrb[64].mxu1 %v13797_v22  ;;  %v2380_v46 = vpop.f32.mrb[16].mxu1 }
 0x1e7   : > { %4165 = vmatprep.mubr.f32.mxu1 %v13824_v30  ;;  %10209 = vmatpush3.bf16.msra.mxu1 %v16998_v29  ;;  %vm3313_vm2 = vcmp.ge.f32.partialorder %v2380_v46, 0.0  ;;  %v3353_v25 = vmul.f32 0.2, %v2380_v46  ;;  %v2382_v59 = vpop.f32.mrb[17].mxu1  ;;  %v17002_v29 = vld [vmem:[#allocation14_spill] sm:$0xff] }
 0x1e8   : > { %10211 = vmatprep.subr.bf16.mxu1 %v16999_v26  ;;  %vm3314_vm3 = vcmp.ge.f32.partialorder %v2382_v59, 0.0  ;;  %v3354_v49 = vmul.f32 0.2, %v2382_v59 }
 0x1e9   : > { %v14074_v28 = vsel %vm3313_vm2, %v2380_v46, %v3353_v25 }
 0x1ea   : > { %4168 = vmatmul.mubr.f32.gmra.mrb[66].mxu1 %v17000_v36  ;;  %v14076_v3 = vsel %vm3314_vm3, %v2382_v59, %v3354_v49  ;;  %v2387_v58 = vpop.f32.mrb[18].mxu1  ;;  %v14084_v42 = vand.u32 4294901760, %v14074_v28  ;;  %v17004_v49 = vld [vmem:[#allocation55_spill] sm:$0xff] }
 0x1eb   : > { %4174 = vmatprep.mubr.f32.mxu1 %v13844_v48  ;;  %10213 = vmatpush3.bf16.msra.mxu1 %v17001_v5  ;;  %v14080_v26 = vand.u32 4294901760, %v14076_v3  ;;  %vm3318_vm4 = vcmp.ge.f32.partialorder %v2387_v58, 0.0  ;;  %v3358_v38 = vmul.f32 0.2, %v2387_v58  ;;  %v2389_v21 = vpop.f32.mrb[19].mxu1  ;;  %v17005_v5 = vld [vmem:[#allocation36_spill] sm:$0xff] }
 0x1ec   : > { %10215 = vmatprep.subr.bf16.mxu1 %v17002_v29  ;;  %vm3319_vm5 = vcmp.ge.f32.partialorder %v2389_v21, 0.0  ;;  %v3359_v13 = vmul.f32 0.2, %v2389_v21  ;;  %17003 = vst [vmem:[#allocation66_spill] sm:$0xff] %v14084_v42 }
 0x1ed   : > { %v14088_v59 = vsel %vm3318_vm4, %v2387_v58, %v3358_v38  ;;  %5224 = vmatprep.mubr.f32.mxu0 %v14080_v26  ;;  %v17007_v58 = vld [vmem:[#allocation80_spill] sm:$0xff]  ;;  %vm3503_vm4 = vcmask 523264  }
 0x1ee   : > { %4177 = vmatmul.mubr.f32.gmra.mrb[68].mxu1 %v13839_v60  ;;  %v14090_v46 = vsel %vm3319_vm5, %v2389_v21, %v3359_v13  ;;  %v2394_v25 = vpop.f32.mrb[20].mxu1  ;;  %5226 = vmatmul.mubr.f32.vlgmr.msra.gmra.mrb[40].mxu0 %v14084_v42  ;;  %v14101_v21 = vand.u32 4294901760, %v14088_v59  ;;  %v17009_v13 = vld [vmem:[#allocation42_spill] sm:$0xff] }
 0x1ef   : > { %4183 = vmatprep.mubr.f32.mxu1 %v13869_v35  ;;  %10217 = vmatpush3.bf16.msra.mxu1 %v17004_v49  ;;  %v14095_v29 = vand.u32 4294901760, %v14090_v46  ;;  %vm3323_vm6 = vcmp.ge.f32.partialorder %v2394_v25, 0.0  ;;  %v3363_v44 = vmul.f32 0.2, %v2394_v25  ;;  %v2396_v19 = vpop.f32.mrb[21].mxu1 }
 0x1f0   : > { %10219 = vmatprep.subr.bf16.mxu1 %v17005_v5  ;;  %vm3324_vm7 = vcmp.ge.f32.partialorder %v2396_v19, 0.0  ;;  %v3364_v2 = vmul.f32 0.2, %v2396_v19  ;;  %10401 = vmatpush3.bf16.msra.mxu0 %v17007_v58  ;;  %17008 = vst [vmem:[#allocation68_spill] sm:$0xff] %v14101_v21 }
 0x1f1   : > { %17006 = vst [vmem:[#allocation67_spill] sm:$0xff] %v14095_v29  ;;  %v14105_v38 = vsel %vm3323_vm6, %v2394_v25, %v3363_v44  ;;  %5231 = vmatprep.mubr.f32.mxu0 %v14095_v29  ;;  %10403 = vmatprep.subr.bf16.mxu0 %v17010_v17  ;;  %v17015_v25 = vld [vmem:[#allocation2_spill] sm:$0xff] }
 0x1f2   : > { %4186 = vmatmul.mubr.f32.gmra.mrb[70].mxu1 %v13864_v24  ;;  %v14107_v49 = vsel %vm3324_vm7, %v2396_v19, %v3364_v2  ;;  %v2401_v5 = vpop.f32.mrb[22].mxu1  ;;  %5233 = vmatmul.mubr.f32.gmra.mrb[42].mxu0 %v14101_v21  ;;  %v17013_v19 = vld [vmem:[#allocation82_spill] sm:$0xff]  ;;  %v14119_v2 = vand.u32 4294901760, %v14105_v38 }
 0x1f3   : > { %4192 = vmatprep.mubr.f32.mxu1 %v13891_v9  ;;  %10221 = vmatpush3.bf16.msra.mxu1 %v17009_v13  ;;  %v14112_v45 = vand.u32 4294901760, %v14107_v49  ;;  %vm3328_vm8 = vcmp.ge.f32.partialorder %v2401_v5, 0.0  ;;  %v3368_v23 = vmul.f32 0.2, %v2401_v5  ;;  %v2403_v57 = vpop.f32.mrb[23].mxu1 }
 0x1f4   : > { %10223 = vmatprep.subr.bf16.mxu1 %v17012_v10  ;;  %vm3329_vm9 = vcmp.ge.f32.partialorder %v2403_v57, 0.0  ;;  %v3369_v44 = vmul.f32 0.2, %v2403_v57  ;;  %10405 = vmatpush3.bf16.msra.mxu0 %v17013_v19  ;;  %17014 = vst [vmem:[#allocation28_spill] sm:$0xff] %v14119_v2 }
 0x1f5   : > { %17011 = vst [vmem:[#allocation7_spill] sm:$0xff] %v14112_v45  ;;  %v14123_v13 = vsel %vm3328_vm8, %v2401_v5, %v3368_v23  ;;  %5238 = vmatprep.mubr.f32.mxu0 %v14112_v45  ;;  %10407 = vmatprep.subr.bf16.mxu0 %v17017_v50 }
 0x1f6   : > { %4195 = vmatmul.mubr.f32.gmra.mrb[72].mxu1 %v13883_v55  ;;  %17016 = vst [vmem:[#allocation31_spill] sm:$0xff] %v14123_v13  ;;  %v14125_v63 = vsel %vm3329_vm9, %v2403_v57, %v3369_v44  ;;  %v2408_v10 = vpop.f32.mrb[24].mxu1  ;;  %5240 = vmatmul.mubr.f32.gmra.mrb[44].mxu0 %v14119_v2  ;;  %v17020_v57 = vld [vmem:[#allocation86_spill] sm:$0xff]  ;;  %v14137_v5 = vand.u32 4294901760, %v14123_v13 }
 0x1f7   : > { %4201 = vmatprep.mubr.f32.mxu1 %v13912_v40  ;;  %10225 = vmatpush3.bf16.msra.mxu1 %v17015_v25  ;;  %v14130_v32 = vand.u32 4294901760, %v14125_v63  ;;  %vm3333_vm10 = vcmp.ge.f32.partialorder %v2408_v10, 0.0  ;;  %v3373_v19 = vmul.f32 0.2, %v2408_v10  ;;  %v2410_v55 = vpop.f32.mrb[25].mxu1  ;;  %v17019_v40 = vld [vmem:[#allocation41_spill] sm:$0xff] }
 0x1f8   : > { %10227 = vmatprep.subr.bf16.mxu1 %v17019_v40  ;;  %vm3334_vm11 = vcmp.ge.f32.partialorder %v2410_v55, 0.0  ;;  %v3374_v23 = vmul.f32 0.2, %v2410_v55  ;;  %10409 = vmatpush3.bf16.msra.mxu0 %v17020_v57  ;;  %17021 = vst [vmem:[#allocation46_spill] sm:$0xff] %v14137_v5  ;;  %v17022_v44 = vld [vmem:[#allocation6_spill] sm:$0xff] }
 0x1f9   : > { %17018 = vst [vmem:[#allocation8_spill] sm:$0xff] %v14130_v32  ;;  %v14141_v25 = vsel %vm3333_vm10, %v2408_v10, %v3373_v19  ;;  %5245 = vmatprep.mubr.f32.mxu0 %v14130_v32  ;;  %10411 = vmatprep.subr.bf16.mxu0 %v17025_v34 }
 0x1fa   : > { %4204 = vmatmul.mubr.f32.gmra.mrb[74].mxu1 %v13907_v0  ;;  %17023 = vst [vmem:[#allocation9_spill] sm:$0xff] %v14141_v25  ;;  %v14143_v50 = vsel %vm3334_vm11, %v2410_v55, %v3374_v23  ;;  %v2415_v40 = vpop.f32.mrb[26].mxu1  ;;  %5247 = vmatmul.mubr.f32.gmra.mrb[46].mxu0 %v14137_v5  ;;  %v17028_v55 = vld [vmem:[#allocation89_spill] sm:$0xff]  ;;  %v14155_v10 = vand.u32 4294901760, %v14141_v25  ;;  %v17030_v23 = vld [vmem:[#allocation3_spill] sm:$0xff] }
 0x1fb   : > { %4210 = vmatprep.mubr.f32.mxu1 %v13937_v11  ;;  %10229 = vmatpush3.bf16.msra.mxu1 %v17022_v44  ;;  %17024 = vst [vmem:[#allocation33_spill] sm:$0xff] %v14143_v50  ;;  %v14148_v0 = vand.u32 4294901760, %v14143_v50  ;;  %vm3338_vm12 = vcmp.ge.f32.partialorder %v2415_v40, 0.0  ;;  %v3378_v57 = vmul.f32 0.2, %v2415_v40  ;;  %v2417_v13 = vpop.f32.mrb[27].mxu1 }
 0x1fc   : > { %v17027_v11 = vld [vmem:[#allocation48_spill] sm:$0xff]  ;;  %vm3339_vm13 = vcmp.ge.f32.partialorder %v2417_v13, 0.0  ;;  %v3379_v19 = vmul.f32 0.2, %v2417_v13  ;;  %10413 = vmatpush3.bf16.msra.mxu0 %v17028_v55  ;;  %17029 = vst [vmem:[#allocation12_spill] sm:$0xff] %v14155_v10  ;;  %v17033_v50 = vld [vmem:[#allocation94_spill] sm:$0xff] }
 0x1fd   : > { %17026 = vst [vmem:[#allocation10_spill] sm:$0xff] %v14148_v0  ;;  %10231 = vmatprep.subr.bf16.mxu1 %v17027_v11  ;;  %v14159_v44 = vsel %vm3338_vm12, %v2415_v40, %v3378_v57  ;;  %5252 = vmatprep.mubr.f32.mxu0 %v14148_v0  ;;  %v17036_v57 = vand.u32 4294901760, %v12824_v39  ;;  %v17043_v39 = vand.u32 4294901760, %v16787_v8  ;;  %v17046_v8 = vand.u32 4294901760, %v16725_v6 }
 0x1fe   : > { %4213 = vmatmul.mubr.f32.gmra.mrb[76].mxu1 %v13932_v4  ;;  %17031 = vst [vmem:[#allocation11_spill] sm:$0xff] %v14159_v44  ;;  %v14161_v34 = vsel %vm3339_vm13, %v2417_v13, %v3379_v19  ;;  %v2422_v11 = vpop.f32.mrb[28].mxu1  ;;  %10415 = vmatprep.subr.bf16.mxu0 %v17033_v50  ;;  %v17037_v13 = vand.u32 4294901760, %v12932_v51  ;;  %v14177_v50 = vand.u32 4294901760, %v14159_v44  ;;  %v17053_v6 = vand.u32 4294901760, %v16736_v14 }
 0x1ff   : > { %4219 = vmatprep.mubr.f32.mxu1 %v13971_v52  ;;  %10233 = vmatpush3.bf16.msra.mxu1 %v17030_v23  ;;  %17032 = vst [vmem:[#allocation50_spill] sm:$0xff] %v14161_v34  ;;  %v14166_v4 = vand.u32 4294901760, %v14161_v34  ;;  %vm3343_vm14 = vcmp.ge.f32.partialorder %v2422_v11, 0.0  ;;  %v3383_v55 = vmul.f32 0.2, %v2422_v11  ;;  %v2424_v25 = vpop.f32.mrb[29].mxu1 }
 0x200   : > { %5254 = vmatmul.mubr.f32.gmra.mrb[48].mxu0 %v14155_v10  ;;  %v17035_v52 = vld [vmem:[#allocation29_spill] sm:$0xff]  ;;  %v10238_v40 = vpack.c.bf16 %v17037_v13, %v17036_v57  ;;  %vm3344_vm15 = vcmp.ge.f32.partialorder %v2424_v25, 0.0  ;;  %v3384_v19 = vmul.f32 0.2, %v2424_v25  ;;  %v17038_v23 = vld [vmem:[#allocation95_spill] sm:$0xff]  ;;  %17039 = vst [vmem:[#allocation51_spill] sm:$0xff] %v14177_v50 }
 0x201   : > { %17034 = vst [vmem:[#allocation49_spill] sm:$0xff] %v14166_v4  ;;  %10235 = vmatprep.subr.bf16.mxu1 %v17035_v52  ;;  %10417 = vmatpush3.bf16.msra.mxu0 %v17038_v23  ;;  %v17040_v34 = vld [vmem:[#allocation5_spill] sm:$0xff]  ;;  %v17041_v10 = vand.u32 4294901760, %v13802_v31  ;;  %v17042_v52 = vand.u32 4294901760, %v16703_v33  ;;  %v14186_v57 = vsel %vm3343_vm14, %v2422_v11, %v3383_v55  ;;  %v17049_v11 = vld [vmem:[#allocation103_spill] sm:$0xff]  ;;  %v17056_v14 = vand.u32 4294901760, %v16962_v37 }
 0x202   : > { %4222 = vmatmul.mubr.f32.gmra.mrb[78].mxu1 %v13968_v47  ;;  %v14188_v13 = vsel %vm3344_vm15, %v2424_v25, %v3384_v19  ;;  %5259 = vmatprep.mubr.f32.mxu0 %v14166_v4  ;;  %v2429_v23 = vpop.f32.mrb[30].mxu1  ;;  %v17044_v47 = vld [vmem:[#allocation100_spill] sm:$0xff]  ;;  %v14204_v19 = vand.u32 4294901760, %v14186_v57  ;;  %v17063_v37 = vand.u32 4294901760, %v16965_v18 }
 0x203   : > { %10237 = vmatpush3.bf16.msra.mxu1 %v17040_v34  ;;  %4326 = vmatprep.mubr.f32.mxu1 %v17041_v10  ;;  %v10240_v51 = vpack.c.bf16 %v17043_v39, %v17042_v52  ;;  %v14193_v44 = vand.u32 4294901760, %v14188_v13  ;;  %vm3348_vm0 = vcmp.ge.f32.partialorder %v2429_v23, 0.0  ;;  %v3388_v31 = vmul.f32 0.2, %v2429_v23  ;;  %v2431_v33 = vpop.f32.mrb[31].mxu1 }
 0x204   : > { %10419 = vmatprep.subr.bf16.mxu0 %v17044_v47  ;;  %5261 = vmatmul.mubr.f32.gmra.mrb[50].mxu0 %v14177_v50  ;;  %v17047_v34 = vand.u32 4294901760, %v16788_v54  ;;  %vm3349_vm1 = vcmp.ge.f32.partialorder %v2431_v33, 0.0  ;;  %v3389_v55 = vmul.f32 0.2, %v2431_v33  ;;  %v17048_v10 = vand.u32 4294901760, %v13797_v22  ;;  %17050 = vst [vmem:[#allocation64_spill] sm:$0xff] %v14204_v19 }
 0x205   : > { %17045 = vst [vmem:[#allocation21_spill] sm:$0xff] %v14193_v44  ;;  %10239 = vmatprep.subr.bf16.mxu1 %v10238_v40  ;;  %10421 = vmatpush3.bf16.msra.mxu0 %v17049_v11  ;;  %v17051_v52 = vand.u32 4294901760, %v13824_v30  ;;  %v17052_v40 = vand.u32 4294901760, %v16790_v1  ;;  %v14212_v39 = vsel %vm3348_vm0, %v2429_v23, %v3388_v31  ;;  %v17054_v22 = vld [vmem:[#allocation105_spill] sm:$0xff]  ;;  %v17057_v1 = vand.u32 4294901760, %v16961_v61  ;;  %v17059_v31 = vld [vmem:[#allocation106_spill] sm:$0xff] }
 0x206   : > { %v10242_v25 = vpack.c.bf16 %v17047_v34, %v17046_v8  ;;  %4330 = vmatmul.mubr.f32.vlgmr.msra.gmra.mrb[80].mxu1 %v17048_v10  ;;  %v14214_v8 = vsel %vm3349_vm1, %v2431_v33, %v3389_v55  ;;  %5266 = vmatprep.mubr.f32.mxu0 %v14193_v44  ;;  %v14220_v34 = vsub.f32 %v14076_v3, %v14080_v26  ;;  %v14238_v33 = vand.u32 4294901760, %v14212_v39 }
 0x207   : > { %4337 = vmatprep.mubr.f32.mxu1 %v17051_v52  ;;  %10241 = vmatpush3.bf16.msra.mxu1 %v10240_v51  ;;  %v10244_v54 = vpack.c.bf16 %v17053_v6, %v17052_v40  ;;  %v14223_v30 = vand.u32 4294901760, %v14214_v8  ;;  %v10246_v23 = vpack.c.bf16 %v17057_v1, %v17056_v14  ;;  %v17058_v51 = vand.u32 4294901760, %v17000_v36  ;;  %v17062_v36 = vld [vmem:[#allocation108_spill] sm:$0xff]  ;;  %v17068_v6 = vld [vmem:[#allocation109_spill] sm:$0xff] }
 0x208   : > { %10423 = vmatprep.subr.bf16.mxu0 %v17054_v22  ;;  %5268 = vmatmul.mubr.f32.gmra.mrb[52].mxu0 %v14204_v19  ;;  %v14235_v3 = vsub.f32 %v14074_v28, %v14084_v42  ;;  %17060 = vst [vmem:[#allocation56_spill] sm:$0xff] %v14238_v33  ;;  %v17061_v55 = vand.u32 4294901760, %v13844_v48  ;;  %v14244_v61 = vsub.f32 %v14090_v46, %v14095_v29  ;;  %v17064_v28 = vand.u32 4294901760, %v16964_v15 }
 0x209   : > { %17055 = vst [vmem:[#allocation53_spill] sm:$0xff] %v14223_v30  ;;  %10243 = vmatprep.subr.bf16.mxu1 %v10242_v25  ;;  %10425 = vmatpush3.bf16.msra.mxu0 %v17059_v31  ;;  %v4880_v48 = vand.u32 4294901760, %v14220_v34  ;;  %v17065_v10 = vand.u32 4294901760, %v16968_v41  ;;  %v17066_v52 = vand.u32 4294901760, %v16967_v16  ;;  %v17067_v40 = vand.u32 4294901760, %v13839_v60 }
 0x20a   : > { %4341 = vmatmul.mubr.f32.gmra.mrb[82].mxu1 %v17058_v51  ;;  %5273 = vmatprep.mubr.f32.mxu0 %v14223_v30  ;;  %v10248_v25 = vpack.c.bf16 %v17064_v28, %v17063_v37  ;;  %v4886_v18 = vand.u32 4294901760, %v14235_v3  ;;  %v14264_v15 = vsub.f32 %v14088_v59, %v14101_v21  ;;  %v14272_v16 = vsub.f32 %v14107_v49, %v14112_v45  ;;  %v17079_v37 = vld [vmem:[#allocation52_spill] sm:$0xff] }
 0x20b   : > { %4348 = vmatprep.mubr.f32.mxu1 %v17061_v55  ;;  %10245 = vmatpush3.bf16.msra.mxu1 %v10244_v54  ;;  %v10250_v46 = vpack.c.bf16 %v17066_v52, %v17065_v10  ;;  %v17069_v54 = vand.u32 4294901760, %v13869_v35  ;;  %v4895_v60 = vand.u32 4294901760, %v14244_v61  ;;  %v17070_v41 = vand.u32 4294901760, %v16971_v43 }
 0x20c   : > { %10427 = vmatprep.subr.bf16.mxu0 %v17062_v36  ;;  %5275 = vmatmul.mubr.f32.gmra.mrb[54].mxu0 %v14238_v33  ;;  %v17071_v59 = vand.u32 4294901760, %v16970_v7  ;;  %v17072_v35 = vand.u32 4294901760, %v16974_v20  ;;  %v17073_v1 = vand.u32 4294901760, %v16973_v12  ;;  %v14292_v43 = vsub.f32 %v14105_v38, %v14119_v2 }
 0x20d   : > { %10247 = vmatprep.subr.bf16.mxu1 %v10246_v23  ;;  %10429 = vmatpush3.bf16.msra.mxu0 %v17068_v6  ;;  %v17074_v23 = vand.u32 4294901760, %v13864_v24  ;;  %v17075_v7 = vand.u32 4294901760, %v13891_v9  ;;  %v16305_v20 = vand.u32 4294901760, %v14264_v15  ;;  %v14300_v12 = vsub.f32 %v14125_v63, %v14130_v32 }
 0x20e   : > { %4352 = vmatmul.mubr.f32.gmra.mrb[84].mxu1 %v17067_v40  ;;  %5580 = vmatprep.mubr.f32.mxu0 %v4880_v48  ;;  %v10252_v14 = vpack.c.bf16 %v17071_v59, %v17070_v41  ;;  %v10254_v49 = vpack.c.bf16 %v17073_v1, %v17072_v35  ;;  %v16302_v24 = vand.u32 4294901760, %v14272_v16  ;;  %v17076_v51 = vand.u32 4294901760, %v16977_v27  ;;  %v17083_v27 = vld [vmem:[#allocation31_spill] sm:$0xff]  ;;  %v17088_v59 = vld [vmem:[#allocation84_spill] sm:$0xff] }
 0x20f   : > { %4359 = vmatprep.mubr.f32.mxu1 %v17069_v54  ;;  %10249 = vmatpush3.bf16.msra.mxu1 %v10248_v25  ;;  %v17077_v38 = vand.u32 4294901760, %v16976_v56  ;;  %v17078_v9 = vand.u32 4294901760, %v16980_v62  ;;  %v17080_v28 = vand.u32 4294901760, %v17079_v37  ;;  %v17081_v25 = vld [vmem:[#allocation25_spill] sm:$0xff]  ;;  %v14320_v52 = vsub.f32 %v17083_v27, %v14137_v5  ;;  %v17084_v56 = vld [vmem:[#allocation82_spill] sm:$0xff]  ;;  %v17089_v35 = vld [vmem:[#allocation60_spill] sm:$0xff] }
 0x210   : > { %10463 = vmatprep.subr.bf16.mxu0 %v13535_v53  ;;  %5584 = vmatmul.mubr.f32.vlgmr.msra.gmra.mrb[56].mxu0 %v4886_v18  ;;  %v17082_v10 = vand.u32 4294901760, %v17081_v25  ;;  %v16301_v62 = vand.u32 4294901760, %v14292_v43  ;;  %v17087_v54 = vld [vmem:[#allocation33_spill] sm:$0xff]  ;;  %v17090_v1 = vand.u32 4294901760, %v17089_v35  ;;  %v17097_v25 = vld [vmem:[#allocation110_spill] sm:$0xff] }
 0x211   : > { %10251 = vmatprep.subr.bf16.mxu1 %v10250_v46  ;;  %5591 = vmatprep.mubr.f32.mxu0 %v4895_v60  ;;  %v10256_v55 = vpack.c.bf16 %v17077_v38, %v17076_v51  ;;  %v10258_v63 = vpack.c.bf16 %v17080_v28, %v17078_v9  ;;  %v17085_v46 = vld [vmem:[#allocation111_spill] sm:$0xff]  ;;  %v14328_v41 = vsub.f32 %v17087_v54, %v14148_v0  ;;  %v17093_v51 = vld [vmem:[#allocation58_spill] sm:$0xff]  ;;  %v17095_v9 = vld [vmem:[#allocation40_spill] sm:$0xff] }
 0x212   : > { %4363 = vmatmul.mubr.f32.gmra.mrb[86].mxu1 %v17074_v23  ;;  %10465 = vmatpush3.bf16.msra.mxu0 %v17007_v58  ;;  %v17086_v40 = vand.u32 4294901760, %v17085_v46  ;;  %v17094_v38 = vand.u32 4294901760, %v17093_v51  ;;  %v17096_v37 = vand.u32 4294901760, %v17095_v9  ;;  %v17100_v27 = vld [vmem:[#allocation9_spill] sm:$0xff] }
 0x213   : > { %4370 = vmatprep.mubr.f32.mxu1 %v17075_v7  ;;  %10253 = vmatpush3.bf16.msra.mxu1 %v10252_v14  ;;  %v16300_v14 = vand.u32 4294901760, %v14300_v12  ;;  %v17102_v54 = vld [vmem:[#allocation37_spill] sm:$0xff]  ;;  %v16303_v51 = vand.u32 4294901760, %v14328_v41 }
 0x214   : > { %10467 = vmatprep.subr.bf16.mxu0 %v17010_v17  ;;  %5595 = vmatmul.mubr.f32.gmra.mrb[58].mxu0 %v16305_v20  ;;  %v10262_v28 = vpack.c.bf16 %v17096_v37, %v17094_v38  ;;  %v17103_v35 = vand.u32 4294901760, %v17102_v54  ;;  %v17106_v38 = vld [vmem:[#allocation19_spill] sm:$0xff]  ;;  %v17108_v37 = vld [vmem:[#allocation34_spill] sm:$0xff] }
 0x215   : > { %10255 = vmatprep.subr.bf16.mxu1 %v10254_v49  ;;  %5602 = vmatprep.mubr.f32.mxu0 %v16302_v24  ;;  %v17091_v49 = vld [vmem:[#allocation61_spill] sm:$0xff]  ;;  %v17107_v9 = vand.u32 4294901760, %v17106_v38  ;;  %v17116_v38 = vld [vmem:[#allocation11_spill] sm:$0xff] }
 0x216   : > { %4374 = vmatmul.mubr.f32.gmra.mrb[88].mxu1 %v17082_v10  ;;  %10469 = vmatpush3.bf16.msra.mxu0 %v17084_v56  ;;  %v17092_v23 = vand.u32 4294901760, %v17091_v49  ;;  %v17099_v10 = vld [vmem:[#allocation12_spill] sm:$0xff] }
 0x217   : > { %4381 = vmatprep.mubr.f32.mxu1 %v17086_v40  ;;  %10257 = vmatpush3.bf16.msra.mxu1 %v10256_v55  ;;  %v17098_v55 = vand.u32 4294901760, %v17097_v25  ;;  %v14348_v46 = vsub.f32 %v17100_v27, %v17099_v10  ;;  %v17101_v40 = vld [vmem:[#allocation86_spill] sm:$0xff]  ;;  %v17109_v25 = vand.u32 4294901760, %v17108_v37  ;;  %v17110_v27 = vld [vmem:[#allocation59_spill] sm:$0xff]  ;;  %v17117_v37 = vld [vmem:[#allocation89_spill] sm:$0xff] }
 0x218   : > { %10471 = vmatprep.subr.bf16.mxu0 %v17088_v59  ;;  %v10260_v7 = vpack.c.bf16 %v17092_v23, %v17090_v1  ;;  %5606 = vmatmul.mubr.f32.gmra.mrb[60].mxu0 %v16301_v62  ;;  %v17104_v1 = vld [vmem:[#allocation50_spill] sm:$0xff]  ;;  %v17105_v23 = vld [vmem:[#allocation88_spill] sm:$0xff]  ;;  %v17111_v54 = vand.u32 4294901760, %v17110_v27  ;;  %v17114_v62 = vld [vmem:[#allocation113_spill] sm:$0xff] }
 0x219   : > { %10259 = vmatprep.subr.bf16.mxu1 %v10258_v63  ;;  %5613 = vmatprep.mubr.f32.mxu0 %v16300_v14  ;;  %v16304_v63 = vand.u32 4294901760, %v14320_v52  ;;  %v14356_v49 = vsub.f32 %v17104_v1, %v14166_v4  ;;  %v16312_v27 = vand.u32 4294901760, %v14348_v46 }
 0x21a   : > { %4385 = vmatmul.mubr.f32.gmra.mrb[90].mxu1 %v17098_v55  ;;  %10473 = vmatpush3.bf16.msra.mxu0 %v17101_v40  ;;  %v10264_v55 = vpack.c.bf16 %v17109_v25, %v17107_v9  ;;  %v14378_v9 = vsub.f32 %v17116_v38, %v14177_v50 }
 0x21b   : > { %4392 = vmatprep.mubr.f32.mxu1 %v17103_v35  ;;  %10261 = vmatpush3.bf16.msra.mxu1 %v10260_v7  ;;  %v17112_v35 = vld [vmem:[#allocation23_spill] sm:$0xff]  ;;  %v17115_v7 = vand.u32 4294901760, %v17114_v62  ;;  %v14388_v62 = vsub.f32 %v14188_v13, %v14193_v44 }
 0x21c   : > { %10475 = vmatprep.subr.bf16.mxu0 %v17105_v23  ;;  %5617 = vmatmul.mubr.f32.gmra.mrb[62].mxu0 %v16304_v63  ;;  %v17113_v14 = vand.u32 4294901760, %v17112_v35  ;;  %v16311_v35 = vand.u32 4294901760, %v14356_v49 }
 0x21d   : > { %10263 = vmatprep.subr.bf16.mxu1 %v10262_v28  ;;  %5624 = vmatprep.mubr.f32.mxu0 %v16303_v51  ;;  %v14374_v24 = vpop.f32.mrb[16].mxu0  ;;  %v17118_v28 = vld [vmem:[#allocation115_spill] sm:$0xff]  ;;  %v17124_v51 = vld [vmem:[#allocation30_spill] sm:$0xff] }
 0x21e   : > { %v10266_v1 = vpack.c.bf16 %v17113_v14, %v17111_v54  ;;  %4396 = vmatmul.mubr.f32.gmra.mrb[92].mxu1 %v17115_v7  ;;  %10477 = vmatpush3.bf16.msra.mxu0 %v17117_v37  ;;  %v17119_v25 = vand.u32 4294901760, %v17118_v28  ;;  %v14384_v14 = vpop.f32.mrb[17].mxu0  ;;  %v17121_v54 = vld [vmem:[#allocation94_spill] sm:$0xff]  ;;  %v17122_v7 = vld [vmem:[#allocation27_spill] sm:$0xff]  ;;  %v17125_v63 = vand.u32 4294901760, %v17124_v51  ;;  %v17126_v28 = vld [vmem:[#allocation4_spill] sm:$0xff] }
 0x21f   : > { %17120 = vst [vmem:[#allocation39_spill] sm:$0xff] %v14384_v14  ;;  %10265 = vmatpush3.bf16.msra.mxu1 %v10264_v55  ;;  %10479 = vmatprep.subr.bf16.mxu0 %v17121_v54  ;;  %v17123_v38 = vand.u32 4294901760, %v17122_v7  ;;  %v14406_v55 = vsub.f32 %v14186_v57, %v14204_v19  ;;  %v17129_v7 = vld [vmem:[#allocation95_spill] sm:$0xff]  ;;  %vm3320_vm2 = vcmp.ge.f32.partialorder %v14374_v24, 0.0 }
 0x220   : > { %4403 = vmatprep.mubr.f32.mxu1 %v17119_v25  ;;  %5628 = vmatmul.mubr.f32.gmra.mrb[64].mxu0 %v16312_v27  ;;  %v17127_v25 = vand.u32 4294901760, %v17126_v28  ;;  %v17130_v51 = vld [vmem:[#allocation63_spill] sm:$0xff]  ;;  %v16307_v28 = vand.u32 4294901760, %v14388_v62 }
 0x221   : > { %v10268_v20 = vpack.c.bf16 %v17125_v63, %v17123_v38  ;;  %10267 = vmatprep.subr.bf16.mxu1 %v10266_v1  ;;  %5635 = vmatprep.mubr.f32.mxu0 %v16311_v35  ;;  %v14402_v13 = vpop.f32.mrb[18].mxu0  ;;  %v16306_v63 = vand.u32 4294901760, %v14378_v9  ;;  %v14415_v1 = vsub.f32 %v14214_v8, %v14223_v30  ;;  %v17133_v8 = vld [vmem:[#allocation62_spill] sm:$0xff]  ;;  %v17168_v27 = vld [vmem:[#allocation75_spill] sm:$0xff] }
 0x222   : > { %4407 = vmatmul.mubr.f32.gmra.mrb[94].mxu1 %v17127_v25  ;;  %17128 = vst [vmem:[#allocation14_spill] sm:$0xff] %v14402_v13  ;;  %10481 = vmatpush3.bf16.msra.mxu0 %v17129_v7  ;;  %v14411_v38 = vpop.f32.mrb[19].mxu0  ;;  %v14428_v25 = vsub.f32 %v14212_v39, %v14238_v33 }
 0x223   : > { %4573 = vmatprep.mubr.f32.mxu1 %v17130_v51  ;;  %17131 = vst [vmem:[#allocation55_spill] sm:$0xff] %v14411_v38  ;;  %10269 = vmatpush3.bf16.msra.mxu1 %v10268_v20  ;;  %v16310_v20 = vand.u32 4294901760, %v14406_v55 }
 0x224   : > { %10483 = vmatprep.subr.bf16.mxu0 %v17044_v47  ;;  %5639 = vmatmul.mubr.f32.gmra.mrb[66].mxu0 %v16306_v63  ;;  %v17135_v63 = vld [vmem:[#allocation54_spill] sm:$0xff] }
 0x225   : > { %10303 = vmatprep.subr.bf16.mxu1 %v13535_v53  ;;  %5646 = vmatprep.mubr.f32.mxu0 %v16307_v28  ;;  %v14424_v57 = vpop.f32.mrb[20].mxu0  ;;  %v16309_v53 = vand.u32 4294901760, %v14415_v1  ;;  %v17139_v28 = vld [vmem:[#allocation45_spill] sm:$0xff] }
 0x226   : > { %17132 = vst [vmem:[#allocation36_spill] sm:$0xff] %v14424_v57  ;;  %4575 = vmatmul.mubr.f32.vlgmr.msra.gmra.mrb[96].mxu1 %v17133_v8  ;;  %10485 = vmatpush3.bf16.msra.mxu0 %v17049_v11  ;;  %v14433_v51 = vpop.f32.mrb[21].mxu0  ;;  %v17137_v8 = vld [vmem:[#allocation65_spill] sm:$0xff] }
 0x227   : > { %17134 = vst [vmem:[#allocation80_spill] sm:$0xff] %v14433_v51  ;;  %4580 = vmatprep.mubr.f32.mxu1 %v17135_v63  ;;  %10305 = vmatpush3.bf16.msra.mxu1 %v17007_v58  ;;  %v16308_v58 = vand.u32 4294901760, %v14428_v25  ;;  %v17182_v51 = vld [vmem:[#allocation90_spill] sm:$0xff] }
 0x228   : > { %5650 = vmatmul.mubr.f32.gmra.mrb[68].mxu0 %v16310_v20  ;;  %10487 = vmatprep.subr.bf16.mxu0 %v17054_v22 }
 0x229   : > { %10307 = vmatprep.subr.bf16.mxu1 %v17010_v17  ;;  %5657 = vmatprep.mubr.f32.mxu0 %v16309_v53  ;;  %v14444_v39 = vpop.f32.mrb[22].mxu0  ;;  %v17140_v17 = vld [vmem:[#allocation57_spill] sm:$0xff]  ;;  %v17162_v53 = vld [vmem:[#allocation71_spill] sm:$0xff] }
 0x22a   : > { %17136 = vst [vmem:[#allocation42_spill] sm:$0xff] %v14444_v39  ;;  %4582 = vmatmul.mubr.f32.gmra.mrb[98].mxu1 %v17137_v8  ;;  %10489 = vmatpush3.bf16.msra.mxu0 %v17059_v31  ;;  %v14449_v63 = vpop.f32.mrb[23].mxu0  ;;  %v17141_v8 = vld [vmem:[#allocation15_spill] sm:$0xff] }
 0x22b   : > { %17138 = vst [vmem:[#allocation81_spill] sm:$0xff] %v14449_v63  ;;  %4587 = vmatprep.mubr.f32.mxu1 %v17139_v28  ;;  %10309 = vmatpush3.bf16.msra.mxu1 %v17084_v56  ;;  %v17142_v56 = vld [vmem:[#allocation35_spill] sm:$0xff]  ;;  %v17143_v28 = vld [vmem:[#allocation26_spill] sm:$0xff]  ;;  %v17178_v63 = vand.u32 4294901760, %v14356_v49 }
 0x22c   : > { %5661 = vmatmul.mubr.f32.gmra.mrb[70].mxu0 %v16308_v58  ;;  %10491 = vmatprep.subr.bf16.mxu0 %v17062_v36 }
 0x22d   : > { %10311 = vmatprep.subr.bf16.mxu1 %v17088_v59  ;;  %5980 = vmatprep.mubr.f32.mxu0 %v14080_v26  ;;  %v17144_v59 = vld [vmem:[#allocation13_spill] sm:$0xff] }
 0x22e   : > { %4589 = vmatmul.mubr.f32.gmra.mrb[100].mxu1 %v17140_v17  ;;  %10493 = vmatpush3.bf16.msra.mxu0 %v17068_v6  ;;  %v17151_v17 = vld [vmem:[#allocation38_spill] sm:$0xff] }
 0x22f   : > { %4594 = vmatprep.mubr.f32.mxu1 %v17141_v8  ;;  %10313 = vmatpush3.bf16.msra.mxu1 %v17101_v40  ;;  %v17145_v40 = vld [vmem:[#allocation22_spill] sm:$0xff] }
 0x230   : > { %10315 = vmatprep.subr.bf16.mxu1 %v17105_v23  ;;  %v17146_v23 = vld [vmem:[#allocation44_spill] sm:$0xff] }
 0x231   : > { %5982 = vmatmul.mubr.f32.vlgmr.msra.gmra.mrb[72].mxu0 %v14084_v42 }
 0x232   : > { %4596 = vmatmul.mubr.f32.gmra.mrb[102].mxu1 %v17142_v56  ;;  %5987 = vmatprep.mubr.f32.mxu0 %v14095_v29  ;;  %v4896_v56 = vsub.f32 %v14244_v61, %v4895_v60 }
 0x233   : > { %4601 = vmatprep.mubr.f32.mxu1 %v17143_v28  ;;  %10317 = vmatpush3.bf16.msra.mxu1 %v17117_v37  ;;  %v17147_v37 = vld [vmem:[#allocation32_spill] sm:$0xff]  ;;  %v17152_v28 = vld [vmem:[#allocation43_spill] sm:$0xff] }
 0x234   : > { %10319 = vmatprep.subr.bf16.mxu1 %v17121_v54  ;;  %v4881_v54 = vsub.f32 %v14220_v34, %v4880_v48  ;;  %v4897_v60 = vand.u32 4294901760, %v4896_v56  ;;  %v17163_v56 = vld [vmem:[#allocation72_spill] sm:$0xff] }
 0x235   : > { %5989 = vmatmul.mubr.f32.gmra.mrb[74].mxu0 %v14101_v21  ;;  %v10374_v20 = vpack.c.bf16 %v17163_v56, %v17162_v53  ;;  %v17189_v21 = vld [vmem:[#allocation96_spill] sm:$0xff] }
 0x236   : > { %4603 = vmatmul.mubr.f32.gmra.mrb[104].mxu1 %v17144_v59  ;;  %5994 = vmatprep.mubr.f32.mxu0 %v14112_v45  ;;  %v4882_v48 = vand.u32 4294901760, %v4881_v54  ;;  %v17157_v54 = vld [vmem:[#allocation24_spill] sm:$0xff] }
 0x237   : > { %4608 = vmatprep.mubr.f32.mxu1 %v17145_v40  ;;  %10321 = vmatpush3.bf16.msra.mxu1 %v17129_v7  ;;  %v17148_v7 = vld [vmem:[#allocation112_spill] sm:$0xff]  ;;  %v17155_v40 = vand.u32 4294901760, %v14264_v15 }
 0x238   : > { %10323 = vmatprep.subr.bf16.mxu1 %v17044_v47  ;;  %v17149_v47 = vld [vmem:[#allocation114_spill] sm:$0xff] }
 0x239   : > { %5996 = vmatmul.mubr.f32.gmra.mrb[76].mxu0 %v14119_v2  ;;  %v17183_v2 = vld [vmem:[#allocation91_spill] sm:$0xff] }
 0x23a   : > { %4610 = vmatmul.mubr.f32.gmra.mrb[106].mxu1 %v17146_v23  ;;  %6001 = vmatprep.mubr.f32.mxu0 %v14130_v32  ;;  %v4902_v23 = vsub.f32 %v14264_v15, %v17155_v40  ;;  %v17161_v40 = vand.u32 4294901760, %v14292_v43  ;;  %v10386_v13 = vpack.c.bf16 %v17183_v2, %v17182_v51 }
 0x23b   : > { %4615 = vmatprep.mubr.f32.mxu1 %v17147_v37  ;;  %10325 = vmatpush3.bf16.msra.mxu1 %v17049_v11  ;;  %v4887_v11 = vsub.f32 %v14235_v3, %v4886_v18  ;;  %v17154_v18 = vld [vmem:[#allocation16_spill] sm:$0xff] }
 0x23c   : > { %10327 = vmatprep.subr.bf16.mxu1 %v17054_v22  ;;  %v17150_v22 = vld [vmem:[#allocation17_spill] sm:$0xff]  ;;  %v17156_v37 = vld [vmem:[#allocation20_spill] sm:$0xff]  ;;  %v4917_v58 = vsub.f32 %v14292_v43, %v17161_v40 }
 0x23d   : > { %6003 = vmatmul.mubr.f32.gmra.mrb[78].mxu0 %v14137_v5  ;;  %v10366_v8 = vpack.c.bf16 %v17151_v17, %v17150_v22  ;;  %v4888_v59 = vand.u32 4294901760, %v4887_v11  ;;  %v17159_v11 = vld [vmem:[#allocation69_spill] sm:$0xff]  ;;  %v17199_v42 = vand.u32 4294901760, %v17150_v22 }
 0x23e   : > { %4617 = vmatmul.mubr.f32.gmra.mrb[108].mxu1 %v17148_v7  ;;  %6008 = vmatprep.mubr.f32.mxu0 %v14148_v0  ;;  %v10370_v7 = vpack.c.bf16 %v17157_v54, %v17156_v37  ;;  %v4918_v35 = vand.u32 4294901760, %v4917_v58  ;;  %v17172_v58 = vld [vmem:[#allocation78_spill] sm:$0xff]  ;;  %v17179_v5 = vld [vmem:[#allocation85_spill] sm:$0xff] }
 0x23f   : > { %4622 = vmatprep.mubr.f32.mxu1 %v17149_v47  ;;  %10329 = vmatpush3.bf16.msra.mxu1 %v17059_v31  ;;  %v17153_v31 = vld [vmem:[#allocation18_spill] sm:$0xff]  ;;  %v17158_v47 = vand.u32 4294901760, %v14272_v16 }
 0x240   : > { %10331 = vmatprep.subr.bf16.mxu1 %v17062_v36  ;;  %v10368_v36 = vpack.c.bf16 %v17154_v18, %v17153_v31 }
 0x241   : > { %6010 = vmatmul.mubr.f32.gmra.mrb[80].mxu0 %v17099_v10 }
 0x242   : > { %4624 = vmatmul.mubr.f32.gmra.mrb[110].mxu1 %v17152_v28  ;;  %6015 = vmatprep.mubr.f32.mxu0 %v14166_v4  ;;  %v4903_v28 = vand.u32 4294901760, %v4902_v23  ;;  %v14534_v23 = vld [vmem:[%s15868_s2 + $0x208] sm:$0xff] }
 0x243   : > { %10333 = vmatpush3.bf16.msra.mxu1 %v17068_v6  ;;  %4883 = vmatprep.mubr.f32.mxu1 %v4882_v48  ;;  %v4911_v6 = vsub.f32 %v14272_v16, %v17158_v47  ;;  %v16325_v4 = vand.u32 4294901760, %v14534_v23 }
 0x244   : > { %10367 = vmatprep.subr.bf16.mxu1 %v10366_v8  ;;  %v17160_v8 = vld [vmem:[#allocation70_spill] sm:$0xff] }
 0x245   : > { %6017 = vmatmul.mubr.f32.gmra.mrb[82].mxu0 %v14177_v50  ;;  %v10372_v48 = vpack.c.bf16 %v17160_v8, %v17159_v11  ;;  %v4912_v47 = vand.u32 4294901760, %v4911_v6  ;;  %v17166_v6 = vld [vmem:[#allocation74_spill] sm:$0xff]  ;;  %v17170_v50 = vand.u32 4294901760, %v14328_v41 }
 0x246   : > { %4889 = vmatmul.mubr.f32.vlgmr.msra.gmra.mrb[112].mxu1 %v4888_v59  ;;  %6022 = vmatprep.mubr.f32.mxu0 %v14193_v44  ;;  %v17164_v59 = vand.u32 4294901760, %v14300_v12 }
 0x247   : > { %4898 = vmatprep.mubr.f32.mxu1 %v4897_v60  ;;  %10369 = vmatpush3.bf16.msra.mxu1 %v10368_v36  ;;  %v14529_v36 = vld [vmem:[%s15868_s2 + $0x200] sm:$0xff] }
 0x248   : > { %10371 = vmatprep.subr.bf16.mxu1 %v10370_v7  ;;  %v4926_v60 = vsub.f32 %v14300_v12, %v17164_v59  ;;  %v17165_v7 = vld [vmem:[#allocation73_spill] sm:$0xff] }
 0x249   : > { %6024 = vmatmul.mubr.f32.gmra.mrb[84].mxu0 %v14204_v19  ;;  %v10376_v40 = vpack.c.bf16 %v17166_v6, %v17165_v7 }
 0x24a   : > { %4904 = vmatmul.mubr.f32.gmra.mrb[114].mxu1 %v4903_v28  ;;  %6029 = vmatprep.mubr.f32.mxu0 %v14223_v30  ;;  %v17167_v28 = vand.u32 4294901760, %v14320_v52  ;;  %v17169_v30 = vld [vmem:[#allocation76_spill] sm:$0xff]  ;;  %v4927_v44 = vand.u32 4294901760, %v4926_v60  ;;  %v14559_v60 = vsub.f32 %v14534_v23, %v16325_v4  ;;  %v17180_v4 = vld [vmem:[#allocation87_spill] sm:$0xff] }
 0x24b   : > { %4913 = vmatprep.mubr.f32.mxu1 %v4912_v47  ;;  %10373 = vmatpush3.bf16.msra.mxu1 %v10372_v48  ;;  %v10378_v19 = vpack.c.bf16 %v17169_v30, %v17168_v27  ;;  %v4941_v47 = vsub.f32 %v14328_v41, %v17170_v50  ;;  %v16323_v48 = vand.u32 4294901760, %v14529_v36  ;;  %v10384_v57 = vpack.c.bf16 %v17180_v4, %v17179_v5 }
 0x24c   : > { %10375 = vmatprep.subr.bf16.mxu1 %v10374_v20  ;;  %v4932_v59 = vsub.f32 %v14320_v52, %v17167_v28  ;;  %v17171_v20 = vld [vmem:[#allocation77_spill] sm:$0xff]  ;;  %17174 = vst [vmem:[#allocation2_spill] sm:$0xff] %v14559_v60 }
 0x24d   : > { %6031 = vmatmul.mubr.f32.gmra.mrb[86].mxu0 %v14238_v33  ;;  %v10380_v28 = vpack.c.bf16 %v17172_v58, %v17171_v20  ;;  %v14554_v10 = vsub.f32 %v14529_v36, %v16323_v48  ;;  %v17175_v33 = vand.u32 4294901760, %v14348_v46  ;;  %v4942_v0 = vand.u32 4294901760, %v4941_v47 }
 0x24e   : > { %4919 = vmatmul.mubr.f32.gmra.mrb[116].mxu1 %v4918_v35  ;;  %v4933_v50 = vand.u32 4294901760, %v4932_v59  ;;  %v17176_v35 = vld [vmem:[#allocation79_spill] sm:$0xff]  ;;  %v4956_v48 = vsub.f32 %v14356_v49, %v17178_v63  ;;  %v16339_v59 = vand.u32 4294901760, %v14559_v60  ;;  %v17191_v60 = vand.u32 4294901760, %v14415_v1 }
 0x24f   : > { %4928 = vmatprep.mubr.f32.mxu1 %v4927_v44  ;;  %10377 = vmatpush3.bf16.msra.mxu1 %v10376_v40  ;;  %17173 = vst [vmem:[#allocation47_spill] sm:$0xff] %v14554_v10  ;;  %v4947_v44 = vsub.f32 %v14348_v46, %v17175_v33  ;;  %v17177_v40 = vld [vmem:[#allocation83_spill] sm:$0xff]  ;;  %v17181_v33 = vand.u32 4294901760, %v14378_v9 }
 0x250   : > { %10379 = vmatprep.subr.bf16.mxu1 %v10378_v19  ;;  %v10382_v39 = vpack.c.bf16 %v17177_v40, %v17176_v35  ;;  %v16340_v19 = vand.u32 4294901760, %v14554_v10  ;;  %v4957_v63 = vand.u32 4294901760, %v4956_v48  ;;  %v17188_v48 = vand.u32 4294901760, %v14406_v55 }
 0x251   : > { %v4948_v32 = vand.u32 4294901760, %v4947_v44  ;;  %v4962_v47 = vsub.f32 %v14378_v9, %v17181_v33  ;;  %v17187_v44 = vld [vmem:[#allocation93_spill] sm:$0xff] }
 0x252   : > { %4934 = vmatmul.mubr.f32.gmra.mrb[118].mxu1 %v4933_v50  ;;  %v14585_v50 = vpack.c.bf16 %v16339_v59, %v16340_v19  ;;  %v4977_v38 = vsub.f32 %v14406_v55, %v17188_v48  ;;  %v4986_v59 = vsub.f32 %v14415_v1, %v17191_v60  ;;  %v17195_v19 = vld [vmem:[#allocation101_spill] sm:$0xff]  ;;  %v17197_v60 = vld [vmem:[#allocation104_spill] sm:$0xff] }
 0x253   : > { %4943 = vmatprep.mubr.f32.mxu1 %v4942_v0  ;;  %10381 = vmatpush3.bf16.msra.mxu1 %v10380_v28  ;;  %v17184_v0 = vand.u32 4294901760, %v14388_v62  ;;  %v4963_v45 = vand.u32 4294901760, %v4962_v47 }
 0x254   : > { %10383 = vmatprep.subr.bf16.mxu1 %v10382_v39  ;;  %17185 = vst [vmem:[#allocation41_spill] sm:$0xff] %v14585_v50  ;;  %v17186_v39 = vld [vmem:[#allocation92_spill] sm:$0xff]  ;;  %v4978_v47 = vand.u32 4294901760, %v4977_v38  ;;  %v17196_v50 = vld [vmem:[#allocation102_spill] sm:$0xff] }
 0x255   : > { %v4971_v28 = vsub.f32 %v14388_v62, %v17184_v0  ;;  %v10388_v33 = vpack.c.bf16 %v17187_v44, %v17186_v39  ;;  %v17190_v0 = vld [vmem:[#allocation97_spill] sm:$0xff]  ;;  %v10394_v14 = vpack.c.bf16 %v17196_v50, %v17195_v19 }
 0x256   : > { %4949 = vmatmul.mubr.f32.gmra.mrb[120].mxu1 %v4948_v32  ;;  %v10390_v29 = vpack.c.bf16 %v17190_v0, %v17189_v21  ;;  %v17192_v32 = vld [vmem:[#allocation98_spill] sm:$0xff] }
 0x257   : > { %4958 = vmatprep.mubr.f32.mxu1 %v4957_v63  ;;  %10385 = vmatpush3.bf16.msra.mxu1 %v10384_v57  ;;  %v4972_v10 = vand.u32 4294901760, %v4971_v28  ;;  %v17193_v57 = vld [vmem:[#allocation99_spill] sm:$0xff]  ;;  %v4987_v28 = vand.u32 4294901760, %v4986_v59  ;;  %v17202_v59 = vand.u32 4294901760, %v17154_v18 }
 0x258   : > { %10387 = vmatprep.subr.bf16.mxu1 %v10386_v13  ;;  %v10392_v63 = vpack.c.bf16 %v17193_v57, %v17192_v32  ;;  %v17194_v13 = vand.u32 4294901760, %v14428_v25 }
 0x25a   : > { %4964 = vmatmul.mubr.f32.gmra.mrb[122].mxu1 %v4963_v45  ;;  %v4992_v48 = vsub.f32 %v14428_v25, %v17194_v13  ;;  %v17198_v45 = vld [vmem:[#allocation107_spill] sm:$0xff]  ;;  %v17201_v13 = vand.u32 4294901760, %v17153_v31  ;;  %v17208_v31 = vand.u32 4294901760, %v17163_v56  ;;  %v17212_v56 = vand.u32 4294901760, %v17169_v30 }
 0x25b   : > { %4973 = vmatprep.mubr.f32.mxu1 %v4972_v10  ;;  %10389 = vmatpush3.bf16.msra.mxu1 %v10388_v33  ;;  %v10396_v10 = vpack.c.bf16 %v17198_v45, %v17197_v60  ;;  %v17216_v30 = vand.u32 4294901760, %v17177_v40  ;;  %v17219_v40 = vand.u32 4294901760, %v17182_v51  ;;  %v17224_v51 = vand.u32 4294901760, %v17190_v0 }
 0x25c   : > { %10391 = vmatprep.subr.bf16.mxu1 %v10390_v29  ;;  %v4993_v33 = vand.u32 4294901760, %v4992_v48  ;;  %v17200_v29 = vand.u32 4294901760, %v17151_v17  ;;  %v17204_v48 = vand.u32 4294901760, %v17157_v54  ;;  %v17207_v17 = vand.u32 4294901760, %v17162_v53 }
 0x25d   : > { %v17211_v53 = vand.u32 4294901760, %v17168_v27  ;;  %v17215_v27 = vand.u32 4294901760, %v17176_v35  ;;  %v17228_v0 = vand.u32 4294901760, %v17196_v50  ;;  %v17229_v50 = vand.u32 4294901760, %v17197_v60 }
 0x25e   : > { %4979 = vmatmul.mubr.f32.gmra.mrb[124].mxu1 %v4978_v47  ;;  %v10430_v38 = vpack.c.bf16 %v17200_v29, %v17199_v42  ;;  %v10432_v47 = vpack.c.bf16 %v17202_v59, %v17201_v13  ;;  %v17205_v42 = vand.u32 4294901760, %v17159_v11  ;;  %v10438_v18 = vpack.c.bf16 %v17208_v31, %v17207_v17 }
 0x25f   : > { %4988 = vmatprep.mubr.f32.mxu1 %v4987_v28  ;;  %10393 = vmatpush3.bf16.msra.mxu1 %v10392_v63  ;;  %v17203_v63 = vand.u32 4294901760, %v17156_v37  ;;  %v10442_v28 = vpack.c.bf16 %v17212_v56, %v17211_v53  ;;  %v10446_v29 = vpack.c.bf16 %v17216_v30, %v17215_v27  ;;  %v14714_v56 = vld [vmem:[%s15868_s2 + $0x220] sm:$0xff]  ;;  %v17232_v60 = vand.u32 4294901760, %v14534_v23 }
 0x260   : > { %10395 = vmatprep.subr.bf16.mxu1 %v10394_v14 }
 0x261   : > { %v10434_v14 = vpack.c.bf16 %v17204_v48, %v17203_v63 }
 0x262   : > { %4994 = vmatmul.mubr.f32.gmra.mrb[126].mxu1 %v4993_v33 }
 0x263   : > { %10397 = vmatpush3.bf16.msra.mxu1 %v10396_v10  ;;  %5410 = vmatprep.mubr.f32.mxu1 %v14220_v34  ;;  %v17206_v34 = vand.u32 4294901760, %v17160_v8 }
 0x264   : > { %10431 = vmatprep.subr.bf16.mxu1 %v10430_v38 }
 0x265   : > { %v10436_v22 = vpack.c.bf16 %v17206_v34, %v17205_v42 }
 0x266   : > { %5413 = vmatmul.mubr.f32.vlgmr.msra.gmra.mrb[128].mxu1 %v14235_v3  ;;  %v17209_v3 = vand.u32 4294901760, %v17165_v7  ;;  %v17214_v7 = vand.u32 4294901760, %v17172_v58 }
 0x267   : > { %5419 = vmatprep.mubr.f32.mxu1 %v14244_v61  ;;  %10433 = vmatpush3.bf16.msra.mxu1 %v10432_v47  ;;  %v17210_v61 = vand.u32 4294901760, %v17166_v6 }
 0x268   : > { %10435 = vmatprep.subr.bf16.mxu1 %v10434_v14 }
 0x269   : > { %v10440_v54 = vpack.c.bf16 %v17210_v61, %v17209_v3 }
 0x26a   : > { %5422 = vmatmul.mubr.f32.gmra.mrb[130].mxu1 %v14264_v15  ;;  %v8514_v37 = vpop.f32.mrb[24].mxu0 }
 0x26b   : > { %5428 = vmatprep.mubr.f32.mxu1 %v14272_v16  ;;  %10437 = vmatpush3.bf16.msra.mxu1 %v10436_v22  ;;  %v8515_v11 = vpop.f32.mrb[25].mxu0  ;;  %v17213_v16 = vand.u32 4294901760, %v17171_v20  ;;  %v17218_v20 = vand.u32 4294901760, %v17180_v4  ;;  %v17221_v4 = vand.u32 4294901760, %v17186_v39  ;;  %v17225_v39 = vand.u32 4294901760, %v17192_v32 }
 0x26c   : > { %10439 = vmatprep.subr.bf16.mxu1 %v10438_v18  ;;  %v14635_v8 = vadd.f32 %v8515_v11, %v8514_v37 }
 0x26d   : > { %v10444_v6 = vpack.c.bf16 %v17214_v7, %v17213_v16 }
 0x26e   : > { %5431 = vmatmul.mubr.f32.gmra.mrb[132].mxu1 %v14292_v43  ;;  %v8517_v15 = vpop.f32.mrb[26].mxu0 }
 0x26f   : > { %5437 = vmatprep.mubr.f32.mxu1 %v14300_v12  ;;  %10441 = vmatpush3.bf16.msra.mxu1 %v10440_v54  ;;  %v8518_v10 = vpop.f32.mrb[27].mxu0  ;;  %v17217_v12 = vand.u32 4294901760, %v17179_v5  ;;  %v17222_v5 = vand.u32 4294901760, %v17187_v44  ;;  %v17226_v44 = vand.u32 4294901760, %v17193_v57  ;;  %v17230_v54 = vand.u32 4294901760, %v17198_v45 }
 0x270   : > { %10443 = vmatprep.subr.bf16.mxu1 %v10442_v28  ;;  %v14647_v33 = vadd.f32 %v8518_v10, %v8517_v15  ;;  %v17231_v28 = vand.u32 4294901760, %v14529_v36 }
 0x271   : > { %v10448_v58 = vpack.c.bf16 %v17218_v20, %v17217_v12  ;;  %v10452_v48 = vpack.c.bf16 %v17222_v5, %v17221_v4  ;;  %v10456_v31 = vpack.c.bf16 %v17226_v44, %v17225_v39  ;;  %v10460_v11 = vpack.c.bf16 %v17230_v54, %v17229_v50  ;;  %v17234_v12 = vld [vmem:[#allocation66_spill] sm:$0xff]  ;;  %v17242_v39 = vld [vmem:[#allocation68_spill] sm:$0xff] }
 0x272   : > { %5440 = vmatmul.mubr.f32.gmra.mrb[134].mxu1 %v14320_v52  ;;  %v8234_v43 = vpop.f32.mrb[32].mxu1  ;;  %v8520_v38 = vpop.f32.mrb[28].mxu0  ;;  %v17220_v52 = vand.u32 4294901760, %v17183_v2  ;;  %v17223_v2 = vand.u32 4294901760, %v17189_v21  ;;  %v17227_v21 = vand.u32 4294901760, %v17195_v19  ;;  %v14727_v45 = vpack.c.bf16 %v17232_v60, %v17231_v28  ;;  %v17246_v60 = vld [vmem:[#allocation28_spill] sm:$0xff] }
 0x273   : > { %5446 = vmatprep.mubr.f32.mxu1 %v14328_v41  ;;  %10445 = vmatpush3.bf16.msra.mxu1 %v10444_v6  ;;  %v8235_v13 = vpop.f32.mrb[33].mxu1  ;;  %v8521_v59 = vpop.f32.mrb[29].mxu0  ;;  %v6049_v6 = vand.u32 4294901760, %v14714_v56 }
 0x274   : > { %10447 = vmatprep.subr.bf16.mxu1 %v10446_v29  ;;  %v14659_v47 = vadd.f32 %v8235_v13, %v8234_v43  ;;  %v14661_v35 = vadd.f32 %v8521_v59, %v8520_v38  ;;  %v10450_v63 = vpack.c.bf16 %v17220_v52, %v17219_v40  ;;  %v10458_v3 = vpack.c.bf16 %v17228_v0, %v17227_v21  ;;  %v14747_v29 = vld [vmem:[%s15868_s2 + $0x230] sm:$0xff]  ;;  %v17235_v13 = vld [vmem:[#allocation39_spill] sm:$0xff] }
 0x275   : > { %v3360_v38 = vmul.f32 0.2, %v14374_v24  ;;  %v3355_v59 = vmul.f32 0.2, %v17235_v13  ;;  %v17236_v40 = vld [vmem:[#allocation67_spill] sm:$0xff]  ;;  %vm3315_vm3 = vcmp.ge.f32.partialorder %v17235_v13, 0.0 }
 0x276   : > { %5449 = vmatmul.mubr.f32.gmra.mrb[136].mxu1 %v14348_v46  ;;  %v8523_v41 = vpop.f32.mrb[30].mxu0  ;;  %v10454_v46 = vpack.c.bf16 %v17224_v51, %v17223_v2  ;;  %v17244_v0 = vld [vmem:[#allocation7_spill] sm:$0xff] }
 0x277   : > { %5455 = vmatprep.mubr.f32.mxu1 %v14356_v49  ;;  %10449 = vmatpush3.bf16.msra.mxu1 %v10448_v58  ;;  %v8237_v14 = vpop.f32.mrb[34].mxu1  ;;  %v8524_v42 = vpop.f32.mrb[31].mxu0  ;;  %v3400_v44 = vsel %vm3320_vm2, %v14374_v24, %v3360_v38 }
 0x278   : > { %10451 = vmatprep.subr.bf16.mxu1 %v10450_v63  ;;  %v8238_v34 = vpop.f32.mrb[35].mxu1  ;;  %v14673_v22 = vadd.f32 %v8524_v42, %v8523_v41  ;;  %v6055_v63 = vand.u32 4294901760, %v14747_v29 }
 0x279   : > { %v14679_v17 = vadd.f32 %v8238_v34, %v8237_v14  ;;  %v17240_v34 = vld [vmem:[#allocation2_spill] sm:$0xff] }
 0x27a   : > { %5458 = vmatmul.mubr.f32.gmra.mrb[138].mxu1 %v14378_v9  ;;  %v14696_v9 = vld [vmem:[%s15868_s2 + $0x210] sm:$0xff]  ;;  %v17241_v2 = vand.u32 4294901760, %v17240_v34 }
 0x27b   : > { %v8526_v49 = vpop.f32.mrb[32].mxu0  ;;  %5464 = vmatprep.mubr.f32.mxu1 %v14388_v62  ;;  %10453 = vmatpush3.bf16.msra.mxu1 %v10452_v48  ;;  %v14701_v62 = vld [vmem:[%s15868_s2 + $0x218] sm:$0xff]  ;;  %v6043_v15 = vand.u32 4294901760, %v14696_v9  ;;  %v17238_v48 = vld [vmem:[#allocation47_spill] sm:$0xff] }
 0x27c   : > { %v8527_v18 = vpop.f32.mrb[33].mxu0  ;;  %10455 = vmatprep.subr.bf16.mxu1 %v10454_v46  ;;  %v6046_v16 = vand.u32 4294901760, %v14701_v62  ;;  %v17239_v14 = vand.u32 4294901760, %v17238_v48  ;;  %v6200_v51 = vsub.f32 %v17240_v34, %v17241_v2  ;;  %v17250_v2 = vld [vmem:[#allocation46_spill] sm:$0xff] }
 0x27d   : > { %v14687_v37 = vadd.f32 %v8527_v18, %v8526_v49  ;;  %v17243_v18 = vld [vmem:[#allocation55_spill] sm:$0xff] }
 0x27e   : > { %v8240_v61 = vpop.f32.mrb[36].mxu1  ;;  %5467 = vmatmul.mubr.f32.gmra.mrb[140].mxu1 %v14406_v55  ;;  %v14719_v55 = vld [vmem:[%s15868_s2 + $0x228] sm:$0xff]  ;;  %v6193_v42 = vsub.f32 %v17238_v48, %v17239_v14  ;;  %v3365_v21 = vmul.f32 0.2, %v17243_v18  ;;  %vm3325_vm5 = vcmp.ge.f32.partialorder %v17243_v18, 0.0  ;;  %v6201_v50 = vand.u32 4294901760, %v6200_v51 }
 0x27f   : > { %v8241_v32 = vpop.f32.mrb[37].mxu1  ;;  %v8529_v57 = vpop.f32.mrb[34].mxu0  ;;  %5473 = vmatprep.mubr.f32.mxu1 %v14415_v1  ;;  %10457 = vmatpush3.bf16.msra.mxu1 %v10456_v31  ;;  %v6052_v10 = vand.u32 4294901760, %v14719_v55  ;;  %v3395_v31 = vsel %vm3315_vm3, %v17235_v13, %v3355_v59  ;;  %v14827_v51 = vsub.f32 %v14696_v9, %v6043_v15 }
 0x280   : > { %v14705_v19 = vadd.f32 %v8241_v32, %v8240_v61  ;;  %v8530_v53 = vpop.f32.mrb[35].mxu0  ;;  %10459 = vmatprep.subr.bf16.mxu1 %v10458_v3  ;;  %v17245_v61 = vld [vmem:[#allocation14_spill] sm:$0xff]  ;;  %v6194_v24 = vand.u32 4294901760, %v6193_v42 }
 0x281   : > { %v14721_v1 = vadd.f32 %v8530_v53, %v8529_v57  ;;  %v14762_v58 = vpack.c.bf16 %v6052_v10, %v6049_v6  ;;  %v3370_v32 = vmul.f32 0.2, %v17245_v61  ;;  %vm3330_vm6 = vcmp.ge.f32.partialorder %v17245_v61, 0.0 }
 0x282   : > { %5476 = vmatmul.mubr.f32.gmra.mrb[142].mxu1 %v14428_v25  ;;  %v14742_v25 = vpack.c.bf16 %v6046_v16, %v6043_v15  ;;  %v3505_v53 = vsel %vm3503_vm4, %v3395_v31, 0  ;;  %v14813_v59 = vpack.c.bf16 %v6201_v50, %v6194_v24 }
 0x283   : > { %v8532_v7 = vpop.f32.mrb[36].mxu0  ;;  %10461 = vmatpush3.bf16.msra.mxu1 %v10460_v11  ;;  %5827 = vmatprep.mubr.f32.mxu1 %v14080_v26  ;;  %v14752_v26 = vld [vmem:[%s15868_s2 + $0x238] sm:$0xff]  ;;  %v3508_v11 = vsel %vm3503_vm4, %v3400_v44, 0  ;;  %v3410_v38 = vsel %vm3330_vm6, %v17245_v61, %v3370_v32  ;;  %v17253_v61 = vld [vmem:[#allocation42_spill] sm:$0xff] }
 0x284   : > { %v8243_v27 = vpop.f32.mrb[38].mxu1  ;;  %v8533_v36 = vpop.f32.mrb[37].mxu0  ;;  %10495 = vmatprep.subr.bf16.mxu1 %v14727_v45  ;;  %v6058_v41 = vand.u32 4294901760, %v14752_v26  ;;  %v17251_v44 = vld [vmem:[#allocation81_spill] sm:$0xff]  ;;  %v3390_v9 = vmul.f32 0.2, %v17253_v61 }
 0x285   : > { %v8244_v30 = vpop.f32.mrb[39].mxu1  ;;  %v14736_v23 = vadd.f32 %v8533_v36, %v8532_v7  ;;  %v3405_v7 = vsel %vm3325_vm5, %v17243_v18, %v3365_v21  ;;  %v3385_v31 = vmul.f32 0.2, %v17251_v44  ;;  %v17252_v18 = vld [vmem:[#allocation10_spill] sm:$0xff]  ;;  %v14837_v21 = vsub.f32 %v14701_v62, %v6046_v16 }
 0x286   : > { %v14754_v43 = vadd.f32 %v8244_v30, %v8243_v27  ;;  %5829 = vmatmul.mubr.f32.vlgmr.msra.gmra.mrb[144].mxu1 %v17234_v12  ;;  %v14794_v3 = vpack.c.bf16 %v6058_v41, %v6055_v63  ;;  %v17247_v27 = vld [vmem:[#allocation80_spill] sm:$0xff]  ;;  %v3511_v14 = vsel %vm3503_vm4, %v3405_v7, 0  ;;  %vm3345_vm9 = vcmp.ge.f32.partialorder %v17251_v44, 0.0 }
 0x287   : > { %17233 = vst [vmem:[#allocation6_spill] sm:$0xff] %v14736_v23  ;;  %v8535_v20 = vpop.f32.mrb[38].mxu0  ;;  %5834 = vmatprep.mubr.f32.mxu1 %v17236_v40  ;;  %10497 = vmatpush3.bf16.msra.mxu1 %v14727_v45  ;;  %v3375_v36 = vmul.f32 0.2, %v17247_v27  ;;  %v17248_v30 = vld [vmem:[#allocation8_spill] sm:$0xff]  ;;  %vm3335_vm7 = vcmp.ge.f32.partialorder %v17247_v27, 0.0 }
 0x288   : > { %v8536_v52 = vpop.f32.mrb[39].mxu0  ;;  %10499 = vmatprep.subr.bf16.mxu1 %v14742_v25  ;;  %v17249_v12 = vld [vmem:[#allocation36_spill] sm:$0xff]  ;;  %v14815_v40 = vand.u32 4294901760, %v3508_v11  ;;  %v14849_v24 = vand.u32 4294901760, %v3511_v14  ;;  %vm3350_vm10 = vcmp.ge.f32.partialorder %v17253_v61, 0.0 }
 0x289   : > { %v8246_v4 = vpop.f32.mrb[40].mxu1  ;;  %v14771_v5 = vadd.f32 %v8536_v52, %v8535_v20  ;;  %v3380_v20 = vmul.f32 0.2, %v17249_v12  ;;  %v14817_v52 = vand.u32 4294901760, %v3505_v53  ;;  %vm3340_vm8 = vcmp.ge.f32.partialorder %v17249_v12, 0.0 }
 0x28a   : > { %v8247_v46 = vpop.f32.mrb[41].mxu1  ;;  %5836 = vmatmul.mubr.f32.gmra.mrb[146].mxu1 %v17242_v39  ;;  %v3415_v39 = vsel %vm3335_vm7, %v17247_v27, %v3375_v36  ;;  %v14844_v32 = vsub.f32 %v3508_v11, %v14815_v40  ;;  %v3425_v11 = vsel %vm3345_vm9, %v17251_v44, %v3385_v31  ;;  %v17255_v27 = vld [vmem:[#allocation49_spill] sm:$0xff]  ;;  %v16344_v36 = vand.u32 4294901760, %v14837_v21 }
 0x28b   : > { %17237 = vst [vmem:[#allocation48_spill] sm:$0xff] %v14771_v5  ;;  %v14780_v49 = vadd.f32 %v8247_v46, %v8246_v4  ;;  %5841 = vmatprep.mubr.f32.mxu1 %v17244_v0  ;;  %10501 = vmatpush3.bf16.msra.mxu1 %v14742_v25  ;;  %v3514_v46 = vsel %vm3503_vm4, %v3410_v38, 0  ;;  %v3420_v0 = vsel %vm3340_vm8, %v17249_v12, %v3380_v20  ;;  %v3517_v50 = vsel %vm3503_vm4, %v3415_v39, 0 }
 0x28c   : > { %10503 = vmatprep.subr.bf16.mxu1 %v14762_v58  ;;  %v14852_v16 = vand.u32 4294901760, %v3514_v46  ;;  %v3520_v7 = vsel %vm3503_vm4, %v3420_v0, 0  ;;  %v14867_v12 = vsub.f32 %v14714_v56, %v6049_v6  ;;  %v14872_v20 = vsub.f32 %v14719_v55, %v6052_v10  ;;  %v17256_v55 = vld [vmem:[#allocation51_spill] sm:$0xff]  ;;  %v17257_v0 = vld [vmem:[#allocation21_spill] sm:$0xff] }
 0x28d   : > { %v8249_v57 = vpop.f32.mrb[42].mxu1  ;;  %v14884_v56 = vand.u32 4294901760, %v3520_v7  ;;  %v3523_v6 = vsel %vm3503_vm4, %v3425_v11, 0  ;;  %v14909_v11 = vsub.f32 %v14752_v26, %v6058_v41  ;;  %v17258_v41 = vld [vmem:[#allocation64_spill] sm:$0xff] }
 0x28e   : > { %v8250_v54 = vpop.f32.mrb[43].mxu1  ;;  %5843 = vmatmul.mubr.f32.gmra.mrb[148].mxu1 %v17246_v60  ;;  %v17254_v60 = vld [vmem:[#allocation12_spill] sm:$0xff]  ;;  %v14882_v31 = vsub.f32 %v3514_v46, %v14852_v16  ;;  %v6214_v46 = vsub.f32 %v14837_v21, %v16344_v36 }
 0x28f   : > { %v14802_v28 = vadd.f32 %v8250_v54, %v8249_v57  ;;  %5848 = vmatprep.mubr.f32.mxu1 %v17248_v30  ;;  %10505 = vmatpush3.bf16.msra.mxu1 %v14762_v58  ;;  %v14847_v57 = vsub.f32 %v3505_v53, %v14817_v52  ;;  %v16345_v53 = vand.u32 4294901760, %v14827_v51  ;;  %v3430_v30 = vsel %vm3350_vm10, %v17253_v61, %v3390_v9 }
 0x290   : > { %10507 = vmatprep.subr.bf16.mxu1 %v14794_v3  ;;  %v3526_v10 = vsel %vm3503_vm4, %v3430_v30, 0  ;;  %v14899_v61 = vsub.f32 %v14747_v29, %v6055_v63  ;;  %v14914_v30 = vand.u32 4294901760, %v3523_v6  ;;  %v6215_v36 = vand.u32 4294901760, %v6214_v46 }
 0x291   : > { %v8252_v13 = vpop.f32.mrb[44].mxu1  ;;  %v16346_v44 = vand.u32 4294901760, %v14847_v57 }
 0x292   : > { %v8253_v4 = vpop.f32.mrb[45].mxu1  ;;  %5850 = vmatmul.mubr.f32.gmra.mrb[150].mxu1 %v17250_v2  ;;  %v14878_v2 = vand.u32 4294901760, %v3517_v50  ;;  %v17261_v5 = vand.u32 4294901760, %v14899_v61 }
 0x293   : > { %v14821_v42 = vadd.f32 %v8253_v4, %v8252_v13  ;;  %5855 = vmatprep.mubr.f32.mxu1 %v17252_v18  ;;  %10509 = vmatpush3.bf16.msra.mxu1 %v14794_v3  ;;  %v16347_v13 = vand.u32 4294901760, %v14844_v32  ;;  %v14876_v4 = vsub.f32 %v3511_v14, %v14849_v24  ;;  %v6207_v14 = vsub.f32 %v14827_v51, %v16345_v53 }
 0x294   : > { %10511 = vmatprep.subr.bf16.mxu1 %v14813_v59 }
 0x295   : > { %v8255_v15 = vpop.f32.mrb[46].mxu1  ;;  %v16350_v63 = vand.u32 4294901760, %v14876_v4 }
 0x296   : > { %v8256_v62 = vpop.f32.mrb[47].mxu1  ;;  %5857 = vmatmul.mubr.f32.gmra.mrb[152].mxu1 %v17254_v60  ;;  %v16349_v60 = vand.u32 4294901760, %v14872_v20 }
 0x297   : > { %v14855_v54 = vadd.f32 %v8256_v62, %v8255_v15  ;;  %5862 = vmatprep.mubr.f32.mxu1 %v17255_v27  ;;  %v16348_v62 = vand.u32 4294901760, %v14867_v12  ;;  %v14912_v27 = vsub.f32 %v3517_v50, %v14878_v2  ;;  %v16351_v50 = vand.u32 4294901760, %v14882_v31 }
 0x299   : > { %v8290_v38 = vpop.f32.mrb[48].mxu1 }
 0x29a   : > { %v8291_v39 = vpop.f32.mrb[49].mxu1  ;;  %5864 = vmatmul.mubr.f32.gmra.mrb[154].mxu1 %v17256_v55  ;;  %v17259_v55 = vld [vmem:[#allocation53_spill] sm:$0xff] }
 0x29b   : > { %v8292_v18 = vadd.f32 %v8291_v39, %v8290_v38  ;;  %5869 = vmatprep.mubr.f32.mxu1 %v17257_v0  ;;  %v6122_v38 = vsub.f32 %v14844_v32, %v16347_v13  ;;  %v14924_v39 = vsub.f32 %v3520_v7, %v14884_v56  ;;  %v6208_v0 = vand.u32 4294901760, %v6207_v14 }
 0x29c   : > { %v6221_v7 = vsub.f32 %v14867_v12, %v16348_v62  ;;  %v17260_v62 = vld [vmem:[#allocation56_spill] sm:$0xff] }
 0x29d   : > { %v14902_v9 = vadd.f32 %v8292_v18, %v14659_v47  ;;  %v8293_v15 = vpop.f32.mrb[50].mxu1  ;;  %v6112_v47 = vsub.f32 %v14847_v57, %v16346_v44  ;;  %v14928_v18 = vand.u32 4294901760, %v3526_v10 }
 0x29e   : > { %v8294_v29 = vpop.f32.mrb[51].mxu1  ;;  %5871 = vmatmul.mubr.f32.gmra.mrb[156].mxu1 %v17258_v41  ;;  %v14943_v41 = vsub.f32 %v3523_v6, %v14914_v30  ;;  %v10514_v6 = vpack.c.bf16 %v6215_v36, %v6208_v0  ;;  %v17263_v36 = vand.u32 4294901760, %v14912_v27 }
 0x29f   : > { %v8295_v26 = vadd.f32 %v8294_v29, %v8293_v15  ;;  %5876 = vmatprep.mubr.f32.mxu1 %v17259_v55  ;;  %v6228_v15 = vsub.f32 %v14872_v20, %v16349_v60  ;;  %v6113_v46 = vand.u32 4294901760, %v6112_v47  ;;  %v6123_v55 = vand.u32 4294901760, %v6122_v38 }
 0x2a0   : > { %v6142_v60 = vsub.f32 %v14882_v31, %v16351_v50  ;;  %v14954_v29 = vsub.f32 %v3526_v10, %v14928_v18  ;;  %v6152_v0 = vsub.f32 %v14912_v27, %v17263_v36 }
 0x2a1   : > { %v14933_v44 = vadd.f32 %v8295_v26, %v14679_v17  ;;  %v8296_v13 = vpop.f32.mrb[52].mxu1  ;;  %v6132_v17 = vsub.f32 %v14876_v4, %v16350_v63  ;;  %v6235_v63 = vsub.f32 %v14899_v61, %v17261_v5  ;;  %v17262_v26 = vand.u32 4294901760, %v14909_v11 }
 0x2a2   : > { %v8297_v14 = vpop.f32.mrb[53].mxu1  ;;  %5878 = vmatmul.mubr.f32.gmra.mrb[158].mxu1 %v17260_v62  ;;  %v6222_v62 = vand.u32 4294901760, %v6221_v7  ;;  %v17264_v5 = vand.u32 4294901760, %v14924_v39  ;;  %v6181_v7 = vand.u32 4294901760, %v14954_v29 }
 0x2a3   : > { %v8298_v53 = vadd.f32 %v8297_v14, %v8296_v13  ;;  %9334 = vmatprep.mubr.f32.mxu1 %v6113_v46  ;;  %v6229_v14 = vand.u32 4294901760, %v6228_v15  ;;  %v6242_v50 = vsub.f32 %v14909_v11, %v17262_v26  ;;  %v6133_v23 = vand.u32 4294901760, %v6132_v17 }
 0x2a4   : > { %v6236_v36 = vand.u32 4294901760, %v6235_v63  ;;  %v6182_v63 = vsub.f32 %v14954_v29, %v6181_v7 }
 0x2a5   : > { %v14961_v38 = vadd.f32 %v8298_v53, %v14705_v19  ;;  %v8299_v13 = vpop.f32.mrb[54].mxu1  ;;  %v6143_v19 = vand.u32 4294901760, %v6142_v60  ;;  %v6162_v53 = vsub.f32 %v14924_v39, %v17264_v5  ;;  %v10518_v26 = vpack.c.bf16 %v6229_v14, %v6222_v62 }
 0x2a6   : > { %v8300_v10 = vpop.f32.mrb[55].mxu1  ;;  %9335 = vmatmul.mubr.f32.vlgmr.msra.gmra.mrb[160].mxu1 %v6123_v55  ;;  %v6243_v46 = vand.u32 4294901760, %v6242_v50  ;;  %v6153_v55 = vand.u32 4294901760, %v6152_v0  ;;  %v10526_v5 = vpack.c.bf16 %v17240_v34, %v17238_v48 }
 0x2a7   : > { %v8301_v47 = vadd.f32 %v8300_v10, %v8299_v13  ;;  %9337 = vmatprep.mubr.f32.mxu1 %v6133_v23  ;;  %10513 = vmatpush3.bf16.msra.mxu1 %v14813_v59  ;;  %v17265_v23 = vand.u32 4294901760, %v14943_v41 }
 0x2a8   : > { %10515 = vmatprep.subr.bf16.mxu1 %v10514_v6  ;;  %v10522_v50 = vpack.c.bf16 %v6243_v46, %v6236_v36 }
 0x2a9   : > { %v14976_v15 = vadd.f32 %v8301_v47, %v14754_v43  ;;  %v8302_v17 = vpop.f32.mrb[56].mxu1  ;;  %v6172_v59 = vsub.f32 %v14943_v41, %v17265_v23  ;;  %v6163_v47 = vand.u32 4294901760, %v6162_v53 }
 0x2aa   : > { %v8303_v13 = vpop.f32.mrb[57].mxu1  ;;  %9338 = vmatmul.mubr.f32.gmra.mrb[162].mxu1 %v6143_v19 }
 0x2ab   : > { %v8304_v60 = vadd.f32 %v8303_v13, %v8302_v17  ;;  %9340 = vmatprep.mubr.f32.mxu1 %v6153_v55  ;;  %10517 = vmatpush3.bf16.msra.mxu1 %v10514_v6  ;;  %v6173_v14 = vand.u32 4294901760, %v6172_v59 }
 0x2ac   : > { %10519 = vmatprep.subr.bf16.mxu1 %v10518_v26 }
 0x2ad   : > { %v14982_v10 = vadd.f32 %v8304_v60, %v14780_v49  ;;  %v8305_v43 = vpop.f32.mrb[58].mxu1  ;;  %v6183_v49 = vand.u32 4294901760, %v6182_v63 }
 0x2ae   : > { %v8306_v62 = vpop.f32.mrb[59].mxu1  ;;  %9341 = vmatmul.mubr.f32.gmra.mrb[164].mxu1 %v6163_v47 }
 0x2af   : > { %v8307_v0 = vadd.f32 %v8306_v62, %v8305_v43  ;;  %9343 = vmatprep.mubr.f32.mxu1 %v6173_v14  ;;  %10521 = vmatpush3.bf16.msra.mxu1 %v10518_v26 }
 0x2b0   : > { %10523 = vmatprep.subr.bf16.mxu1 %v10522_v50 }
 0x2b1   : > { %v14988_v19 = vadd.f32 %v8307_v0, %v14802_v28  ;;  %v8308_v6 = vpop.f32.mrb[60].mxu1  ;;  %v10530_v28 = vpack.c.bf16 %v14837_v21, %v14827_v51 }
 0x2b2   : > { %v8309_v53 = vpop.f32.mrb[61].mxu1  ;;  %9344 = vmatmul.mubr.f32.gmra.mrb[166].mxu1 %v6183_v49 }
 0x2b3   : > { %v8310_v17 = vadd.f32 %v8309_v53, %v8308_v6  ;;  %10525 = vmatpush3.bf16.msra.mxu1 %v10522_v50  ;;  %9362 = vmatprep.mubr.f32.mxu1 %v14817_v52 }
 0x2b4   : > { %10527 = vmatprep.subr.bf16.mxu1 %v10526_v5 }
 0x2b5   : > { %v14994_v46 = vadd.f32 %v8310_v17, %v14821_v42  ;;  %v8311_v36 = vpop.f32.mrb[62].mxu1  ;;  %v10534_v42 = vpack.c.bf16 %v14872_v20, %v14867_v12 }
 0x2b6   : > { %v8312_v26 = vpop.f32.mrb[63].mxu1  ;;  %9363 = vmatmul.mubr.f32.vlgmr.msra.gmra.mrb[160].mxu1 %v14815_v40 }
 0x2b7   : > { %v8313_v13 = vadd.f32 %v8312_v26, %v8311_v36  ;;  %9365 = vmatprep.mubr.f32.mxu1 %v14849_v24  ;;  %10529 = vmatpush3.bf16.msra.mxu1 %v10526_v5 }
 0x2b8   : > { %10531 = vmatprep.subr.bf16.mxu1 %v10530_v28 }
 0x2b9   : > { %v15001_v48 = vadd.f32 %v8313_v13, %v14855_v54  ;;  %v8346_v34 = vpop.f32.mrb[64].mxu1  ;;  %v10538_v54 = vpack.c.bf16 %v14909_v11, %v14899_v61 }
 0x2ba   : > { %v8347_v55 = vpop.f32.mrb[65].mxu1  ;;  %9366 = vmatmul.mubr.f32.gmra.mrb[162].mxu1 %v14852_v16 }
 0x2bb   : > { %v8348_v23 = vadd.f32 %v8347_v55, %v8346_v34  ;;  %9368 = vmatprep.mubr.f32.mxu1 %v14878_v2  ;;  %10533 = vmatpush3.bf16.msra.mxu1 %v10530_v28 }
 0x2bc   : > { %10535 = vmatprep.subr.bf16.mxu1 %v10534_v42 }
 0x2bd   : > { %v15008_v59 = vadd.f32 %v8348_v23, %v14902_v9  ;;  %v8349_v60 = vpop.f32.mrb[66].mxu1 }
 0x2be   : > { %v8350_v43 = vpop.f32.mrb[67].mxu1  ;;  %9369 = vmatmul.mubr.f32.gmra.mrb[164].mxu1 %v14884_v56 }
 0x2bf   : > { %v8351_v47 = vadd.f32 %v8350_v43, %v8349_v60  ;;  %9371 = vmatprep.mubr.f32.mxu1 %v14914_v30  ;;  %10537 = vmatpush3.bf16.msra.mxu1 %v10534_v42 }
 0x2c0   : > { %10539 = vmatprep.subr.bf16.mxu1 %v10538_v54 }
 0x2c1   : > { %v15015_v63 = vadd.f32 %v8351_v47, %v14933_v44  ;;  %v8352_v50 = vpop.f32.mrb[68].mxu1  ;;  %v8626_v14 = vpop.f32.mrb[40].mxu0 }
 0x2c2   : > { %v8353_v62 = vpop.f32.mrb[69].mxu1  ;;  %9372 = vmatmul.mubr.f32.gmra.mrb[166].mxu1 %v14928_v18  ;;  %v8627_v49 = vpop.f32.mrb[41].mxu0 }
 0x2c3   : > { %v8354_v9 = vadd.f32 %v8353_v62, %v8352_v50  ;;  %10541 = vmatpush3.bf16.msra.mxu1 %v10538_v54  ;;  %9390 = vmatprep.mubr.f32.mxu1 %v14847_v57  ;;  %v15023_v5 = vadd.f32 %v8627_v49, %v8626_v14  ;;  %v17266_v49 = vand.u32 4294901760, %v14847_v57  ;;  %v17270_v57 = vand.u32 4294901760, %v14844_v32 }
 0x2c4   : > { %10543 = vmatprep.subr.bf16.mxu1 %v14727_v45 }
 0x2c5   : > { %v15020_v0 = vadd.f32 %v8354_v9, %v14961_v38  ;;  %v8355_v6 = vpop.f32.mrb[70].mxu1  ;;  %v8629_v17 = vpop.f32.mrb[42].mxu0 }
 0x2c6   : > { %v8356_v44 = vpop.f32.mrb[71].mxu1  ;;  %9391 = vmatmul.mubr.f32.vlgmr.msra.gmra.mrb[160].mxu1 %v14844_v32  ;;  %v8630_v28 = vpop.f32.mrb[43].mxu0 }
 0x2c7   : > { %v8357_v53 = vadd.f32 %v8356_v44, %v8355_v6  ;;  %9393 = vmatprep.mubr.f32.mxu1 %v14876_v4  ;;  %10545 = vmatpush3.bf16.msra.mxu1 %v14727_v45  ;;  %v15032_v26 = vadd.f32 %v8630_v28, %v8629_v17  ;;  %v17268_v28 = vand.u32 4294901760, %v14827_v51 }
 0x2c8   : > { %10547 = vmatprep.subr.bf16.mxu1 %v14742_v25 }
 0x2c9   : > { %v15029_v36 = vadd.f32 %v8357_v53, %v14976_v15  ;;  %v8358_v38 = vpop.f32.mrb[72].mxu1  ;;  %v8632_v42 = vpop.f32.mrb[44].mxu0 }
 0x2ca   : > { %v8359_v13 = vpop.f32.mrb[73].mxu1  ;;  %9394 = vmatmul.mubr.f32.gmra.mrb[162].mxu1 %v14882_v31  ;;  %v8633_v23 = vpop.f32.mrb[45].mxu0 }
 0x2cb   : > { %v8360_v34 = vadd.f32 %v8359_v13, %v8358_v38  ;;  %9396 = vmatprep.mubr.f32.mxu1 %v14912_v27  ;;  %10549 = vmatpush3.bf16.msra.mxu1 %v14742_v25  ;;  %v15041_v60 = vadd.f32 %v8633_v23, %v8632_v42  ;;  %v17267_v38 = vld [vmem:[#allocation41_spill] sm:$0xff]  ;;  %v17269_v13 = vand.u32 4294901760, %v14837_v21  ;;  %v17272_v21 = vand.u32 4294901760, %v14867_v12 }
 0x2cc   : > { %10551 = vmatprep.subr.bf16.mxu1 %v14762_v58 }
 0x2cd   : > { %v15038_v55 = vadd.f32 %v8360_v34, %v14982_v10  ;;  %v8361_v15 = vpop.f32.mrb[74].mxu1  ;;  %v8635_v47 = vpop.f32.mrb[46].mxu0  ;;  %v10562_v34 = vpack.c.bf16 %v17269_v13, %v17268_v28 }
 0x2ce   : > { %v8362_v54 = vpop.f32.mrb[75].mxu1  ;;  %9397 = vmatmul.mubr.f32.gmra.mrb[164].mxu1 %v14924_v39  ;;  %v8636_v62 = vpop.f32.mrb[47].mxu0 }
 0x2cf   : > { %v8363_v43 = vadd.f32 %v8362_v54, %v8361_v15  ;;  %9399 = vmatprep.mubr.f32.mxu1 %v14943_v41  ;;  %10553 = vmatpush3.bf16.msra.mxu1 %v14762_v58  ;;  %v15050_v9 = vadd.f32 %v8636_v62, %v8635_v47  ;;  %v17271_v54 = vand.u32 4294901760, %v14876_v4  ;;  %v17274_v4 = vand.u32 4294901760, %v14882_v31 }
 0x2d0   : > { %10555 = vmatprep.subr.bf16.mxu1 %v14794_v3 }
 0x2d1   : > { %v15047_v50 = vadd.f32 %v8363_v43, %v14988_v19  ;;  %v8364_v10 = vpop.f32.mrb[76].mxu1 }
 0x2d2   : > { %v8365_v14 = vpop.f32.mrb[77].mxu1  ;;  %9400 = vmatmul.mubr.f32.gmra.mrb[166].mxu1 %v14954_v29 }
 0x2d3   : > { %v8366_v6 = vadd.f32 %v8365_v14, %v8364_v10  ;;  %10557 = vmatpush3.bf16.msra.mxu1 %v14794_v3  ;;  %9418 = vmatprep.mubr.f32.mxu1 %v17266_v49  ;;  %v8638_v44 = vpop.f32.mrb[48].mxu0  ;;  %v17273_v10 = vand.u32 4294901760, %v14872_v20  ;;  %v17275_v49 = vand.u32 4294901760, %v14912_v27  ;;  %v17276_v20 = vand.u32 4294901760, %v14899_v61 }
 0x2d4   : > { %v8639_v17 = vpop.f32.mrb[49].mxu0  ;;  %10559 = vmatprep.subr.bf16.mxu1 %v17267_v38  ;;  %v17278_v27 = vand.u32 4294901760, %v14924_v39 }
 0x2d5   : > { %v15057_v53 = vadd.f32 %v8366_v6, %v14994_v46  ;;  %v8367_v19 = vpop.f32.mrb[78].mxu1  ;;  %v15064_v42 = vadd.f32 %v8639_v17, %v8638_v44  ;;  %v10566_v62 = vpack.c.bf16 %v17273_v10, %v17272_v21  ;;  %v17277_v17 = vand.u32 4294901760, %v14909_v11 }
 0x2d6   : > { %v8368_v15 = vpop.f32.mrb[79].mxu1  ;;  %9419 = vmatmul.mubr.f32.vlgmr.msra.gmra.mrb[160].mxu1 %v17270_v57 }
 0x2d7   : > { %v8369_v23 = vadd.f32 %v8368_v15, %v8367_v19  ;;  %9421 = vmatprep.mubr.f32.mxu1 %v17271_v54  ;;  %10561 = vmatpush3.bf16.msra.mxu1 %v17267_v38  ;;  %v8641_v46 = vpop.f32.mrb[50].mxu0  ;;  %v10570_v38 = vpack.c.bf16 %v17277_v17, %v17276_v20 }
 0x2d8   : > { %v8642_v47 = vpop.f32.mrb[51].mxu0  ;;  %10563 = vmatprep.subr.bf16.mxu1 %v10562_v34 }
 0x2d9   : > { %v15072_v43 = vadd.f32 %v8369_v23, %v15001_v48  ;;  %v8402_v51 = vpop.f32.mrb[80].mxu1  ;;  %v15078_v14 = vadd.f32 %v8642_v47, %v8641_v46 }
 0x2da   : > { %v8403_v32 = vpop.f32.mrb[81].mxu1  ;;  %9422 = vmatmul.mubr.f32.gmra.mrb[162].mxu1 %v17274_v4 }
 0x2db   : > { %v8404_v6 = vadd.f32 %v8403_v32, %v8402_v51  ;;  %9424 = vmatprep.mubr.f32.mxu1 %v17275_v49  ;;  %10565 = vmatpush3.bf16.msra.mxu1 %v10562_v34  ;;  %v8644_v48 = vpop.f32.mrb[52].mxu0  ;;  %v17279_v34 = vand.u32 4294901760, %v14943_v41 }
 0x2dc   : > { %v8645_v12 = vpop.f32.mrb[53].mxu0  ;;  %10567 = vmatprep.subr.bf16.mxu1 %v10566_v62 }
 0x2dd   : > { %v15085_v44 = vadd.f32 %v8404_v6, %v15008_v59  ;;  %v8405_v19 = vpop.f32.mrb[82].mxu1  ;;  %v15091_v28 = vadd.f32 %v8645_v12, %v8644_v48 }
 0x2de   : > { %v8406_v31 = vpop.f32.mrb[83].mxu1  ;;  %9425 = vmatmul.mubr.f32.gmra.mrb[164].mxu1 %v17278_v27 }
 0x2df   : > { %v8407_v13 = vadd.f32 %v8406_v31, %v8405_v19  ;;  %9427 = vmatprep.mubr.f32.mxu1 %v17279_v34  ;;  %10569 = vmatpush3.bf16.msra.mxu1 %v10566_v62  ;;  %v8647_v59 = vpop.f32.mrb[54].mxu0 }
 0x2e0   : > { %v8648_v61 = vpop.f32.mrb[55].mxu0  ;;  %10571 = vmatprep.subr.bf16.mxu1 %v10570_v38 }
 0x2e1   : > { %v15098_v15 = vadd.f32 %v8407_v13, %v15015_v63  ;;  %v8408_v23 = vpop.f32.mrb[84].mxu1  ;;  %v15100_v11 = vadd.f32 %v8648_v61, %v8647_v59 }
 0x2e2   : > { %v8409_v57 = vpop.f32.mrb[85].mxu1  ;;  %9428 = vmatmul.mubr.f32.gmra.mrb[166].mxu1 %v6181_v7 }
 0x2e3   : > { %v8410_v54 = vadd.f32 %v8409_v57, %v8408_v23  ;;  %10573 = vmatpush3.bf16.msra.mxu1 %v10570_v38  ;;  %9446 = vmatprep.mubr.f32.mxu1 %v14817_v52  ;;  %v8738_v39 = vpop.f32.mrb[56].mxu0 }
 0x2e4   : > { %v8739_v63 = vpop.f32.mrb[57].mxu0  ;;  %10575 = vmatprep.subr.bf16.mxu1 %v14727_v45 }
 0x2e5   : > { %v15106_v41 = vadd.f32 %v8410_v54, %v15020_v0  ;;  %v8411_v46 = vpop.f32.mrb[86].mxu1  ;;  %v15109_v51 = vadd.f32 %v8739_v63, %v8738_v39 }
 0x2e6   : > { %v8412_v47 = vpop.f32.mrb[87].mxu1  ;;  %9447 = vmatmul.mubr.f32.vlgmr.msra.gmra.mrb[160].mxu1 %v14815_v40 }
 0x2e7   : > { %v8413_v21 = vadd.f32 %v8412_v47, %v8411_v46  ;;  %9449 = vmatprep.mubr.f32.mxu1 %v14849_v24  ;;  %10577 = vmatpush3.bf16.msra.mxu1 %v14727_v45  ;;  %v8741_v29 = vpop.f32.mrb[58].mxu0  ;;  %v15161_v46 = vld [vmem:[%s15869_s3 + $0x8] sm:$0xff]  ;;  %v15174_v47 = vld [vmem:[%s15869_s3 + $0x18] sm:$0xff] }
 0x2e8   : > { %v8742_v10 = vpop.f32.mrb[59].mxu0  ;;  %10579 = vmatprep.subr.bf16.mxu1 %v14742_v25  ;;  %v6918_v63 = vand.u32 4294901760, %v15161_v46 }
 0x2e9   : > { %v15115_v7 = vadd.f32 %v8413_v21, %v15029_v36  ;;  %v8414_v0 = vpop.f32.mrb[88].mxu1  ;;  %v15118_v62 = vadd.f32 %v8742_v10, %v8741_v29  ;;  %v15180_v29 = vld [vmem:[%s15869_s3 + $0x20] sm:$0xff]  ;;  %v16356_v10 = vand.u32 4294901760, %v15174_v47 }
 0x2ea   : > { %v8415_v32 = vpop.f32.mrb[89].mxu1  ;;  %9450 = vmatmul.mubr.f32.gmra.mrb[162].mxu1 %v14852_v16 }
 0x2eb   : > { %v8416_v6 = vadd.f32 %v8415_v32, %v8414_v0  ;;  %9452 = vmatprep.mubr.f32.mxu1 %v14878_v2  ;;  %10581 = vmatpush3.bf16.msra.mxu1 %v14742_v25  ;;  %v8744_v4 = vpop.f32.mrb[60].mxu0  ;;  %v15187_v32 = vld [vmem:[%s15869_s3 + $0x28] sm:$0xff] }
 0x2ec   : > { %v8745_v49 = vpop.f32.mrb[61].mxu0  ;;  %10583 = vmatprep.subr.bf16.mxu1 %v14762_v58 }
 0x2ed   : > { %v15124_v45 = vadd.f32 %v8416_v6, %v15038_v55  ;;  %v8417_v36 = vpop.f32.mrb[90].mxu1  ;;  %v15127_v48 = vadd.f32 %v8745_v49, %v8744_v4  ;;  %v16354_v49 = vand.u32 4294901760, %v15187_v32 }
 0x2ee   : > { %v8418_v19 = vpop.f32.mrb[91].mxu1  ;;  %9453 = vmatmul.mubr.f32.gmra.mrb[164].mxu1 %v14884_v56 }
 0x2ef   : > { %v8419_v12 = vadd.f32 %v8418_v19, %v8417_v36  ;;  %9455 = vmatprep.mubr.f32.mxu1 %v14914_v30  ;;  %10585 = vmatpush3.bf16.msra.mxu1 %v14762_v58  ;;  %v8747_v20 = vpop.f32.mrb[62].mxu0  ;;  %v16355_v36 = vand.u32 4294901760, %v15180_v29 }
 0x2f0   : > { %v8748_v17 = vpop.f32.mrb[63].mxu0  ;;  %10587 = vmatprep.subr.bf16.mxu1 %v14794_v3 }
 0x2f1   : > { %v15133_v25 = vadd.f32 %v8419_v12, %v15047_v50  ;;  %v8420_v55 = vpop.f32.mrb[92].mxu1  ;;  %v15136_v38 = vadd.f32 %v8748_v17, %v8747_v20  ;;  %v15214_v17 = vld [vmem:[%s15869_s3 + $0x38] sm:$0xff] }
 0x2f2   : > { %v8421_v31 = vpop.f32.mrb[93].mxu1  ;;  %9456 = vmatmul.mubr.f32.gmra.mrb[166].mxu1 %v14928_v18 }
 0x2f3   : > { %v8422_v13 = vadd.f32 %v8421_v31, %v8420_v55  ;;  %10589 = vmatpush3.bf16.msra.mxu1 %v14794_v3  ;;  %9474 = vmatprep.mubr.f32.mxu1 %v14817_v52  ;;  %v8750_v27 = vpop.f32.mrb[64].mxu0  ;;  %v15209_v55 = vld [vmem:[%s15869_s3 + $0x30] sm:$0xff] }
 0x2f4   : > { %v8751_v34 = vpop.f32.mrb[65].mxu0 }
 0x2f5   : > { %v15142_v58 = vadd.f32 %v8422_v13, %v15057_v53  ;;  %v8423_v50 = vpop.f32.mrb[94].mxu1  ;;  %v15144_v59 = vadd.f32 %v8751_v34, %v8750_v27  ;;  %v15156_v53 = vld [vmem:[%s15869_s3] sm:$0xff]  ;;  %v15228_v34 = vpack.c.bf16 %v16354_v49, %v16355_v36 }
 0x2f6   : > { %v8424_v23 = vpop.f32.mrb[95].mxu1  ;;  %9475 = vmatmul.mubr.f32.vlgmr.msra.gmra.mrb[160].mxu1 %v14815_v40  ;;  %v15166_v40 = vld [vmem:[%s15869_s3 + $0x10] sm:$0xff] }
 0x2f7   : > { %v8425_v61 = vadd.f32 %v8424_v23, %v8423_v50  ;;  %9477 = vmatprep.mubr.f32.mxu1 %v14849_v24  ;;  %v8753_v57 = vpop.f32.mrb[66].mxu0  ;;  %v16357_v21 = vand.u32 4294901760, %v15166_v40  ;;  %v16352_v23 = vand.u32 4294901760, %v15214_v17 }
 0x2f8   : > { %v8754_v3 = vpop.f32.mrb[67].mxu0 }
 0x2f9   : > { %v15149_v54 = vadd.f32 %v8425_v61, %v15072_v43  ;;  %v8458_v52 = vpop.f32.mrb[96].mxu1  ;;  %v15151_v39 = vadd.f32 %v8754_v3, %v8753_v57  ;;  %v6915_v43 = vand.u32 4294901760, %v15156_v53  ;;  %v15204_v20 = vpack.c.bf16 %v16356_v10, %v16357_v21 }
 0x2fa   : > { %v8459_v24 = vpop.f32.mrb[97].mxu1  ;;  %9478 = vmatmul.mubr.f32.gmra.mrb[162].mxu1 %v14852_v16 }
 0x2fb   : > { %v8460_v0 = vadd.f32 %v8459_v24, %v8458_v52  ;;  %9480 = vmatprep.mubr.f32.mxu1 %v14878_v2  ;;  %v8756_v16 = vpop.f32.mrb[68].mxu0  ;;  %v15193_v4 = vpack.c.bf16 %v6918_v63, %v6915_v43 }
 0x2fc   : > { %v8757_v6 = vpop.f32.mrb[69].mxu0 }
 0x2fd   : > { %v4577_v2 = vadd.f32 %v8460_v0, %v15085_v44  ;;  %v8461_v19 = vpop.f32.mrb[98].mxu1  ;;  %v15198_v12 = vadd.f32 %v8757_v6, %v8756_v16  ;;  %10591 = vmatprep.subr.bf16.mxu0 %v15193_v4 }
 0x2fe   : > { %v8462_v44 = vpop.f32.mrb[99].mxu1  ;;  %9481 = vmatmul.mubr.f32.gmra.mrb[164].mxu1 %v14884_v56  ;;  %10593 = vmatpush3.bf16.msra.mxu0 %v15193_v4  ;;  %v16353_v56 = vand.u32 4294901760, %v15209_v55 }
 0x2ff   : > { %v8463_v31 = vadd.f32 %v8462_v44, %v8461_v19  ;;  %9483 = vmatprep.mubr.f32.mxu1 %v14914_v30  ;;  %v8759_v13 = vpop.f32.mrb[70].mxu0  ;;  %v15220_v27 = vadd.f32 %v14635_v8, %v4577_v2  ;;  %10595 = vmatprep.subr.bf16.mxu0 %v15204_v20 }
 0x300   : > { %v8760_v50 = vpop.f32.mrb[71].mxu0 }
 0x301   : > { %v4584_v30 = vadd.f32 %v8463_v31, %v15098_v15  ;;  %v8464_v61 = vpop.f32.mrb[100].mxu1  ;;  %v15233_v8 = vadd.f32 %v8760_v50, %v8759_v13  ;;  %v15245_v15 = vpack.c.bf16 %v16352_v23, %v16353_v56 }
 0x302   : > { %v8465_v57 = vpop.f32.mrb[101].mxu1  ;;  %9484 = vmatmul.mubr.f32.gmra.mrb[166].mxu1 %v14928_v18  ;;  %10597 = vmatpush3.bf16.msra.mxu0 %v15204_v20 }
 0x303   : > { %v8466_v3 = vadd.f32 %v8465_v57, %v8464_v61  ;;  %v15237_v52 = vadd.f32 %v14647_v33, %v4584_v30  ;;  %10599 = vmatprep.subr.bf16.mxu0 %v15228_v34 }
 0x304   : > { %v8850_v24 = vpop.f32.mrb[72].mxu0 }
 0x305   : > { %v4591_v0 = vadd.f32 %v8466_v3, %v15106_v41  ;;  %v8467_v16 = vpop.f32.mrb[102].mxu1  ;;  %v8851_v6 = vpop.f32.mrb[73].mxu0 }
 0x306   : > { %v15248_v18 = vadd.f32 %v8851_v6, %v8850_v24  ;;  %v8468_v2 = vpop.f32.mrb[103].mxu1  ;;  %10601 = vmatpush3.bf16.msra.mxu0 %v15228_v34 }
 0x307   : > { %v8469_v33 = vadd.f32 %v8468_v2, %v8467_v16  ;;  %v4744_v19 = vadd.f32 %v14661_v35, %v4591_v0  ;;  %10603 = vmatprep.subr.bf16.mxu0 %v15245_v15 }
 0x308   : > { %v8853_v44 = vpop.f32.mrb[74].mxu0 }
 0x309   : > { %v4598_v31 = vadd.f32 %v8469_v33, %v15115_v7  ;;  %v8470_v13 = vpop.f32.mrb[104].mxu1  ;;  %v8854_v50 = vpop.f32.mrb[75].mxu0 }
 0x30a   : > { %v15254_v30 = vadd.f32 %v8854_v50, %v8853_v44  ;;  %v8471_v41 = vpop.f32.mrb[105].mxu1  ;;  %10605 = vmatpush3.bf16.msra.mxu0 %v15245_v15 }
 0x30b   : > { %v8472_v61 = vadd.f32 %v8471_v41, %v8470_v13  ;;  %v4751_v57 = vadd.f32 %v14673_v22, %v4598_v31 }
 0x30c   : > { %v8856_v3 = vpop.f32.mrb[76].mxu0 }
 0x30d   : > { %v4605_v35 = vadd.f32 %v8472_v61, %v15124_v45  ;;  %v8473_v24 = vpop.f32.mrb[106].mxu1  ;;  %v8857_v0 = vpop.f32.mrb[77].mxu0 }
 0x30e   : > { %v15259_v16 = vadd.f32 %v8857_v0, %v8856_v3  ;;  %v8474_v6 = vpop.f32.mrb[107].mxu1 }
 0x30f   : > { %v8475_v2 = vadd.f32 %v8474_v6, %v8473_v24  ;;  %v4758_v7 = vadd.f32 %v14687_v37, %v4605_v35  ;;  %v17280_v35 = vld [vmem:[#allocation6_spill] sm:$0xff] }
 0x310   : > { %v8859_v33 = vpop.f32.mrb[78].mxu0 }
 0x311   : > { %v4612_v44 = vadd.f32 %v8475_v2, %v15133_v25  ;;  %v8476_v50 = vpop.f32.mrb[108].mxu1  ;;  %v8860_v13 = vpop.f32.mrb[79].mxu0 }
 0x312   : > { %v15263_v41 = vadd.f32 %v8860_v13, %v8859_v33  ;;  %v8477_v22 = vpop.f32.mrb[109].mxu1 }
 0x313   : > { %v8478_v31 = vadd.f32 %v8477_v22, %v8476_v50  ;;  %v4765_v23 = vadd.f32 %v14721_v1, %v4612_v44  ;;  %v17281_v44 = vld [vmem:[#allocation48_spill] sm:$0xff] }
 0x314   : > { %v8862_v45 = vpop.f32.mrb[80].mxu0 }
 0x315   : > { %v4619_v61 = vadd.f32 %v8478_v31, %v15142_v58  ;;  %v8479_v3 = vpop.f32.mrb[110].mxu1  ;;  %v8863_v0 = vpop.f32.mrb[81].mxu0 }
 0x316   : > { %v15267_v56 = vadd.f32 %v8863_v0, %v8862_v45  ;;  %v8480_v24 = vpop.f32.mrb[111].mxu1 }
 0x317   : > { %v8481_v37 = vadd.f32 %v8480_v24, %v8479_v3  ;;  %v4772_v6 = vadd.f32 %v17280_v35, %v4619_v61 }
 0x318   : > { %v8865_v25 = vpop.f32.mrb[82].mxu0 }
 0x319   : > { %v4626_v2 = vadd.f32 %v8481_v37, %v15149_v54  ;;  %v8570_v33 = vpop.f32.mrb[112].mxu1  ;;  %v8866_v13 = vpop.f32.mrb[83].mxu0 }
 0x31a   : > { %v15271_v49 = vadd.f32 %v8866_v13, %v8865_v25  ;;  %v8571_v50 = vpop.f32.mrb[113].mxu1 }
 0x31b   : > { %v8572_v1 = vadd.f32 %v8571_v50, %v8570_v33  ;;  %v4779_v22 = vadd.f32 %v17281_v44, %v4626_v2 }
 0x31c   : > { %v8868_v58 = vpop.f32.mrb[84].mxu0 }
 0x31d   : > { %v4891_v31 = vadd.f32 %v8572_v1, %v15220_v27  ;;  %v8573_v45 = vpop.f32.mrb[114].mxu1  ;;  %v8869_v0 = vpop.f32.mrb[85].mxu0 }
 0x31e   : > { %v15275_v36 = vadd.f32 %v8869_v0, %v8868_v58  ;;  %v8574_v3 = vpop.f32.mrb[115].mxu1 }
 0x31f   : > { %v8575_v61 = vadd.f32 %v8574_v3, %v8573_v45  ;;  %v5228_v24 = vadd.f32 %v15023_v5, %v4891_v31 }
 0x320   : > { %v8871_v54 = vpop.f32.mrb[86].mxu0 }
 0x321   : > { %v4906_v37 = vadd.f32 %v8575_v61, %v15237_v52  ;;  %v8576_v35 = vpop.f32.mrb[116].mxu1  ;;  %v8872_v25 = vpop.f32.mrb[87].mxu0 }
 0x322   : > { %v15279_v13 = vadd.f32 %v8872_v25, %v8871_v54  ;;  %v8577_v33 = vpop.f32.mrb[117].mxu1 }
 0x323   : > { %v8578_v2 = vadd.f32 %v8577_v33, %v8576_v35  ;;  %v5235_v50 = vadd.f32 %v15032_v26, %v4906_v37 }
 0x325   : > { %v4921_v27 = vadd.f32 %v8578_v2, %v4744_v19  ;;  %v8579_v1 = vpop.f32.mrb[118].mxu1 }
 0x326   : > { %v8580_v44 = vpop.f32.mrb[119].mxu1 }
 0x327   : > { %v8581_v58 = vadd.f32 %v8580_v44, %v8579_v1  ;;  %v5242_v0 = vadd.f32 %v15041_v60, %v4921_v27 }
 0x329   : > { %v4936_v45 = vadd.f32 %v8581_v58, %v4751_v57  ;;  %v8582_v3 = vpop.f32.mrb[120].mxu1 }
 0x32a   : > { %v8583_v5 = vpop.f32.mrb[121].mxu1 }
 0x32b   : > { %v8584_v31 = vadd.f32 %v8583_v5, %v8582_v3  ;;  %v5249_v52 = vadd.f32 %v15050_v9, %v4936_v45 }
 0x32d   : > { %v4951_v61 = vadd.f32 %v8584_v31, %v4758_v7  ;;  %v8585_v10 = vpop.f32.mrb[122].mxu1 }
 0x32e   : > { %v8586_v54 = vpop.f32.mrb[123].mxu1 }
 0x32f   : > { %v8587_v25 = vadd.f32 %v8586_v54, %v8585_v10  ;;  %v5256_v35 = vadd.f32 %v15064_v42, %v4951_v61 }
 0x331   : > { %v4966_v33 = vadd.f32 %v8587_v25, %v4765_v23  ;;  %v8588_v26 = vpop.f32.mrb[124].mxu1 }
 0x332   : > { %v8589_v19 = vpop.f32.mrb[125].mxu1 }
 0x333   : > { %v8590_v37 = vadd.f32 %v8589_v19, %v8588_v26  ;;  %v5263_v2 = vadd.f32 %v15078_v14, %v4966_v33 }
 0x335   : > { %v4981_v1 = vadd.f32 %v8590_v37, %v4772_v6  ;;  %v8591_v60 = vpop.f32.mrb[126].mxu1 }
 0x336   : > { %v8592_v57 = vpop.f32.mrb[127].mxu1 }
 0x337   : > { %v8593_v27 = vadd.f32 %v8592_v57, %v8591_v60  ;;  %v15287_v44 = vadd.f32 %v15091_v28, %v4981_v1  ;;  %v15322_v60 = vld [vmem:[%s15869_s3 + $0x50] sm:$0xff] }
 0x339   : > { %v4996_v9 = vadd.f32 %v8593_v27, %v4779_v22  ;;  %v8682_v7 = vpop.f32.mrb[128].mxu1  ;;  %v6945_v27 = vand.u32 4294901760, %v15322_v60 }
 0x33a   : > { %v8683_v58 = vpop.f32.mrb[129].mxu1 }
 0x33b   : > { %v8684_v45 = vadd.f32 %v8683_v58, %v8682_v7  ;;  %v15290_v10 = vadd.f32 %v15100_v11, %v4996_v9  ;;  %v15301_v11 = vld [vmem:[%s15869_s3 + $0x40] sm:$0xff] }
 0x33d   : > { %v5415_v42 = vadd.f32 %v8684_v45, %v5228_v24  ;;  %v8685_v23 = vpop.f32.mrb[130].mxu1 }
 0x33e   : > { %v8686_v3 = vpop.f32.mrb[131].mxu1 }
 0x33f   : > { %v8687_v5 = vadd.f32 %v8686_v3, %v8685_v23  ;;  %v15293_v14 = vadd.f32 %v15109_v51, %v5415_v42  ;;  %v15306_v51 = vld [vmem:[%s15869_s3 + $0x48] sm:$0xff] }
 0x340   : > { %v15350_v23 = vld [vmem:[%s15869_s3 + $0x68] sm:$0xff] }
 0x341   : > { %v5424_v6 = vadd.f32 %v8687_v5, %v5235_v50  ;;  %v8688_v31 = vpop.f32.mrb[132].mxu1 }
 0x342   : > { %v8689_v61 = vpop.f32.mrb[133].mxu1 }
 0x343   : > { %v8690_v54 = vadd.f32 %v8689_v61, %v8688_v31  ;;  %v15296_v28 = vadd.f32 %v15118_v62, %v5424_v6  ;;  %v6939_v62 = vand.u32 4294901760, %v15301_v11  ;;  %v6954_v6 = vand.u32 4294901760, %v15350_v23 }
 0x345   : > { %v5433_v22 = vadd.f32 %v8690_v54, %v5242_v0  ;;  %v8691_v25 = vpop.f32.mrb[134].mxu1  ;;  %v6942_v0 = vand.u32 4294901760, %v15306_v51 }
 0x346   : > { %v8692_v33 = vpop.f32.mrb[135].mxu1 }
 0x347   : > { %v8693_v24 = vadd.f32 %v8692_v33, %v8691_v25  ;;  %v15309_v50 = vadd.f32 %v15127_v48, %v5433_v22  ;;  %v15317_v37 = vpack.c.bf16 %v6942_v0, %v6939_v62  ;;  %v15327_v48 = vld [vmem:[%s15869_s3 + $0x58] sm:$0xff]  ;;  %v15373_v22 = vsub.f32 %v15161_v46, %v6918_v63 }
 0x348   : > { %v6948_v9 = vand.u32 4294901760, %v15327_v48  ;;  %v15383_v33 = vld [vmem:[%s15869_s3 + $0x78] sm:$0xff] }
 0x349   : > { %v5442_v26 = vadd.f32 %v8693_v24, %v5249_v52  ;;  %v8694_v19 = vpop.f32.mrb[136].mxu1  ;;  %10607 = vmatprep.subr.bf16.mxu0 %v15317_v37 }
 0x34a   : > { %v8695_v1 = vpop.f32.mrb[137].mxu1  ;;  %10609 = vmatpush3.bf16.msra.mxu0 %v15317_v37  ;;  %v15340_v45 = vpack.c.bf16 %v6948_v9, %v6945_v27 }
 0x34b   : > { %v8696_v57 = vadd.f32 %v8695_v1, %v8694_v19  ;;  %v15330_v52 = vadd.f32 %v15136_v38, %v5442_v26  ;;  %v15345_v38 = vld [vmem:[%s15869_s3 + $0x60] sm:$0xff]  ;;  %v16374_v26 = vand.u32 4294901760, %v15373_v22 }
 0x34c   : > { %10611 = vmatprep.subr.bf16.mxu0 %v15340_v45  ;;  %v6951_v5 = vand.u32 4294901760, %v15345_v38 }
 0x34d   : > { %v5451_v7 = vadd.f32 %v8696_v57, %v5256_v35  ;;  %v8697_v58 = vpop.f32.mrb[138].mxu1 }
 0x34e   : > { %v8698_v42 = vpop.f32.mrb[139].mxu1  ;;  %10613 = vmatpush3.bf16.msra.mxu0 %v15340_v45  ;;  %v15363_v54 = vpack.c.bf16 %v6954_v6, %v6951_v5 }
 0x34f   : > { %v8699_v3 = vadd.f32 %v8698_v42, %v8697_v58  ;;  %v15353_v35 = vadd.f32 %v15144_v59, %v5451_v7  ;;  %v15368_v59 = vsub.f32 %v15156_v53, %v6915_v43  ;;  %v16359_v43 = vand.u32 4294901760, %v15383_v33 }
 0x350   : > { %10615 = vmatprep.subr.bf16.mxu0 %v15363_v54  ;;  %v7085_v58 = vsub.f32 %v15373_v22, %v16374_v26 }
 0x351   : > { %v5460_v31 = vadd.f32 %v8699_v3, %v5263_v2  ;;  %v8700_v61 = vpop.f32.mrb[140].mxu1  ;;  %v15378_v2 = vld [vmem:[%s15869_s3 + $0x70] sm:$0xff]  ;;  %v16358_v63 = vand.u32 4294901760, %v15368_v59 }
 0x352   : > { %v8701_v25 = vpop.f32.mrb[141].mxu1  ;;  %v6957_v46 = vand.u32 4294901760, %v15378_v2  ;;  %10617 = vmatpush3.bf16.msra.mxu0 %v15363_v54 }
 0x353   : > { %v8702_v24 = vadd.f32 %v8701_v25, %v8700_v61  ;;  %v15386_v53 = vadd.f32 %v15151_v39, %v5460_v31  ;;  %v7078_v7 = vsub.f32 %v15368_v59, %v16358_v63  ;;  %v7086_v31 = vand.u32 4294901760, %v7085_v58 }
 0x354   : > { %v15399_v39 = vpack.c.bf16 %v16359_v43, %v6957_v46 }
 0x355   : > { %v5469_v19 = vadd.f32 %v8702_v24, %v15287_v44  ;;  %v8703_v1 = vpop.f32.mrb[142].mxu1  ;;  %v7079_v44 = vand.u32 4294901760, %v7078_v7 }
 0x356   : > { %v8704_v57 = vpop.f32.mrb[143].mxu1  ;;  %10619 = vmatprep.subr.bf16.mxu0 %v15399_v39 }
 0x357   : > { %v8705_v42 = vadd.f32 %v8704_v57, %v8703_v1  ;;  %v15408_v3 = vadd.f32 %v15198_v12, %v5469_v19  ;;  %10621 = vmatpush3.bf16.msra.mxu0 %v15399_v39  ;;  %v15413_v21 = vpack.c.bf16 %v7086_v31, %v7079_v44 }
 0x359   : > { %v5478_v61 = vadd.f32 %v8705_v42, %v15290_v10  ;;  %v8794_v25 = vpop.f32.mrb[144].mxu1  ;;  %10623 = vmatprep.subr.bf16.mxu0 %v15413_v21 }
 0x35a   : > { %v8795_v24 = vpop.f32.mrb[145].mxu1 }
 0x35b   : > { %v8796_v63 = vadd.f32 %v8795_v24, %v8794_v25  ;;  %v15416_v43 = vadd.f32 %v15233_v8, %v5478_v61  ;;  %v15430_v8 = vsub.f32 %v15301_v11, %v6939_v62  ;;  %v15446_v11 = vsub.f32 %v15322_v60, %v6945_v27 }
 0x35c   : > { %v15457_v62 = vsub.f32 %v15327_v48, %v6948_v9  ;;  %v15471_v48 = vsub.f32 %v15345_v38, %v6951_v5 }
 0x35d   : > { %v5831_v12 = vadd.f32 %v8796_v63, %v15293_v14  ;;  %v8797_v19 = vpop.f32.mrb[146].mxu1  ;;  %v15435_v14 = vsub.f32 %v15306_v51, %v6942_v0  ;;  %v16367_v61 = vand.u32 4294901760, %v15430_v8 }
 0x35e   : > { %v8798_v1 = vpop.f32.mrb[147].mxu1 }
 0x35f   : > { %v8799_v57 = vadd.f32 %v8798_v1, %v8797_v19  ;;  %v15421_v7 = vadd.f32 %v15248_v18, %v5831_v12  ;;  %v16366_v25 = vand.u32 4294901760, %v15435_v14  ;;  %v7134_v51 = vsub.f32 %v15430_v8, %v16367_v61 }
 0x360   : > { %v16365_v12 = vand.u32 4294901760, %v15446_v11  ;;  %v16364_v1 = vand.u32 4294901760, %v15457_v62 }
 0x361   : > { %v5838_v10 = vadd.f32 %v8799_v57, %v15296_v28  ;;  %v8800_v58 = vpop.f32.mrb[148].mxu1  ;;  %v7135_v27 = vand.u32 4294901760, %v7134_v51 }
 0x362   : > { %v8801_v42 = vpop.f32.mrb[149].mxu1  ;;  %v7155_v9 = vsub.f32 %v15457_v62, %v16364_v1 }
 0x363   : > { %v8802_v44 = vadd.f32 %v8801_v42, %v8800_v58  ;;  %v15425_v31 = vadd.f32 %v15254_v30, %v5838_v10  ;;  %v7148_v58 = vsub.f32 %v15446_v11, %v16365_v12 }
 0x364   : > { %v7156_v38 = vand.u32 4294901760, %v7155_v9 }
 0x365   : > { %v5845_v18 = vadd.f32 %v8802_v44, %v15309_v50  ;;  %v8803_v63 = vpop.f32.mrb[150].mxu1  ;;  %v7141_v50 = vsub.f32 %v15435_v14, %v16366_v25 }
 0x366   : > { %v8804_v28 = vpop.f32.mrb[151].mxu1 }
 0x367   : > { %v8805_v30 = vadd.f32 %v8804_v28, %v8803_v63  ;;  %v15441_v24 = vadd.f32 %v15259_v16, %v5845_v18  ;;  %v7142_v19 = vand.u32 4294901760, %v7141_v50  ;;  %v7149_v18 = vand.u32 4294901760, %v7148_v58 }
 0x368   : > { %v16363_v63 = vand.u32 4294901760, %v15471_v48 }
 0x369   : > { %v5852_v16 = vadd.f32 %v8805_v30, %v15330_v52  ;;  %v8806_v0 = vpop.f32.mrb[152].mxu1  ;;  %v15473_v52 = vpack.c.bf16 %v7142_v19, %v7135_v27 }
 0x36a   : > { %v8807_v60 = vpop.f32.mrb[153].mxu1  ;;  %v7162_v50 = vsub.f32 %v15471_v48, %v16363_v63 }
 0x36b   : > { %v8808_v57 = vadd.f32 %v8807_v60, %v8806_v0  ;;  %v15463_v10 = vadd.f32 %v15263_v41, %v5852_v16  ;;  %v15481_v41 = vsub.f32 %v15350_v23, %v6954_v6  ;;  %v15495_v23 = vsub.f32 %v15378_v2, %v6957_v46 }
 0x36c   : > { %v17284_v16 = vand.u32 4294901760, %v15383_v33  ;;  %v7163_v27 = vand.u32 4294901760, %v7162_v50 }
 0x36d   : > { %17282 = vst [vmem:[#allocation3_spill] sm:$0xff] %v15481_v41  ;;  %v5859_v42 = vadd.f32 %v8808_v57, %v15353_v35  ;;  %v8809_v44 = vpop.f32.mrb[154].mxu1  ;;  %v16362_v5 = vand.u32 4294901760, %v15481_v41  ;;  %17283 = vst [vmem:[#allocation29_spill] sm:$0xff] %v15495_v23  ;;  %v15497_v35 = vpack.c.bf16 %v7156_v38, %v7149_v18  ;;  %v16361_v19 = vand.u32 4294901760, %v15495_v23 }
 0x36e   : > { %v8810_v28 = vpop.f32.mrb[155].mxu1 }
 0x36f   : > { %v8811_v30 = vadd.f32 %v8810_v28, %v8809_v44  ;;  %v15487_v51 = vadd.f32 %v15267_v56, %v5859_v42  ;;  %v7169_v6 = vsub.f32 %v15481_v41, %v16362_v5  ;;  %v15505_v56 = vsub.f32 %v15383_v33, %v17284_v16 }
 0x370   : > { %v7176_v42 = vsub.f32 %v15495_v23, %v16361_v19 }
 0x371   : > { %17285 = vst [vmem:[#allocation5_spill] sm:$0xff] %v15505_v56  ;;  %v5866_v0 = vadd.f32 %v8811_v30, %v15386_v53  ;;  %v8812_v60 = vpop.f32.mrb[156].mxu1  ;;  %v7170_v2 = vand.u32 4294901760, %v7169_v6  ;;  %v16360_v46 = vand.u32 4294901760, %v15505_v56 }
 0x372   : > { %v8813_v57 = vpop.f32.mrb[157].mxu1  ;;  %v7177_v28 = vand.u32 4294901760, %v7176_v42 }
 0x373   : > { %v8814_v58 = vadd.f32 %v8813_v57, %v8812_v60  ;;  %v15511_v9 = vadd.f32 %v15271_v49, %v5866_v0  ;;  %v15516_v33 = vpack.c.bf16 %v7170_v2, %v7163_v27  ;;  %v7183_v53 = vsub.f32 %v15505_v56, %v16360_v46 }
 0x374   : > { %v15533_v60 = vpack.c.bf16 %v15373_v22, %v15368_v59  ;;  %v15541_v27 = vpack.c.bf16 %v15457_v62, %v15446_v11  ;;  %v17287_v2 = vand.u32 4294901760, %v15174_v47  ;;  %v17291_v46 = vand.u32 4294901760, %v15214_v17 }
 0x375   : > { %v5873_v44 = vadd.f32 %v8814_v58, %v15408_v3  ;;  %v8815_v18 = vpop.f32.mrb[158].mxu1  ;;  %v7184_v30 = vand.u32 4294901760, %v7183_v53  ;;  %v15537_v3 = vpack.c.bf16 %v15435_v14, %v15430_v8 }
 0x376   : > { %v8816_v38 = vpop.f32.mrb[159].mxu1  ;;  %v15559_v58 = vsub.f32 %v15174_v47, %v17287_v2  ;;  %v15590_v19 = vsub.f32 %v15214_v17, %v17291_v46 }
 0x377   : > { %v8817_v50 = vadd.f32 %v8816_v38, %v8815_v18  ;;  %v15523_v49 = vadd.f32 %v15275_v36, %v5873_v44  ;;  %v15525_v6 = vpack.c.bf16 %v7184_v30, %v7177_v28  ;;  %v15545_v36 = vpack.c.bf16 %v15481_v41, %v15471_v48 }
 0x378   : > { %v16371_v53 = vand.u32 4294901760, %v15559_v58  ;;  %v17288_v44 = vand.u32 4294901760, %v15180_v29  ;;  %v17289_v28 = vand.u32 4294901760, %v15187_v32 }
 0x379   : > { %v5880_v16 = vadd.f32 %v8817_v50, %v15416_v43  ;;  %v17286_v43 = vand.u32 4294901760, %v15166_v40 }
 0x37a   : > { %v15566_v18 = vsub.f32 %v15180_v29, %v17288_v44  ;;  %v15571_v38 = vsub.f32 %v15187_v32, %v17289_v28  ;;  %v7099_v47 = vsub.f32 %v15559_v58, %v16371_v53  ;;  %v17290_v29 = vand.u32 4294901760, %v15209_v55 }
 0x37b   : > { %v15529_v0 = vadd.f32 %v15279_v13, %v5880_v16  ;;  %v15549_v13 = vpack.c.bf16 %v15505_v56, %v15495_v23  ;;  %v15554_v57 = vsub.f32 %v15166_v40, %v17286_v43 }
 0x37c   : > { %v16369_v30 = vand.u32 4294901760, %v15566_v18  ;;  %v16368_v50 = vand.u32 4294901760, %v15571_v38  ;;  %v15584_v43 = vsub.f32 %v15209_v55, %v17290_v29  ;;  %v7100_v28 = vand.u32 4294901760, %v7099_v47 }
 0x37d   : > { %v16373_v42 = vand.u32 4294901760, %v15554_v57 }
 0x37e   : > { %v15596_v63 = vsub.f32 %v15566_v18, %v16369_v30  ;;  %v16370_v17 = vand.u32 4294901760, %v15584_v43 }
 0x37f   : > { %v7092_v40 = vsub.f32 %v15554_v57, %v16373_v42 }
 0x380   : > { %v7107_v61 = vand.u32 4294901760, %v15596_v63 }
 0x381   : > { %v7093_v44 = vand.u32 4294901760, %v7092_v40 }
 0x383   : > { %v15605_v29 = vpack.c.bf16 %v7100_v28, %v7093_v44 }
 0x3c9   : > { %v9476_v16 = vpop.f32.mrb[160].mxu1 }
 0x3ca   : > { %v10810_v32 = vadd.f32 %v9476_v16, %v15425_v31  ;;  %v6828_v2 = vpop.f32.mrb[161].mxu1  ;;  %v15601_v31 = vsub.f32 %v15571_v38, %v16368_v50 }
 0x3cb   : > { %v10811_v5 = vadd.f32 %v6828_v2, %v15421_v7  ;;  %v16372_v2 = vand.u32 4294901760, %v15590_v19 }
 0x3cc   : > { %vm6875_vm11 = vcmp.ge.f32.partialorder %v10810_v32, 0.0  ;;  %v6883_v55 = vmul.f32 0.2, %v10810_v32 }
 0x3cd   : > { %vm6874_vm12 = vcmp.ge.f32.partialorder %v10811_v5, 0.0  ;;  %v6882_v40 = vmul.f32 0.2, %v10811_v5  ;;  %v9479_v47 = vpop.f32.mrb[162].mxu1 }
 0x3ce   : > { %v6891_v46 = vsel %vm6875_vm11, %v10810_v32, %v6883_v55  ;;  %v10812_v7 = vadd.f32 %v9479_v47, %v15463_v10  ;;  %v6840_v16 = vpop.f32.mrb[163].mxu1  ;;  %v7114_v32 = vand.u32 4294901760, %v15601_v31  ;;  %v15630_v31 = vsub.f32 %v15590_v19, %v16372_v2 }
 0x3cf   : > { %v15608_v1 = vand.u32 4294901760, %v6891_v46  ;;  %v6890_v12 = vsel %vm6874_vm12, %v10811_v5, %v6882_v40  ;;  %v10813_v25 = vadd.f32 %v6840_v16, %v15441_v24  ;;  %v15621_v5 = vsub.f32 %v15584_v43, %v16370_v17 }
 0x3d0   : > { %v15612_v50 = vand.u32 4294901760, %v6890_v12  ;;  %vm6877_vm13 = vcmp.ge.f32.partialorder %v10812_v7, 0.0  ;;  %v6885_v30 = vmul.f32 0.2, %v10812_v7  ;;  %vm8029_vm12 = vcmask 65536  }
 0x3d1   : > { %v15616_v10 = vsub.f32 %v6891_v46, %v15608_v1  ;;  %vm6876_vm14 = vcmp.ge.f32.partialorder %v10813_v25, 0.0  ;;  %v6884_v44 = vmul.f32 0.2, %v10813_v25  ;;  %v9482_v28 = vpop.f32.mrb[164].mxu1 }
 0x3d2   : > { %v15624_v24 = vsub.f32 %v6890_v12, %v15612_v50  ;;  %v6893_v63 = vsel %vm6877_vm13, %v10812_v7, %v6885_v30  ;;  %v10814_v55 = vadd.f32 %v9482_v28, %v15511_v9  ;;  %v6852_v40 = vpop.f32.mrb[165].mxu1 }
 0x3d3   : > { %v16376_v47 = vand.u32 4294901760, %v15616_v10  ;;  %v15633_v46 = vand.u32 4294901760, %v6893_v63  ;;  %v6892_v16 = vsel %vm6876_vm14, %v10813_v25, %v6884_v44  ;;  %v10815_v17 = vadd.f32 %v6852_v40, %v15487_v51 }
 0x3d4   : > { %v15636_v53 = vand.u32 4294901760, %v6892_v16  ;;  %vm6879_vm15 = vcmp.ge.f32.partialorder %v10814_v55, 0.0  ;;  %v6887_v12 = vmul.f32 0.2, %v10814_v55  ;;  %v6997_v30 = vand.u32 4294901760, %v15624_v24 }
 0x3d5   : > { %v7008_v9 = vsub.f32 %v15616_v10, %v16376_v47  ;;  %v15643_v7 = vsub.f32 %v6893_v63, %v15633_v46  ;;  %vm6878_vm0 = vcmp.ge.f32.partialorder %v10815_v17, 0.0  ;;  %v6886_v28 = vmul.f32 0.2, %v10815_v17  ;;  %v9485_v2 = vpop.f32.mrb[166].mxu1 }
 0x3d6   : > { %v15646_v25 = vsub.f32 %v6892_v16, %v15636_v53  ;;  %v6895_v51 = vsel %vm6879_vm15, %v10814_v55, %v6887_v12  ;;  %v10816_v44 = vadd.f32 %v9485_v2, %v15529_v0  ;;  %v6864_v40 = vpop.f32.mrb[167].mxu1  ;;  %v6998_v42 = vsub.f32 %v15624_v24, %v6997_v30 }
 0x3d7   : > { %v7009_v26 = vand.u32 4294901760, %v7008_v9  ;;  %v15652_v56 = vand.u32 4294901760, %v6895_v51  ;;  %v6894_v47 = vsel %vm6878_vm0, %v10815_v17, %v6886_v28  ;;  %v10817_v63 = vadd.f32 %v6864_v40, %v15523_v49 }
 0x3d8   : > { %v15655_v23 = vand.u32 4294901760, %v6894_v47  ;;  %vm6881_vm1 = vcmp.ge.f32.partialorder %v10816_v44, 0.0  ;;  %v6889_v41 = vmul.f32 0.2, %v10816_v44  ;;  %v6999_v16 = vand.u32 4294901760, %v6998_v42 }
 0x3d9   : > { %v15658_v55 = vsub.f32 %v6895_v51, %v15652_v56  ;;  %vm6880_vm2 = vcmp.ge.f32.partialorder %v10817_v63, 0.0  ;;  %v6888_v0 = vmul.f32 0.2, %v10817_v63  ;;  %v16379_v2 = vand.u32 4294901760, %v15646_v25 }
 0x3da   : > { %v15662_v12 = vsub.f32 %v6894_v47, %v15655_v23  ;;  %v6897_v9 = vsel %vm6881_vm1, %v10816_v44, %v6889_v41  ;;  %9518 = vmatprep.mubr.f32.mxu0 %v6999_v16  ;;  %v16380_v17 = vand.u32 4294901760, %v15643_v7  ;;  %v10630_v44 = vpack.c.bf16 %v7114_v32, %v7107_v61 }
 0x3db   : > { %v15665_v49 = vand.u32 4294901760, %v6897_v9  ;;  %v6896_v28 = vsel %vm6880_vm2, %v10817_v63, %v6888_v0  ;;  %9519 = vmatmul.mubr.f32.vlgmr.msra.gmra.mrb[88].mxu0 %v7009_v26  ;;  %v7018_v42 = vsub.f32 %v15646_v25, %v16379_v2  ;;  %v7047_v51 = vand.u32 4294901760, %v15658_v55 }
 0x3dc   : > { %v15671_v40 = vand.u32 4294901760, %v6896_v28  ;;  %10625 = vmatpush3.bf16.msra.mxu0 %v15413_v21  ;;  %v7028_v41 = vsub.f32 %v15643_v7, %v16380_v17  ;;  %v7037_v47 = vand.u32 4294901760, %v15662_v12  ;;  %v7121_v16 = vand.u32 4294901760, %v15621_v5 }
 0x3dd   : > { %v15679_v63 = vsub.f32 %v6897_v9, %v15665_v49  ;;  %v7019_v26 = vand.u32 4294901760, %v7018_v42  ;;  %10627 = vmatprep.subr.bf16.mxu0 %v15605_v29  ;;  %v7128_v0 = vand.u32 4294901760, %v15630_v31  ;;  %v7048_v61 = vsub.f32 %v15658_v55, %v7047_v51 }
 0x3de   : > { %v15685_v2 = vsub.f32 %v6896_v28, %v15671_v40  ;;  %v7029_v21 = vand.u32 4294901760, %v7028_v41  ;;  %v7038_v17 = vsub.f32 %v15662_v12, %v7037_v47 }
 0x3df   : > { %9521 = vmatprep.mubr.f32.mxu0 %v7019_v26  ;;  %v7067_v32 = vand.u32 4294901760, %v15679_v63  ;;  %v7049_v31 = vand.u32 4294901760, %v7048_v61  ;;  %v10634_v42 = vpack.c.bf16 %v7128_v0, %v7121_v16 }
 0x3e0   : > { %9522 = vmatmul.mubr.f32.gmra.mrb[90].mxu0 %v7029_v21  ;;  %v7039_v9 = vand.u32 4294901760, %v7038_v17  ;;  %v7057_v5 = vand.u32 4294901760, %v15685_v2 }
 0x3e1   : > { %10629 = vmatpush3.bf16.msra.mxu0 %v15605_v29  ;;  %v7068_v41 = vsub.f32 %v15679_v63, %v7067_v32  ;;  %v10658_v29 = vpack.c.bf16 %v15559_v58, %v15554_v57 }
 0x3e2   : > { %9524 = vmatprep.mubr.f32.mxu0 %v7039_v9  ;;  %10631 = vmatprep.subr.bf16.mxu0 %v10630_v44  ;;  %v7058_v28 = vsub.f32 %v15685_v2, %v7057_v5 }
 0x3e3   : > { %v7069_v17 = vand.u32 4294901760, %v7068_v41 }
 0x3e4   : > { %9525 = vmatmul.mubr.f32.gmra.mrb[92].mxu0 %v7049_v31  ;;  %v7059_v26 = vand.u32 4294901760, %v7058_v28 }
 0x3e5   : > { %10633 = vmatpush3.bf16.msra.mxu0 %v10630_v44  ;;  %v17300_v44 = vand.u32 4294901760, %v15643_v7 }
 0x3e6   : > { %9527 = vmatprep.mubr.f32.mxu0 %v7059_v26  ;;  %10635 = vmatprep.subr.bf16.mxu0 %v10634_v42 }
 0x3e8   : > { %9528 = vmatmul.mubr.f32.gmra.mrb[94].mxu0 %v7069_v17 }
 0x3e9   : > { %10637 = vmatpush3.bf16.msra.mxu0 %v10634_v42  ;;  %9562 = vmatprep.mubr.f32.mxu0 %v15612_v50 }
 0x3ea   : > { %10639 = vmatprep.subr.bf16.mxu0 %v15473_v52 }
 0x3ed   : > { %10641 = vmatpush3.bf16.msra.mxu0 %v15473_v52  ;;  %v10662_v52 = vpack.c.bf16 %v15571_v38, %v15566_v18 }
 0x3ee   : > { %10643 = vmatprep.subr.bf16.mxu0 %v15497_v35 }
 0x3f1   : > { %10645 = vmatpush3.bf16.msra.mxu0 %v15497_v35  ;;  %v10666_v35 = vpack.c.bf16 %v15590_v19, %v15584_v43 }
 0x3f2   : > { %10647 = vmatprep.subr.bf16.mxu0 %v15516_v33 }
 0x3f5   : > { %10649 = vmatpush3.bf16.msra.mxu0 %v15516_v33  ;;  %v17292_v33 = vand.u32 4294901760, %v15368_v59  ;;  %v17298_v59 = vand.u32 4294901760, %v15566_v18  ;;  %v17303_v18 = vand.u32 4294901760, %v15430_v8  ;;  %v17308_v8 = vld [vmem:[#allocation3_spill] sm:$0xff] }
 0x3f6   : > { %10651 = vmatprep.subr.bf16.mxu0 %v15525_v6 }
 0x3f9   : > { %10653 = vmatpush3.bf16.msra.mxu0 %v15525_v6  ;;  %v17293_v6 = vand.u32 4294901760, %v15373_v22  ;;  %v17299_v22 = vand.u32 4294901760, %v15571_v38  ;;  %v17304_v38 = vand.u32 4294901760, %v15435_v14 }
 0x3fa   : > { %10655 = vmatprep.subr.bf16.mxu0 %v15533_v60 }
 0x3fc   : > { %9563 = vmatmul.mubr.f32.vlgmr.msra.gmra.mrb[88].mxu0 %v15608_v1 }
 0x3fd   : > { %9565 = vmatprep.mubr.f32.mxu0 %v15636_v53  ;;  %10657 = vmatpush3.bf16.msra.mxu0 %v15533_v60  ;;  %v10718_v60 = vpack.c.bf16 %v17293_v6, %v17292_v33 }
 0x3fe   : > { %10659 = vmatprep.subr.bf16.mxu0 %v10658_v29 }
 0x400   : > { %9566 = vmatmul.mubr.f32.gmra.mrb[90].mxu0 %v15633_v46 }
 0x401   : > { %9568 = vmatprep.mubr.f32.mxu0 %v15655_v23  ;;  %10661 = vmatpush3.bf16.msra.mxu0 %v10658_v29 }
 0x402   : > { %10663 = vmatprep.subr.bf16.mxu0 %v10662_v52 }
 0x404   : > { %9569 = vmatmul.mubr.f32.gmra.mrb[92].mxu0 %v15652_v56 }
 0x405   : > { %9571 = vmatprep.mubr.f32.mxu0 %v15671_v40  ;;  %10665 = vmatpush3.bf16.msra.mxu0 %v10662_v52 }
 0x406   : > { %10667 = vmatprep.subr.bf16.mxu0 %v10666_v35 }
 0x408   : > { %9572 = vmatmul.mubr.f32.gmra.mrb[94].mxu0 %v15665_v49 }
 0x409   : > { %10669 = vmatpush3.bf16.msra.mxu0 %v10666_v35  ;;  %9606 = vmatprep.mubr.f32.mxu0 %v15624_v24  ;;  %v17297_v24 = vand.u32 4294901760, %v15646_v25 }
 0x40a   : > { %10671 = vmatprep.subr.bf16.mxu0 %v15537_v3 }
 0x40d   : > { %10673 = vmatpush3.bf16.msra.mxu0 %v15537_v3  ;;  %v17294_v3 = vand.u32 4294901760, %v15554_v57  ;;  %v17301_v57 = vand.u32 4294901760, %v15584_v43  ;;  %v17306_v43 = vand.u32 4294901760, %v15457_v62 }
 0x40e   : > { %10675 = vmatprep.subr.bf16.mxu0 %v15541_v27 }
 0x411   : > { %10677 = vmatpush3.bf16.msra.mxu0 %v15541_v27  ;;  %v17295_v27 = vand.u32 4294901760, %v15559_v58  ;;  %v17302_v58 = vand.u32 4294901760, %v15590_v19  ;;  %v17305_v19 = vand.u32 4294901760, %v15446_v11 }
 0x412   : > { %10679 = vmatprep.subr.bf16.mxu0 %v15545_v36 }
 0x415   : > { %10681 = vmatpush3.bf16.msra.mxu0 %v15545_v36  ;;  %v10722_v36 = vpack.c.bf16 %v17295_v27, %v17294_v3 }
 0x416   : > { %10683 = vmatprep.subr.bf16.mxu0 %v15549_v13 }
 0x419   : > { %10685 = vmatpush3.bf16.msra.mxu0 %v15549_v13  ;;  %v17296_v13 = vand.u32 4294901760, %v15616_v10 }
 0x41a   : > { %10687 = vmatprep.subr.bf16.mxu0 %v15193_v4 }
 0x41c   : > { %9607 = vmatmul.mubr.f32.vlgmr.msra.gmra.mrb[88].mxu0 %v15616_v10  ;;  %v10730_v10 = vpack.c.bf16 %v17302_v58, %v17301_v57 }
 0x41d   : > { %9609 = vmatprep.mubr.f32.mxu0 %v15646_v25  ;;  %10689 = vmatpush3.bf16.msra.mxu0 %v15193_v4  ;;  %v10738_v25 = vpack.c.bf16 %v17306_v43, %v17305_v19 }
 0x41e   : > { %10691 = vmatprep.subr.bf16.mxu0 %v15204_v20 }
 0x420   : > { %9610 = vmatmul.mubr.f32.gmra.mrb[90].mxu0 %v15643_v7  ;;  %v10734_v7 = vpack.c.bf16 %v17304_v38, %v17303_v18 }
 0x421   : > { %9612 = vmatprep.mubr.f32.mxu0 %v15662_v12  ;;  %10693 = vmatpush3.bf16.msra.mxu0 %v15204_v20  ;;  %v17310_v12 = vld [vmem:[#allocation29_spill] sm:$0xff] }
 0x422   : > { %10695 = vmatprep.subr.bf16.mxu0 %v15228_v34 }
 0x424   : > { %9613 = vmatmul.mubr.f32.gmra.mrb[92].mxu0 %v15658_v55  ;;  %v17307_v55 = vand.u32 4294901760, %v15471_v48 }
 0x425   : > { %9615 = vmatprep.mubr.f32.mxu0 %v15685_v2  ;;  %10697 = vmatpush3.bf16.msra.mxu0 %v15228_v34  ;;  %v17309_v2 = vand.u32 4294901760, %v17308_v8 }
 0x426   : > { %10699 = vmatprep.subr.bf16.mxu0 %v15245_v15 }
 0x427   : > { %v10742_v14 = vpack.c.bf16 %v17309_v2, %v17307_v55 }
 0x428   : > { %9616 = vmatmul.mubr.f32.gmra.mrb[94].mxu0 %v15679_v63 }
 0x429   : > { %10701 = vmatpush3.bf16.msra.mxu0 %v15245_v15  ;;  %9650 = vmatprep.mubr.f32.mxu0 %v6997_v30  ;;  %v10726_v30 = vpack.c.bf16 %v17299_v22, %v17298_v59 }
 0x42a   : > { %10703 = vmatprep.subr.bf16.mxu0 %v15317_v37 }
 0x42d   : > { %10705 = vmatpush3.bf16.msra.mxu0 %v15317_v37 }
 0x42e   : > { %10707 = vmatprep.subr.bf16.mxu0 %v15340_v45 }
 0x431   : > { %10709 = vmatpush3.bf16.msra.mxu0 %v15340_v45 }
 0x432   : > { %10711 = vmatprep.subr.bf16.mxu0 %v15363_v54 }
 0x435   : > { %10713 = vmatpush3.bf16.msra.mxu0 %v15363_v54 }
 0x436   : > { %10715 = vmatprep.subr.bf16.mxu0 %v15399_v39 }
 0x439   : > { %10717 = vmatpush3.bf16.msra.mxu0 %v15399_v39 }
 0x43a   : > { %10719 = vmatprep.subr.bf16.mxu0 %v10718_v60 }
 0x43c   : > { %9651 = vmatmul.mubr.f32.vlgmr.msra.gmra.mrb[88].mxu0 %v17296_v13 }
 0x43d   : > { %9653 = vmatprep.mubr.f32.mxu0 %v17297_v24  ;;  %10721 = vmatpush3.bf16.msra.mxu0 %v10718_v60 }
 0x43e   : > { %10723 = vmatprep.subr.bf16.mxu0 %v10722_v36 }
 0x440   : > { %9654 = vmatmul.mubr.f32.gmra.mrb[90].mxu0 %v17300_v44 }
 0x441   : > { %9656 = vmatprep.mubr.f32.mxu0 %v7037_v47  ;;  %10725 = vmatpush3.bf16.msra.mxu0 %v10722_v36  ;;  %v17312_v47 = vld [vmem:[#allocation5_spill] sm:$0xff] }
 0x442   : > { %10727 = vmatprep.subr.bf16.mxu0 %v10726_v30  ;;  %v17313_v63 = vand.u32 4294901760, %v17312_v47 }
 0x444   : > { %9657 = vmatmul.mubr.f32.gmra.mrb[92].mxu0 %v7047_v51  ;;  %v17311_v51 = vand.u32 4294901760, %v17310_v12 }
 0x445   : > { %9659 = vmatprep.mubr.f32.mxu0 %v7057_v5  ;;  %10729 = vmatpush3.bf16.msra.mxu0 %v10726_v30 }
 0x446   : > { %10731 = vmatprep.subr.bf16.mxu0 %v10730_v10  ;;  %v10746_v16 = vpack.c.bf16 %v17313_v63, %v17311_v51 }
 0x448   : > { %9660 = vmatmul.mubr.f32.gmra.mrb[94].mxu0 %v7067_v32 }
 0x449   : > { %10733 = vmatpush3.bf16.msra.mxu0 %v10730_v10  ;;  %9694 = vmatprep.mubr.f32.mxu0 %v15612_v50 }
 0x44a   : > { %10735 = vmatprep.subr.bf16.mxu0 %v10734_v7 }
 0x44d   : > { %10737 = vmatpush3.bf16.msra.mxu0 %v10734_v7 }
 0x44e   : > { %10739 = vmatprep.subr.bf16.mxu0 %v10738_v25 }
 0x451   : > { %10741 = vmatpush3.bf16.msra.mxu0 %v10738_v25 }
 0x452   : > { %10743 = vmatprep.subr.bf16.mxu0 %v10742_v14 }
 0x455   : > { %10745 = vmatpush3.bf16.msra.mxu0 %v10742_v14 }
 0x456   : > { %10747 = vmatprep.subr.bf16.mxu0 %v10746_v16 }
 0x459   : > { %10749 = vmatpush3.bf16.msra.mxu0 %v10746_v16 }
 0x45a   : > { %10751 = vmatprep.subr.bf16.mxu0 %v15193_v4 }
 0x45c   : > { %9695 = vmatmul.mubr.f32.vlgmr.msra.gmra.mrb[88].mxu0 %v15608_v1 }
 0x45d   : > { %9697 = vmatprep.mubr.f32.mxu0 %v15636_v53  ;;  %10753 = vmatpush3.bf16.msra.mxu0 %v15193_v4 }
 0x45e   : > { %10755 = vmatprep.subr.bf16.mxu0 %v15204_v20 }
 0x460   : > { %9698 = vmatmul.mubr.f32.gmra.mrb[90].mxu0 %v15633_v46 }
 0x461   : > { %9700 = vmatprep.mubr.f32.mxu0 %v15655_v23  ;;  %10757 = vmatpush3.bf16.msra.mxu0 %v15204_v20 }
 0x462   : > { %10759 = vmatprep.subr.bf16.mxu0 %v15228_v34 }
 0x464   : > { %9701 = vmatmul.mubr.f32.gmra.mrb[92].mxu0 %v15652_v56 }
 0x465   : > { %9703 = vmatprep.mubr.f32.mxu0 %v15671_v40  ;;  %10761 = vmatpush3.bf16.msra.mxu0 %v15228_v34 }
 0x466   : > { %10763 = vmatprep.subr.bf16.mxu0 %v15245_v15 }
 0x468   : > { %9704 = vmatmul.mubr.f32.gmra.mrb[94].mxu0 %v15665_v49 }
 0x469   : > { %10765 = vmatpush3.bf16.msra.mxu0 %v15245_v15  ;;  %9738 = vmatprep.mubr.f32.mxu0 %v15612_v50 }
 0x46a   : > { %10767 = vmatprep.subr.bf16.mxu0 %v15317_v37 }
 0x46d   : > { %10769 = vmatpush3.bf16.msra.mxu0 %v15317_v37 }
 0x46e   : > { %10771 = vmatprep.subr.bf16.mxu0 %v15340_v45 }
 0x471   : > { %10773 = vmatpush3.bf16.msra.mxu0 %v15340_v45 }
 0x472   : > { %10775 = vmatprep.subr.bf16.mxu0 %v15363_v54 }
 0x475   : > { %10777 = vmatpush3.bf16.msra.mxu0 %v15363_v54 }
 0x476   : > { %10779 = vmatprep.subr.bf16.mxu0 %v15399_v39 }
 0x479   : > { %10781 = vmatpush3.bf16.msra.mxu0 %v15399_v39 }
 0x47c   : > { %9739 = vmatmul.mubr.f32.vlgmr.msra.gmra.mrb[88].mxu0 %v15608_v1 }
 0x47d   : > { %9741 = vmatprep.mubr.f32.mxu0 %v15636_v53  ;;  %v11117_v53 = vmov 0  }
 0x47e   : > { %11100 = vset.pattern.permute.xlu0 %v11117_v53  ;;  %11101 = vset.pattern.permute.xlu1 %v11117_v53 }
 0x480   : > { %9742 = vmatmul.mubr.f32.gmra.mrb[90].mxu0 %v15633_v46 }
 0x481   : > { %9744 = vmatprep.mubr.f32.mxu0 %v15655_v23 }
 0x484   : > { %9745 = vmatmul.mubr.f32.gmra.mrb[92].mxu0 %v15652_v56 }
 0x485   : > { %9747 = vmatprep.mubr.f32.mxu0 %v15671_v40 }
 0x488   : > { %9748 = vmatmul.mubr.f32.gmra.mrb[94].mxu0 %v15665_v49 }
 0x54f   : > { %v9740_v4 = vpop.f32.mrb[88].mxu0 }
 0x550   : > { %7864 = vrot.lane.b32.xlu1 %v9740_v4, %s11111_s20  ;;  %v7805_v20 = vpop.f32.mrb[89].mxu0  ;;  %v7868_v15 = vrot.slane %v9740_v4, 1  ;;  %v7873_v39 = vrot.slane %v9740_v4, 2 }
 0x551   : > { %v7853_v34 = vrot.slane %v7805_v20, 1  ;;  %v7858_v54 = vrot.slane %v7805_v20, 2 }
 0x553   : > { %7854 = vrot.lane.b32.xlu0 %v7853_v34, %s11112_s21  ;;  %v9743_v37 = vpop.f32.mrb[90].mxu0 }
 0x554   : > { %7869 = vrot.lane.b32.xlu1 %v7868_v15, %s11113_s22  ;;  %v7817_v45 = vpop.f32.mrb[91].mxu0  ;;  %v7926_v23 = vrot.slane %v9743_v37, 1  ;;  %v7931_v56 = vrot.slane %v9743_v37, 2 }
 0x555   : > { %v7883_v50 = vrot.slane %v7817_v45, 1  ;;  %v7888_v46 = vrot.slane %v7817_v45, 2 }
 0x557   : > { %7859 = vrot.lane.b32.xlu0 %v7858_v54, %s11114_s23  ;;  %v9746_v11 = vpop.f32.mrb[92].mxu0 }
 0x558   : > { %7874 = vrot.lane.b32.xlu1 %v7873_v39, %s11115_s24  ;;  %v15843_v62 = vpop.f32.mrb[93].mxu0  ;;  %v7984_v0 = vrot.slane %v9746_v11, 1  ;;  %v7989_v21 = vrot.slane %v9746_v11, 2  ;;  %v7850_v39 = vlaneseq }
 0x559   : > { %v7941_v49 = vrot.slane %v15843_v62, 1  ;;  %v7946_v40 = vrot.slane %v15843_v62, 2 }
 0x55b   : > { %7922 = vrot.lane.b32.xlu0 %v9743_v37, %s11111_s20  ;;  %v9749_v1 = vpop.f32.mrb[94].mxu0 }
 0x55c   : > { %7879 = vrot.lane.b32.xlu1 %v7817_v45, %s11116_s25  ;;  %v7841_v48 = vpop.f32.mrb[95].mxu0 }
 0x55d   : > { %v8004_v61 = vrot.slane %v7841_v48, 2  ;;  %v7999_v32 = vrot.slane %v7841_v48, 1 }
 0x55f   : > { %7927 = vrot.lane.b32.xlu0 %v7926_v23, %s11113_s22 }
 0x560   : > { %7932 = vrot.lane.b32.xlu1 %v7931_v56, %s11115_s24 }
 0x563   : > { %7913 = vrot.lane.b32.xlu0 %v7883_v50, %s11112_s21 }
 0x564   : > { %7884 = vrot.lane.b32.xlu1 %v7883_v50, %s11118_s26 }
 0x567   : > { %7917 = vrot.lane.b32.xlu0 %v7888_v46, %s11114_s23 }
 0x568   : > { %7937 = vrot.lane.b32.xlu1 %v15843_v62, %s11116_s25 }
 0x56b   : > { %7889 = vrot.lane.b32.xlu0 %v7888_v46, %s11119_s27 }
 0x56c   : > { %7971 = vrot.lane.b32.xlu1 %v7941_v49, %s11112_s21 }
 0x56f   : > { %7980 = vrot.lane.b32.xlu0 %v9746_v11, %s11111_s20  ;;  %v7851_v11 = vand.u32 127, %v7850_v39 }
 0x570   : > { %7942 = vrot.lane.b32.xlu1 %v7941_v49, %s11118_s26 }
 0x571   : > { %vm7901_vm3 = vcmp.eq.s32.totalorder %v7851_v11, 1  ;;  %vm7893_vm4 = vcmp.eq.s32.totalorder %v7851_v11, 0  ;;  %vm7907_vm5 = vcmp.eq.s32.totalorder %v7851_v11, 2  ;;  %vm7951_vm6 = vcmp.eq.s32.totalorder %v7851_v11, 3 }
 0x572   : > { %vm7959_vm7 = vcmp.eq.s32.totalorder %v7851_v11, 4  ;;  %vm7965_vm8 = vcmp.eq.s32.totalorder %v7851_v11, 5  ;;  %vm8009_vm9 = vcmp.eq.s32.totalorder %v7851_v11, 6  ;;  %vm8017_vm10 = vcmp.eq.s32.totalorder %v7851_v11, 7 }
 0x573   : > { %7975 = vrot.lane.b32.xlu0 %v7946_v40, %s11114_s23  ;;  %vm8023_vm11 = vcmp.eq.s32.totalorder %v7851_v11, 8 }
 0x574   : > { %7947 = vrot.lane.b32.xlu1 %v7946_v40, %s11119_s27 }
 0x577   : > { %7985 = vrot.lane.b32.xlu0 %v7984_v0, %s11113_s22 }
 0x578   : > { %7995 = vrot.lane.b32.xlu1 %v7841_v48, %s11116_s25 }
 0x57b   : > { %7990 = vrot.lane.b32.xlu0 %v7989_v21, %s11115_s24 }
 0x57c   : > { %8005 = vrot.lane.b32.xlu1 %v8004_v61, %s11119_s27 }
 0x57f   : > { %8000 = vrot.lane.b32.xlu0 %v7999_v32, %s11118_s26 }
 0x5c2   : > { %v7865_v9 = vpop.permute.xlu1 %7864 }
 0x5c5   : > { %v7855_v5 = vpop.permute.xlu0 %7854 }
 0x5c6   : > { %v7870_v31 = vpop.permute.xlu1 %7869  ;;  %v7857_v28 = vadd.f32 %v7855_v5, %v7805_v20 }
 0x5c9   : > { %v7860_v42 = vpop.permute.xlu0 %7859 }
 0x5ca   : > { %v7862_v41 = vadd.f32 %v7860_v42, %v7857_v28  ;;  %v7875_v26 = vpop.permute.xlu1 %7874 }
 0x5cc   : > { %v7867_v29 = vadd.f32 %v7865_v9, %v7862_v41 }
 0x5cd   : > { %v7923_v17 = vpop.permute.xlu0 %7922 }
 0x5ce   : > { %v7880_v52 = vpop.permute.xlu1 %7879  ;;  %v7872_v33 = vadd.f32 %v7870_v31, %v7867_v29 }
 0x5d0   : > { %v7877_v3 = vadd.f32 %v7875_v26, %v7872_v33 }
 0x5d1   : > { %v7928_v35 = vpop.permute.xlu0 %7927 }
 0x5d2   : > { %v7933_v6 = vpop.permute.xlu1 %7932  ;;  %v7882_v24 = vadd.f32 %v7880_v52, %v7877_v3 }
 0x5d5   : > { %v7914_v60 = vpop.permute.xlu0 %7913 }
 0x5d6   : > { %v7885_v27 = vpop.permute.xlu1 %7884  ;;  %v7916_v36 = vadd.f32 %v7914_v60, %v7817_v45 }
 0x5d7   : > { %v7887_v30 = vadd.f32 %v7885_v27, %v7882_v24 }
 0x5d9   : > { %v7918_v13 = vpop.permute.xlu0 %7917 }
 0x5da   : > { %v7920_v59 = vadd.f32 %v7918_v13, %v7916_v36  ;;  %v7938_v22 = vpop.permute.xlu1 %7937 }
 0x5dc   : > { %v7925_v44 = vadd.f32 %v7923_v17, %v7920_v59 }
 0x5dd   : > { %v7890_v57 = vpop.permute.xlu0 %7889 }
 0x5de   : > { %v7930_v58 = vadd.f32 %v7928_v35, %v7925_v44  ;;  %v7892_v10 = vadd.f32 %v7890_v57, %v7887_v30  ;;  %v7972_v18 = vpop.permute.xlu1 %7971 }
 0x5df   : > { %v7974_v25 = vadd.f32 %v7972_v18, %v15843_v62 }
 0x5e0   : > { %v7935_v38 = vadd.f32 %v7933_v6, %v7930_v58  ;;  %7896 = vperm.xlu0 %11100, %v7892_v10  }
 0x5e1   : > { %v7981_v7 = vpop.permute.xlu0 %7980 }
 0x5e2   : > { %v7940_v19 = vadd.f32 %v7938_v22, %v7935_v38  ;;  %v7943_v43 = vpop.permute.xlu1 %7942 }
 0x5e4   : > { %v7945_v55 = vadd.f32 %v7943_v43, %v7940_v19 }
 0x5e5   : > { %v7976_v8 = vpop.permute.xlu0 %7975 }
 0x5e6   : > { %v7978_v2 = vadd.f32 %v7976_v8, %v7974_v25  ;;  %v7948_v14 = vpop.permute.xlu1 %7947 }
 0x5e7   : > { %v7950_v12 = vadd.f32 %v7948_v14, %v7945_v55 }
 0x5e8   : > { %v7983_v51 = vadd.f32 %v7981_v7, %v7978_v2 }
 0x5e9   : > { %v7986_v47 = vpop.permute.xlu0 %7985  ;;  %7954 = vperm.xlu1 %11101, %v7950_v12  }
 0x5ea   : > { %v7988_v63 = vadd.f32 %v7986_v47, %v7983_v51  ;;  %v7996_v16 = vpop.permute.xlu1 %7995 }
 0x5ed   : > { %v7991_v4 = vpop.permute.xlu0 %7990 }
 0x5ee   : > { %v7993_v20 = vadd.f32 %v7991_v4, %v7988_v63  ;;  %v8006_v45 = vpop.permute.xlu1 %8005 }
 0x5f0   : > { %v7998_v34 = vadd.f32 %v7996_v16, %v7993_v20 }
 0x5f1   : > { %v8001_v15 = vpop.permute.xlu0 %8000 }
 0x5f2   : > { %v8003_v37 = vadd.f32 %v8001_v15, %v7998_v34 }
 0x5f4   : > { %v8008_v54 = vadd.f32 %v8006_v45, %v8003_v37 }
 0x5f6   : > { %8012 = vperm.xlu1 %11101, %v8008_v54  }
 0x65f   : > { %v7897_v62 = vpop.permute.xlu0 %7896 }
 0x660   : > { %v7902_v1 = vsel %vm7901_vm3, %v7897_v62, 0.0  ;;  %v7899_v23 = vsel %vm7893_vm4, %v7897_v62, 0.0  ;;  %v7908_v56 = vsel %vm7907_vm5, %v7897_v62, 0.0 }
 0x661   : > { %v7904_v48 = vrot.slane %v7902_v1, 2  ;;  %v7910_v46 = vrot.slane %v7908_v56, 4 }
 0x663   : > { %v7906_v53 = vadd.f32 %v7904_v48, %v7899_v23 }
 0x665   : > { %v7912_v0 = vadd.f32 %v7910_v46, %v7906_v53 }
 0x668   : > { %v7955_v50 = vpop.permute.xlu1 %7954 }
 0x669   : > { %v7957_v49 = vsel %vm7951_vm6, %v7955_v50, 0.0  ;;  %v7960_v40 = vsel %vm7959_vm7, %v7955_v50, 0.0  ;;  %v7966_v32 = vsel %vm7965_vm8, %v7955_v50, 0.0 }
 0x66a   : > { %v7958_v21 = vadd.f32 %v7957_v49, %v7912_v0  ;;  %v7962_v61 = vrot.slane %v7960_v40, 2  ;;  %v7968_v5 = vrot.slane %v7966_v32, 4 }
 0x66c   : > { %v7964_v9 = vadd.f32 %v7962_v61, %v7958_v21 }
 0x66e   : > { %v7970_v28 = vadd.f32 %v7968_v5, %v7964_v9 }
 0x675   : > { %v8013_v31 = vpop.permute.xlu1 %8012 }
 0x676   : > { %v8015_v42 = vsel %vm8009_vm9, %v8013_v31, 0.0  ;;  %v8018_v41 = vsel %vm8017_vm10, %v8013_v31, 0.0  ;;  %v8024_v26 = vsel %vm8023_vm11, %v8013_v31, 0.0 }
 0x677   : > { %v8016_v17 = vadd.f32 %v8015_v42, %v7970_v28  ;;  %v8020_v29 = vrot.slane %v8018_v41, 2  ;;  %v8026_v35 = vrot.slane %v8024_v26, 4 }
 0x679   : > { %v8022_v52 = vadd.f32 %v8020_v29, %v8016_v17 }
 0x67b   : > { %v8028_v33 = vadd.f32 %v8026_v35, %v8022_v52 }
 0x67d   : > { %8030 = vst.msk [vmem:[%s193_s30] sm:$0x1] %vm8029_vm12, %v8028_v33 }
 0x67e PF: > { %s14_s15 = sadd.s32 1, %s11108_s15  }
 0x67f   : > { %p11_p4 = scmp.ge.s32.totalorder %s14_s15, 4  }
 0x681   :  { %13 = sbr.rel (!%p11_p4) target bundleno = 1 (0x1), region = 66 }

</bundles_post_ra>
